<compile_context>
chip_gen: v7x
topology: tpu7x:2x2x1
jax: 0.10.0
libtpu: 0.0.40
codegen_flags: <defaults>
</compile_context>

<pallas_src>
import functools

import jax
import jax.numpy as jnp
from jax import lax
from jax.experimental import pallas as pl
from jax.experimental.pallas import tpu as pltpu

LANE = 128      # TPU vreg lane width
SUBLANE = 8     # TPU vreg sublane count (f32)


def _round_up(x, m):
    return (x + m - 1) // m * m


# ---------------------------------------------------------------------------
# Fused kernel: bidirectional LSTM G-encoder + FullyContextualEmbedding
# ---------------------------------------------------------------------------
def matchingnet_kernel(sup_ref, qry_ref,
                       wi_fr_ref, b_fr_ref, wh_f_ref, wh_r_ref,
                       wi_top_ref, w_rh_ref, b_cell_ref,
                       g_ref, f_ref,
                       xf_scr, xr_scr, hf_scr, hr_scr, rh_scr):
    K, Dp = sup_ref.shape
    N = qry_ref.shape[0]
    cd = wh_f_ref.dtype                  # MXU operand dtype (f32 or bf16)
    f32 = jnp.float32

    def gate_split(g):                   # PyTorch gate order: i, f, g, o
        i = jax.nn.sigmoid(g[:, 0 * Dp:1 * Dp])
        f = jax.nn.sigmoid(g[:, 1 * Dp:2 * Dp])
        cg = jnp.tanh(g[:, 2 * Dp:3 * Dp])
        o = jax.nn.sigmoid(g[:, 3 * Dp:4 * Dp])
        return i, f, cg, o

    # ---- Stage 1: bidirectional LSTM over the support set -------------------
    sup = sup_ref[...]

    # One merged input projection for both directions ((K,Dp)@(Dp,8Dp)), biases
    # folded in; split into two scratches so the per-step read is a plain
    # full-lane dynamic row slice.
    xfr = (jnp.dot(sup.astype(cd), wi_fr_ref[...], preferred_element_type=f32)
           + b_fr_ref[...])
    xf_scr[...] = xfr[:, :4 * Dp]
    xr_scr[...] = xfr[:, 4 * Dp:]

    wh_f = wh_f_ref[...]                 # loop-invariant recurrent weights
    wh_r = wh_r_ref[...]

    zero2 = jnp.zeros((2, Dp), f32)

    def bilstm_step(s, carry):
        h2, c2 = carry                   # (2, Dp): row 0 = forward, row 1 = reverse
        kr = K - 1 - s
        gf = xf_scr[pl.ds(s, 1), :] + jnp.dot(
            h2[0:1].astype(cd), wh_f, preferred_element_type=f32)
        gr = xr_scr[pl.ds(kr, 1), :] + jnp.dot(
            h2[1:2].astype(cd), wh_r, preferred_element_type=f32)
        # Stack both directions so sigmoid/tanh run once per step on (2, 4Dp).
        g2 = jnp.concatenate([gf, gr], axis=0)
        i, f, cg, o = gate_split(g2)
        c2 = f * c2 + i * cg
        h2 = o * jnp.tanh(c2)
        hf_scr[pl.ds(s, 1), :] = h2[0:1]     # write-only scratches (no RMW)
        hr_scr[pl.ds(kr, 1), :] = h2[1:2]
        return (h2, c2)

    lax.fori_loop(0, K, bilstm_step, (zero2, zero2), unroll=True)

    # Vectorized epilogue: G = support + h_fwd + h_rev (single full-tile add).
    g = sup + hf_scr[...] + hr_scr[...]
    g_ref[...] = g

    # ---- Stage 2: FullyContextualEmbedding ----------------------------------
    q = qry_ref[...]

    # Loop invariants hoisted: query projection, weights, G / G^T.
    xq = (jnp.dot(q.astype(cd), wi_top_ref[...], preferred_element_type=f32)
          + b_cell_ref[...])
    w_rh = w_rh_ref[...]                 # stacked [Wi_bot; Wh_cell], (2Dp, 4Dp)

    KP = _round_up(K, SUBLANE)           # static sublane pad -> aligned transpose
    if KP != K:
        g_pad = jnp.concatenate([g, jnp.zeros((KP - K, Dp), f32)], axis=0)
        col_ok = lax.broadcasted_iota(jnp.int32, (1, KP), 1) < K
    else:
        g_pad = g
        col_ok = None
    gt = g_pad.T                         # (Dp, KP), hoisted out of the FCE loop
    g_c = g_pad.astype(cd)               # RHS of r = a @ G

    def fce_step(_, carry):
        h, c = carry
        # Softmax logits stay f32 (tiny N x Dp x K matmul; keeps attention
        # weights accurate even when weights are bf16).
        logits = jnp.dot(h, gt, preferred_element_type=f32)       # (N, KP)
        if col_ok is not None:
            logits = jnp.where(col_ok, logits, f32(-1e30))
        m = jnp.max(logits, axis=1, keepdims=True)
        e = jnp.exp(logits - m)
        a = e / jnp.sum(e, axis=1, keepdims=True)   # exact divide (no approx recip)
        r = jnp.dot(a.astype(cd), g_c, preferred_element_type=f32)    # (N, Dp)
        # Persistent [r | h] scratch replaces the per-step lane concatenate.
        rh_scr[:, :Dp] = r.astype(cd)
        rh_scr[:, Dp:] = h.astype(cd)
        gates = xq + jnp.dot(rh_scr[...], w_rh, preferred_element_type=f32)
        i, f, cg, o = gate_split(gates)
        c_new = f * c + i * cg
        h_new = o * jnp.tanh(c_new) + q
        return (h_new, c_new)

    h_out, _ = lax.fori_loop(0, K, fce_step, (q, jnp.zeros((N, Dp), f32)),
                             unroll=True)
    f_ref[...] = h_out


# ---------------------------------------------------------------------------
# Wrapper: lane/gate padding, weight merging, episode grid
# ---------------------------------------------------------------------------
def _pad_gate_cols(w, D, Dp):
    """(..., 4*D) -> (..., 4*Dp): each D-wide gate block lands in its own Dp slot."""
    if Dp == D:
        return w
    pad = [(0, 0)] * (w.ndim - 1) + [(0, Dp - D)]
    return jnp.concatenate(
        [jnp.pad(w[..., g * D:(g + 1) * D], pad) for g in range(4)], axis=-1)


def _pad_in_rows(w, D, Dp):
    if Dp == D:
        return w
    return jnp.pad(w, ((0, Dp - D), (0, 0)))


@functools.partial(jax.jit, static_argnames=("compute_dtype",))
def matching_net_layer_batched(support, query, params, *,
                               compute_dtype=jnp.bfloat16):
    """support: (E, K, D), query: (E, N, D).  Returns G: (E, K, D), F: (E, N, D)."""
    E, K, D = support.shape
    N = query.shape[1]
    Dp = _round_up(max(D, LANE), LANE)
    cd = compute_dtype
    f32 = jnp.float32

    # Lane-pad features (padded lanes provably stay zero through both LSTMs).
    sup_p = jnp.pad(support.astype(f32), ((0, 0), (0, 0), (0, Dp - D)))
    qry_p = jnp.pad(query.astype(f32), ((0, 0), (0, 0), (0, Dp - D)))

    # Gate-aware weight padding + merges; MXU weight operands cast to cd once.
    def prep_w(w):        # (D, 4D) -> (Dp, 4Dp)
        return _pad_in_rows(_pad_gate_cols(w.astype(f32), D, Dp), D, Dp).astype(cd)

    def prep_b(b):        # (1, 4D) -> (1, 4Dp), stays f32 (added after f32 acc)
        return _pad_gate_cols(b.astype(f32), D, Dp)

    wi_fr = jnp.concatenate([prep_w(params["wi_f"]), prep_w(params["wi_r"])], axis=1)
    b_fr = jnp.concatenate([prep_b(params["b_f"]), prep_b(params["b_r"])], axis=1)
    wh_f = prep_w(params["wh_f"])
    wh_r = prep_w(params["wh_r"])
    wi_top = prep_w(params["wi_top"])
    w_rh = jnp.concatenate([prep_w(params["wi_bot"]), prep_w(params["wh_cell"])],
                           axis=0)
    b_cell = prep_b(params["b_cell"])

    # Explicit VMEM budget (review: v7x has 64 MiB physical) and a cost hint.
    dsz = jnp.dtype(cd).itemsize
    w_bytes = dsz * Dp * Dp * 28 + 4 * Dp * 12
    io_bytes = 4 * 4 * (K * Dp + N * Dp)                 # in+out, double-buffered
    scr_bytes = 4 * K * Dp * 10 + dsz * N * 2 * Dp
    est = 2 * w_bytes + io_bytes + scr_bytes
    vmem_limit = int(min(64 << 20, max(32 << 20, int(1.3 * est) + (8 << 20))))

    KP = _round_up(K, SUBLANE)
    flops = E * (2 * K * Dp * 8 * Dp + K * 4 * Dp * 4 * Dp
                 + 2 * N * Dp * 4 * Dp
                 + K * (4 * N * Dp * KP + 16 * N * Dp * Dp))
    transc = E * (K * 10 * Dp + K * N * (5 * Dp + KP))
    bytes_acc = E * 8 * (K * Dp + N * Dp) + w_bytes

    w44 = pl.BlockSpec((Dp, 4 * Dp), lambda e: (0, 0))   # VMEM-resident weights
    grid_spec = pltpu.PrefetchScalarGridSpec(
        num_scalar_prefetch=0,
        grid=(E,),
        in_specs=[
            pl.BlockSpec((None, K, Dp), lambda e: (e, 0, 0)),    # support
            pl.BlockSpec((None, N, Dp), lambda e: (e, 0, 0)),    # query
            pl.BlockSpec((Dp, 8 * Dp), lambda e: (0, 0)),        # wi_fr
            pl.BlockSpec((1, 8 * Dp), lambda e: (0, 0)),         # b_fr
            w44,                                                 # wh_f
            w44,                                                 # wh_r
            w44,                                                 # wi_top
            pl.BlockSpec((2 * Dp, 4 * Dp), lambda e: (0, 0)),    # w_rh
            pl.BlockSpec((1, 4 * Dp), lambda e: (0, 0)),         # b_cell
        ],
        out_specs=(
            pl.BlockSpec((None, K, Dp), lambda e: (e, 0, 0)),    # G
            pl.BlockSpec((None, N, Dp), lambda e: (e, 0, 0)),    # F
        ),
        scratch_shapes=[
            pltpu.VMEM((K, 4 * Dp), f32),   # XF = sup@Wi_f + b_f
            pltpu.VMEM((K, 4 * Dp), f32),   # XR = sup@Wi_r + b_r
            pltpu.VMEM((K, Dp), f32),       # forward hidden states
            pltpu.VMEM((K, Dp), f32),       # reverse hidden states
            pltpu.VMEM((N, 2 * Dp), cd),    # [r | h] for the merged gate matmul
        ],
    )

    G_p, F_p = pl.pallas_call(
        matchingnet_kernel,
        out_shape=(jax.ShapeDtypeStruct((E, K, Dp), f32),
                   jax.ShapeDtypeStruct((E, N, Dp), f32)),
        grid_spec=grid_spec,
        compiler_params=pltpu.CompilerParams(
            dimension_semantics=("parallel",),
            vmem_limit_bytes=vmem_limit),
        cost_estimate=pl.CostEstimate(flops=flops, transcendentals=transc,
                                      bytes_accessed=bytes_acc),
    )(sup_p, qry_p, wi_fr, b_fr, wh_f, wh_r, wi_top, w_rh, b_cell)

    return G_p[..., :D], F_p[..., :D]


def matching_net_layer(support, query, params, *, compute_dtype=jnp.float32):
    """Single-episode API matching the PyTorch module: support (K,D), query (N,D)."""
    G, F = matching_net_layer_batched(support[None], query[None], params,
                                      compute_dtype=compute_dtype)
    return G[0], F[0]


# ---------------------------------------------------------------------------
# Deterministic parameter init (PyTorch-style U(-1/sqrt(D), 1/sqrt(D)))
# ---------------------------------------------------------------------------
def init_params(key, D):
    bound = 1.0 / jnp.sqrt(jnp.float32(D))
    ks = jax.random.split(key, 13)

    def u(k, shape):
        return jax.random.uniform(k, shape, jnp.float32, -bound, bound)

    return {
        # bidirectional LSTM, forward direction (weights pre-transposed to (D,4D))
        "wi_f": u(ks[0], (D, 4 * D)),
        "wh_f": u(ks[1], (D, 4 * D)),
        "b_f": u(ks[2], (1, 4 * D)) + u(ks[3], (1, 4 * D)),   # bias_ih + bias_hh
        # reverse direction
        "wi_r": u(ks[4], (D, 4 * D)),
        "wh_r": u(ks[5], (D, 4 * D)),
        "b_r": u(ks[6], (1, 4 * D)) + u(ks[7], (1, 4 * D)),
        # LSTMCell of FCE: W_ih (2D,4D) pre-transposed, split into [top; bottom]
        "wi_top": u(ks[8], (D, 4 * D)),
        "wi_bot": u(ks[9], (D, 4 * D)),
        "wh_cell": u(ks[10], (D, 4 * D)),
        "b_cell": u(ks[11], (1, 4 * D)) + u(ks[12], (1, 4 * D)),
    }


# ---------------------------------------------------------------------------
# Pure-JAX reference (mirrors the PyTorch forward semantics exactly)
# ---------------------------------------------------------------------------
def ref_forward(support, query, p):
    K, D = support.shape

    def split(g):
        return (jax.nn.sigmoid(g[..., :D]), jax.nn.sigmoid(g[..., D:2 * D]),
                jnp.tanh(g[..., 2 * D:3 * D]), jax.nn.sigmoid(g[..., 3 * D:]))

    h = jnp.zeros((1, D)); c = jnp.zeros((1, D)); hf = []
    for k in range(K):
        i, f, cg, o = split(support[k:k + 1] @ p["wi_f"] + h @ p["wh_f"] + p["b_f"])
        c = f * c + i * cg; h = o * jnp.tanh(c); hf.append(h)
    hf = jnp.concatenate(hf, 0)

    h = jnp.zeros((1, D)); c = jnp.zeros((1, D)); hr = [None] * K
    for s in range(K):
        k = K - 1 - s
        i, f, cg, o = split(support[k:k + 1] @ p["wi_r"] + h @ p["wh_r"] + p["b_r"])
        c = f * c + i * cg; h = o * jnp.tanh(c); hr[k] = h
    hr = jnp.concatenate(hr, 0)

    G = support + hf + hr

    hq = query; cq = jnp.zeros_like(query)
    for _ in range(K):
        a = jax.nn.softmax(hq @ G.T, axis=1)
        r = a @ G
        gates = (query @ p["wi_top"] + r @ p["wi_bot"]
                 + hq @ p["wh_cell"] + p["b_cell"])
        i, f, cg, o = split(gates)
        cq = f * cq + i * cg
        hq = o * jnp.tanh(cq) + query
    return G, hq


if __name__ == "__main__":
    D, K, N = 32, 8, 8
    key = jax.random.PRNGKey(0)
    k_sup, k_qry, k_par = jax.random.split(key, 3)
    params = init_params(k_par, D)

    # --- Test 1: single episode, f32 MXU path (tight check vs. pure-JAX ref) --
    support = jax.random.normal(k_sup, (K, D), jnp.float32)
    query = jax.random.normal(k_qry, (N, D), jnp.float32)
    G, F = matching_net_layer(support, query, params, compute_dtype=jnp.float32)
    jax.block_until_ready((G, F))
    G_ref, F_ref = ref_forward(support, query, params)
    assert jnp.allclose(G, G_ref, atol=1e-4, rtol=1e-4), "G mismatch (f32)"
    assert jnp.allclose(F, F_ref, atol=2e-3, rtol=2e-3), "F mismatch (f32)"

    # --- Test 2: odd K (exercises K-padding / masked-softmax path) ------------
    K2, N2 = 7, 5
    sup2 = jax.random.normal(jax.random.fold_in(k_sup, 1), (K2, D), jnp.float32)
    qry2 = jax.random.normal(jax.random.fold_in(k_qry, 1), (N2, D), jnp.float32)
    G2, F2 = matching_net_layer(sup2, qry2, params, compute_dtype=jnp.float32)
    jax.block_until_ready((G2, F2))
    G2_ref, F2_ref = ref_forward(sup2, qry2, params)
    assert jnp.allclose(G2, G2_ref, atol=1e-4, rtol=1e-4), "G mismatch (odd K)"
    assert jnp.allclose(F2, F2_ref, atol=2e-3, rtol=2e-3), "F mismatch (odd K)"

    # --- Test 3: batched episodes on the parallel grid, bf16 MXU operands -----
    E = 3
    sup_b = jax.random.normal(jax.random.fold_in(k_sup, 2), (E, K, D), jnp.float32)
    qry_b = jax.random.normal(jax.random.fold_in(k_qry, 2), (E, N, D), jnp.float32)
    G_b, F_b = matching_net_layer_batched(sup_b, qry_b, params,
                                          compute_dtype=jnp.bfloat16)
    jax.block_until_ready((G_b, F_b))
    for e in range(E):
        G_r, F_r = ref_forward(sup_b[e], qry_b[e], params)
        # bf16 matmul operands with f32 accumulation/carries: loose tolerance
        # (errors compound over 2*K recurrent steps).
        assert jnp.allclose(G_b[e], G_r, atol=1e-1, rtol=1e-1), "G mismatch (bf16)"
        assert jnp.allclose(F_b[e], F_r, atol=3e-1, rtol=1e-1), "F mismatch (bf16)"

    print("KERNEL_OK")
</pallas_src>

<mosaic_0001>
module attributes {stable_mosaic.version = 11 : i64} {
  func.func @matchingnet_kernel(%arg0: i32, %arg1: memref<1x8x128xf32, #tpu.memory_space<vmem>>, %arg2: memref<1x8x128xf32, #tpu.memory_space<vmem>>, %arg3: memref<128x1024xf32, #tpu.memory_space<vmem>>, %arg4: memref<1x1024xf32, #tpu.memory_space<vmem>>, %arg5: memref<128x512xf32, #tpu.memory_space<vmem>>, %arg6: memref<128x512xf32, #tpu.memory_space<vmem>>, %arg7: memref<128x512xf32, #tpu.memory_space<vmem>>, %arg8: memref<256x512xf32, #tpu.memory_space<vmem>>, %arg9: memref<1x512xf32, #tpu.memory_space<vmem>>, %arg10: memref<1x8x128xf32, #tpu.memory_space<vmem>>, %arg11: memref<1x8x128xf32, #tpu.memory_space<vmem>>, %arg12: memref<8x512xf32, #tpu.memory_space<vmem>>, %arg13: memref<8x512xf32, #tpu.memory_space<vmem>>, %arg14: memref<8x128xf32, #tpu.memory_space<vmem>>, %arg15: memref<8x128xf32, #tpu.memory_space<vmem>>, %arg16: memref<8x256xf32, #tpu.memory_space<vmem>>) attributes {dimension_semantics = [#tpu.dimension_semantics<parallel>], iteration_bounds = array<i64: 1>, scalar_prefetch = 0 : i64, scratch_operands = 5 : i64, tpu.core_type = #tpu.core_type<tc>, window_params = [{transform_indices = @transform_0, window_bounds = array<i64: 1, 8, 128>}, {transform_indices = @transform_1, window_bounds = array<i64: 1, 8, 128>}, {pipeline_mode = #tpu.pipeline_mode<synchronous>, transform_indices = @transform_2, window_bounds = array<i64: 128, 1024>}, {pipeline_mode = #tpu.pipeline_mode<synchronous>, transform_indices = @transform_3, window_bounds = array<i64: 1, 1024>}, {pipeline_mode = #tpu.pipeline_mode<synchronous>, transform_indices = @transform_4, window_bounds = array<i64: 128, 512>}, {pipeline_mode = #tpu.pipeline_mode<synchronous>, transform_indices = @transform_5, window_bounds = array<i64: 128, 512>}, {pipeline_mode = #tpu.pipeline_mode<synchronous>, transform_indices = @transform_6, window_bounds = array<i64: 128, 512>}, {pipeline_mode = #tpu.pipeline_mode<synchronous>, transform_indices = @transform_7, window_bounds = array<i64: 256, 512>}, {pipeline_mode = #tpu.pipeline_mode<synchronous>, transform_indices = @transform_8, window_bounds = array<i64: 1, 512>}, {transform_indices = @transform_9, window_bounds = array<i64: 1, 8, 128>}, {transform_indices = @transform_10, window_bounds = array<i64: 1, 8, 128>}]} {
    %c0 = arith.constant 0 : index
    %c0_0 = arith.constant 0 : index
    %c0_1 = arith.constant 0 : index
    %0 = vector.load %arg1[%c0, %c0_0, %c0_1] : memref<1x8x128xf32, #tpu.memory_space<vmem>>, vector<1x8x128xf32>
    %1 = vector.shape_cast %0 : vector<1x8x128xf32> to vector<8x128xf32>
    %c0_2 = arith.constant 0 : index
    %c0_3 = arith.constant 0 : index
    %2 = vector.load %arg3[%c0_2, %c0_3] : memref<128x1024xf32, #tpu.memory_space<vmem>>, vector<128x1024xf32>
    %cst = arith.constant dense<0.000000e+00> : vector<8x1024xf32>
    %3 = tpu.matmul %1, %2, %cst {dimension_numbers = #tpu.dot_dimension_numbers<[1], [0], [0], [1], [0, 0, 1, 1], [], []>} : vector<8x128xf32>, vector<128x1024xf32>, vector<8x1024xf32> -> vector<8x1024xf32>
    %c0_4 = arith.constant 0 : index
    %c0_5 = arith.constant 0 : index
    %4 = vector.load %arg4[%c0_4, %c0_5] : memref<1x1024xf32, #tpu.memory_space<vmem>>, vector<1x1024xf32>
    %5 = vector.broadcast %4 : vector<1x1024xf32> to vector<8x1024xf32>
    %6 = arith.addf %3, %5 : vector<8x1024xf32>
    %7 = vector.extract_strided_slice %6 {offsets = [0, 0], sizes = [8, 512], strides = [1, 1]} : vector<8x1024xf32> to vector<8x512xf32>
    %c0_6 = arith.constant 0 : index
    %c0_7 = arith.constant 0 : index
    %8 = vector.load %arg12[%c0_6, %c0_7] : memref<8x512xf32, #tpu.memory_space<vmem>>, vector<8x512xf32>
    tpu.vector_store %arg12[%c0_6, %c0_7], %7 {strides = array<i32>} : memref<8x512xf32, #tpu.memory_space<vmem>>, vector<8x512xf32>,
    %9 = vector.extract_strided_slice %6 {offsets = [0, 512], sizes = [8, 512], strides = [1, 1]} : vector<8x1024xf32> to vector<8x512xf32>
    %c0_8 = arith.constant 0 : index
    %c0_9 = arith.constant 0 : index
    %10 = vector.load %arg13[%c0_8, %c0_9] : memref<8x512xf32, #tpu.memory_space<vmem>>, vector<8x512xf32>
    tpu.vector_store %arg13[%c0_8, %c0_9], %9 {strides = array<i32>} : memref<8x512xf32, #tpu.memory_space<vmem>>, vector<8x512xf32>,
    %c0_10 = arith.constant 0 : index
    %c0_11 = arith.constant 0 : index
    %11 = vector.load %arg5[%c0_10, %c0_11] : memref<128x512xf32, #tpu.memory_space<vmem>>, vector<128x512xf32>
    %c0_12 = arith.constant 0 : index
    %c0_13 = arith.constant 0 : index
    %12 = vector.load %arg6[%c0_12, %c0_13] : memref<128x512xf32, #tpu.memory_space<vmem>>, vector<128x512xf32>
    %cst_14 = arith.constant 0.000000e+00 : f32
    %13 = vector.broadcast %cst_14 : f32 to vector<2x128xf32>
    %c0_i32 = arith.constant 0 : i32
    %c7_i32 = arith.constant 7 : i32
    %14 = arith.subi %c7_i32, %c0_i32 : i32
    %15 = arith.index_cast %c0_i32 : i32 to index
    %c0_15 = arith.constant 0 : index
    %16 = vector.load %arg12[%15, %c0_15] : memref<8x512xf32, #tpu.memory_space<vmem>>, vector<1x512xf32>
    %17 = vector.extract_strided_slice %13 {offsets = [0, 0], sizes = [1, 128], strides = [1, 1]} : vector<2x128xf32> to vector<1x128xf32>
    %cst_16 = arith.constant dense<0.000000e+00> : vector<1x512xf32>
    %18 = tpu.matmul %17, %11, %cst_16 {dimension_numbers = #tpu.dot_dimension_numbers<[1], [0], [0], [1], [0, 0, 1, 1], [], []>} : vector<1x128xf32>, vector<128x512xf32>, vector<1x512xf32> -> vector<1x512xf32>
    %19 = arith.addf %16, %18 : vector<1x512xf32>
    %20 = arith.index_cast %14 : i32 to index
    %c0_17 = arith.constant 0 : index
    %21 = vector.load %arg13[%20, %c0_17] : memref<8x512xf32, #tpu.memory_space<vmem>>, vector<1x512xf32>
    %22 = vector.extract_strided_slice %13 {offsets = [1, 0], sizes = [1, 128], strides = [1, 1]} : vector<2x128xf32> to vector<1x128xf32>
    %cst_18 = arith.constant dense<0.000000e+00> : vector<1x512xf32>
    %23 = tpu.matmul %22, %12, %cst_18 {dimension_numbers = #tpu.dot_dimension_numbers<[1], [0], [0], [1], [0, 0, 1, 1], [], []>} : vector<1x128xf32>, vector<128x512xf32>, vector<1x512xf32> -> vector<1x512xf32>
    %24 = arith.addf %21, %23 : vector<1x512xf32>
    %25 = tpu.concatenate %19, %24 in 0 : vector<1x512xf32>, vector<1x512xf32> -> vector<2x512xf32>
    %26 = vector.extract_strided_slice %25 {offsets = [0, 0], sizes = [2, 128], strides = [1, 1]} : vector<2x512xf32> to vector<2x128xf32>
    %27 = arith.negf %26 : vector<2x128xf32>
    %28 = math.exp %27 : vector<2x128xf32>
    %cst_19 = arith.constant 1.000000e+00 : f32
    %29 = vector.broadcast %cst_19 : f32 to vector<2x128xf32>
    %30 = arith.addf %29, %28 : vector<2x128xf32>
    %31 = arith.divf %29, %30 : vector<2x128xf32>
    %32 = vector.extract_strided_slice %25 {offsets = [0, 128], sizes = [2, 128], strides = [1, 1]} : vector<2x512xf32> to vector<2x128xf32>
    %33 = arith.negf %32 : vector<2x128xf32>
    %34 = math.exp %33 : vector<2x128xf32>
    %cst_20 = arith.constant 1.000000e+00 : f32
    %35 = vector.broadcast %cst_20 : f32 to vector<2x128xf32>
    %36 = arith.addf %35, %34 : vector<2x128xf32>
    %37 = arith.divf %35, %36 : vector<2x128xf32>
    %38 = vector.extract_strided_slice %25 {offsets = [0, 256], sizes = [2, 128], strides = [1, 1]} : vector<2x512xf32> to vector<2x128xf32>
    %39 = math.tanh %38 : vector<2x128xf32>
    %40 = vector.extract_strided_slice %25 {offsets = [0, 384], sizes = [2, 128], strides = [1, 1]} : vector<2x512xf32> to vector<2x128xf32>
    %41 = arith.negf %40 : vector<2x128xf32>
    %42 = math.exp %41 : vector<2x128xf32>
    %cst_21 = arith.constant 1.000000e+00 : f32
    %43 = vector.broadcast %cst_21 : f32 to vector<2x128xf32>
    %44 = arith.addf %43, %42 : vector<2x128xf32>
    %45 = arith.divf %43, %44 : vector<2x128xf32>
    %46 = arith.mulf %37, %13 : vector<2x128xf32>
    %47 = arith.mulf %31, %39 : vector<2x128xf32>
    %48 = arith.addf %46, %47 : vector<2x128xf32>
    %49 = math.tanh %48 : vector<2x128xf32>
    %50 = arith.mulf %45, %49 : vector<2x128xf32>
    %51 = vector.extract_strided_slice %50 {offsets = [0, 0], sizes = [1, 128], strides = [1, 1]} : vector<2x128xf32> to vector<1x128xf32>
    %52 = arith.index_cast %c0_i32 : i32 to index
    %c0_22 = arith.constant 0 : index
    %53 = vector.load %arg14[%52, %c0_22] : memref<8x128xf32, #tpu.memory_space<vmem>>, vector<1x128xf32>
    tpu.vector_store %arg14[%52, %c0_22], %51 {strides = array<i32>} : memref<8x128xf32, #tpu.memory_space<vmem>>, vector<1x128xf32>,
    %54 = vector.extract_strided_slice %50 {offsets = [1, 0], sizes = [1, 128], strides = [1, 1]} : vector<2x128xf32> to vector<1x128xf32>
    %55 = arith.index_cast %14 : i32 to index
    %c0_23 = arith.constant 0 : index
    %56 = vector.load %arg15[%55, %c0_23] : memref<8x128xf32, #tpu.memory_space<vmem>>, vector<1x128xf32>
    tpu.vector_store %arg15[%55, %c0_23], %54 {strides = array<i32>} : memref<8x128xf32, #tpu.memory_space<vmem>>, vector<1x128xf32>,
    %c1_i32 = arith.constant 1 : i32
    %c7_i32_24 = arith.constant 7 : i32
    %57 = arith.subi %c7_i32_24, %c1_i32 : i32
    %58 = arith.index_cast %c1_i32 : i32 to index
    %c0_25 = arith.constant 0 : index
    %59 = vector.load %arg12[%58, %c0_25] : memref<8x512xf32, #tpu.memory_space<vmem>>, vector<1x512xf32>
    %60 = vector.extract_strided_slice %50 {offsets = [0, 0], sizes = [1, 128], strides = [1, 1]} : vector<2x128xf32> to vector<1x128xf32>
    %cst_26 = arith.constant dense<0.000000e+00> : vector<1x512xf32>
    %61 = tpu.matmul %60, %11, %cst_26 {dimension_numbers = #tpu.dot_dimension_numbers<[1], [0], [0], [1], [0, 0, 1, 1], [], []>} : vector<1x128xf32>, vector<128x512xf32>, vector<1x512xf32> -> vector<1x512xf32>
    %62 = arith.addf %59, %61 : vector<1x512xf32>
    %63 = arith.index_cast %57 : i32 to index
    %c0_27 = arith.constant 0 : index
    %64 = vector.load %arg13[%63, %c0_27] : memref<8x512xf32, #tpu.memory_space<vmem>>, vector<1x512xf32>
    %65 = vector.extract_strided_slice %50 {offsets = [1, 0], sizes = [1, 128], strides = [1, 1]} : vector<2x128xf32> to vector<1x128xf32>
    %cst_28 = arith.constant dense<0.000000e+00> : vector<1x512xf32>
    %66 = tpu.matmul %65, %12, %cst_28 {dimension_numbers = #tpu.dot_dimension_numbers<[1], [0], [0], [1], [0, 0, 1, 1], [], []>} : vector<1x128xf32>, vector<128x512xf32>, vector<1x512xf32> -> vector<1x512xf32>
    %67 = arith.addf %64, %66 : vector<1x512xf32>
    %68 = tpu.concatenate %62, %67 in 0 : vector<1x512xf32>, vector<1x512xf32> -> vector<2x512xf32>
    %69 = vector.extract_strided_slice %68 {offsets = [0, 0], sizes = [2, 128], strides = [1, 1]} : vector<2x512xf32> to vector<2x128xf32>
    %70 = arith.negf %69 : vector<2x128xf32>
    %71 = math.exp %70 : vector<2x128xf32>
    %cst_29 = arith.constant 1.000000e+00 : f32
    %72 = vector.broadcast %cst_29 : f32 to vector<2x128xf32>
    %73 = arith.addf %72, %71 : vector<2x128xf32>
    %74 = arith.divf %72, %73 : vector<2x128xf32>
    %75 = vector.extract_strided_slice %68 {offsets = [0, 128], sizes = [2, 128], strides = [1, 1]} : vector<2x512xf32> to vector<2x128xf32>
    %76 = arith.negf %75 : vector<2x128xf32>
    %77 = math.exp %76 : vector<2x128xf32>
    %cst_30 = arith.constant 1.000000e+00 : f32
    %78 = vector.broadcast %cst_30 : f32 to vector<2x128xf32>
    %79 = arith.addf %78, %77 : vector<2x128xf32>
    %80 = arith.divf %78, %79 : vector<2x128xf32>
    %81 = vector.extract_strided_slice %68 {offsets = [0, 256], sizes = [2, 128], strides = [1, 1]} : vector<2x512xf32> to vector<2x128xf32>
    %82 = math.tanh %81 : vector<2x128xf32>
    %83 = vector.extract_strided_slice %68 {offsets = [0, 384], sizes = [2, 128], strides = [1, 1]} : vector<2x512xf32> to vector<2x128xf32>
    %84 = arith.negf %83 : vector<2x128xf32>
    %85 = math.exp %84 : vector<2x128xf32>
    %cst_31 = arith.constant 1.000000e+00 : f32
    %86 = vector.broadcast %cst_31 : f32 to vector<2x128xf32>
    %87 = arith.addf %86, %85 : vector<2x128xf32>
    %88 = arith.divf %86, %87 : vector<2x128xf32>
    %89 = arith.mulf %80, %48 : vector<2x128xf32>
    %90 = arith.mulf %74, %82 : vector<2x128xf32>
    %91 = arith.addf %89, %90 : vector<2x128xf32>
    %92 = math.tanh %91 : vector<2x128xf32>
    %93 = arith.mulf %88, %92 : vector<2x128xf32>
    %94 = vector.extract_strided_slice %93 {offsets = [0, 0], sizes = [1, 128], strides = [1, 1]} : vector<2x128xf32> to vector<1x128xf32>
    %95 = arith.index_cast %c1_i32 : i32 to index
    %c0_32 = arith.constant 0 : index
    %96 = vector.load %arg14[%95, %c0_32] : memref<8x128xf32, #tpu.memory_space<vmem>>, vector<1x128xf32>
    tpu.vector_store %arg14[%95, %c0_32], %94 {strides = array<i32>} : memref<8x128xf32, #tpu.memory_space<vmem>>, vector<1x128xf32>,
    %97 = vector.extract_strided_slice %93 {offsets = [1, 0], sizes = [1, 128], strides = [1, 1]} : vector<2x128xf32> to vector<1x128xf32>
    %98 = arith.index_cast %57 : i32 to index
    %c0_33 = arith.constant 0 : index
    %99 = vector.load %arg15[%98, %c0_33] : memref<8x128xf32, #tpu.memory_space<vmem>>, vector<1x128xf32>
    tpu.vector_store %arg15[%98, %c0_33], %97 {strides = array<i32>} : memref<8x128xf32, #tpu.memory_space<vmem>>, vector<1x128xf32>,
    %c2_i32 = arith.constant 2 : i32
    %c7_i32_34 = arith.constant 7 : i32
    %100 = arith.subi %c7_i32_34, %c2_i32 : i32
    %101 = arith.index_cast %c2_i32 : i32 to index
    %c0_35 = arith.constant 0 : index
    %102 = vector.load %arg12[%101, %c0_35] : memref<8x512xf32, #tpu.memory_space<vmem>>, vector<1x512xf32>
    %103 = vector.extract_strided_slice %93 {offsets = [0, 0], sizes = [1, 128], strides = [1, 1]} : vector<2x128xf32> to vector<1x128xf32>
    %cst_36 = arith.constant dense<0.000000e+00> : vector<1x512xf32>
    %104 = tpu.matmul %103, %11, %cst_36 {dimension_numbers = #tpu.dot_dimension_numbers<[1], [0], [0], [1], [0, 0, 1, 1], [], []>} : vector<1x128xf32>, vector<128x512xf32>, vector<1x512xf32> -> vector<1x512xf32>
    %105 = arith.addf %102, %104 : vector<1x512xf32>
    %106 = arith.index_cast %100 : i32 to index
    %c0_37 = arith.constant 0 : index
    %107 = vector.load %arg13[%106, %c0_37] : memref<8x512xf32, #tpu.memory_space<vmem>>, vector<1x512xf32>
    %108 = vector.extract_strided_slice %93 {offsets = [1, 0], sizes = [1, 128], strides = [1, 1]} : vector<2x128xf32> to vector<1x128xf32>
    %cst_38 = arith.constant dense<0.000000e+00> : vector<1x512xf32>
    %109 = tpu.matmul %108, %12, %cst_38 {dimension_numbers = #tpu.dot_dimension_numbers<[1], [0], [0], [1], [0, 0, 1, 1], [], []>} : vector<1x128xf32>, vector<128x512xf32>, vector<1x512xf32> -> vector<1x512xf32>
    %110 = arith.addf %107, %109 : vector<1x512xf32>
    %111 = tpu.concatenate %105, %110 in 0 : vector<1x512xf32>, vector<1x512xf32> -> vector<2x512xf32>
    %112 = vector.extract_strided_slice %111 {offsets = [0, 0], sizes = [2, 128], strides = [1, 1]} : vector<2x512xf32> to vector<2x128xf32>
    %113 = arith.negf %112 : vector<2x128xf32>
    %114 = math.exp %113 : vector<2x128xf32>
    %cst_39 = arith.constant 1.000000e+00 : f32
    %115 = vector.broadcast %cst_39 : f32 to vector<2x128xf32>
    %116 = arith.addf %115, %114 : vector<2x128xf32>
    %117 = arith.divf %115, %116 : vector<2x128xf32>
    %118 = vector.extract_strided_slice %111 {offsets = [0, 128], sizes = [2, 128], strides = [1, 1]} : vector<2x512xf32> to vector<2x128xf32>
    %119 = arith.negf %118 : vector<2x128xf32>
    %120 = math.exp %119 : vector<2x128xf32>
    %cst_40 = arith.constant 1.000000e+00 : f32
    %121 = vector.broadcast %cst_40 : f32 to vector<2x128xf32>
    %122 = arith.addf %121, %120 : vector<2x128xf32>
    %123 = arith.divf %121, %122 : vector<2x128xf32>
    %124 = vector.extract_strided_slice %111 {offsets = [0, 256], sizes = [2, 128], strides = [1, 1]} : vector<2x512xf32> to vector<2x128xf32>
    %125 = math.tanh %124 : vector<2x128xf32>
    %126 = vector.extract_strided_slice %111 {offsets = [0, 384], sizes = [2, 128], strides = [1, 1]} : vector<2x512xf32> to vector<2x128xf32>
    %127 = arith.negf %126 : vector<2x128xf32>
    %128 = math.exp %127 : vector<2x128xf32>
    %cst_41 = arith.constant 1.000000e+00 : f32
    %129 = vector.broadcast %cst_41 : f32 to vector<2x128xf32>
    %130 = arith.addf %129, %128 : vector<2x128xf32>
    %131 = arith.divf %129, %130 : vector<2x128xf32>
    %132 = arith.mulf %123, %91 : vector<2x128xf32>
    %133 = arith.mulf %117, %125 : vector<2x128xf32>
    %134 = arith.addf %132, %133 : vector<2x128xf32>
    %135 = math.tanh %134 : vector<2x128xf32>
    %136 = arith.mulf %131, %135 : vector<2x128xf32>
    %137 = vector.extract_strided_slice %136 {offsets = [0, 0], sizes = [1, 128], strides = [1, 1]} : vector<2x128xf32> to vector<1x128xf32>
    %138 = arith.index_cast %c2_i32 : i32 to index
    %c0_42 = arith.constant 0 : index
    %139 = vector.load %arg14[%138, %c0_42] : memref<8x128xf32, #tpu.memory_space<vmem>>, vector<1x128xf32>
    tpu.vector_store %arg14[%138, %c0_42], %137 {strides = array<i32>} : memref<8x128xf32, #tpu.memory_space<vmem>>, vector<1x128xf32>,
    %140 = vector.extract_strided_slice %136 {offsets = [1, 0], sizes = [1, 128], strides = [1, 1]} : vector<2x128xf32> to vector<1x128xf32>
    %141 = arith.index_cast %100 : i32 to index
    %c0_43 = arith.constant 0 : index
    %142 = vector.load %arg15[%141, %c0_43] : memref<8x128xf32, #tpu.memory_space<vmem>>, vector<1x128xf32>
    tpu.vector_store %arg15[%141, %c0_43], %140 {strides = array<i32>} : memref<8x128xf32, #tpu.memory_space<vmem>>, vector<1x128xf32>,
    %c3_i32 = arith.constant 3 : i32
    %c7_i32_44 = arith.constant 7 : i32
    %143 = arith.subi %c7_i32_44, %c3_i32 : i32
    %144 = arith.index_cast %c3_i32 : i32 to index
    %c0_45 = arith.constant 0 : index
    %145 = vector.load %arg12[%144, %c0_45] : memref<8x512xf32, #tpu.memory_space<vmem>>, vector<1x512xf32>
    %146 = vector.extract_strided_slice %136 {offsets = [0, 0], sizes = [1, 128], strides = [1, 1]} : vector<2x128xf32> to vector<1x128xf32>
    %cst_46 = arith.constant dense<0.000000e+00> : vector<1x512xf32>
    %147 = tpu.matmul %146, %11, %cst_46 {dimension_numbers = #tpu.dot_dimension_numbers<[1], [0], [0], [1], [0, 0, 1, 1], [], []>} : vector<1x128xf32>, vector<128x512xf32>, vector<1x512xf32> -> vector<1x512xf32>
    %148 = arith.addf %145, %147 : vector<1x512xf32>
    %149 = arith.index_cast %143 : i32 to index
    %c0_47 = arith.constant 0 : index
    %150 = vector.load %arg13[%149, %c0_47] : memref<8x512xf32, #tpu.memory_space<vmem>>, vector<1x512xf32>
    %151 = vector.extract_strided_slice %136 {offsets = [1, 0], sizes = [1, 128], strides = [1, 1]} : vector<2x128xf32> to vector<1x128xf32>
    %cst_48 = arith.constant dense<0.000000e+00> : vector<1x512xf32>
    %152 = tpu.matmul %151, %12, %cst_48 {dimension_numbers = #tpu.dot_dimension_numbers<[1], [0], [0], [1], [0, 0, 1, 1], [], []>} : vector<1x128xf32>, vector<128x512xf32>, vector<1x512xf32> -> vector<1x512xf32>
    %153 = arith.addf %150, %152 : vector<1x512xf32>
    %154 = tpu.concatenate %148, %153 in 0 : vector<1x512xf32>, vector<1x512xf32> -> vector<2x512xf32>
    %155 = vector.extract_strided_slice %154 {offsets = [0, 0], sizes = [2, 128], strides = [1, 1]} : vector<2x512xf32> to vector<2x128xf32>
    %156 = arith.negf %155 : vector<2x128xf32>
    %157 = math.exp %156 : vector<2x128xf32>
    %cst_49 = arith.constant 1.000000e+00 : f32
    %158 = vector.broadcast %cst_49 : f32 to vector<2x128xf32>
    %159 = arith.addf %158, %157 : vector<2x128xf32>
    %160 = arith.divf %158, %159 : vector<2x128xf32>
    %161 = vector.extract_strided_slice %154 {offsets = [0, 128], sizes = [2, 128], strides = [1, 1]} : vector<2x512xf32> to vector<2x128xf32>
    %162 = arith.negf %161 : vector<2x128xf32>
    %163 = math.exp %162 : vector<2x128xf32>
    %cst_50 = arith.constant 1.000000e+00 : f32
    %164 = vector.broadcast %cst_50 : f32 to vector<2x128xf32>
    %165 = arith.addf %164, %163 : vector<2x128xf32>
    %166 = arith.divf %164, %165 : vector<2x128xf32>
    %167 = vector.extract_strided_slice %154 {offsets = [0, 256], sizes = [2, 128], strides = [1, 1]} : vector<2x512xf32> to vector<2x128xf32>
    %168 = math.tanh %167 : vector<2x128xf32>
    %169 = vector.extract_strided_slice %154 {offsets = [0, 384], sizes = [2, 128], strides = [1, 1]} : vector<2x512xf32> to vector<2x128xf32>
    %170 = arith.negf %169 : vector<2x128xf32>
    %171 = math.exp %170 : vector<2x128xf32>
    %cst_51 = arith.constant 1.000000e+00 : f32
    %172 = vector.broadcast %cst_51 : f32 to vector<2x128xf32>
    %173 = arith.addf %172, %171 : vector<2x128xf32>
    %174 = arith.divf %172, %173 : vector<2x128xf32>
    %175 = arith.mulf %166, %134 : vector<2x128xf32>
    %176 = arith.mulf %160, %168 : vector<2x128xf32>
    %177 = arith.addf %175, %176 : vector<2x128xf32>
    %178 = math.tanh %177 : vector<2x128xf32>
    %179 = arith.mulf %174, %178 : vector<2x128xf32>
    %180 = vector.extract_strided_slice %179 {offsets = [0, 0], sizes = [1, 128], strides = [1, 1]} : vector<2x128xf32> to vector<1x128xf32>
    %181 = arith.index_cast %c3_i32 : i32 to index
    %c0_52 = arith.constant 0 : index
    %182 = vector.load %arg14[%181, %c0_52] : memref<8x128xf32, #tpu.memory_space<vmem>>, vector<1x128xf32>
    tpu.vector_store %arg14[%181, %c0_52], %180 {strides = array<i32>} : memref<8x128xf32, #tpu.memory_space<vmem>>, vector<1x128xf32>,
    %183 = vector.extract_strided_slice %179 {offsets = [1, 0], sizes = [1, 128], strides = [1, 1]} : vector<2x128xf32> to vector<1x128xf32>
    %184 = arith.index_cast %143 : i32 to index
    %c0_53 = arith.constant 0 : index
    %185 = vector.load %arg15[%184, %c0_53] : memref<8x128xf32, #tpu.memory_space<vmem>>, vector<1x128xf32>
    tpu.vector_store %arg15[%184, %c0_53], %183 {strides = array<i32>} : memref<8x128xf32, #tpu.memory_space<vmem>>, vector<1x128xf32>,
    %c4_i32 = arith.constant 4 : i32
    %c7_i32_54 = arith.constant 7 : i32
    %186 = arith.subi %c7_i32_54, %c4_i32 : i32
    %187 = arith.index_cast %c4_i32 : i32 to index
    %c0_55 = arith.constant 0 : index
    %188 = vector.load %arg12[%187, %c0_55] : memref<8x512xf32, #tpu.memory_space<vmem>>, vector<1x512xf32>
    %189 = vector.extract_strided_slice %179 {offsets = [0, 0], sizes = [1, 128], strides = [1, 1]} : vector<2x128xf32> to vector<1x128xf32>
    %cst_56 = arith.constant dense<0.000000e+00> : vector<1x512xf32>
    %190 = tpu.matmul %189, %11, %cst_56 {dimension_numbers = #tpu.dot_dimension_numbers<[1], [0], [0], [1], [0, 0, 1, 1], [], []>} : vector<1x128xf32>, vector<128x512xf32>, vector<1x512xf32> -> vector<1x512xf32>
    %191 = arith.addf %188, %190 : vector<1x512xf32>
    %192 = arith.index_cast %186 : i32 to index
    %c0_57 = arith.constant 0 : index
    %193 = vector.load %arg13[%192, %c0_57] : memref<8x512xf32, #tpu.memory_space<vmem>>, vector<1x512xf32>
    %194 = vector.extract_strided_slice %179 {offsets = [1, 0], sizes = [1, 128], strides = [1, 1]} : vector<2x128xf32> to vector<1x128xf32>
    %cst_58 = arith.constant dense<0.000000e+00> : vector<1x512xf32>
    %195 = tpu.matmul %194, %12, %cst_58 {dimension_numbers = #tpu.dot_dimension_numbers<[1], [0], [0], [1], [0, 0, 1, 1], [], []>} : vector<1x128xf32>, vector<128x512xf32>, vector<1x512xf32> -> vector<1x512xf32>
    %196 = arith.addf %193, %195 : vector<1x512xf32>
    %197 = tpu.concatenate %191, %196 in 0 : vector<1x512xf32>, vector<1x512xf32> -> vector<2x512xf32>
    %198 = vector.extract_strided_slice %197 {offsets = [0, 0], sizes = [2, 128], strides = [1, 1]} : vector<2x512xf32> to vector<2x128xf32>
    %199 = arith.negf %198 : vector<2x128xf32>
    %200 = math.exp %199 : vector<2x128xf32>
    %cst_59 = arith.constant 1.000000e+00 : f32
    %201 = vector.broadcast %cst_59 : f32 to vector<2x128xf32>
    %202 = arith.addf %201, %200 : vector<2x128xf32>
    %203 = arith.divf %201, %202 : vector<2x128xf32>
    %204 = vector.extract_strided_slice %197 {offsets = [0, 128], sizes = [2, 128], strides = [1, 1]} : vector<2x512xf32> to vector<2x128xf32>
    %205 = arith.negf %204 : vector<2x128xf32>
    %206 = math.exp %205 : vector<2x128xf32>
    %cst_60 = arith.constant 1.000000e+00 : f32
    %207 = vector.broadcast %cst_60 : f32 to vector<2x128xf32>
    %208 = arith.addf %207, %206 : vector<2x128xf32>
    %209 = arith.divf %207, %208 : vector<2x128xf32>
    %210 = vector.extract_strided_slice %197 {offsets = [0, 256], sizes = [2, 128], strides = [1, 1]} : vector<2x512xf32> to vector<2x128xf32>
    %211 = math.tanh %210 : vector<2x128xf32>
    %212 = vector.extract_strided_slice %197 {offsets = [0, 384], sizes = [2, 128], strides = [1, 1]} : vector<2x512xf32> to vector<2x128xf32>
    %213 = arith.negf %212 : vector<2x128xf32>
    %214 = math.exp %213 : vector<2x128xf32>
    %cst_61 = arith.constant 1.000000e+00 : f32
    %215 = vector.broadcast %cst_61 : f32 to vector<2x128xf32>
    %216 = arith.addf %215, %214 : vector<2x128xf32>
    %217 = arith.divf %215, %216 : vector<2x128xf32>
    %218 = arith.mulf %209, %177 : vector<2x128xf32>
    %219 = arith.mulf %203, %211 : vector<2x128xf32>
    %220 = arith.addf %218, %219 : vector<2x128xf32>
    %221 = math.tanh %220 : vector<2x128xf32>
    %222 = arith.mulf %217, %221 : vector<2x128xf32>
    %223 = vector.extract_strided_slice %222 {offsets = [0, 0], sizes = [1, 128], strides = [1, 1]} : vector<2x128xf32> to vector<1x128xf32>
    %224 = arith.index_cast %c4_i32 : i32 to index
    %c0_62 = arith.constant 0 : index
    %225 = vector.load %arg14[%224, %c0_62] : memref<8x128xf32, #tpu.memory_space<vmem>>, vector<1x128xf32>
    tpu.vector_store %arg14[%224, %c0_62], %223 {strides = array<i32>} : memref<8x128xf32, #tpu.memory_space<vmem>>, vector<1x128xf32>,
    %226 = vector.extract_strided_slice %222 {offsets = [1, 0], sizes = [1, 128], strides = [1, 1]} : vector<2x128xf32> to vector<1x128xf32>
    %227 = arith.index_cast %186 : i32 to index
    %c0_63 = arith.constant 0 : index
    %228 = vector.load %arg15[%227, %c0_63] : memref<8x128xf32, #tpu.memory_space<vmem>>, vector<1x128xf32>
    tpu.vector_store %arg15[%227, %c0_63], %226 {strides = array<i32>} : memref<8x128xf32, #tpu.memory_space<vmem>>, vector<1x128xf32>,
    %c5_i32 = arith.constant 5 : i32
    %c7_i32_64 = arith.constant 7 : i32
    %229 = arith.subi %c7_i32_64, %c5_i32 : i32
    %230 = arith.index_cast %c5_i32 : i32 to index
    %c0_65 = arith.constant 0 : index
    %231 = vector.load %arg12[%230, %c0_65] : memref<8x512xf32, #tpu.memory_space<vmem>>, vector<1x512xf32>
    %232 = vector.extract_strided_slice %222 {offsets = [0, 0], sizes = [1, 128], strides = [1, 1]} : vector<2x128xf32> to vector<1x128xf32>
    %cst_66 = arith.constant dense<0.000000e+00> : vector<1x512xf32>
    %233 = tpu.matmul %232, %11, %cst_66 {dimension_numbers = #tpu.dot_dimension_numbers<[1], [0], [0], [1], [0, 0, 1, 1], [], []>} : vector<1x128xf32>, vector<128x512xf32>, vector<1x512xf32> -> vector<1x512xf32>
    %234 = arith.addf %231, %233 : vector<1x512xf32>
    %235 = arith.index_cast %229 : i32 to index
    %c0_67 = arith.constant 0 : index
    %236 = vector.load %arg13[%235, %c0_67] : memref<8x512xf32, #tpu.memory_space<vmem>>, vector<1x512xf32>
    %237 = vector.extract_strided_slice %222 {offsets = [1, 0], sizes = [1, 128], strides = [1, 1]} : vector<2x128xf32> to vector<1x128xf32>
    %cst_68 = arith.constant dense<0.000000e+00> : vector<1x512xf32>
    %238 = tpu.matmul %237, %12, %cst_68 {dimension_numbers = #tpu.dot_dimension_numbers<[1], [0], [0], [1], [0, 0, 1, 1], [], []>} : vector<1x128xf32>, vector<128x512xf32>, vector<1x512xf32> -> vector<1x512xf32>
    %239 = arith.addf %236, %238 : vector<1x512xf32>
    %240 = tpu.concatenate %234, %239 in 0 : vector<1x512xf32>, vector<1x512xf32> -> vector<2x512xf32>
    %241 = vector.extract_strided_slice %240 {offsets = [0, 0], sizes = [2, 128], strides = [1, 1]} : vector<2x512xf32> to vector<2x128xf32>
    %242 = arith.negf %241 : vector<2x128xf32>
    %243 = math.exp %242 : vector<2x128xf32>
    %cst_69 = arith.constant 1.000000e+00 : f32
    %244 = vector.broadcast %cst_69 : f32 to vector<2x128xf32>
    %245 = arith.addf %244, %243 : vector<2x128xf32>
    %246 = arith.divf %244, %245 : vector<2x128xf32>
    %247 = vector.extract_strided_slice %240 {offsets = [0, 128], sizes = [2, 128], strides = [1, 1]} : vector<2x512xf32> to vector<2x128xf32>
    %248 = arith.negf %247 : vector<2x128xf32>
    %249 = math.exp %248 : vector<2x128xf32>
    %cst_70 = arith.constant 1.000000e+00 : f32
    %250 = vector.broadcast %cst_70 : f32 to vector<2x128xf32>
    %251 = arith.addf %250, %249 : vector<2x128xf32>
    %252 = arith.divf %250, %251 : vector<2x128xf32>
    %253 = vector.extract_strided_slice %240 {offsets = [0, 256], sizes = [2, 128], strides = [1, 1]} : vector<2x512xf32> to vector<2x128xf32>
    %254 = math.tanh %253 : vector<2x128xf32>
    %255 = vector.extract_strided_slice %240 {offsets = [0, 384], sizes = [2, 128], strides = [1, 1]} : vector<2x512xf32> to vector<2x128xf32>
    %256 = arith.negf %255 : vector<2x128xf32>
    %257 = math.exp %256 : vector<2x128xf32>
    %cst_71 = arith.constant 1.000000e+00 : f32
    %258 = vector.broadcast %cst_71 : f32 to vector<2x128xf32>
    %259 = arith.addf %258, %257 : vector<2x128xf32>
    %260 = arith.divf %258, %259 : vector<2x128xf32>
    %261 = arith.mulf %252, %220 : vector<2x128xf32>
    %262 = arith.mulf %246, %254 : vector<2x128xf32>
    %263 = arith.addf %261, %262 : vector<2x128xf32>
    %264 = math.tanh %263 : vector<2x128xf32>
    %265 = arith.mulf %260, %264 : vector<2x128xf32>
    %266 = vector.extract_strided_slice %265 {offsets = [0, 0], sizes = [1, 128], strides = [1, 1]} : vector<2x128xf32> to vector<1x128xf32>
    %267 = arith.index_cast %c5_i32 : i32 to index
    %c0_72 = arith.constant 0 : index
    %268 = vector.load %arg14[%267, %c0_72] : memref<8x128xf32, #tpu.memory_space<vmem>>, vector<1x128xf32>
    tpu.vector_store %arg14[%267, %c0_72], %266 {strides = array<i32>} : memref<8x128xf32, #tpu.memory_space<vmem>>, vector<1x128xf32>,
    %269 = vector.extract_strided_slice %265 {offsets = [1, 0], sizes = [1, 128], strides = [1, 1]} : vector<2x128xf32> to vector<1x128xf32>
    %270 = arith.index_cast %229 : i32 to index
    %c0_73 = arith.constant 0 : index
    %271 = vector.load %arg15[%270, %c0_73] : memref<8x128xf32, #tpu.memory_space<vmem>>, vector<1x128xf32>
    tpu.vector_store %arg15[%270, %c0_73], %269 {strides = array<i32>} : memref<8x128xf32, #tpu.memory_space<vmem>>, vector<1x128xf32>,
    %c6_i32 = arith.constant 6 : i32
    %c7_i32_74 = arith.constant 7 : i32
    %272 = arith.subi %c7_i32_74, %c6_i32 : i32
    %273 = arith.index_cast %c6_i32 : i32 to index
    %c0_75 = arith.constant 0 : index
    %274 = vector.load %arg12[%273, %c0_75] : memref<8x512xf32, #tpu.memory_space<vmem>>, vector<1x512xf32>
    %275 = vector.extract_strided_slice %265 {offsets = [0, 0], sizes = [1, 128], strides = [1, 1]} : vector<2x128xf32> to vector<1x128xf32>
    %cst_76 = arith.constant dense<0.000000e+00> : vector<1x512xf32>
    %276 = tpu.matmul %275, %11, %cst_76 {dimension_numbers = #tpu.dot_dimension_numbers<[1], [0], [0], [1], [0, 0, 1, 1], [], []>} : vector<1x128xf32>, vector<128x512xf32>, vector<1x512xf32> -> vector<1x512xf32>
    %277 = arith.addf %274, %276 : vector<1x512xf32>
    %278 = arith.index_cast %272 : i32 to index
    %c0_77 = arith.constant 0 : index
    %279 = vector.load %arg13[%278, %c0_77] : memref<8x512xf32, #tpu.memory_space<vmem>>, vector<1x512xf32>
    %280 = vector.extract_strided_slice %265 {offsets = [1, 0], sizes = [1, 128], strides = [1, 1]} : vector<2x128xf32> to vector<1x128xf32>
    %cst_78 = arith.constant dense<0.000000e+00> : vector<1x512xf32>
    %281 = tpu.matmul %280, %12, %cst_78 {dimension_numbers = #tpu.dot_dimension_numbers<[1], [0], [0], [1], [0, 0, 1, 1], [], []>} : vector<1x128xf32>, vector<128x512xf32>, vector<1x512xf32> -> vector<1x512xf32>
    %282 = arith.addf %279, %281 : vector<1x512xf32>
    %283 = tpu.concatenate %277, %282 in 0 : vector<1x512xf32>, vector<1x512xf32> -> vector<2x512xf32>
    %284 = vector.extract_strided_slice %283 {offsets = [0, 0], sizes = [2, 128], strides = [1, 1]} : vector<2x512xf32> to vector<2x128xf32>
    %285 = arith.negf %284 : vector<2x128xf32>
    %286 = math.exp %285 : vector<2x128xf32>
    %cst_79 = arith.constant 1.000000e+00 : f32
    %287 = vector.broadcast %cst_79 : f32 to vector<2x128xf32>
    %288 = arith.addf %287, %286 : vector<2x128xf32>
    %289 = arith.divf %287, %288 : vector<2x128xf32>
    %290 = vector.extract_strided_slice %283 {offsets = [0, 128], sizes = [2, 128], strides = [1, 1]} : vector<2x512xf32> to vector<2x128xf32>
    %291 = arith.negf %290 : vector<2x128xf32>
    %292 = math.exp %291 : vector<2x128xf32>
    %cst_80 = arith.constant 1.000000e+00 : f32
    %293 = vector.broadcast %cst_80 : f32 to vector<2x128xf32>
    %294 = arith.addf %293, %292 : vector<2x128xf32>
    %295 = arith.divf %293, %294 : vector<2x128xf32>
    %296 = vector.extract_strided_slice %283 {offsets = [0, 256], sizes = [2, 128], strides = [1, 1]} : vector<2x512xf32> to vector<2x128xf32>
    %297 = math.tanh %296 : vector<2x128xf32>
    %298 = vector.extract_strided_slice %283 {offsets = [0, 384], sizes = [2, 128], strides = [1, 1]} : vector<2x512xf32> to vector<2x128xf32>
    %299 = arith.negf %298 : vector<2x128xf32>
    %300 = math.exp %299 : vector<2x128xf32>
    %cst_81 = arith.constant 1.000000e+00 : f32
    %301 = vector.broadcast %cst_81 : f32 to vector<2x128xf32>
    %302 = arith.addf %301, %300 : vector<2x128xf32>
    %303 = arith.divf %301, %302 : vector<2x128xf32>
    %304 = arith.mulf %295, %263 : vector<2x128xf32>
    %305 = arith.mulf %289, %297 : vector<2x128xf32>
    %306 = arith.addf %304, %305 : vector<2x128xf32>
    %307 = math.tanh %306 : vector<2x128xf32>
    %308 = arith.mulf %303, %307 : vector<2x128xf32>
    %309 = vector.extract_strided_slice %308 {offsets = [0, 0], sizes = [1, 128], strides = [1, 1]} : vector<2x128xf32> to vector<1x128xf32>
    %310 = arith.index_cast %c6_i32 : i32 to index
    %c0_82 = arith.constant 0 : index
    %311 = vector.load %arg14[%310, %c0_82] : memref<8x128xf32, #tpu.memory_space<vmem>>, vector<1x128xf32>
    tpu.vector_store %arg14[%310, %c0_82], %309 {strides = array<i32>} : memref<8x128xf32, #tpu.memory_space<vmem>>, vector<1x128xf32>,
    %312 = vector.extract_strided_slice %308 {offsets = [1, 0], sizes = [1, 128], strides = [1, 1]} : vector<2x128xf32> to vector<1x128xf32>
    %313 = arith.index_cast %272 : i32 to index
    %c0_83 = arith.constant 0 : index
    %314 = vector.load %arg15[%313, %c0_83] : memref<8x128xf32, #tpu.memory_space<vmem>>, vector<1x128xf32>
    tpu.vector_store %arg15[%313, %c0_83], %312 {strides = array<i32>} : memref<8x128xf32, #tpu.memory_space<vmem>>, vector<1x128xf32>,
    %c7_i32_84 = arith.constant 7 : i32
    %c7_i32_85 = arith.constant 7 : i32
    %315 = arith.subi %c7_i32_85, %c7_i32_84 : i32
    %316 = arith.index_cast %c7_i32_84 : i32 to index
    %c0_86 = arith.constant 0 : index
    %317 = vector.load %arg12[%316, %c0_86] : memref<8x512xf32, #tpu.memory_space<vmem>>, vector<1x512xf32>
    %318 = vector.extract_strided_slice %308 {offsets = [0, 0], sizes = [1, 128], strides = [1, 1]} : vector<2x128xf32> to vector<1x128xf32>
    %cst_87 = arith.constant dense<0.000000e+00> : vector<1x512xf32>
    %319 = tpu.matmul %318, %11, %cst_87 {dimension_numbers = #tpu.dot_dimension_numbers<[1], [0], [0], [1], [0, 0, 1, 1], [], []>} : vector<1x128xf32>, vector<128x512xf32>, vector<1x512xf32> -> vector<1x512xf32>
    %320 = arith.addf %317, %319 : vector<1x512xf32>
    %321 = arith.index_cast %315 : i32 to index
    %c0_88 = arith.constant 0 : index
    %322 = vector.load %arg13[%321, %c0_88] : memref<8x512xf32, #tpu.memory_space<vmem>>, vector<1x512xf32>
    %323 = vector.extract_strided_slice %308 {offsets = [1, 0], sizes = [1, 128], strides = [1, 1]} : vector<2x128xf32> to vector<1x128xf32>
    %cst_89 = arith.constant dense<0.000000e+00> : vector<1x512xf32>
    %324 = tpu.matmul %323, %12, %cst_89 {dimension_numbers = #tpu.dot_dimension_numbers<[1], [0], [0], [1], [0, 0, 1, 1], [], []>} : vector<1x128xf32>, vector<128x512xf32>, vector<1x512xf32> -> vector<1x512xf32>
    %325 = arith.addf %322, %324 : vector<1x512xf32>
    %326 = tpu.concatenate %320, %325 in 0 : vector<1x512xf32>, vector<1x512xf32> -> vector<2x512xf32>
    %327 = vector.extract_strided_slice %326 {offsets = [0, 0], sizes = [2, 128], strides = [1, 1]} : vector<2x512xf32> to vector<2x128xf32>
    %328 = arith.negf %327 : vector<2x128xf32>
    %329 = math.exp %328 : vector<2x128xf32>
    %cst_90 = arith.constant 1.000000e+00 : f32
    %330 = vector.broadcast %cst_90 : f32 to vector<2x128xf32>
    %331 = arith.addf %330, %329 : vector<2x128xf32>
    %332 = arith.divf %330, %331 : vector<2x128xf32>
    %333 = vector.extract_strided_slice %326 {offsets = [0, 128], sizes = [2, 128], strides = [1, 1]} : vector<2x512xf32> to vector<2x128xf32>
    %334 = arith.negf %333 : vector<2x128xf32>
    %335 = math.exp %334 : vector<2x128xf32>
    %cst_91 = arith.constant 1.000000e+00 : f32
    %336 = vector.broadcast %cst_91 : f32 to vector<2x128xf32>
    %337 = arith.addf %336, %335 : vector<2x128xf32>
    %338 = arith.divf %336, %337 : vector<2x128xf32>
    %339 = vector.extract_strided_slice %326 {offsets = [0, 256], sizes = [2, 128], strides = [1, 1]} : vector<2x512xf32> to vector<2x128xf32>
    %340 = math.tanh %339 : vector<2x128xf32>
    %341 = vector.extract_strided_slice %326 {offsets = [0, 384], sizes = [2, 128], strides = [1, 1]} : vector<2x512xf32> to vector<2x128xf32>
    %342 = arith.negf %341 : vector<2x128xf32>
    %343 = math.exp %342 : vector<2x128xf32>
    %cst_92 = arith.constant 1.000000e+00 : f32
    %344 = vector.broadcast %cst_92 : f32 to vector<2x128xf32>
    %345 = arith.addf %344, %343 : vector<2x128xf32>
    %346 = arith.divf %344, %345 : vector<2x128xf32>
    %347 = arith.mulf %338, %306 : vector<2x128xf32>
    %348 = arith.mulf %332, %340 : vector<2x128xf32>
    %349 = arith.addf %347, %348 : vector<2x128xf32>
    %350 = math.tanh %349 : vector<2x128xf32>
    %351 = arith.mulf %346, %350 : vector<2x128xf32>
    %352 = vector.extract_strided_slice %351 {offsets = [0, 0], sizes = [1, 128], strides = [1, 1]} : vector<2x128xf32> to vector<1x128xf32>
    %353 = arith.index_cast %c7_i32_84 : i32 to index
    %c0_93 = arith.constant 0 : index
    %354 = vector.load %arg14[%353, %c0_93] : memref<8x128xf32, #tpu.memory_space<vmem>>, vector<1x128xf32>
    tpu.vector_store %arg14[%353, %c0_93], %352 {strides = array<i32>} : memref<8x128xf32, #tpu.memory_space<vmem>>, vector<1x128xf32>,
    %355 = vector.extract_strided_slice %351 {offsets = [1, 0], sizes = [1, 128], strides = [1, 1]} : vector<2x128xf32> to vector<1x128xf32>
    %356 = arith.index_cast %315 : i32 to index
    %c0_94 = arith.constant 0 : index
    %357 = vector.load %arg15[%356, %c0_94] : memref<8x128xf32, #tpu.memory_space<vmem>>, vector<1x128xf32>
    tpu.vector_store %arg15[%356, %c0_94], %355 {strides = array<i32>} : memref<8x128xf32, #tpu.memory_space<vmem>>, vector<1x128xf32>,
    %c8_i32 = arith.constant 8 : i32
    %c0_95 = arith.constant 0 : index
    %c0_96 = arith.constant 0 : index
    %358 = vector.load %arg14[%c0_95, %c0_96] : memref<8x128xf32, #tpu.memory_space<vmem>>, vector<8x128xf32>
    %359 = arith.addf %1, %358 : vector<8x128xf32>
    %c0_97 = arith.constant 0 : index
    %c0_98 = arith.constant 0 : index
    %360 = vector.load %arg15[%c0_97, %c0_98] : memref<8x128xf32, #tpu.memory_space<vmem>>, vector<8x128xf32>
    %361 = arith.addf %359, %360 : vector<8x128xf32>
    %c0_99 = arith.constant 0 : index
    %c0_100 = arith.constant 0 : index
    %c0_101 = arith.constant 0 : index
    %362 = vector.load %arg10[%c0_99, %c0_100, %c0_101] : memref<1x8x128xf32, #tpu.memory_space<vmem>>, vector<1x8x128xf32>
    %363 = vector.shape_cast %362 : vector<1x8x128xf32> to vector<8x128xf32>
    %364 = vector.shape_cast %361 : vector<8x128xf32> to vector<1x8x128xf32>
    tpu.vector_store %arg10[%c0_99, %c0_100, %c0_101], %364 {strides = array<i32>} : memref<1x8x128xf32, #tpu.memory_space<vmem>>, vector<1x8x128xf32>,
    %c0_102 = arith.constant 0 : index
    %c0_103 = arith.constant 0 : index
    %c0_104 = arith.constant 0 : index
    %365 = vector.load %arg2[%c0_102, %c0_103, %c0_104] : memref<1x8x128xf32, #tpu.memory_space<vmem>>, vector<1x8x128xf32>
    %366 = vector.shape_cast %365 : vector<1x8x128xf32> to vector<8x128xf32>
    %c0_105 = arith.constant 0 : index
    %c0_106 = arith.constant 0 : index
    %367 = vector.load %arg7[%c0_105, %c0_106] : memref<128x512xf32, #tpu.memory_space<vmem>>, vector<128x512xf32>
    %cst_107 = arith.constant dense<0.000000e+00> : vector<8x512xf32>
    %368 = tpu.matmul %366, %367, %cst_107 {dimension_numbers = #tpu.dot_dimension_numbers<[1], [0], [0], [1], [0, 0, 1, 1], [], []>} : vector<8x128xf32>, vector<128x512xf32>, vector<8x512xf32> -> vector<8x512xf32>
    %c0_108 = arith.constant 0 : index
    %c0_109 = arith.constant 0 : index
    %369 = vector.load %arg9[%c0_108, %c0_109] : memref<1x512xf32, #tpu.memory_space<vmem>>, vector<1x512xf32>
    %370 = vector.broadcast %369 : vector<1x512xf32> to vector<8x512xf32>
    %371 = arith.addf %368, %370 : vector<8x512xf32>
    %c0_110 = arith.constant 0 : index
    %c0_111 = arith.constant 0 : index
    %372 = vector.load %arg8[%c0_110, %c0_111] : memref<256x512xf32, #tpu.memory_space<vmem>>, vector<256x512xf32>
    %373 = tpu.transpose %361, [1, 0] : vector<8x128xf32> -> vector<128x8xf32>
    %cst_112 = arith.constant 0.000000e+00 : f32
    %374 = vector.broadcast %cst_112 : f32 to vector<8x128xf32>
    %c0_i32_113 = arith.constant 0 : i32
    %cst_114 = arith.constant dense<0.000000e+00> : vector<8x8xf32>
    %375 = tpu.matmul %366, %373, %cst_114 {dimension_numbers = #tpu.dot_dimension_numbers<[1], [0], [0], [1], [0, 0, 1, 1], [], []>} : vector<8x128xf32>, vector<128x8xf32>, vector<8x8xf32> -> vector<8x8xf32>
    %cst_115 = arith.constant dense<0xFF800000> : vector<8xf32>
    %376 = vector.multi_reduction <maximumf>, %375, %cst_115 [1] : vector<8x8xf32> to vector<8xf32>
    %377 = vector.shape_cast %376 : vector<8xf32> to vector<8x1xf32>
    %378 = vector.broadcast %377 : vector<8x1xf32> to vector<8x8xf32>
    %379 = arith.subf %375, %378 : vector<8x8xf32>
    %380 = math.exp %379 : vector<8x8xf32>
    %cst_116 = arith.constant dense<0.000000e+00> : vector<8xf32>
    %381 = vector.multi_reduction <add>, %380, %cst_116 [1] : vector<8x8xf32> to vector<8xf32>
    %382 = vector.shape_cast %381 : vector<8xf32> to vector<8x1xf32>
    %383 = vector.broadcast %382 : vector<8x1xf32> to vector<8x8xf32>
    %384 = arith.divf %380, %383 : vector<8x8xf32>
    %cst_117 = arith.constant dense<0.000000e+00> : vector<8x128xf32>
    %385 = tpu.matmul %384, %361, %cst_117 {dimension_numbers = #tpu.dot_dimension_numbers<[1], [0], [0], [1], [0, 0, 1, 1], [], []>} : vector<8x8xf32>, vector<8x128xf32>, vector<8x128xf32> -> vector<8x128xf32>
    %c0_118 = arith.constant 0 : index
    %c0_119 = arith.constant 0 : index
    %386 = vector.load %arg16[%c0_118, %c0_119] : memref<8x256xf32, #tpu.memory_space<vmem>>, vector<8x128xf32>
    tpu.vector_store %arg16[%c0_118, %c0_119], %385 {strides = array<i32>} : memref<8x256xf32, #tpu.memory_space<vmem>>, vector<8x128xf32>,
    %c0_120 = arith.constant 0 : index
    %c128 = arith.constant 128 : index
    %387 = vector.load %arg16[%c0_120, %c128] : memref<8x256xf32, #tpu.memory_space<vmem>>, vector<8x128xf32>
    tpu.vector_store %arg16[%c0_120, %c128], %366 {strides = array<i32>} : memref<8x256xf32, #tpu.memory_space<vmem>>, vector<8x128xf32>,
    %c0_121 = arith.constant 0 : index
    %c0_122 = arith.constant 0 : index
    %388 = vector.load %arg16[%c0_121, %c0_122] : memref<8x256xf32, #tpu.memory_space<vmem>>, vector<8x256xf32>
    %cst_123 = arith.constant dense<0.000000e+00> : vector<8x512xf32>
    %389 = tpu.matmul %388, %372, %cst_123 {dimension_numbers = #tpu.dot_dimension_numbers<[1], [0], [0], [1], [0, 0, 1, 1], [], []>} : vector<8x256xf32>, vector<256x512xf32>, vector<8x512xf32> -> vector<8x512xf32>
    %390 = arith.addf %371, %389 : vector<8x512xf32>
    %391 = vector.extract_strided_slice %390 {offsets = [0, 0], sizes = [8, 128], strides = [1, 1]} : vector<8x512xf32> to vector<8x128xf32>
    %392 = arith.negf %391 : vector<8x128xf32>
    %393 = math.exp %392 : vector<8x128xf32>
    %cst_124 = arith.constant 1.000000e+00 : f32
    %394 = vector.broadcast %cst_124 : f32 to vector<8x128xf32>
    %395 = arith.addf %394, %393 : vector<8x128xf32>
    %396 = arith.divf %394, %395 : vector<8x128xf32>
    %397 = vector.extract_strided_slice %390 {offsets = [0, 128], sizes = [8, 128], strides = [1, 1]} : vector<8x512xf32> to vector<8x128xf32>
    %398 = arith.negf %397 : vector<8x128xf32>
    %399 = math.exp %398 : vector<8x128xf32>
    %cst_125 = arith.constant 1.000000e+00 : f32
    %400 = vector.broadcast %cst_125 : f32 to vector<8x128xf32>
    %401 = arith.addf %400, %399 : vector<8x128xf32>
    %402 = arith.divf %400, %401 : vector<8x128xf32>
    %403 = vector.extract_strided_slice %390 {offsets = [0, 256], sizes = [8, 128], strides = [1, 1]} : vector<8x512xf32> to vector<8x128xf32>
    %404 = math.tanh %403 : vector<8x128xf32>
    %405 = vector.extract_strided_slice %390 {offsets = [0, 384], sizes = [8, 128], strides = [1, 1]} : vector<8x512xf32> to vector<8x128xf32>
    %406 = arith.negf %405 : vector<8x128xf32>
    %407 = math.exp %406 : vector<8x128xf32>
    %cst_126 = arith.constant 1.000000e+00 : f32
    %408 = vector.broadcast %cst_126 : f32 to vector<8x128xf32>
    %409 = arith.addf %408, %407 : vector<8x128xf32>
    %410 = arith.divf %408, %409 : vector<8x128xf32>
    %411 = arith.mulf %402, %374 : vector<8x128xf32>
    %412 = arith.mulf %396, %404 : vector<8x128xf32>
    %413 = arith.addf %411, %412 : vector<8x128xf32>
    %414 = math.tanh %413 : vector<8x128xf32>
    %415 = arith.mulf %410, %414 : vector<8x128xf32>
    %416 = arith.addf %415, %366 : vector<8x128xf32>
    %c1_i32_127 = arith.constant 1 : i32
    %cst_128 = arith.constant dense<0.000000e+00> : vector<8x8xf32>
    %417 = tpu.matmul %416, %373, %cst_128 {dimension_numbers = #tpu.dot_dimension_numbers<[1], [0], [0], [1], [0, 0, 1, 1], [], []>} : vector<8x128xf32>, vector<128x8xf32>, vector<8x8xf32> -> vector<8x8xf32>
    %cst_129 = arith.constant dense<0xFF800000> : vector<8xf32>
    %418 = vector.multi_reduction <maximumf>, %417, %cst_129 [1] : vector<8x8xf32> to vector<8xf32>
    %419 = vector.shape_cast %418 : vector<8xf32> to vector<8x1xf32>
    %420 = vector.broadcast %419 : vector<8x1xf32> to vector<8x8xf32>
    %421 = arith.subf %417, %420 : vector<8x8xf32>
    %422 = math.exp %421 : vector<8x8xf32>
    %cst_130 = arith.constant dense<0.000000e+00> : vector<8xf32>
    %423 = vector.multi_reduction <add>, %422, %cst_130 [1] : vector<8x8xf32> to vector<8xf32>
    %424 = vector.shape_cast %423 : vector<8xf32> to vector<8x1xf32>
    %425 = vector.broadcast %424 : vector<8x1xf32> to vector<8x8xf32>
    %426 = arith.divf %422, %425 : vector<8x8xf32>
    %cst_131 = arith.constant dense<0.000000e+00> : vector<8x128xf32>
    %427 = tpu.matmul %426, %361, %cst_131 {dimension_numbers = #tpu.dot_dimension_numbers<[1], [0], [0], [1], [0, 0, 1, 1], [], []>} : vector<8x8xf32>, vector<8x128xf32>, vector<8x128xf32> -> vector<8x128xf32>
    %c0_132 = arith.constant 0 : index
    %c0_133 = arith.constant 0 : index
    %428 = vector.load %arg16[%c0_132, %c0_133] : memref<8x256xf32, #tpu.memory_space<vmem>>, vector<8x128xf32>
    tpu.vector_store %arg16[%c0_132, %c0_133], %427 {strides = array<i32>} : memref<8x256xf32, #tpu.memory_space<vmem>>, vector<8x128xf32>,
    %c0_134 = arith.constant 0 : index
    %c128_135 = arith.constant 128 : index
    %429 = vector.load %arg16[%c0_134, %c128_135] : memref<8x256xf32, #tpu.memory_space<vmem>>, vector<8x128xf32>
    tpu.vector_store %arg16[%c0_134, %c128_135], %416 {strides = array<i32>} : memref<8x256xf32, #tpu.memory_space<vmem>>, vector<8x128xf32>,
    %c0_136 = arith.constant 0 : index
    %c0_137 = arith.constant 0 : index
    %430 = vector.load %arg16[%c0_136, %c0_137] : memref<8x256xf32, #tpu.memory_space<vmem>>, vector<8x256xf32>
    %cst_138 = arith.constant dense<0.000000e+00> : vector<8x512xf32>
    %431 = tpu.matmul %430, %372, %cst_138 {dimension_numbers = #tpu.dot_dimension_numbers<[1], [0], [0], [1], [0, 0, 1, 1], [], []>} : vector<8x256xf32>, vector<256x512xf32>, vector<8x512xf32> -> vector<8x512xf32>
    %432 = arith.addf %371, %431 : vector<8x512xf32>
    %433 = vector.extract_strided_slice %432 {offsets = [0, 0], sizes = [8, 128], strides = [1, 1]} : vector<8x512xf32> to vector<8x128xf32>
    %434 = arith.negf %433 : vector<8x128xf32>
    %435 = math.exp %434 : vector<8x128xf32>
    %cst_139 = arith.constant 1.000000e+00 : f32
    %436 = vector.broadcast %cst_139 : f32 to vector<8x128xf32>
    %437 = arith.addf %436, %435 : vector<8x128xf32>
    %438 = arith.divf %436, %437 : vector<8x128xf32>
    %439 = vector.extract_strided_slice %432 {offsets = [0, 128], sizes = [8, 128], strides = [1, 1]} : vector<8x512xf32> to vector<8x128xf32>
    %440 = arith.negf %439 : vector<8x128xf32>
    %441 = math.exp %440 : vector<8x128xf32>
    %cst_140 = arith.constant 1.000000e+00 : f32
    %442 = vector.broadcast %cst_140 : f32 to vector<8x128xf32>
    %443 = arith.addf %442, %441 : vector<8x128xf32>
    %444 = arith.divf %442, %443 : vector<8x128xf32>
    %445 = vector.extract_strided_slice %432 {offsets = [0, 256], sizes = [8, 128], strides = [1, 1]} : vector<8x512xf32> to vector<8x128xf32>
    %446 = math.tanh %445 : vector<8x128xf32>
    %447 = vector.extract_strided_slice %432 {offsets = [0, 384], sizes = [8, 128], strides = [1, 1]} : vector<8x512xf32> to vector<8x128xf32>
    %448 = arith.negf %447 : vector<8x128xf32>
    %449 = math.exp %448 : vector<8x128xf32>
    %cst_141 = arith.constant 1.000000e+00 : f32
    %450 = vector.broadcast %cst_141 : f32 to vector<8x128xf32>
    %451 = arith.addf %450, %449 : vector<8x128xf32>
    %452 = arith.divf %450, %451 : vector<8x128xf32>
    %453 = arith.mulf %444, %413 : vector<8x128xf32>
    %454 = arith.mulf %438, %446 : vector<8x128xf32>
    %455 = arith.addf %453, %454 : vector<8x128xf32>
    %456 = math.tanh %455 : vector<8x128xf32>
    %457 = arith.mulf %452, %456 : vector<8x128xf32>
    %458 = arith.addf %457, %366 : vector<8x128xf32>
    %c2_i32_142 = arith.constant 2 : i32
    %cst_143 = arith.constant dense<0.000000e+00> : vector<8x8xf32>
    %459 = tpu.matmul %458, %373, %cst_143 {dimension_numbers = #tpu.dot_dimension_numbers<[1], [0], [0], [1], [0, 0, 1, 1], [], []>} : vector<8x128xf32>, vector<128x8xf32>, vector<8x8xf32> -> vector<8x8xf32>
    %cst_144 = arith.constant dense<0xFF800000> : vector<8xf32>
    %460 = vector.multi_reduction <maximumf>, %459, %cst_144 [1] : vector<8x8xf32> to vector<8xf32>
    %461 = vector.shape_cast %460 : vector<8xf32> to vector<8x1xf32>
    %462 = vector.broadcast %461 : vector<8x1xf32> to vector<8x8xf32>
    %463 = arith.subf %459, %462 : vector<8x8xf32>
    %464 = math.exp %463 : vector<8x8xf32>
    %cst_145 = arith.constant dense<0.000000e+00> : vector<8xf32>
    %465 = vector.multi_reduction <add>, %464, %cst_145 [1] : vector<8x8xf32> to vector<8xf32>
    %466 = vector.shape_cast %465 : vector<8xf32> to vector<8x1xf32>
    %467 = vector.broadcast %466 : vector<8x1xf32> to vector<8x8xf32>
    %468 = arith.divf %464, %467 : vector<8x8xf32>
    %cst_146 = arith.constant dense<0.000000e+00> : vector<8x128xf32>
    %469 = tpu.matmul %468, %361, %cst_146 {dimension_numbers = #tpu.dot_dimension_numbers<[1], [0], [0], [1], [0, 0, 1, 1], [], []>} : vector<8x8xf32>, vector<8x128xf32>, vector<8x128xf32> -> vector<8x128xf32>
    %c0_147 = arith.constant 0 : index
    %c0_148 = arith.constant 0 : index
    %470 = vector.load %arg16[%c0_147, %c0_148] : memref<8x256xf32, #tpu.memory_space<vmem>>, vector<8x128xf32>
    tpu.vector_store %arg16[%c0_147, %c0_148], %469 {strides = array<i32>} : memref<8x256xf32, #tpu.memory_space<vmem>>, vector<8x128xf32>,
    %c0_149 = arith.constant 0 : index
    %c128_150 = arith.constant 128 : index
    %471 = vector.load %arg16[%c0_149, %c128_150] : memref<8x256xf32, #tpu.memory_space<vmem>>, vector<8x128xf32>
    tpu.vector_store %arg16[%c0_149, %c128_150], %458 {strides = array<i32>} : memref<8x256xf32, #tpu.memory_space<vmem>>, vector<8x128xf32>,
    %c0_151 = arith.constant 0 : index
    %c0_152 = arith.constant 0 : index
    %472 = vector.load %arg16[%c0_151, %c0_152] : memref<8x256xf32, #tpu.memory_space<vmem>>, vector<8x256xf32>
    %cst_153 = arith.constant dense<0.000000e+00> : vector<8x512xf32>
    %473 = tpu.matmul %472, %372, %cst_153 {dimension_numbers = #tpu.dot_dimension_numbers<[1], [0], [0], [1], [0, 0, 1, 1], [], []>} : vector<8x256xf32>, vector<256x512xf32>, vector<8x512xf32> -> vector<8x512xf32>
    %474 = arith.addf %371, %473 : vector<8x512xf32>
    %475 = vector.extract_strided_slice %474 {offsets = [0, 0], sizes = [8, 128], strides = [1, 1]} : vector<8x512xf32> to vector<8x128xf32>
    %476 = arith.negf %475 : vector<8x128xf32>
    %477 = math.exp %476 : vector<8x128xf32>
    %cst_154 = arith.constant 1.000000e+00 : f32
    %478 = vector.broadcast %cst_154 : f32 to vector<8x128xf32>
    %479 = arith.addf %478, %477 : vector<8x128xf32>
    %480 = arith.divf %478, %479 : vector<8x128xf32>
    %481 = vector.extract_strided_slice %474 {offsets = [0, 128], sizes = [8, 128], strides = [1, 1]} : vector<8x512xf32> to vector<8x128xf32>
    %482 = arith.negf %481 : vector<8x128xf32>
    %483 = math.exp %482 : vector<8x128xf32>
    %cst_155 = arith.constant 1.000000e+00 : f32
    %484 = vector.broadcast %cst_155 : f32 to vector<8x128xf32>
    %485 = arith.addf %484, %483 : vector<8x128xf32>
    %486 = arith.divf %484, %485 : vector<8x128xf32>
    %487 = vector.extract_strided_slice %474 {offsets = [0, 256], sizes = [8, 128], strides = [1, 1]} : vector<8x512xf32> to vector<8x128xf32>
    %488 = math.tanh %487 : vector<8x128xf32>
    %489 = vector.extract_strided_slice %474 {offsets = [0, 384], sizes = [8, 128], strides = [1, 1]} : vector<8x512xf32> to vector<8x128xf32>
    %490 = arith.negf %489 : vector<8x128xf32>
    %491 = math.exp %490 : vector<8x128xf32>
    %cst_156 = arith.constant 1.000000e+00 : f32
    %492 = vector.broadcast %cst_156 : f32 to vector<8x128xf32>
    %493 = arith.addf %492, %491 : vector<8x128xf32>
    %494 = arith.divf %492, %493 : vector<8x128xf32>
    %495 = arith.mulf %486, %455 : vector<8x128xf32>
    %496 = arith.mulf %480, %488 : vector<8x128xf32>
    %497 = arith.addf %495, %496 : vector<8x128xf32>
    %498 = math.tanh %497 : vector<8x128xf32>
    %499 = arith.mulf %494, %498 : vector<8x128xf32>
    %500 = arith.addf %499, %366 : vector<8x128xf32>
    %c3_i32_157 = arith.constant 3 : i32
    %cst_158 = arith.constant dense<0.000000e+00> : vector<8x8xf32>
    %501 = tpu.matmul %500, %373, %cst_158 {dimension_numbers = #tpu.dot_dimension_numbers<[1], [0], [0], [1], [0, 0, 1, 1], [], []>} : vector<8x128xf32>, vector<128x8xf32>, vector<8x8xf32> -> vector<8x8xf32>
    %cst_159 = arith.constant dense<0xFF800000> : vector<8xf32>
    %502 = vector.multi_reduction <maximumf>, %501, %cst_159 [1] : vector<8x8xf32> to vector<8xf32>
    %503 = vector.shape_cast %502 : vector<8xf32> to vector<8x1xf32>
    %504 = vector.broadcast %503 : vector<8x1xf32> to vector<8x8xf32>
    %505 = arith.subf %501, %504 : vector<8x8xf32>
    %506 = math.exp %505 : vector<8x8xf32>
    %cst_160 = arith.constant dense<0.000000e+00> : vector<8xf32>
    %507 = vector.multi_reduction <add>, %506, %cst_160 [1] : vector<8x8xf32> to vector<8xf32>
    %508 = vector.shape_cast %507 : vector<8xf32> to vector<8x1xf32>
    %509 = vector.broadcast %508 : vector<8x1xf32> to vector<8x8xf32>
    %510 = arith.divf %506, %509 : vector<8x8xf32>
    %cst_161 = arith.constant dense<0.000000e+00> : vector<8x128xf32>
    %511 = tpu.matmul %510, %361, %cst_161 {dimension_numbers = #tpu.dot_dimension_numbers<[1], [0], [0], [1], [0, 0, 1, 1], [], []>} : vector<8x8xf32>, vector<8x128xf32>, vector<8x128xf32> -> vector<8x128xf32>
    %c0_162 = arith.constant 0 : index
    %c0_163 = arith.constant 0 : index
    %512 = vector.load %arg16[%c0_162, %c0_163] : memref<8x256xf32, #tpu.memory_space<vmem>>, vector<8x128xf32>
    tpu.vector_store %arg16[%c0_162, %c0_163], %511 {strides = array<i32>} : memref<8x256xf32, #tpu.memory_space<vmem>>, vector<8x128xf32>,
    %c0_164 = arith.constant 0 : index
    %c128_165 = arith.constant 128 : index
    %513 = vector.load %arg16[%c0_164, %c128_165] : memref<8x256xf32, #tpu.memory_space<vmem>>, vector<8x128xf32>
    tpu.vector_store %arg16[%c0_164, %c128_165], %500 {strides = array<i32>} : memref<8x256xf32, #tpu.memory_space<vmem>>, vector<8x128xf32>,
    %c0_166 = arith.constant 0 : index
    %c0_167 = arith.constant 0 : index
    %514 = vector.load %arg16[%c0_166, %c0_167] : memref<8x256xf32, #tpu.memory_space<vmem>>, vector<8x256xf32>
    %cst_168 = arith.constant dense<0.000000e+00> : vector<8x512xf32>
    %515 = tpu.matmul %514, %372, %cst_168 {dimension_numbers = #tpu.dot_dimension_numbers<[1], [0], [0], [1], [0, 0, 1, 1], [], []>} : vector<8x256xf32>, vector<256x512xf32>, vector<8x512xf32> -> vector<8x512xf32>
    %516 = arith.addf %371, %515 : vector<8x512xf32>
    %517 = vector.extract_strided_slice %516 {offsets = [0, 0], sizes = [8, 128], strides = [1, 1]} : vector<8x512xf32> to vector<8x128xf32>
    %518 = arith.negf %517 : vector<8x128xf32>
    %519 = math.exp %518 : vector<8x128xf32>
    %cst_169 = arith.constant 1.000000e+00 : f32
    %520 = vector.broadcast %cst_169 : f32 to vector<8x128xf32>
    %521 = arith.addf %520, %519 : vector<8x128xf32>
    %522 = arith.divf %520, %521 : vector<8x128xf32>
    %523 = vector.extract_strided_slice %516 {offsets = [0, 128], sizes = [8, 128], strides = [1, 1]} : vector<8x512xf32> to vector<8x128xf32>
    %524 = arith.negf %523 : vector<8x128xf32>
    %525 = math.exp %524 : vector<8x128xf32>
    %cst_170 = arith.constant 1.000000e+00 : f32
    %526 = vector.broadcast %cst_170 : f32 to vector<8x128xf32>
    %527 = arith.addf %526, %525 : vector<8x128xf32>
    %528 = arith.divf %526, %527 : vector<8x128xf32>
    %529 = vector.extract_strided_slice %516 {offsets = [0, 256], sizes = [8, 128], strides = [1, 1]} : vector<8x512xf32> to vector<8x128xf32>
    %530 = math.tanh %529 : vector<8x128xf32>
    %531 = vector.extract_strided_slice %516 {offsets = [0, 384], sizes = [8, 128], strides = [1, 1]} : vector<8x512xf32> to vector<8x128xf32>
    %532 = arith.negf %531 : vector<8x128xf32>
    %533 = math.exp %532 : vector<8x128xf32>
    %cst_171 = arith.constant 1.000000e+00 : f32
    %534 = vector.broadcast %cst_171 : f32 to vector<8x128xf32>
    %535 = arith.addf %534, %533 : vector<8x128xf32>
    %536 = arith.divf %534, %535 : vector<8x128xf32>
    %537 = arith.mulf %528, %497 : vector<8x128xf32>
    %538 = arith.mulf %522, %530 : vector<8x128xf32>
    %539 = arith.addf %537, %538 : vector<8x128xf32>
    %540 = math.tanh %539 : vector<8x128xf32>
    %541 = arith.mulf %536, %540 : vector<8x128xf32>
    %542 = arith.addf %541, %366 : vector<8x128xf32>
    %c4_i32_172 = arith.constant 4 : i32
    %cst_173 = arith.constant dense<0.000000e+00> : vector<8x8xf32>
    %543 = tpu.matmul %542, %373, %cst_173 {dimension_numbers = #tpu.dot_dimension_numbers<[1], [0], [0], [1], [0, 0, 1, 1], [], []>} : vector<8x128xf32>, vector<128x8xf32>, vector<8x8xf32> -> vector<8x8xf32>
    %cst_174 = arith.constant dense<0xFF800000> : vector<8xf32>
    %544 = vector.multi_reduction <maximumf>, %543, %cst_174 [1] : vector<8x8xf32> to vector<8xf32>
    %545 = vector.shape_cast %544 : vector<8xf32> to vector<8x1xf32>
    %546 = vector.broadcast %545 : vector<8x1xf32> to vector<8x8xf32>
    %547 = arith.subf %543, %546 : vector<8x8xf32>
    %548 = math.exp %547 : vector<8x8xf32>
    %cst_175 = arith.constant dense<0.000000e+00> : vector<8xf32>
    %549 = vector.multi_reduction <add>, %548, %cst_175 [1] : vector<8x8xf32> to vector<8xf32>
    %550 = vector.shape_cast %549 : vector<8xf32> to vector<8x1xf32>
    %551 = vector.broadcast %550 : vector<8x1xf32> to vector<8x8xf32>
    %552 = arith.divf %548, %551 : vector<8x8xf32>
    %cst_176 = arith.constant dense<0.000000e+00> : vector<8x128xf32>
    %553 = tpu.matmul %552, %361, %cst_176 {dimension_numbers = #tpu.dot_dimension_numbers<[1], [0], [0], [1], [0, 0, 1, 1], [], []>} : vector<8x8xf32>, vector<8x128xf32>, vector<8x128xf32> -> vector<8x128xf32>
    %c0_177 = arith.constant 0 : index
    %c0_178 = arith.constant 0 : index
    %554 = vector.load %arg16[%c0_177, %c0_178] : memref<8x256xf32, #tpu.memory_space<vmem>>, vector<8x128xf32>
    tpu.vector_store %arg16[%c0_177, %c0_178], %553 {strides = array<i32>} : memref<8x256xf32, #tpu.memory_space<vmem>>, vector<8x128xf32>,
    %c0_179 = arith.constant 0 : index
    %c128_180 = arith.constant 128 : index
    %555 = vector.load %arg16[%c0_179, %c128_180] : memref<8x256xf32, #tpu.memory_space<vmem>>, vector<8x128xf32>
    tpu.vector_store %arg16[%c0_179, %c128_180], %542 {strides = array<i32>} : memref<8x256xf32, #tpu.memory_space<vmem>>, vector<8x128xf32>,
    %c0_181 = arith.constant 0 : index
    %c0_182 = arith.constant 0 : index
    %556 = vector.load %arg16[%c0_181, %c0_182] : memref<8x256xf32, #tpu.memory_space<vmem>>, vector<8x256xf32>
    %cst_183 = arith.constant dense<0.000000e+00> : vector<8x512xf32>
    %557 = tpu.matmul %556, %372, %cst_183 {dimension_numbers = #tpu.dot_dimension_numbers<[1], [0], [0], [1], [0, 0, 1, 1], [], []>} : vector<8x256xf32>, vector<256x512xf32>, vector<8x512xf32> -> vector<8x512xf32>
    %558 = arith.addf %371, %557 : vector<8x512xf32>
    %559 = vector.extract_strided_slice %558 {offsets = [0, 0], sizes = [8, 128], strides = [1, 1]} : vector<8x512xf32> to vector<8x128xf32>
    %560 = arith.negf %559 : vector<8x128xf32>
    %561 = math.exp %560 : vector<8x128xf32>
    %cst_184 = arith.constant 1.000000e+00 : f32
    %562 = vector.broadcast %cst_184 : f32 to vector<8x128xf32>
    %563 = arith.addf %562, %561 : vector<8x128xf32>
    %564 = arith.divf %562, %563 : vector<8x128xf32>
    %565 = vector.extract_strided_slice %558 {offsets = [0, 128], sizes = [8, 128], strides = [1, 1]} : vector<8x512xf32> to vector<8x128xf32>
    %566 = arith.negf %565 : vector<8x128xf32>
    %567 = math.exp %566 : vector<8x128xf32>
    %cst_185 = arith.constant 1.000000e+00 : f32
    %568 = vector.broadcast %cst_185 : f32 to vector<8x128xf32>
    %569 = arith.addf %568, %567 : vector<8x128xf32>
    %570 = arith.divf %568, %569 : vector<8x128xf32>
    %571 = vector.extract_strided_slice %558 {offsets = [0, 256], sizes = [8, 128], strides = [1, 1]} : vector<8x512xf32> to vector<8x128xf32>
    %572 = math.tanh %571 : vector<8x128xf32>
    %573 = vector.extract_strided_slice %558 {offsets = [0, 384], sizes = [8, 128], strides = [1, 1]} : vector<8x512xf32> to vector<8x128xf32>
    %574 = arith.negf %573 : vector<8x128xf32>
    %575 = math.exp %574 : vector<8x128xf32>
    %cst_186 = arith.constant 1.000000e+00 : f32
    %576 = vector.broadcast %cst_186 : f32 to vector<8x128xf32>
    %577 = arith.addf %576, %575 : vector<8x128xf32>
    %578 = arith.divf %576, %577 : vector<8x128xf32>
    %579 = arith.mulf %570, %539 : vector<8x128xf32>
    %580 = arith.mulf %564, %572 : vector<8x128xf32>
    %581 = arith.addf %579, %580 : vector<8x128xf32>
    %582 = math.tanh %581 : vector<8x128xf32>
    %583 = arith.mulf %578, %582 : vector<8x128xf32>
    %584 = arith.addf %583, %366 : vector<8x128xf32>
    %c5_i32_187 = arith.constant 5 : i32
    %cst_188 = arith.constant dense<0.000000e+00> : vector<8x8xf32>
    %585 = tpu.matmul %584, %373, %cst_188 {dimension_numbers = #tpu.dot_dimension_numbers<[1], [0], [0], [1], [0, 0, 1, 1], [], []>} : vector<8x128xf32>, vector<128x8xf32>, vector<8x8xf32> -> vector<8x8xf32>
    %cst_189 = arith.constant dense<0xFF800000> : vector<8xf32>
    %586 = vector.multi_reduction <maximumf>, %585, %cst_189 [1] : vector<8x8xf32> to vector<8xf32>
    %587 = vector.shape_cast %586 : vector<8xf32> to vector<8x1xf32>
    %588 = vector.broadcast %587 : vector<8x1xf32> to vector<8x8xf32>
    %589 = arith.subf %585, %588 : vector<8x8xf32>
    %590 = math.exp %589 : vector<8x8xf32>
    %cst_190 = arith.constant dense<0.000000e+00> : vector<8xf32>
    %591 = vector.multi_reduction <add>, %590, %cst_190 [1] : vector<8x8xf32> to vector<8xf32>
    %592 = vector.shape_cast %591 : vector<8xf32> to vector<8x1xf32>
    %593 = vector.broadcast %592 : vector<8x1xf32> to vector<8x8xf32>
    %594 = arith.divf %590, %593 : vector<8x8xf32>
    %cst_191 = arith.constant dense<0.000000e+00> : vector<8x128xf32>
    %595 = tpu.matmul %594, %361, %cst_191 {dimension_numbers = #tpu.dot_dimension_numbers<[1], [0], [0], [1], [0, 0, 1, 1], [], []>} : vector<8x8xf32>, vector<8x128xf32>, vector<8x128xf32> -> vector<8x128xf32>
    %c0_192 = arith.constant 0 : index
    %c0_193 = arith.constant 0 : index
    %596 = vector.load %arg16[%c0_192, %c0_193] : memref<8x256xf32, #tpu.memory_space<vmem>>, vector<8x128xf32>
    tpu.vector_store %arg16[%c0_192, %c0_193], %595 {strides = array<i32>} : memref<8x256xf32, #tpu.memory_space<vmem>>, vector<8x128xf32>,
    %c0_194 = arith.constant 0 : index
    %c128_195 = arith.constant 128 : index
    %597 = vector.load %arg16[%c0_194, %c128_195] : memref<8x256xf32, #tpu.memory_space<vmem>>, vector<8x128xf32>
    tpu.vector_store %arg16[%c0_194, %c128_195], %584 {strides = array<i32>} : memref<8x256xf32, #tpu.memory_space<vmem>>, vector<8x128xf32>,
    %c0_196 = arith.constant 0 : index
    %c0_197 = arith.constant 0 : index
    %598 = vector.load %arg16[%c0_196, %c0_197] : memref<8x256xf32, #tpu.memory_space<vmem>>, vector<8x256xf32>
    %cst_198 = arith.constant dense<0.000000e+00> : vector<8x512xf32>
    %599 = tpu.matmul %598, %372, %cst_198 {dimension_numbers = #tpu.dot_dimension_numbers<[1], [0], [0], [1], [0, 0, 1, 1], [], []>} : vector<8x256xf32>, vector<256x512xf32>, vector<8x512xf32> -> vector<8x512xf32>
    %600 = arith.addf %371, %599 : vector<8x512xf32>
    %601 = vector.extract_strided_slice %600 {offsets = [0, 0], sizes = [8, 128], strides = [1, 1]} : vector<8x512xf32> to vector<8x128xf32>
    %602 = arith.negf %601 : vector<8x128xf32>
    %603 = math.exp %602 : vector<8x128xf32>
    %cst_199 = arith.constant 1.000000e+00 : f32
    %604 = vector.broadcast %cst_199 : f32 to vector<8x128xf32>
    %605 = arith.addf %604, %603 : vector<8x128xf32>
    %606 = arith.divf %604, %605 : vector<8x128xf32>
    %607 = vector.extract_strided_slice %600 {offsets = [0, 128], sizes = [8, 128], strides = [1, 1]} : vector<8x512xf32> to vector<8x128xf32>
    %608 = arith.negf %607 : vector<8x128xf32>
    %609 = math.exp %608 : vector<8x128xf32>
    %cst_200 = arith.constant 1.000000e+00 : f32
    %610 = vector.broadcast %cst_200 : f32 to vector<8x128xf32>
    %611 = arith.addf %610, %609 : vector<8x128xf32>
    %612 = arith.divf %610, %611 : vector<8x128xf32>
    %613 = vector.extract_strided_slice %600 {offsets = [0, 256], sizes = [8, 128], strides = [1, 1]} : vector<8x512xf32> to vector<8x128xf32>
    %614 = math.tanh %613 : vector<8x128xf32>
    %615 = vector.extract_strided_slice %600 {offsets = [0, 384], sizes = [8, 128], strides = [1, 1]} : vector<8x512xf32> to vector<8x128xf32>
    %616 = arith.negf %615 : vector<8x128xf32>
    %617 = math.exp %616 : vector<8x128xf32>
    %cst_201 = arith.constant 1.000000e+00 : f32
    %618 = vector.broadcast %cst_201 : f32 to vector<8x128xf32>
    %619 = arith.addf %618, %617 : vector<8x128xf32>
    %620 = arith.divf %618, %619 : vector<8x128xf32>
    %621 = arith.mulf %612, %581 : vector<8x128xf32>
    %622 = arith.mulf %606, %614 : vector<8x128xf32>
    %623 = arith.addf %621, %622 : vector<8x128xf32>
    %624 = math.tanh %623 : vector<8x128xf32>
    %625 = arith.mulf %620, %624 : vector<8x128xf32>
    %626 = arith.addf %625, %366 : vector<8x128xf32>
    %c6_i32_202 = arith.constant 6 : i32
    %cst_203 = arith.constant dense<0.000000e+00> : vector<8x8xf32>
    %627 = tpu.matmul %626, %373, %cst_203 {dimension_numbers = #tpu.dot_dimension_numbers<[1], [0], [0], [1], [0, 0, 1, 1], [], []>} : vector<8x128xf32>, vector<128x8xf32>, vector<8x8xf32> -> vector<8x8xf32>
    %cst_204 = arith.constant dense<0xFF800000> : vector<8xf32>
    %628 = vector.multi_reduction <maximumf>, %627, %cst_204 [1] : vector<8x8xf32> to vector<8xf32>
    %629 = vector.shape_cast %628 : vector<8xf32> to vector<8x1xf32>
    %630 = vector.broadcast %629 : vector<8x1xf32> to vector<8x8xf32>
    %631 = arith.subf %627, %630 : vector<8x8xf32>
    %632 = math.exp %631 : vector<8x8xf32>
    %cst_205 = arith.constant dense<0.000000e+00> : vector<8xf32>
    %633 = vector.multi_reduction <add>, %632, %cst_205 [1] : vector<8x8xf32> to vector<8xf32>
    %634 = vector.shape_cast %633 : vector<8xf32> to vector<8x1xf32>
    %635 = vector.broadcast %634 : vector<8x1xf32> to vector<8x8xf32>
    %636 = arith.divf %632, %635 : vector<8x8xf32>
    %cst_206 = arith.constant dense<0.000000e+00> : vector<8x128xf32>
    %637 = tpu.matmul %636, %361, %cst_206 {dimension_numbers = #tpu.dot_dimension_numbers<[1], [0], [0], [1], [0, 0, 1, 1], [], []>} : vector<8x8xf32>, vector<8x128xf32>, vector<8x128xf32> -> vector<8x128xf32>
    %c0_207 = arith.constant 0 : index
    %c0_208 = arith.constant 0 : index
    %638 = vector.load %arg16[%c0_207, %c0_208] : memref<8x256xf32, #tpu.memory_space<vmem>>, vector<8x128xf32>
    tpu.vector_store %arg16[%c0_207, %c0_208], %637 {strides = array<i32>} : memref<8x256xf32, #tpu.memory_space<vmem>>, vector<8x128xf32>,
    %c0_209 = arith.constant 0 : index
    %c128_210 = arith.constant 128 : index
    %639 = vector.load %arg16[%c0_209, %c128_210] : memref<8x256xf32, #tpu.memory_space<vmem>>, vector<8x128xf32>
    tpu.vector_store %arg16[%c0_209, %c128_210], %626 {strides = array<i32>} : memref<8x256xf32, #tpu.memory_space<vmem>>, vector<8x128xf32>,
    %c0_211 = arith.constant 0 : index
    %c0_212 = arith.constant 0 : index
    %640 = vector.load %arg16[%c0_211, %c0_212] : memref<8x256xf32, #tpu.memory_space<vmem>>, vector<8x256xf32>
    %cst_213 = arith.constant dense<0.000000e+00> : vector<8x512xf32>
    %641 = tpu.matmul %640, %372, %cst_213 {dimension_numbers = #tpu.dot_dimension_numbers<[1], [0], [0], [1], [0, 0, 1, 1], [], []>} : vector<8x256xf32>, vector<256x512xf32>, vector<8x512xf32> -> vector<8x512xf32>
    %642 = arith.addf %371, %641 : vector<8x512xf32>
    %643 = vector.extract_strided_slice %642 {offsets = [0, 0], sizes = [8, 128], strides = [1, 1]} : vector<8x512xf32> to vector<8x128xf32>
    %644 = arith.negf %643 : vector<8x128xf32>
    %645 = math.exp %644 : vector<8x128xf32>
    %cst_214 = arith.constant 1.000000e+00 : f32
    %646 = vector.broadcast %cst_214 : f32 to vector<8x128xf32>
    %647 = arith.addf %646, %645 : vector<8x128xf32>
    %648 = arith.divf %646, %647 : vector<8x128xf32>
    %649 = vector.extract_strided_slice %642 {offsets = [0, 128], sizes = [8, 128], strides = [1, 1]} : vector<8x512xf32> to vector<8x128xf32>
    %650 = arith.negf %649 : vector<8x128xf32>
    %651 = math.exp %650 : vector<8x128xf32>
    %cst_215 = arith.constant 1.000000e+00 : f32
    %652 = vector.broadcast %cst_215 : f32 to vector<8x128xf32>
    %653 = arith.addf %652, %651 : vector<8x128xf32>
    %654 = arith.divf %652, %653 : vector<8x128xf32>
    %655 = vector.extract_strided_slice %642 {offsets = [0, 256], sizes = [8, 128], strides = [1, 1]} : vector<8x512xf32> to vector<8x128xf32>
    %656 = math.tanh %655 : vector<8x128xf32>
    %657 = vector.extract_strided_slice %642 {offsets = [0, 384], sizes = [8, 128], strides = [1, 1]} : vector<8x512xf32> to vector<8x128xf32>
    %658 = arith.negf %657 : vector<8x128xf32>
    %659 = math.exp %658 : vector<8x128xf32>
    %cst_216 = arith.constant 1.000000e+00 : f32
    %660 = vector.broadcast %cst_216 : f32 to vector<8x128xf32>
    %661 = arith.addf %660, %659 : vector<8x128xf32>
    %662 = arith.divf %660, %661 : vector<8x128xf32>
    %663 = arith.mulf %654, %623 : vector<8x128xf32>
    %664 = arith.mulf %648, %656 : vector<8x128xf32>
    %665 = arith.addf %663, %664 : vector<8x128xf32>
    %666 = math.tanh %665 : vector<8x128xf32>
    %667 = arith.mulf %662, %666 : vector<8x128xf32>
    %668 = arith.addf %667, %366 : vector<8x128xf32>
    %c7_i32_217 = arith.constant 7 : i32
    %cst_218 = arith.constant dense<0.000000e+00> : vector<8x8xf32>
    %669 = tpu.matmul %668, %373, %cst_218 {dimension_numbers = #tpu.dot_dimension_numbers<[1], [0], [0], [1], [0, 0, 1, 1], [], []>} : vector<8x128xf32>, vector<128x8xf32>, vector<8x8xf32> -> vector<8x8xf32>
    %cst_219 = arith.constant dense<0xFF800000> : vector<8xf32>
    %670 = vector.multi_reduction <maximumf>, %669, %cst_219 [1] : vector<8x8xf32> to vector<8xf32>
    %671 = vector.shape_cast %670 : vector<8xf32> to vector<8x1xf32>
    %672 = vector.broadcast %671 : vector<8x1xf32> to vector<8x8xf32>
    %673 = arith.subf %669, %672 : vector<8x8xf32>
    %674 = math.exp %673 : vector<8x8xf32>
    %cst_220 = arith.constant dense<0.000000e+00> : vector<8xf32>
    %675 = vector.multi_reduction <add>, %674, %cst_220 [1] : vector<8x8xf32> to vector<8xf32>
    %676 = vector.shape_cast %675 : vector<8xf32> to vector<8x1xf32>
    %677 = vector.broadcast %676 : vector<8x1xf32> to vector<8x8xf32>
    %678 = arith.divf %674, %677 : vector<8x8xf32>
    %cst_221 = arith.constant dense<0.000000e+00> : vector<8x128xf32>
    %679 = tpu.matmul %678, %361, %cst_221 {dimension_numbers = #tpu.dot_dimension_numbers<[1], [0], [0], [1], [0, 0, 1, 1], [], []>} : vector<8x8xf32>, vector<8x128xf32>, vector<8x128xf32> -> vector<8x128xf32>
    %c0_222 = arith.constant 0 : index
    %c0_223 = arith.constant 0 : index
    %680 = vector.load %arg16[%c0_222, %c0_223] : memref<8x256xf32, #tpu.memory_space<vmem>>, vector<8x128xf32>
    tpu.vector_store %arg16[%c0_222, %c0_223], %679 {strides = array<i32>} : memref<8x256xf32, #tpu.memory_space<vmem>>, vector<8x128xf32>,
    %c0_224 = arith.constant 0 : index
    %c128_225 = arith.constant 128 : index
    %681 = vector.load %arg16[%c0_224, %c128_225] : memref<8x256xf32, #tpu.memory_space<vmem>>, vector<8x128xf32>
    tpu.vector_store %arg16[%c0_224, %c128_225], %668 {strides = array<i32>} : memref<8x256xf32, #tpu.memory_space<vmem>>, vector<8x128xf32>,
    %c0_226 = arith.constant 0 : index
    %c0_227 = arith.constant 0 : index
    %682 = vector.load %arg16[%c0_226, %c0_227] : memref<8x256xf32, #tpu.memory_space<vmem>>, vector<8x256xf32>
    %cst_228 = arith.constant dense<0.000000e+00> : vector<8x512xf32>
    %683 = tpu.matmul %682, %372, %cst_228 {dimension_numbers = #tpu.dot_dimension_numbers<[1], [0], [0], [1], [0, 0, 1, 1], [], []>} : vector<8x256xf32>, vector<256x512xf32>, vector<8x512xf32> -> vector<8x512xf32>
    %684 = arith.addf %371, %683 : vector<8x512xf32>
    %685 = vector.extract_strided_slice %684 {offsets = [0, 0], sizes = [8, 128], strides = [1, 1]} : vector<8x512xf32> to vector<8x128xf32>
    %686 = arith.negf %685 : vector<8x128xf32>
    %687 = math.exp %686 : vector<8x128xf32>
    %cst_229 = arith.constant 1.000000e+00 : f32
    %688 = vector.broadcast %cst_229 : f32 to vector<8x128xf32>
    %689 = arith.addf %688, %687 : vector<8x128xf32>
    %690 = arith.divf %688, %689 : vector<8x128xf32>
    %691 = vector.extract_strided_slice %684 {offsets = [0, 128], sizes = [8, 128], strides = [1, 1]} : vector<8x512xf32> to vector<8x128xf32>
    %692 = arith.negf %691 : vector<8x128xf32>
    %693 = math.exp %692 : vector<8x128xf32>
    %cst_230 = arith.constant 1.000000e+00 : f32
    %694 = vector.broadcast %cst_230 : f32 to vector<8x128xf32>
    %695 = arith.addf %694, %693 : vector<8x128xf32>
    %696 = arith.divf %694, %695 : vector<8x128xf32>
    %697 = vector.extract_strided_slice %684 {offsets = [0, 256], sizes = [8, 128], strides = [1, 1]} : vector<8x512xf32> to vector<8x128xf32>
    %698 = math.tanh %697 : vector<8x128xf32>
    %699 = vector.extract_strided_slice %684 {offsets = [0, 384], sizes = [8, 128], strides = [1, 1]} : vector<8x512xf32> to vector<8x128xf32>
    %700 = arith.negf %699 : vector<8x128xf32>
    %701 = math.exp %700 : vector<8x128xf32>
    %cst_231 = arith.constant 1.000000e+00 : f32
    %702 = vector.broadcast %cst_231 : f32 to vector<8x128xf32>
    %703 = arith.addf %702, %701 : vector<8x128xf32>
    %704 = arith.divf %702, %703 : vector<8x128xf32>
    %705 = arith.mulf %696, %665 : vector<8x128xf32>
    %706 = arith.mulf %690, %698 : vector<8x128xf32>
    %707 = arith.addf %705, %706 : vector<8x128xf32>
    %708 = math.tanh %707 : vector<8x128xf32>
    %709 = arith.mulf %704, %708 : vector<8x128xf32>
    %710 = arith.addf %709, %366 : vector<8x128xf32>
    %c0_232 = arith.constant 0 : index
    %c0_233 = arith.constant 0 : index
    %c0_234 = arith.constant 0 : index
    %711 = vector.load %arg11[%c0_232, %c0_233, %c0_234] : memref<1x8x128xf32, #tpu.memory_space<vmem>>, vector<1x8x128xf32>
    %712 = vector.shape_cast %711 : vector<1x8x128xf32> to vector<8x128xf32>
    %713 = vector.shape_cast %710 : vector<8x128xf32> to vector<1x8x128xf32>
    tpu.vector_store %arg11[%c0_232, %c0_233, %c0_234], %713 {strides = array<i32>} : memref<1x8x128xf32, #tpu.memory_space<vmem>>, vector<1x8x128xf32>,
    return
  }
  func.func @transform_0(%arg0: i32) -> (i32, i32, i32) {
    %c0_i32 = arith.constant 0 : i32
    %c0_i32_0 = arith.constant 0 : i32
    %c0_i32_1 = arith.constant 0 : i32
    return %arg0, %c0_i32, %c0_i32_0 : i32, i32, i32
  }
  func.func @transform_1(%arg0: i32) -> (i32, i32, i32) {
    %c0_i32 = arith.constant 0 : i32
    %c0_i32_0 = arith.constant 0 : i32
    %c0_i32_1 = arith.constant 0 : i32
    return %arg0, %c0_i32, %c0_i32_0 : i32, i32, i32
  }
  func.func @transform_2(%arg0: i32) -> (i32, i32) {
    %c0_i32 = arith.constant 0 : i32
    %c0_i32_0 = arith.constant 0 : i32
    %c0_i32_1 = arith.constant 0 : i32
    return %c0_i32, %c0_i32_0 : i32, i32
  }
  func.func @transform_3(%arg0: i32) -> (i32, i32) {
    %c0_i32 = arith.constant 0 : i32
    %c0_i32_0 = arith.constant 0 : i32
    %c0_i32_1 = arith.constant 0 : i32
    return %c0_i32, %c0_i32_0 : i32, i32
  }
  func.func @transform_4(%arg0: i32) -> (i32, i32) {
    %c0_i32 = arith.constant 0 : i32
    %c0_i32_0 = arith.constant 0 : i32
    %c0_i32_1 = arith.constant 0 : i32
    return %c0_i32, %c0_i32_0 : i32, i32
  }
  func.func @transform_5(%arg0: i32) -> (i32, i32) {
    %c0_i32 = arith.constant 0 : i32
    %c0_i32_0 = arith.constant 0 : i32
    %c0_i32_1 = arith.constant 0 : i32
    return %c0_i32, %c0_i32_0 : i32, i32
  }
  func.func @transform_6(%arg0: i32) -> (i32, i32) {
    %c0_i32 = arith.constant 0 : i32
    %c0_i32_0 = arith.constant 0 : i32
    %c0_i32_1 = arith.constant 0 : i32
    return %c0_i32, %c0_i32_0 : i32, i32
  }
  func.func @transform_7(%arg0: i32) -> (i32, i32) {
    %c0_i32 = arith.constant 0 : i32
    %c0_i32_0 = arith.constant 0 : i32
    %c0_i32_1 = arith.constant 0 : i32
    return %c0_i32, %c0_i32_0 : i32, i32
  }
  func.func @transform_8(%arg0: i32) -> (i32, i32) {
    %c0_i32 = arith.constant 0 : i32
    %c0_i32_0 = arith.constant 0 : i32
    %c0_i32_1 = arith.constant 0 : i32
    return %c0_i32, %c0_i32_0 : i32, i32
  }
  func.func @transform_9(%arg0: i32) -> (i32, i32, i32) {
    %c0_i32 = arith.constant 0 : i32
    %c0_i32_0 = arith.constant 0 : i32
    %c0_i32_1 = arith.constant 0 : i32
    return %arg0, %c0_i32, %c0_i32_0 : i32, i32, i32
  }
  func.func @transform_10(%arg0: i32) -> (i32, i32, i32) {
    %c0_i32 = arith.constant 0 : i32
    %c0_i32_0 = arith.constant 0 : i32
    %c0_i32_1 = arith.constant 0 : i32
    return %arg0, %c0_i32, %c0_i32_0 : i32, i32, i32
  }
}

</mosaic_0001>

<bundles_post_ra>
// kernel: matching_net_layer_batched.1
= control target key start
LH: loop header
LB: loop body
LE: loop exit
PB: predicated region body
PF: predicated region fallthrough
CT: control target
= control target key end

     0   :  { %16 = vsyncpa [#allocation8], 0  ;;  %v12957_v7 = vmov 0.0   ;;  %s12946_s0 = inlined_call_operand.vmem [shape: f32[1,8,128], index: 0, kind: input, shape index: {}]   ;;  %s12947_s1 = inlined_call_operand.vmem [shape: f32[1,8,128], index: 1, kind: input, shape index: {}]   ;;  %s12948_s2 = inlined_call_operand.vmem [shape: f32[128,1024], index: 2, kind: input, shape index: {}]   ;;  %s12949_s3 = inlined_call_operand.vmem [shape: f32[1,1024], index: 3, kind: input, shape index: {}]   ;;  %s12950_s4 = inlined_call_operand.vmem [shape: f32[128,512], index: 4, kind: input, shape index: {}]   ;;  %s12951_s5 = inlined_call_operand.vmem [shape: f32[128,512], index: 5, kind: input, shape index: {}]   ;;  %s12952_s6 = inlined_call_operand.vmem [shape: f32[128,512], index: 6, kind: input, shape index: {}]   ;;  %s12953_s7 = inlined_call_operand.vmem [shape: f32[256,512], index: 7, kind: input, shape index: {}]   ;;  %s12954_s8 = inlined_call_operand.vmem [shape: f32[1,512], index: 8, kind: input, shape index: {}]   ;;  %s12955_s9 = inlined_call_operand.hbm [shape: f32[1,8,128], index: 9, kind: output, shape index: {0}]   ;;  %s12956_s10 = inlined_call_operand.hbm [shape: f32[1,8,128], index: 10, kind: output, shape index: {1}]  }
   0x1   :  { %v38_v0 = vld [vmem:[%s12948_s2 + $0x8] sm:$0xff]  ;;  %v40_v2 = vld [vmem:[%s12948_s2 + $0x18] sm:$0xff]  ;;  %v37_v5 = vld [vmem:[%s12948_s2] sm:$0xff]  ;;  %271 = vmatprep.mubr.f32.mxu0 %v12957_v7  ;;  %342 = vmatprep.mubr.f32.mxu1 %v12957_v7 }
   0x2   :  { %v46_v1 = vld [vmem:[%s12948_s2 + $0x48] sm:$0xff]  ;;  %v48_v4 = vld [vmem:[%s12948_s2 + $0x58] sm:$0xff]  ;;  %v45_v6 = vld [vmem:[%s12948_s2 + $0x40] sm:$0xff] }
   0x3   :  { %v7199_v3 = vpack.c.bf16 %v46_v1, %v38_v0  ;;  %v7231_v8 = vpack.c.bf16 %v48_v4, %v40_v2  ;;  %v7201_v9 = vpack.c.bf16 %v45_v6, %v37_v5  ;;  %v39_v10 = vld [vmem:[%s12948_s2 + $0x10] sm:$0xff]  ;;  %v54_v12 = vld [vmem:[%s12948_s2 + $0x88] sm:$0xff]  ;;  %v56_v15 = vld [vmem:[%s12948_s2 + $0x98] sm:$0xff] }
   0x4   :  { %v47_v11 = vld [vmem:[%s12948_s2 + $0x50] sm:$0xff]  ;;  %v62_v14 = vld [vmem:[%s12948_s2 + $0xc8] sm:$0xff]  ;;  %v64_v16 = vld [vmem:[%s12948_s2 + $0xd8] sm:$0xff] }
   0x5   :  { %7200 = vmatprep.subr.bf16.mxu0 %v7199_v3  ;;  %v7233_v13 = vpack.c.bf16 %v47_v11, %v39_v10  ;;  %7232 = vmatprep.subr.bf16.mxu1 %v7231_v8  ;;  %v7203_v17 = vpack.c.bf16 %v62_v14, %v54_v12  ;;  %v7235_v18 = vpack.c.bf16 %v64_v16, %v56_v15  ;;  %v53_v19 = vld [vmem:[%s12948_s2 + $0x80] sm:$0xff]  ;;  %v55_v21 = vld [vmem:[%s12948_s2 + $0x90] sm:$0xff]  ;;  %v70_v24 = vld [vmem:[%s12948_s2 + $0x108] sm:$0xff] }
   0x6   :  { %7202 = vmatpush1.bf16.msra.mxu0 %v7201_v9  ;;  %v61_v20 = vld [vmem:[%s12948_s2 + $0xc0] sm:$0xff]  ;;  %v63_v23 = vld [vmem:[%s12948_s2 + $0xd0] sm:$0xff]  ;;  %v78_v25 = vld [vmem:[%s12948_s2 + $0x148] sm:$0xff] }
   0x7   :  { %7234 = vmatpush1.bf16.msra.mxu1 %v7233_v13  ;;  %v7205_v22 = vpack.c.bf16 %v61_v20, %v53_v19  ;;  %7204 = vmatprep.subr.bf16.mxu0 %v7203_v17  ;;  %v7237_v26 = vpack.c.bf16 %v63_v23, %v55_v21  ;;  %v7207_v27 = vpack.c.bf16 %v78_v25, %v70_v24  ;;  %v72_v28 = vld [vmem:[%s12948_s2 + $0x118] sm:$0xff]  ;;  %v69_v30 = vld [vmem:[%s12948_s2 + $0x100] sm:$0xff]  ;;  %v71_v33 = vld [vmem:[%s12948_s2 + $0x110] sm:$0xff] }
   0x8   :  { %7236 = vmatprep.subr.bf16.mxu1 %v7235_v18  ;;  %v80_v29 = vld [vmem:[%s12948_s2 + $0x158] sm:$0xff]  ;;  %v77_v32 = vld [vmem:[%s12948_s2 + $0x140] sm:$0xff]  ;;  %v79_v34 = vld [vmem:[%s12948_s2 + $0x150] sm:$0xff] }
   0x9   :  { %v7239_v31 = vpack.c.bf16 %v80_v29, %v72_v28  ;;  %v7209_v35 = vpack.c.bf16 %v77_v32, %v69_v30  ;;  %v86_v36 = vld [vmem:[%s12948_s2 + $0x188] sm:$0xff]  ;;  %v88_v38 = vld [vmem:[%s12948_s2 + $0x198] sm:$0xff]  ;;  %v7241_v39 = vpack.c.bf16 %v79_v34, %v71_v33  ;;  %v85_v42 = vld [vmem:[%s12948_s2 + $0x180] sm:$0xff] }
   0xa   :  { %7206 = vmatpush1.bf16.msra.mxu0 %v7205_v22  ;;  %v94_v37 = vld [vmem:[%s12948_s2 + $0x1c8] sm:$0xff]  ;;  %v96_v41 = vld [vmem:[%s12948_s2 + $0x1d8] sm:$0xff]  ;;  %v93_v43 = vld [vmem:[%s12948_s2 + $0x1c0] sm:$0xff] }
   0xb   :  { %7238 = vmatpush1.bf16.msra.mxu1 %v7237_v26  ;;  %7208 = vmatprep.subr.bf16.mxu0 %v7207_v27  ;;  %v7211_v40 = vpack.c.bf16 %v94_v37, %v86_v36  ;;  %v7243_v44 = vpack.c.bf16 %v96_v41, %v88_v38  ;;  %v87_v45 = vld [vmem:[%s12948_s2 + $0x190] sm:$0xff]  ;;  %v102_v47 = vld [vmem:[%s12948_s2 + $0x208] sm:$0xff]  ;;  %v104_v49 = vld [vmem:[%s12948_s2 + $0x218] sm:$0xff]  ;;  %v7213_v51 = vpack.c.bf16 %v93_v43, %v85_v42 }
   0xc   :  { %7240 = vmatprep.subr.bf16.mxu1 %v7239_v31  ;;  %v95_v46 = vld [vmem:[%s12948_s2 + $0x1d0] sm:$0xff]  ;;  %v110_v48 = vld [vmem:[%s12948_s2 + $0x248] sm:$0xff]  ;;  %v112_v50 = vld [vmem:[%s12948_s2 + $0x258] sm:$0xff] }
   0xd   :  { %v7245_v52 = vpack.c.bf16 %v95_v46, %v87_v45  ;;  %v7215_v53 = vpack.c.bf16 %v110_v48, %v102_v47  ;;  %v101_v54 = vld [vmem:[%s12948_s2 + $0x200] sm:$0xff]  ;;  %v103_v56 = vld [vmem:[%s12948_s2 + $0x210] sm:$0xff]  ;;  %v7247_v57 = vpack.c.bf16 %v112_v50, %v104_v49  ;;  %v118_v59 = vld [vmem:[%s12948_s2 + $0x288] sm:$0xff] }
   0xe   :  { %7210 = vmatpush1.bf16.msra.mxu0 %v7209_v35  ;;  %v109_v55 = vld [vmem:[%s12948_s2 + $0x240] sm:$0xff]  ;;  %v111_v58 = vld [vmem:[%s12948_s2 + $0x250] sm:$0xff]  ;;  %v126_v60 = vld [vmem:[%s12948_s2 + $0x2c8] sm:$0xff] }
   0xf   :  { %7242 = vmatpush1.bf16.msra.mxu1 %v7241_v39  ;;  %7212 = vmatprep.subr.bf16.mxu0 %v7211_v40  ;;  %v120_v61 = vld [vmem:[%s12948_s2 + $0x298] sm:$0xff]  ;;  %v7217_v63 = vpack.c.bf16 %v109_v55, %v101_v54  ;;  %v7249_v0 = vpack.c.bf16 %v111_v58, %v103_v56  ;;  %v7219_v1 = vpack.c.bf16 %v126_v60, %v118_v59  ;;  %v117_v2 = vld [vmem:[%s12948_s2 + $0x280] sm:$0xff]  ;;  %v119_v4 = vld [vmem:[%s12948_s2 + $0x290] sm:$0xff] }
  0x10   :  { %7244 = vmatprep.subr.bf16.mxu1 %v7243_v44  ;;  %v128_v62 = vld [vmem:[%s12948_s2 + $0x2d8] sm:$0xff]  ;;  %v125_v3 = vld [vmem:[%s12948_s2 + $0x2c0] sm:$0xff]  ;;  %v127_v6 = vld [vmem:[%s12948_s2 + $0x2d0] sm:$0xff] }
  0x11   :  { %v7251_v5 = vpack.c.bf16 %v128_v62, %v120_v61  ;;  %v134_v8 = vld [vmem:[%s12948_s2 + $0x308] sm:$0xff]  ;;  %v136_v10 = vld [vmem:[%s12948_s2 + $0x318] sm:$0xff]  ;;  %v7221_v12 = vpack.c.bf16 %v125_v3, %v117_v2  ;;  %v7253_v13 = vpack.c.bf16 %v127_v6, %v119_v4  ;;  %v133_v15 = vld [vmem:[%s12948_s2 + $0x300] sm:$0xff] }
  0x12   :  { %7214 = vmatpush1.bf16.msra.mxu0 %v7213_v51  ;;  %v142_v9 = vld [vmem:[%s12948_s2 + $0x348] sm:$0xff]  ;;  %v144_v11 = vld [vmem:[%s12948_s2 + $0x358] sm:$0xff]  ;;  %v141_v16 = vld [vmem:[%s12948_s2 + $0x340] sm:$0xff] }
  0x13   :  { %7246 = vmatpush1.bf16.msra.mxu1 %v7245_v52  ;;  %7216 = vmatprep.subr.bf16.mxu0 %v7215_v53  ;;  %v7223_v14 = vpack.c.bf16 %v142_v9, %v134_v8  ;;  %v135_v17 = vld [vmem:[%s12948_s2 + $0x310] sm:$0xff]  ;;  %v7255_v18 = vpack.c.bf16 %v144_v11, %v136_v10  ;;  %v150_v20 = vld [vmem:[%s12948_s2 + $0x388] sm:$0xff]  ;;  %v152_v22 = vld [vmem:[%s12948_s2 + $0x398] sm:$0xff]  ;;  %v7225_v24 = vpack.c.bf16 %v141_v16, %v133_v15 }
  0x14   :  { %7248 = vmatprep.subr.bf16.mxu1 %v7247_v57  ;;  %v143_v19 = vld [vmem:[%s12948_s2 + $0x350] sm:$0xff]  ;;  %v158_v21 = vld [vmem:[%s12948_s2 + $0x3c8] sm:$0xff]  ;;  %v160_v23 = vld [vmem:[%s12948_s2 + $0x3d8] sm:$0xff] }
  0x15   :  { %v7257_v25 = vpack.c.bf16 %v143_v19, %v135_v17  ;;  %v7227_v26 = vpack.c.bf16 %v158_v21, %v150_v20  ;;  %v149_v27 = vld [vmem:[%s12948_s2 + $0x380] sm:$0xff]  ;;  %v151_v29 = vld [vmem:[%s12948_s2 + $0x390] sm:$0xff]  ;;  %v7259_v30 = vpack.c.bf16 %v160_v23, %v152_v22  ;;  %v42_v32 = vld [vmem:[%s12948_s2 + $0x28] sm:$0xff] }
  0x16   :  { %7218 = vmatpush1.bf16.msra.mxu0 %v7217_v63  ;;  %v157_v28 = vld [vmem:[%s12948_s2 + $0x3c0] sm:$0xff]  ;;  %v159_v31 = vld [vmem:[%s12948_s2 + $0x3d0] sm:$0xff]  ;;  %v50_v33 = vld [vmem:[%s12948_s2 + $0x68] sm:$0xff] }
  0x17   :  { %7250 = vmatpush1.bf16.msra.mxu1 %v7249_v0  ;;  %7220 = vmatprep.subr.bf16.mxu0 %v7219_v1  ;;  %v44_v34 = vld [vmem:[%s12948_s2 + $0x38] sm:$0xff]  ;;  %v7229_v36 = vpack.c.bf16 %v157_v28, %v149_v27  ;;  %v7261_v37 = vpack.c.bf16 %v159_v31, %v151_v29  ;;  %v7263_v38 = vpack.c.bf16 %v50_v33, %v42_v32  ;;  %v41_v39 = vld [vmem:[%s12948_s2 + $0x20] sm:$0xff]  ;;  %v43_v41 = vld [vmem:[%s12948_s2 + $0x30] sm:$0xff] }
  0x18   :  { %7252 = vmatprep.subr.bf16.mxu1 %v7251_v5  ;;  %v52_v35 = vld [vmem:[%s12948_s2 + $0x78] sm:$0xff]  ;;  %v49_v40 = vld [vmem:[%s12948_s2 + $0x60] sm:$0xff]  ;;  %v51_v43 = vld [vmem:[%s12948_s2 + $0x70] sm:$0xff] }
  0x19   :  { %v7295_v42 = vpack.c.bf16 %v52_v35, %v44_v34  ;;  %v58_v44 = vld [vmem:[%s12948_s2 + $0xa8] sm:$0xff]  ;;  %v60_v46 = vld [vmem:[%s12948_s2 + $0xb8] sm:$0xff]  ;;  %v10078_v48 = vld [vmem:[%s12946_s0] sm:$0xff]  ;;  %v7265_v49 = vpack.c.bf16 %v49_v40, %v41_v39  ;;  %v7297_v50 = vpack.c.bf16 %v51_v43, %v43_v41 }
  0x1a   :  { %7222 = vmatpush1.bf16.msra.mxu0 %v7221_v12  ;;  %v66_v45 = vld [vmem:[%s12948_s2 + $0xe8] sm:$0xff]  ;;  %v68_v47 = vld [vmem:[%s12948_s2 + $0xf8] sm:$0xff]  ;;  %v57_v52 = vld [vmem:[%s12948_s2 + $0xa0] sm:$0xff] }
  0x1b   :  { %7254 = vmatpush1.bf16.msra.mxu1 %v7253_v13  ;;  %7224 = vmatprep.subr.bf16.mxu0 %v7223_v14  ;;  %v7267_v51 = vpack.c.bf16 %v66_v45, %v58_v44  ;;  %v65_v53 = vld [vmem:[%s12948_s2 + $0xe0] sm:$0xff]  ;;  %v59_v54 = vld [vmem:[%s12948_s2 + $0xb0] sm:$0xff]  ;;  %v7299_v55 = vpack.c.bf16 %v68_v47, %v60_v46  ;;  %v74_v57 = vld [vmem:[%s12948_s2 + $0x128] sm:$0xff] }
  0x1c   :  { %7256 = vmatprep.subr.bf16.mxu1 %v7255_v18  ;;  %v67_v56 = vld [vmem:[%s12948_s2 + $0xf0] sm:$0xff]  ;;  %v82_v58 = vld [vmem:[%s12948_s2 + $0x168] sm:$0xff]  ;;  %v76_v59 = vld [vmem:[%s12948_s2 + $0x138] sm:$0xff]  ;;  %v7269_v61 = vpack.c.bf16 %v65_v53, %v57_v52 }
  0x1d   :  { %v84_v60 = vld [vmem:[%s12948_s2 + $0x178] sm:$0xff]  ;;  %v7301_v62 = vpack.c.bf16 %v67_v56, %v59_v54  ;;  %v7271_v63 = vpack.c.bf16 %v82_v58, %v74_v57  ;;  %v73_v0 = vld [vmem:[%s12948_s2 + $0x120] sm:$0xff]  ;;  %v75_v2 = vld [vmem:[%s12948_s2 + $0x130] sm:$0xff] }
  0x1e   :  { %7226 = vmatpush1.bf16.msra.mxu0 %v7225_v24  ;;  %v81_v1 = vld [vmem:[%s12948_s2 + $0x160] sm:$0xff]  ;;  %v7303_v3 = vpack.c.bf16 %v84_v60, %v76_v59  ;;  %v83_v4 = vld [vmem:[%s12948_s2 + $0x170] sm:$0xff]  ;;  %v90_v5 = vld [vmem:[%s12948_s2 + $0x1a8] sm:$0xff] }
  0x1f   :  { %7258 = vmatpush1.bf16.msra.mxu1 %v7257_v25  ;;  %7228 = vmatprep.subr.bf16.mxu0 %v7227_v26  ;;  %v98_v6 = vld [vmem:[%s12948_s2 + $0x1e8] sm:$0xff]  ;;  %v92_v8 = vld [vmem:[%s12948_s2 + $0x1b8] sm:$0xff]  ;;  %v7273_v10 = vpack.c.bf16 %v81_v1, %v73_v0  ;;  %v7305_v11 = vpack.c.bf16 %v83_v4, %v75_v2  ;;  %v89_v13 = vld [vmem:[%s12948_s2 + $0x1a0] sm:$0xff] }
  0x20   :  { %7260 = vmatprep.subr.bf16.mxu1 %v7259_v30  ;;  %v100_v9 = vld [vmem:[%s12948_s2 + $0x1f8] sm:$0xff]  ;;  %v7275_v12 = vpack.c.bf16 %v98_v6, %v90_v5  ;;  %v97_v14 = vld [vmem:[%s12948_s2 + $0x1e0] sm:$0xff]  ;;  %v91_v15 = vld [vmem:[%s12948_s2 + $0x1b0] sm:$0xff] }
  0x21   :  { %v7307_v16 = vpack.c.bf16 %v100_v9, %v92_v8  ;;  %v99_v17 = vld [vmem:[%s12948_s2 + $0x1f0] sm:$0xff]  ;;  %v106_v18 = vld [vmem:[%s12948_s2 + $0x228] sm:$0xff]  ;;  %v108_v20 = vld [vmem:[%s12948_s2 + $0x238] sm:$0xff]  ;;  %v7277_v22 = vpack.c.bf16 %v97_v14, %v89_v13 }
  0x22   :  { %7230 = vmatpush1.bf16.msra.mxu0 %v7229_v36  ;;  %v114_v19 = vld [vmem:[%s12948_s2 + $0x268] sm:$0xff]  ;;  %v116_v21 = vld [vmem:[%s12948_s2 + $0x278] sm:$0xff]  ;;  %v7309_v23 = vpack.c.bf16 %v99_v17, %v91_v15  ;;  %v105_v25 = vld [vmem:[%s12948_s2 + $0x220] sm:$0xff] }
  0x23   :  { %7262 = vmatpush1.bf16.msra.mxu1 %v7261_v37  ;;  %7264 = vmatprep.subr.bf16.mxu0 %v7263_v38  ;;  %v7279_v24 = vpack.c.bf16 %v114_v19, %v106_v18  ;;  %v113_v26 = vld [vmem:[%s12948_s2 + $0x260] sm:$0xff]  ;;  %v107_v27 = vld [vmem:[%s12948_s2 + $0x230] sm:$0xff]  ;;  %v7311_v28 = vpack.c.bf16 %v116_v21, %v108_v20  ;;  %v122_v30 = vld [vmem:[%s12948_s2 + $0x2a8] sm:$0xff] }
  0x24   :  { %7296 = vmatprep.subr.bf16.mxu1 %v7295_v42  ;;  %v115_v29 = vld [vmem:[%s12948_s2 + $0x270] sm:$0xff]  ;;  %v130_v31 = vld [vmem:[%s12948_s2 + $0x2e8] sm:$0xff]  ;;  %v124_v32 = vld [vmem:[%s12948_s2 + $0x2b8] sm:$0xff]  ;;  %v7281_v34 = vpack.c.bf16 %v113_v26, %v105_v25 }
  0x25   :  { %272 = vmatmul.mubr.f32.vlgmr.msra.gmra.mrb[0].mxu0 %v10078_v48  ;;  %v132_v33 = vld [vmem:[%s12948_s2 + $0x2f8] sm:$0xff]  ;;  %v7313_v35 = vpack.c.bf16 %v115_v29, %v107_v27  ;;  %v7283_v36 = vpack.c.bf16 %v130_v31, %v122_v30  ;;  %v121_v37 = vld [vmem:[%s12948_s2 + $0x2a0] sm:$0xff]  ;;  %v123_v39 = vld [vmem:[%s12948_s2 + $0x2b0] sm:$0xff] }
  0x26   :  { %343 = vmatmul.mubr.f32.vlgmr.msra.gmra.mrb[0].mxu1 %v10078_v48  ;;  %7266 = vmatpush1.bf16.msra.mxu0 %v7265_v49  ;;  %v129_v38 = vld [vmem:[%s12948_s2 + $0x2e0] sm:$0xff]  ;;  %v7315_v40 = vpack.c.bf16 %v132_v33, %v124_v32  ;;  %v131_v41 = vld [vmem:[%s12948_s2 + $0x2f0] sm:$0xff]  ;;  %v138_v42 = vld [vmem:[%s12948_s2 + $0x328] sm:$0xff] }
  0x27   :  { %7298 = vmatpush1.bf16.msra.mxu1 %v7297_v50  ;;  %7268 = vmatprep.subr.bf16.mxu0 %v7267_v51  ;;  %v146_v43 = vld [vmem:[%s12948_s2 + $0x368] sm:$0xff]  ;;  %v140_v44 = vld [vmem:[%s12948_s2 + $0x338] sm:$0xff]  ;;  %v7285_v46 = vpack.c.bf16 %v129_v38, %v121_v37  ;;  %v7317_v47 = vpack.c.bf16 %v131_v41, %v123_v39  ;;  %v137_v50 = vld [vmem:[%s12948_s2 + $0x320] sm:$0xff] }
  0x28   :  { %7300 = vmatprep.subr.bf16.mxu1 %v7299_v55  ;;  %413 = vmatprep.mubr.f32.mxu0 %v12957_v7  ;;  %v148_v45 = vld [vmem:[%s12948_s2 + $0x378] sm:$0xff]  ;;  %v7287_v49 = vpack.c.bf16 %v146_v43, %v138_v42  ;;  %v145_v51 = vld [vmem:[%s12948_s2 + $0x360] sm:$0xff]  ;;  %v139_v52 = vld [vmem:[%s12948_s2 + $0x330] sm:$0xff] }
  0x29   :  { %484 = vmatprep.mubr.f32.mxu1 %v12957_v7  ;;  %v7319_v53 = vpack.c.bf16 %v148_v45, %v140_v44  ;;  %v147_v54 = vld [vmem:[%s12948_s2 + $0x370] sm:$0xff]  ;;  %v154_v55 = vld [vmem:[%s12948_s2 + $0x3a8] sm:$0xff]  ;;  %v156_v57 = vld [vmem:[%s12948_s2 + $0x3b8] sm:$0xff]  ;;  %v7289_v59 = vpack.c.bf16 %v145_v51, %v137_v50 }
  0x2a   :  { %7270 = vmatpush1.bf16.msra.mxu0 %v7269_v61  ;;  %v162_v56 = vld [vmem:[%s12948_s2 + $0x3e8] sm:$0xff]  ;;  %v164_v58 = vld [vmem:[%s12948_s2 + $0x3f8] sm:$0xff]  ;;  %v7321_v60 = vpack.c.bf16 %v147_v54, %v139_v52  ;;  %v155_v0 = vld [vmem:[%s12948_s2 + $0x3b0] sm:$0xff] }
  0x2b   :  { %7302 = vmatpush1.bf16.msra.mxu1 %v7301_v62  ;;  %7272 = vmatprep.subr.bf16.mxu0 %v7271_v63  ;;  %v7291_v61 = vpack.c.bf16 %v162_v56, %v154_v55  ;;  %v153_v62 = vld [vmem:[%s12948_s2 + $0x3a0] sm:$0xff]  ;;  %v7323_v1 = vpack.c.bf16 %v164_v58, %v156_v57  ;;  %v163_v2 = vld [vmem:[%s12948_s2 + $0x3f0] sm:$0xff]  ;;  %v504_v4 = vld [vmem:[%s12950_s4 + $0x28] sm:$0xff] }
  0x2c   :  { %7304 = vmatprep.subr.bf16.mxu1 %v7303_v3  ;;  %v161_v63 = vld [vmem:[%s12948_s2 + $0x3e0] sm:$0xff]  ;;  %v500_v3 = vld [vmem:[%s12950_s4 + $0x8] sm:$0xff]  ;;  %v502_v5 = vld [vmem:[%s12950_s4 + $0x18] sm:$0xff]  ;;  %v7325_v9 = vpack.c.bf16 %v163_v2, %v155_v0 }
  0x2d   :  { %v506_v6 = vld [vmem:[%s12950_s4 + $0x38] sm:$0xff]  ;;  %v7293_v8 = vpack.c.bf16 %v161_v63, %v153_v62  ;;  %v501_v13 = vld [vmem:[%s12950_s4 + $0x10] sm:$0xff]  ;;  %v512_v17 = vld [vmem:[%s12950_s4 + $0x68] sm:$0xff] }
  0x2e   :  { %7274 = vmatpush1.bf16.msra.mxu0 %v7273_v10  ;;  %v10252_v10 = vpack.c.bf16 %v504_v4, %v500_v3  ;;  %v10263_v14 = vpack.c.bf16 %v506_v6, %v502_v5  ;;  %v505_v15 = vld [vmem:[%s12950_s4 + $0x30] sm:$0xff]  ;;  %v510_v18 = vld [vmem:[%s12950_s4 + $0x58] sm:$0xff]  ;;  %v520_v29 = vld [vmem:[%s12950_s4 + $0xa8] sm:$0xff] }
  0x2f   :  { %7306 = vmatpush1.bf16.msra.mxu1 %v7305_v11  ;;  %7276 = vmatprep.subr.bf16.mxu0 %v7275_v12  ;;  %v499_v11 = vld [vmem:[%s12950_s4] sm:$0xff]  ;;  %v514_v19 = vld [vmem:[%s12950_s4 + $0x78] sm:$0xff]  ;;  %v10283_v21 = vpack.c.bf16 %v505_v15, %v501_v13  ;;  %v509_v25 = vld [vmem:[%s12950_s4 + $0x50] sm:$0xff] }
  0x30   :  { %7308 = vmatprep.subr.bf16.mxu1 %v7307_v16  ;;  %v503_v12 = vld [vmem:[%s12950_s4 + $0x20] sm:$0xff]  ;;  %v508_v16 = vld [vmem:[%s12950_s4 + $0x48] sm:$0xff]  ;;  %v10297_v26 = vpack.c.bf16 %v514_v19, %v510_v18  ;;  %v513_v27 = vld [vmem:[%s12950_s4 + $0x70] sm:$0xff] }
  0x31   :  { %v10280_v20 = vpack.c.bf16 %v503_v12, %v499_v11  ;;  %v518_v30 = vld [vmem:[%s12950_s4 + $0x98] sm:$0xff]  ;;  %v10321_v33 = vpack.c.bf16 %v513_v27, %v509_v25  ;;  %v521_v38 = vld [vmem:[%s12950_s4 + $0xb0] sm:$0xff]  ;;  %v524_v39 = vld [vmem:[%s12950_s4 + $0xc8] sm:$0xff] }
  0x32   :  { %7278 = vmatpush1.bf16.msra.mxu0 %v7277_v22  ;;  %v10285_v22 = vpack.c.bf16 %v512_v17, %v508_v16  ;;  %v522_v31 = vld [vmem:[%s12950_s4 + $0xb8] sm:$0xff]  ;;  %v529_v51 = vld [vmem:[%s12950_s4 + $0xf0] sm:$0xff]  ;;  %v532_v52 = vld [vmem:[%s12950_s4 + $0x108] sm:$0xff] }
  0x33   :  { %7310 = vmatpush1.bf16.msra.mxu1 %v7309_v23  ;;  %7280 = vmatprep.subr.bf16.mxu0 %v7279_v24  ;;  %v507_v23 = vld [vmem:[%s12950_s4 + $0x40] sm:$0xff]  ;;  %v10335_v37 = vpack.c.bf16 %v522_v31, %v518_v30  ;;  %v526_v41 = vld [vmem:[%s12950_s4 + $0xd8] sm:$0xff]  ;;  %v537_v63 = vld [vmem:[%s12950_s4 + $0x130] sm:$0xff] }
  0x34   :  { %7312 = vmatprep.subr.bf16.mxu1 %v7311_v28  ;;  %v511_v24 = vld [vmem:[%s12950_s4 + $0x60] sm:$0xff]  ;;  %v516_v28 = vld [vmem:[%s12950_s4 + $0x88] sm:$0xff]  ;;  %v530_v42 = vld [vmem:[%s12950_s4 + $0xf8] sm:$0xff] }
  0x35   :  { %v10317_v32 = vpack.c.bf16 %v511_v24, %v507_v23  ;;  %13094 = vst [vmem:[#allocation14_spill] sm:$0xff] %v10335_v37  ;;  %v10373_v50 = vpack.c.bf16 %v530_v42, %v526_v41  ;;  %v534_v54 = vld [vmem:[%s12950_s4 + $0x118] sm:$0xff]  ;;  %v540_v0 = vld [vmem:[%s12950_s4 + $0x148] sm:$0xff]  ;;  %v541_v11 = vld [vmem:[%s12950_s4 + $0x150] sm:$0xff] }
  0x36   :  { %7282 = vmatpush1.bf16.msra.mxu0 %v7281_v34  ;;  %v10323_v34 = vpack.c.bf16 %v520_v29, %v516_v28  ;;  %v538_v55 = vld [vmem:[%s12950_s4 + $0x138] sm:$0xff]  ;;  %v545_v13 = vld [vmem:[%s12950_s4 + $0x170] sm:$0xff]  ;;  %v548_v15 = vld [vmem:[%s12950_s4 + $0x188] sm:$0xff] }
  0x37   :  { %7314 = vmatpush1.bf16.msra.mxu1 %v7313_v35  ;;  %7284 = vmatprep.subr.bf16.mxu0 %v7283_v36  ;;  %v515_v35 = vld [vmem:[%s12950_s4 + $0x80] sm:$0xff]  ;;  %v517_v36 = vld [vmem:[%s12950_s4 + $0x90] sm:$0xff]  ;;  %13098 = vst [vmem:[#allocation18_spill] sm:$0xff] %v10373_v50  ;;  %v10409_v62 = vpack.c.bf16 %v538_v55, %v534_v54  ;;  %v542_v2 = vld [vmem:[%s12950_s4 + $0x158] sm:$0xff]  ;;  %v10470_v24 = vpack.c.bf16 %v545_v13, %v541_v11 }
  0x38   :  { %7316 = vmatprep.subr.bf16.mxu1 %v7315_v40  ;;  %13093 = vst [vmem:[#allocation13_spill] sm:$0xff] %v10323_v34  ;;  %v528_v40 = vld [vmem:[%s12950_s4 + $0xe8] sm:$0xff]  ;;  %v10359_v44 = vpack.c.bf16 %v521_v38, %v517_v36  ;;  %v546_v3 = vld [vmem:[%s12950_s4 + $0x178] sm:$0xff]  ;;  %v547_v23 = vld [vmem:[%s12950_s4 + $0x180] sm:$0xff] }
  0x39   :  { %v10361_v45 = vpack.c.bf16 %v528_v40, %v524_v39  ;;  %13102 = vst [vmem:[#allocation22_spill] sm:$0xff] %v10409_v62  ;;  %v10445_v12 = vpack.c.bf16 %v546_v3, %v542_v2  ;;  %v552_v16 = vld [vmem:[%s12950_s4 + $0x1a8] sm:$0xff]  ;;  %v550_v17 = vld [vmem:[%s12950_s4 + $0x198] sm:$0xff]  ;;  %13108 = vst [vmem:[#allocation28_spill] sm:$0xff] %v10470_v24 }
  0x3a   :  { %7286 = vmatpush1.bf16.msra.mxu0 %v7285_v46  ;;  %13096 = vst [vmem:[#allocation16_spill] sm:$0xff] %v10359_v44  ;;  %v523_v46 = vld [vmem:[%s12950_s4 + $0xc0] sm:$0xff]  ;;  %v554_v18 = vld [vmem:[%s12950_s4 + $0x1b8] sm:$0xff]  ;;  %v10472_v25 = vpack.c.bf16 %v552_v16, %v548_v15  ;;  %v549_v28 = vld [vmem:[%s12950_s4 + $0x190] sm:$0xff] }
  0x3b   :  { %7318 = vmatpush1.bf16.msra.mxu1 %v7317_v47  ;;  %7288 = vmatprep.subr.bf16.mxu0 %v7287_v49  ;;  %13097 = vst [vmem:[#allocation17_spill] sm:$0xff] %v10361_v45  ;;  %v527_v47 = vld [vmem:[%s12950_s4 + $0xe0] sm:$0xff]  ;;  %v525_v49 = vld [vmem:[%s12950_s4 + $0xd0] sm:$0xff]  ;;  %13106 = vst [vmem:[#allocation26_spill] sm:$0xff] %v10445_v12  ;;  %v10484_v30 = vpack.c.bf16 %v554_v18, %v550_v17 }
  0x3c   :  { %7320 = vmatprep.subr.bf16.mxu1 %v7319_v53  ;;  %v536_v53 = vld [vmem:[%s12950_s4 + $0x128] sm:$0xff]  ;;  %v10391_v56 = vpack.c.bf16 %v527_v47, %v523_v46  ;;  %v10395_v57 = vpack.c.bf16 %v529_v51, %v525_v49  ;;  %13109 = vst [vmem:[#allocation29_spill] sm:$0xff] %v10472_v25  ;;  %v551_v27 = vld [vmem:[%s12950_s4 + $0x1a0] sm:$0xff]  ;;  %v553_v29 = vld [vmem:[%s12950_s4 + $0x1b0] sm:$0xff] }
  0x3d   :  { %v10397_v58 = vpack.c.bf16 %v536_v53, %v532_v52  ;;  %13110 = vst [vmem:[#allocation30_spill] sm:$0xff] %v10484_v30  ;;  %v556_v31 = vld [vmem:[%s12950_s4 + $0x1c8] sm:$0xff] }
  0x3e   :  { %7290 = vmatpush1.bf16.msra.mxu0 %v7289_v59  ;;  %13099 = vst [vmem:[#allocation19_spill] sm:$0xff] %v10391_v56  ;;  %13100 = vst [vmem:[#allocation20_spill] sm:$0xff] %v10395_v57  ;;  %v531_v59 = vld [vmem:[%s12950_s4 + $0x100] sm:$0xff] }
  0x3f   :  { %7322 = vmatpush1.bf16.msra.mxu1 %v7321_v60  ;;  %7292 = vmatprep.subr.bf16.mxu0 %v7291_v61  ;;  %13101 = vst [vmem:[#allocation21_spill] sm:$0xff] %v10397_v58  ;;  %v535_v60 = vld [vmem:[%s12950_s4 + $0x120] sm:$0xff]  ;;  %v533_v61 = vld [vmem:[%s12950_s4 + $0x110] sm:$0xff] }
  0x40   :  { %7324 = vmatprep.subr.bf16.mxu1 %v7323_v1  ;;  %v544_v1 = vld [vmem:[%s12950_s4 + $0x168] sm:$0xff]  ;;  %v10427_v4 = vpack.c.bf16 %v535_v60, %v531_v59  ;;  %v10431_v5 = vpack.c.bf16 %v537_v63, %v533_v61 }
  0x41   :  { %v10433_v6 = vpack.c.bf16 %v544_v1, %v540_v0 }
  0x42   :  { %7294 = vmatpush1.bf16.msra.mxu0 %v7293_v8  ;;  %13103 = vst [vmem:[#allocation23_spill] sm:$0xff] %v10427_v4  ;;  %13104 = vst [vmem:[#allocation24_spill] sm:$0xff] %v10431_v5  ;;  %v539_v8 = vld [vmem:[%s12950_s4 + $0x140] sm:$0xff] }
  0x43   :  { %7326 = vmatpush1.bf16.msra.mxu1 %v7325_v9  ;;  %7328 = vmatprep.subr.bf16.mxu0 %v10252_v10  ;;  %13105 = vst [vmem:[#allocation25_spill] sm:$0xff] %v10433_v6  ;;  %v543_v9 = vld [vmem:[%s12950_s4 + $0x160] sm:$0xff] }
  0x44   :  { %7360 = vmatprep.subr.bf16.mxu1 %v10263_v14  ;;  %v10463_v19 = vpack.c.bf16 %v543_v9, %v539_v8 }
  0x45   :  { %414 = vmatmul.mubr.f32.vlgmr.msra.gmra.mrb[2].mxu0 %v10078_v48 }
  0x46   :  { %485 = vmatmul.mubr.f32.vlgmr.msra.gmra.mrb[2].mxu1 %v10078_v48  ;;  %7330 = vmatpush1.bf16.msra.mxu0 %v10280_v20  ;;  %v519_v48 = vld [vmem:[%s12950_s4 + $0xa0] sm:$0xff]  ;;  %13107 = vst [vmem:[#allocation27_spill] sm:$0xff] %v10463_v19 }
  0x47   :  { %7362 = vmatpush1.bf16.msra.mxu1 %v10283_v21  ;;  %7332 = vmatprep.subr.bf16.mxu0 %v10285_v22  ;;  %v10355_v43 = vpack.c.bf16 %v519_v48, %v515_v35  ;;  %v560_v35 = vld [vmem:[%s12950_s4 + $0x1e8] sm:$0xff] }
  0x48   :  { %7364 = vmatprep.subr.bf16.mxu1 %v10297_v26  ;;  %692 = vmatprep.mubr.f32.mxu0 %v12957_v7 }
  0x49   :  { %763 = vmatprep.mubr.f32.mxu1 %v12957_v7  ;;  %13095 = vst [vmem:[#allocation15_spill] sm:$0xff] %v10355_v43 }
  0x4a   :  { %7334 = vmatpush1.bf16.msra.mxu0 %v10317_v32 }
  0x4b   :  { %7366 = vmatpush1.bf16.msra.mxu1 %v10321_v33  ;;  %7336 = vmatprep.subr.bf16.mxu0 %v10323_v34 }
  0x4c   :  { %7368 = vmatprep.subr.bf16.mxu1 %v10335_v37 }
  0x4e   :  { %7338 = vmatpush1.bf16.msra.mxu0 %v10355_v43 }
  0x4f   :  { %7370 = vmatpush1.bf16.msra.mxu1 %v10359_v44  ;;  %7340 = vmatprep.subr.bf16.mxu0 %v10361_v45 }
  0x50   :  { %7372 = vmatprep.subr.bf16.mxu1 %v10373_v50 }
  0x52   :  { %7342 = vmatpush1.bf16.msra.mxu0 %v10391_v56 }
  0x53   :  { %7374 = vmatpush1.bf16.msra.mxu1 %v10395_v57  ;;  %7344 = vmatprep.subr.bf16.mxu0 %v10397_v58 }
  0x54   :  { %7376 = vmatprep.subr.bf16.mxu1 %v10409_v62 }
  0x56   :  { %7346 = vmatpush1.bf16.msra.mxu0 %v10427_v4 }
  0x57   :  { %7378 = vmatpush1.bf16.msra.mxu1 %v10431_v5  ;;  %7348 = vmatprep.subr.bf16.mxu0 %v10433_v6 }
  0x58   :  { %7380 = vmatprep.subr.bf16.mxu1 %v10445_v12 }
  0x59   :  { %17 = vsyncpa [#allocation10], 0  ;;  %v558_v48 = vld [vmem:[%s12950_s4 + $0x1d8] sm:$0xff]  ;;  %v10499_v38 = vpack.c.bf16 %v551_v27, %v547_v23  ;;  %v10503_v39 = vpack.c.bf16 %v553_v29, %v549_v28  ;;  %v10505_v40 = vpack.c.bf16 %v560_v35, %v556_v31  ;;  %v555_v41 = vld [vmem:[%s12950_s4 + $0x1c0] sm:$0xff]  ;;  %vm1016_vm0 = vcmask 1040384  }
  0x5a   :  { %v562_v36 = vld [vmem:[%s12950_s4 + $0x1f8] sm:$0xff]  ;;  %7350 = vmatpush1.bf16.msra.mxu0 %v10463_v19  ;;  %v559_v42 = vld [vmem:[%s12950_s4 + $0x1e0] sm:$0xff]  ;;  %v557_v46 = vld [vmem:[%s12950_s4 + $0x1d0] sm:$0xff]  ;;  %vm9787_vm1 = vmmov 0   ;;  %vm4439_vm2 = vcmask 64512  }
  0x5b   :  { %13111 = vst [vmem:[#allocation31_spill] sm:$0xff] %v10499_v38  ;;  %7382 = vmatpush1.bf16.msra.mxu1 %v10470_v24  ;;  %7352 = vmatprep.subr.bf16.mxu0 %v10472_v25  ;;  %13112 = vst [vmem:[#allocation32_spill] sm:$0xff] %v10503_v39  ;;  %v10517_v47 = vpack.c.bf16 %v562_v36, %v558_v48  ;;  %v561_v49 = vld [vmem:[%s12950_s4 + $0x1f0] sm:$0xff]  ;;  %v564_v51 = vld [vmem:[%s12951_s5 + $0x8] sm:$0xff]  ;;  %v10535_v55 = vpack.c.bf16 %v559_v42, %v555_v41 }
  0x5c   :  { %13113 = vst [vmem:[#allocation33_spill] sm:$0xff] %v10505_v40  ;;  %7384 = vmatprep.subr.bf16.mxu1 %v10484_v30  ;;  %v568_v52 = vld [vmem:[%s12951_s5 + $0x28] sm:$0xff]  ;;  %v566_v53 = vld [vmem:[%s12951_s5 + $0x18] sm:$0xff]  ;;  %v10539_v59 = vpack.c.bf16 %v561_v49, %v557_v46  ;;  %v563_v61 = vld [vmem:[%s12951_s5] sm:$0xff] }
  0x5d   :  { %13114 = vst [vmem:[#allocation34_spill] sm:$0xff] %v10517_v47  ;;  %v570_v54 = vld [vmem:[%s12951_s5 + $0x38] sm:$0xff]  ;;  %13115 = vst [vmem:[#allocation35_spill] sm:$0xff] %v10535_v55  ;;  %v10541_v60 = vpack.c.bf16 %v568_v52, %v564_v51  ;;  %v567_v63 = vld [vmem:[%s12951_s5 + $0x20] sm:$0xff] }
  0x5e   :  { %7354 = vmatpush1.bf16.msra.mxu0 %v10499_v38  ;;  %13116 = vst [vmem:[#allocation36_spill] sm:$0xff] %v10539_v59  ;;  %v565_v0 = vld [vmem:[%s12951_s5 + $0x10] sm:$0xff]  ;;  %v10553_v1 = vpack.c.bf16 %v570_v54, %v566_v53  ;;  %v572_v3 = vld [vmem:[%s12951_s5 + $0x48] sm:$0xff]  ;;  %v574_v9 = vld [vmem:[%s12951_s5 + $0x58] sm:$0xff]  ;;  %v10571_v13 = vpack.c.bf16 %v567_v63, %v563_v61 }
  0x5f   :  { %7386 = vmatpush1.bf16.msra.mxu1 %v10503_v39  ;;  %7356 = vmatprep.subr.bf16.mxu0 %v10505_v40  ;;  %13117 = vst [vmem:[#allocation37_spill] sm:$0xff] %v10541_v60  ;;  %v569_v2 = vld [vmem:[%s12951_s5 + $0x30] sm:$0xff]  ;;  %v576_v8 = vld [vmem:[%s12951_s5 + $0x68] sm:$0xff]  ;;  %v578_v11 = vld [vmem:[%s12951_s5 + $0x78] sm:$0xff] }
  0x60   :  { %7388 = vmatprep.subr.bf16.mxu1 %v10517_v47  ;;  %13118 = vst [vmem:[#allocation38_spill] sm:$0xff] %v10553_v1  ;;  %v10575_v15 = vpack.c.bf16 %v569_v2, %v565_v0  ;;  %v10577_v16 = vpack.c.bf16 %v576_v8, %v572_v3  ;;  %v571_v17 = vld [vmem:[%s12951_s5 + $0x40] sm:$0xff]  ;;  %v573_v23 = vld [vmem:[%s12951_s5 + $0x50] sm:$0xff]  ;;  %v10589_v27 = vpack.c.bf16 %v578_v11, %v574_v9  ;;  %v580_v29 = vld [vmem:[%s12951_s5 + $0x88] sm:$0xff] }
  0x61   :  { %v575_v18 = vld [vmem:[%s12951_s5 + $0x60] sm:$0xff]  ;;  %v577_v28 = vld [vmem:[%s12951_s5 + $0x70] sm:$0xff]  ;;  %v584_v31 = vld [vmem:[%s12951_s5 + $0xa8] sm:$0xff] }
  0x62   :  { %7358 = vmatpush1.bf16.msra.mxu0 %v10535_v55  ;;  %v582_v35 = vld [vmem:[%s12951_s5 + $0x98] sm:$0xff]  ;;  %v10609_v36 = vpack.c.bf16 %v575_v18, %v571_v17  ;;  %v10613_v41 = vpack.c.bf16 %v577_v28, %v573_v23  ;;  %v10615_v42 = vpack.c.bf16 %v584_v31, %v580_v29  ;;  %v579_v46 = vld [vmem:[%s12951_s5 + $0x80] sm:$0xff]  ;;  %v581_v51 = vld [vmem:[%s12951_s5 + $0x90] sm:$0xff] }
  0x63   :  { %7390 = vmatpush1.bf16.msra.mxu1 %v10539_v59  ;;  %7392 = vmatprep.subr.bf16.mxu0 %v10541_v60  ;;  %v586_v48 = vld [vmem:[%s12951_s5 + $0xb8] sm:$0xff]  ;;  %v583_v49 = vld [vmem:[%s12951_s5 + $0xa0] sm:$0xff]  ;;  %v585_v53 = vld [vmem:[%s12951_s5 + $0xb0] sm:$0xff] }
  0x64   :  { %7424 = vmatprep.subr.bf16.mxu1 %v10553_v1  ;;  %v10627_v52 = vpack.c.bf16 %v586_v48, %v582_v35  ;;  %v588_v54 = vld [vmem:[%s12951_s5 + $0xc8] sm:$0xff]  ;;  %v590_v63 = vld [vmem:[%s12951_s5 + $0xd8] sm:$0xff]  ;;  %v10647_v2 = vpack.c.bf16 %v583_v49, %v579_v46  ;;  %v10651_v3 = vpack.c.bf16 %v585_v53, %v581_v51  ;;  %v587_v9 = vld [vmem:[%s12951_s5 + $0xc0] sm:$0xff] }
  0x65   :  { %693 = vmatmul.mubr.f32.vlgmr.msra.gmra.mrb[4].mxu0 %v12957_v7  ;;  %v592_v61 = vld [vmem:[%s12951_s5 + $0xe8] sm:$0xff]  ;;  %v594_v0 = vld [vmem:[%s12951_s5 + $0xf8] sm:$0xff]  ;;  %v591_v11 = vld [vmem:[%s12951_s5 + $0xe0] sm:$0xff] }
  0x66   :  { %764 = vmatmul.mubr.f32.vlgmr.msra.gmra.mrb[4].mxu1 %v12957_v7  ;;  %7394 = vmatpush1.bf16.msra.mxu0 %v10571_v13  ;;  %v10653_v8 = vpack.c.bf16 %v592_v61, %v588_v54  ;;  %v589_v17 = vld [vmem:[%s12951_s5 + $0xd0] sm:$0xff]  ;;  %v10665_v18 = vpack.c.bf16 %v594_v0, %v590_v63  ;;  %v596_v28 = vld [vmem:[%s12951_s5 + $0x108] sm:$0xff]  ;;  %v598_v31 = vld [vmem:[%s12951_s5 + $0x118] sm:$0xff]  ;;  %v10683_v48 = vpack.c.bf16 %v591_v11, %v587_v9 }
  0x67   :  { %7426 = vmatpush1.bf16.msra.mxu1 %v10575_v15  ;;  %7396 = vmatprep.subr.bf16.mxu0 %v10577_v16  ;;  %v593_v23 = vld [vmem:[%s12951_s5 + $0xf0] sm:$0xff]  ;;  %v600_v29 = vld [vmem:[%s12951_s5 + $0x128] sm:$0xff]  ;;  %v602_v35 = vld [vmem:[%s12951_s5 + $0x138] sm:$0xff] }
  0x68   :  { %7428 = vmatprep.subr.bf16.mxu1 %v10589_v27  ;;  %866 = vmatprep.mubr.f32.mxu0 %v12957_v7  ;;  %v10687_v46 = vpack.c.bf16 %v593_v23, %v589_v17  ;;  %v10689_v49 = vpack.c.bf16 %v600_v29, %v596_v28  ;;  %v595_v51 = vld [vmem:[%s12951_s5 + $0x100] sm:$0xff]  ;;  %v597_v54 = vld [vmem:[%s12951_s5 + $0x110] sm:$0xff]  ;;  %v10701_v61 = vpack.c.bf16 %v602_v35, %v598_v31  ;;  %v604_v0 = vld [vmem:[%s12951_s5 + $0x148] sm:$0xff] }
  0x69   :  { %937 = vmatprep.mubr.f32.mxu1 %v12957_v7  ;;  %v599_v53 = vld [vmem:[%s12951_s5 + $0x120] sm:$0xff]  ;;  %v601_v63 = vld [vmem:[%s12951_s5 + $0x130] sm:$0xff]  ;;  %v608_v9 = vld [vmem:[%s12951_s5 + $0x168] sm:$0xff] }
  0x6a   :  { %7398 = vmatpush1.bf16.msra.mxu0 %v10609_v36  ;;  %13119 = vst [vmem:[#allocation39_spill] sm:$0xff] %v10687_v46  ;;  %13120 = vst [vmem:[#allocation40_spill] sm:$0xff] %v10689_v49  ;;  %v606_v11 = vld [vmem:[%s12951_s5 + $0x158] sm:$0xff]  ;;  %v10719_v23 = vpack.c.bf16 %v599_v53, %v595_v51  ;;  %v10723_v28 = vpack.c.bf16 %v601_v63, %v597_v54  ;;  %v10725_v29 = vpack.c.bf16 %v608_v9, %v604_v0  ;;  %v603_v31 = vld [vmem:[%s12951_s5 + $0x140] sm:$0xff] }
  0x6b   :  { %7430 = vmatpush1.bf16.msra.mxu1 %v10613_v41  ;;  %7400 = vmatprep.subr.bf16.mxu0 %v10615_v42  ;;  %13121 = vst [vmem:[#allocation41_spill] sm:$0xff] %v10701_v61  ;;  %v610_v17 = vld [vmem:[%s12951_s5 + $0x178] sm:$0xff]  ;;  %v607_v35 = vld [vmem:[%s12951_s5 + $0x160] sm:$0xff]  ;;  %v605_v51 = vld [vmem:[%s12951_s5 + $0x150] sm:$0xff] }
  0x6c   :  { %7432 = vmatprep.subr.bf16.mxu1 %v10627_v52  ;;  %13122 = vst [vmem:[#allocation42_spill] sm:$0xff] %v10719_v23  ;;  %13123 = vst [vmem:[#allocation43_spill] sm:$0xff] %v10723_v28  ;;  %v10737_v53 = vpack.c.bf16 %v610_v17, %v606_v11  ;;  %v609_v54 = vld [vmem:[%s12951_s5 + $0x170] sm:$0xff]  ;;  %v612_v63 = vld [vmem:[%s12951_s5 + $0x188] sm:$0xff]  ;;  %v10755_v17 = vpack.c.bf16 %v607_v35, %v603_v31 }
  0x6d   :  { %13124 = vst [vmem:[#allocation44_spill] sm:$0xff] %v10725_v29  ;;  %v616_v0 = vld [vmem:[%s12951_s5 + $0x1a8] sm:$0xff]  ;;  %v614_v9 = vld [vmem:[%s12951_s5 + $0x198] sm:$0xff]  ;;  %v10759_v7 = vpack.c.bf16 %v609_v54, %v605_v51  ;;  %v613_v31 = vld [vmem:[%s12951_s5 + $0x190] sm:$0xff] }
  0x6e   :  { %7402 = vmatpush1.bf16.msra.mxu0 %v10647_v2  ;;  %13125 = vst [vmem:[#allocation45_spill] sm:$0xff] %v10737_v53  ;;  %v618_v11 = vld [vmem:[%s12951_s5 + $0x1b8] sm:$0xff]  ;;  %v617_v51 = vld [vmem:[%s12951_s5 + $0x1b0] sm:$0xff]  ;;  %v620_v54 = vld [vmem:[%s12951_s5 + $0x1c8] sm:$0xff] }
  0x6f   :  { %7434 = vmatpush1.bf16.msra.mxu1 %v10651_v3  ;;  %7404 = vmatprep.subr.bf16.mxu0 %v10653_v8  ;;  %v10773_v35 = vpack.c.bf16 %v618_v11, %v614_v9  ;;  %v626_v9 = vld [vmem:[%s12951_s5 + $0x1f8] sm:$0xff] }
  0x70   :  { %7436 = vmatprep.subr.bf16.mxu1 %v10665_v18 }
  0x72   :  { %7406 = vmatpush1.bf16.msra.mxu0 %v10683_v48 }
  0x73   :  { %7438 = vmatpush1.bf16.msra.mxu1 %v10687_v46  ;;  %7408 = vmatprep.subr.bf16.mxu0 %v10689_v49  ;;  %v611_v49 = vld [vmem:[%s12951_s5 + $0x180] sm:$0xff] }
  0x74   :  { %7440 = vmatprep.subr.bf16.mxu1 %v10701_v61  ;;  %v10761_v61 = vpack.c.bf16 %v616_v0, %v612_v63  ;;  %v615_v46 = vld [vmem:[%s12951_s5 + $0x1a0] sm:$0xff]  ;;  %v624_v63 = vld [vmem:[%s12951_s5 + $0x1e8] sm:$0xff]  ;;  %v622_v0 = vld [vmem:[%s12951_s5 + $0x1d8] sm:$0xff] }
  0x75   :  { %v10791_v11 = vpack.c.bf16 %v615_v46, %v611_v49  ;;  %v10806_v46 = vpack.c.bf16 %v626_v9, %v622_v0  ;;  %v621_v49 = vld [vmem:[%s12951_s5 + $0x1d0] sm:$0xff]  ;;  %v165_v9 = vld [vmem:[%s12949_s3] sm:$0xff] }
  0x76   :  { %7410 = vmatpush1.bf16.msra.mxu0 %v10719_v23  ;;  %v623_v23 = vld [vmem:[%s12951_s5 + $0x1e0] sm:$0xff] }
  0x77   :  { %7442 = vmatpush1.bf16.msra.mxu1 %v10723_v28  ;;  %7412 = vmatprep.subr.bf16.mxu0 %v10725_v29  ;;  %v10797_v29 = vpack.c.bf16 %v624_v63, %v620_v54  ;;  %v619_v28 = vld [vmem:[%s12951_s5 + $0x1c0] sm:$0xff]  ;;  %v13126_v63 = vmov 0.0  }
  0x78   :  { %7444 = vmatprep.subr.bf16.mxu1 %v10737_v53  ;;  %v10795_v53 = vpack.c.bf16 %v617_v51, %v613_v31  ;;  %v625_v31 = vld [vmem:[%s12951_s5 + $0x1f0] sm:$0xff]  ;;  %v10815_v51 = vpack.c.bf16 %v623_v23, %v619_v28  ;;  %v167_v23 = vlaneseq }
  0x79   :  { %v10819_v54 = vpack.c.bf16 %v625_v31, %v621_v49 }
  0x7a   :  { %7414 = vmatpush1.bf16.msra.mxu0 %v10755_v17  ;;  %v168_v28 = vshrl.u32 %v167_v23, 7 }
  0x7b   :  { %7446 = vmatpush1.bf16.msra.mxu1 %v10759_v7  ;;  %7416 = vmatprep.subr.bf16.mxu0 %v10761_v61 }
  0x7c   :  { %7448 = vmatprep.subr.bf16.mxu1 %v10773_v35  ;;  %v10862_v0 = vsub.s32 0, %v168_v28  ;;  %v10867_v49 = vsub.s32 2, %v168_v28  ;;  %v10869_v31 = vsub.s32 1, %v168_v28 }
  0x7e   :  { %7418 = vmatpush1.bf16.msra.mxu0 %v10791_v11  ;;  %13127 = vst [vmem:[#allocation46_spill] sm:$0xff] %v10867_v49  ;;  %13128 = vst [vmem:[#allocation47_spill] sm:$0xff] %v10869_v31 }
  0x7f   :  { %7450 = vmatpush1.bf16.msra.mxu1 %v10795_v53  ;;  %7420 = vmatprep.subr.bf16.mxu0 %v10797_v29 }
  0x80   :  { %7452 = vmatprep.subr.bf16.mxu1 %v10806_v46 }
  0x82   :  { %7422 = vmatpush1.bf16.msra.mxu0 %v10815_v51 }
  0x83   :  { %7454 = vmatpush1.bf16.msra.mxu1 %v10819_v54  ;;  %7456 = vmatprep.subr.bf16.mxu0 %v10252_v10 }
  0x84   :  { %7488 = vmatprep.subr.bf16.mxu1 %v10263_v14 }
  0x85   :  { %867 = vmatmul.mubr.f32.vlgmr.msra.gmra.mrb[6].mxu0 %v13126_v63 }
  0x86   :  { %938 = vmatmul.mubr.f32.vlgmr.msra.gmra.mrb[6].mxu1 %v13126_v63  ;;  %7458 = vmatpush1.bf16.msra.mxu0 %v10280_v20 }
  0x87   :  { %7490 = vmatpush1.bf16.msra.mxu1 %v10283_v21  ;;  %7460 = vmatprep.subr.bf16.mxu0 %v10285_v22 }
  0x88   :  { %7492 = vmatprep.subr.bf16.mxu1 %v10297_v26  ;;  %1113 = vmatprep.mubr.f32.mxu0 %v13126_v63 }
  0x89   :  { %1184 = vmatprep.mubr.f32.mxu1 %v13126_v63 }
  0x8a   :  { %7462 = vmatpush1.bf16.msra.mxu0 %v10317_v32 }
  0x8b   :  { %7494 = vmatpush1.bf16.msra.mxu1 %v10321_v33  ;;  %7464 = vmatprep.subr.bf16.mxu0 %v10323_v34 }
  0x8c   :  { %7496 = vmatprep.subr.bf16.mxu1 %v10335_v37 }
  0x8e   :  { %7466 = vmatpush1.bf16.msra.mxu0 %v10355_v43 }
  0x8f   :  { %7498 = vmatpush1.bf16.msra.mxu1 %v10359_v44  ;;  %7468 = vmatprep.subr.bf16.mxu0 %v10361_v45 }
  0x90   :  { %7500 = vmatprep.subr.bf16.mxu1 %v10373_v50 }
  0x92   :  { %7470 = vmatpush1.bf16.msra.mxu0 %v10391_v56 }
  0x93   :  { %7502 = vmatpush1.bf16.msra.mxu1 %v10395_v57  ;;  %7472 = vmatprep.subr.bf16.mxu0 %v10397_v58 }
  0x94   :  { %7504 = vmatprep.subr.bf16.mxu1 %v10409_v62 }
  0x96   :  { %7474 = vmatpush1.bf16.msra.mxu0 %v10427_v4  ;;  %v197_v4 = vsub.s32 7, %v168_v28 }
  0x97   :  { %7506 = vmatpush1.bf16.msra.mxu1 %v10431_v5  ;;  %7476 = vmatprep.subr.bf16.mxu0 %v10433_v6  ;;  %v193_v6 = vsub.s32 6, %v168_v28  ;;  %v189_v5 = vsub.s32 5, %v168_v28 }
  0x98   :  { %7508 = vmatprep.subr.bf16.mxu1 %v10445_v12  ;;  %v185_v12 = vsub.s32 4, %v168_v28  ;;  %v198_v56 = vrot.slane %v165_v9, %v197_v4 }
  0x99   :  { %v194_v58 = vrot.slane %v165_v9, %v193_v6  ;;  %v190_v57 = vrot.slane %v165_v9, %v189_v5 }
  0x9a   :  { %7478 = vmatpush1.bf16.msra.mxu0 %v10463_v19  ;;  %v186_v62 = vrot.slane %v165_v9, %v185_v12 }
  0x9b   :  { %7510 = vmatpush1.bf16.msra.mxu1 %v10470_v24  ;;  %7480 = vmatprep.subr.bf16.mxu0 %v10472_v25 }
  0x9c   :  { %7512 = vmatprep.subr.bf16.mxu1 %v10484_v30 }
  0x9e   :  { %7482 = vmatpush1.bf16.msra.mxu0 %v10499_v38 }
  0x9f   :  { %7514 = vmatpush1.bf16.msra.mxu1 %v10503_v39  ;;  %7484 = vmatprep.subr.bf16.mxu0 %v10505_v40 }
  0xa0   :  { %7516 = vmatprep.subr.bf16.mxu1 %v10517_v47  ;;  %v10871_v47 = vsub.s32 3, %v168_v28 }
  0xa2   :  { %7486 = vmatpush1.bf16.msra.mxu0 %v10535_v55  ;;  %v182_v23 = vrot.slane %v165_v9, %v10871_v47 }
  0xa3   :  { %7518 = vmatpush1.bf16.msra.mxu1 %v10539_v59  ;;  %7520 = vmatprep.subr.bf16.mxu0 %v10541_v60  ;;  %v170_v59 = vrot.slane %v165_v9, %v10862_v0  ;;  %v178_v60 = vrot.slane %v165_v9, %v10867_v49 }
  0xa4   :  { %7552 = vmatprep.subr.bf16.mxu1 %v10553_v1  ;;  %v174_v1 = vrot.slane %v165_v9, %v10869_v31 }
  0xf8   :  { %v273_v55 = vpop.f32.mrb[0].mxu0 }
  0xf9   :  { %v274_v40 = vadd.f32 %v273_v55, %v170_v59  ;;  %v344_v39 = vpop.f32.mrb[0].mxu1  ;;  %v275_v38 = vpop.f32.mrb[1].mxu0 }
  0xfa   :  { %v345_v30 = vadd.f32 %v344_v39, %v178_v60  ;;  %v276_v25 = vadd.f32 %v275_v38, %v174_v1  ;;  %v346_v24 = vpop.f32.mrb[1].mxu1 }
  0xfb   :  { %491 = vst [vmem:[#allocation2] sm:$0xff] %v274_v40  ;;  %v347_v19 = vadd.f32 %v346_v24, %v182_v23 }
  0xfc   :  { %493 = vst [vmem:[#allocation2 + $0x10] sm:$0xff] %v345_v30  ;;  %492 = vst [vmem:[#allocation2 + $0x8] sm:$0xff] %v276_v25 }
  0xfd   :  { %494 = vst [vmem:[#allocation2 + $0x18] sm:$0xff] %v347_v19  ;;  %v9786_v19 = vmov 1966171168  }
  0xfe   :  { %v777_v25 = vunpack.c.l.s4 %v9786_v19 }
 0x100   :  { %v778_v30 = vunpack.c.0.s8 %v777_v25 }
 0x102   :  { %v10877_v40 = vsub.s32 %v778_v30, %v168_v28 }
 0x118   :  { %v415_v50 = vpop.f32.mrb[2].mxu0 }
 0x119   :  { %v416_v55 = vadd.f32 %v415_v50, %v186_v62  ;;  %v486_v59 = vpop.f32.mrb[2].mxu1  ;;  %v417_v45 = vpop.f32.mrb[3].mxu0 }
 0x11a   :  { %v487_v39 = vadd.f32 %v486_v59, %v194_v58  ;;  %v418_v38 = vadd.f32 %v417_v45, %v190_v57  ;;  %v488_v60 = vpop.f32.mrb[3].mxu1 }
 0x11b   :  { %495 = vst [vmem:[#allocation3] sm:$0xff] %v416_v55  ;;  %v489_v24 = vadd.f32 %v488_v60, %v198_v56  ;;  %v627_v60 = vld [vmem:[#allocation2] ss:$8 sm:$0xf] }
 0x11c   :  { %497 = vst [vmem:[#allocation3 + $0x10] sm:$0xff] %v487_v39  ;;  %496 = vst [vmem:[#allocation3 + $0x8] sm:$0xff] %v418_v38 }
 0x11d   :  { %498 = vst [vmem:[#allocation3 + $0x18] sm:$0xff] %v489_v24 }
 0x124   :  { %v801_v30 = vld [vmem:[#allocation3 + $0x7] ss:$8 sm:$0xf] }
 0x138   :  { %v694_v6 = vpop.f32.mrb[4].mxu0 }
 0x139   :  { %v765_v5 = vpop.f32.mrb[4].mxu1  ;;  %v696_v4 = vpop.f32.mrb[5].mxu0 }
 0x13a   :  { %v774_v12 = vcombine.low %v694_v6, %v696_v4  ;;  %v767_v50 = vpop.f32.mrb[5].mxu1 }
 0x13b   :  { %v775_v62 = vcombine.low %v765_v5, %v767_v50 }
 0x13c   :  { %v782_v58 = vrot.slane %v774_v12, %v10877_v40 }
 0x13d   :  { %v789_v45 = vrot.slane %v775_v62, %v10877_v40 }
 0x13f   :  { %v790_v57 = vcombine.low %v782_v58, %v789_v45 }
 0x141   :  { %v797_v28 = vrot.slane %v790_v57, %v10877_v40 }
 0x143   :  { %v799_v19 = vadd.f32 %v797_v28, %v627_v60 }
 0x145   :  { %v978_v5 = vrot.slane %v799_v19, %v10862_v0  ;;  %v982_v4 = vrot.slane %v799_v19, %v10869_v31  ;;  %v986_v12 = vrot.slane %v799_v19, %v10867_v49  ;;  %v990_v50 = vrot.slane %v799_v19, %v10871_v47 }
 0x158   :  { %v868_v56 = vpop.f32.mrb[6].mxu0 }
 0x159   :  { %v939_v1 = vpop.f32.mrb[6].mxu1  ;;  %v870_v9 = vpop.f32.mrb[7].mxu0 }
 0x15a   :  { %v948_v23 = vcombine.low %v868_v56, %v870_v9  ;;  %v941_v55 = vpop.f32.mrb[7].mxu1 }
 0x15b   :  { %v949_v59 = vcombine.low %v939_v1, %v941_v55 }
 0x15c   :  { %v956_v39 = vrot.slane %v948_v23, %v10877_v40 }
 0x15d   :  { %v963_v38 = vrot.slane %v949_v59, %v10877_v40 }
 0x15f   :  { %v964_v24 = vcombine.low %v956_v39, %v963_v38 }
 0x161   :  { %v971_v25 = vrot.slane %v964_v24, %v10877_v40 }
 0x163   :  { %v973_v6 = vadd.f32 %v971_v25, %v801_v30 }
 0x165   :  { %v999_v62 = vrot.slane %v973_v6, %v10862_v0  ;;  %v1003_v58 = vrot.slane %v973_v6, %v10869_v31  ;;  %v1007_v45 = vrot.slane %v973_v6, %v10867_v49  ;;  %v1011_v57 = vrot.slane %v973_v6, %v10871_v47 }
 0x167   :  { %v1017_v56 = vsel %vm1016_vm0, %v978_v5, %v999_v62  ;;  %v1018_v1 = vsel %vm1016_vm0, %v982_v4, %v1003_v58  ;;  %v1019_v9 = vsel %vm1016_vm0, %v986_v12, %v1007_v45  ;;  %v1020_v23 = vsel %vm1016_vm0, %v990_v50, %v1011_v57  ;;  %v13129_v57 = vld [vmem:[#allocation39_spill] sm:$0xff] }
 0x168   :  { %v7031_v55 = vmul.f32 -1.442695, %v1017_v56  ;;  %v7032_v59 = vmul.f32 -1.442695, %v1018_v1  ;;  %v7033_v28 = vmul.f32 -1.442695, %v1020_v23 }
 0x169   :  { %v13130_v56 = vld [vmem:[#allocation40_spill] sm:$0xff]  ;;  %v13131_v1 = vld [vmem:[#allocation41_spill] sm:$0xff]  ;;  %v13133_v23 = vld [vmem:[#allocation43_spill] sm:$0xff] }
 0x16a   :  { %9444 = vpow2.f32 %v7031_v55  ;;  %v13134_v55 = vld [vmem:[#allocation44_spill] sm:$0xff] }
 0x16b   :  { %9446 = vpow2.f32 %v7032_v59  ;;  %v13135_v59 = vld [vmem:[#allocation45_spill] sm:$0xff] }
 0x16c   :  { %9448 = vpow2.f32 %v7033_v28 }
 0x16d   :  { %9450 = vtanh.f32 %v1019_v9  ;;  %v13132_v9 = vld [vmem:[#allocation42_spill] sm:$0xff] }
 0x174   :  { %v9445_v39 = vpop.eup %9444 }
 0x175   :  { %v9447_v38 = vpop.eup %9446  ;;  %v1024_v60 = vadd.f32 1.0, %v9445_v39  ;;  %v13136_v39 = vld [vmem:[#allocation17_spill] sm:$0xff] }
 0x176   :  { %v1030_v24 = vadd.f32 1.0, %v9447_v38  ;;  %v9449_v19 = vpop.eup %9448  ;;  %v13137_v38 = vld [vmem:[#allocation18_spill] sm:$0xff] }
 0x177   :  { %9452 = vrcp.f32 %v1024_v60  ;;  %v9451_v25 = vpop.eup %9450  ;;  %v1037_v5 = vadd.f32 1.0, %v9449_v19  ;;  %v13138_v60 = vld [vmem:[#allocation19_spill] sm:$0xff]  ;;  %v13140_v19 = vld [vmem:[#allocation21_spill] sm:$0xff] }
 0x178   :  { %9454 = vrcp.f32 %v1030_v24  ;;  %v13139_v24 = vld [vmem:[#allocation20_spill] sm:$0xff] }
 0x179   :  { %9456 = vrcp.f32 %v1037_v5  ;;  %v13144_v5 = vld [vmem:[#allocation25_spill] sm:$0xff] }
 0x181   :  { %v9453_v30 = vpop.eup %9452 }
 0x182   :  { %v9455_v6 = vpop.eup %9454  ;;  %v1041_v4 = vmul.f32 %v9453_v30, %v9451_v25  ;;  %v13141_v25 = vld [vmem:[#allocation22_spill] sm:$0xff]  ;;  %v13142_v30 = vld [vmem:[#allocation23_spill] sm:$0xff] }
 0x183   :  { %v1040_v12 = vmul.f32 0.0, %v9455_v6  ;;  %v9457_v62 = vpop.eup %9456  ;;  %v13143_v6 = vld [vmem:[#allocation24_spill] sm:$0xff] }
 0x185   :  { %v10897_v50 = vadd.f32 %v1041_v4, %v1040_v12  ;;  %v13145_v4 = vld [vmem:[#allocation26_spill] sm:$0xff]  ;;  %v13146_v12 = vld [vmem:[#allocation27_spill] sm:$0xff] }
 0x187   :  { %9458 = vtanh.f32 %v10897_v50 }
 0x191   :  { %v9459_v58 = vpop.eup %9458 }
 0x192   :  { %v1044_v45 = vmul.f32 %v9459_v58, %v9457_v62  ;;  %v13147_v62 = vld [vmem:[#allocation28_spill] sm:$0xff]  ;;  %v13148_v58 = vld [vmem:[#allocation29_spill] sm:$0xff] }
 0x194   :  { %1045 = vst [vmem:[#allocation4] sm:$0x1] %v1044_v45  ;;  %1046 = vst [vmem:[#allocation5 + $0x6] sm:$0x2] %v1044_v45  ;;  %1114 = vmatmul.mubr.f32.vlgmr.msra.gmra.mrb[8].mxu0 %v1044_v45  ;;  %1185 = vmatmul.mubr.f32.vlgmr.msra.gmra.mrb[8].mxu1 %v1044_v45  ;;  %v1224_v28 = vrot.slane %v1044_v45, 1  ;;  %v13149_v45 = vld [vmem:[#allocation30_spill] sm:$0xff] }
 0x195   :  { %7522 = vmatpush1.bf16.msra.mxu0 %v10571_v13  ;;  %7554 = vmatpush1.bf16.msra.mxu1 %v10575_v15 }
 0x196   :  { %7524 = vmatprep.subr.bf16.mxu0 %v10577_v16  ;;  %7556 = vmatprep.subr.bf16.mxu1 %v10589_v27 }
 0x197   :  { %1290 = vmatprep.mubr.f32.mxu0 %v13126_v63  ;;  %1361 = vmatprep.mubr.f32.mxu1 %v13126_v63 }
 0x199   :  { %7526 = vmatpush1.bf16.msra.mxu0 %v10609_v36  ;;  %7558 = vmatpush1.bf16.msra.mxu1 %v10613_v41 }
 0x19a   :  { %7528 = vmatprep.subr.bf16.mxu0 %v10615_v42  ;;  %7560 = vmatprep.subr.bf16.mxu1 %v10627_v52 }
 0x19d   :  { %7530 = vmatpush1.bf16.msra.mxu0 %v10647_v2  ;;  %7562 = vmatpush1.bf16.msra.mxu1 %v10651_v3 }
 0x19e   :  { %7532 = vmatprep.subr.bf16.mxu0 %v10653_v8  ;;  %7564 = vmatprep.subr.bf16.mxu1 %v10665_v18 }
 0x1a1   :  { %7534 = vmatpush1.bf16.msra.mxu0 %v10683_v48  ;;  %7566 = vmatpush1.bf16.msra.mxu1 %v13129_v57 }
 0x1a2   :  { %7536 = vmatprep.subr.bf16.mxu0 %v13130_v56  ;;  %7568 = vmatprep.subr.bf16.mxu1 %v13131_v1 }
 0x1a5   :  { %7538 = vmatpush1.bf16.msra.mxu0 %v13132_v9  ;;  %7570 = vmatpush1.bf16.msra.mxu1 %v13133_v23 }
 0x1a6   :  { %7540 = vmatprep.subr.bf16.mxu0 %v13134_v55  ;;  %7572 = vmatprep.subr.bf16.mxu1 %v13135_v59 }
 0x1a9   :  { %7542 = vmatpush1.bf16.msra.mxu0 %v10755_v17  ;;  %7574 = vmatpush1.bf16.msra.mxu1 %v10759_v7 }
 0x1aa   :  { %7544 = vmatprep.subr.bf16.mxu0 %v10761_v61  ;;  %7576 = vmatprep.subr.bf16.mxu1 %v10773_v35 }
 0x1ad   :  { %7546 = vmatpush1.bf16.msra.mxu0 %v10791_v11  ;;  %7578 = vmatpush1.bf16.msra.mxu1 %v10795_v53 }
 0x1ae   :  { %7548 = vmatprep.subr.bf16.mxu0 %v10797_v29  ;;  %7580 = vmatprep.subr.bf16.mxu1 %v10806_v46 }
 0x1b1   :  { %7550 = vmatpush1.bf16.msra.mxu0 %v10815_v51  ;;  %7582 = vmatpush1.bf16.msra.mxu1 %v10819_v54 }
 0x1b2   :  { %7584 = vmatprep.subr.bf16.mxu0 %v10252_v10  ;;  %7616 = vmatprep.subr.bf16.mxu1 %v10263_v14 }
 0x1b4   :  { %1291 = vmatmul.mubr.f32.vlgmr.msra.gmra.mrb[10].mxu0 %v1224_v28  ;;  %1362 = vmatmul.mubr.f32.vlgmr.msra.gmra.mrb[10].mxu1 %v1224_v28  ;;  %v13150_v28 = vld [vmem:[#allocation31_spill] sm:$0xff] }
 0x1b5   :  { %7586 = vmatpush1.bf16.msra.mxu0 %v10280_v20  ;;  %7618 = vmatpush1.bf16.msra.mxu1 %v10283_v21 }
 0x1b6   :  { %7588 = vmatprep.subr.bf16.mxu0 %v10285_v22  ;;  %7620 = vmatprep.subr.bf16.mxu1 %v10297_v26 }
 0x1b7   :  { %1536 = vmatprep.mubr.f32.mxu0 %v13126_v63  ;;  %1607 = vmatprep.mubr.f32.mxu1 %v13126_v63 }
 0x1b9   :  { %7590 = vmatpush1.bf16.msra.mxu0 %v10317_v32  ;;  %7622 = vmatpush1.bf16.msra.mxu1 %v10321_v33 }
 0x1ba   :  { %7592 = vmatprep.subr.bf16.mxu0 %v10323_v34  ;;  %7624 = vmatprep.subr.bf16.mxu1 %v10335_v37  ;;  %v1048_v34 = vld [vmem:[#allocation2 + $0x1] ss:$8 sm:$0xf] }
 0x1bd   :  { %7594 = vmatpush1.bf16.msra.mxu0 %v10355_v43  ;;  %7626 = vmatpush1.bf16.msra.mxu1 %v10359_v44 }
 0x1be   :  { %7596 = vmatprep.subr.bf16.mxu0 %v13136_v39  ;;  %7628 = vmatprep.subr.bf16.mxu1 %v13137_v38 }
 0x1c1   :  { %7598 = vmatpush1.bf16.msra.mxu0 %v13138_v60  ;;  %7630 = vmatpush1.bf16.msra.mxu1 %v13139_v24 }
 0x1c2   :  { %7600 = vmatprep.subr.bf16.mxu0 %v13140_v19  ;;  %7632 = vmatprep.subr.bf16.mxu1 %v13141_v25  ;;  %v13151_v19 = vld [vmem:[#allocation32_spill] sm:$0xff]  ;;  %v13152_v25 = vld [vmem:[#allocation33_spill] sm:$0xff] }
 0x1c5   :  { %7602 = vmatpush1.bf16.msra.mxu0 %v13142_v30  ;;  %7634 = vmatpush1.bf16.msra.mxu1 %v13143_v6  ;;  %v13153_v30 = vld [vmem:[#allocation34_spill] sm:$0xff]  ;;  %v13154_v6 = vld [vmem:[#allocation35_spill] sm:$0xff] }
 0x1c6   :  { %7604 = vmatprep.subr.bf16.mxu0 %v13144_v5  ;;  %7636 = vmatprep.subr.bf16.mxu1 %v13145_v4  ;;  %v13155_v5 = vld [vmem:[#allocation36_spill] sm:$0xff]  ;;  %v13156_v4 = vld [vmem:[#allocation37_spill] sm:$0xff] }
 0x1c9   :  { %7606 = vmatpush1.bf16.msra.mxu0 %v13146_v12  ;;  %7638 = vmatpush1.bf16.msra.mxu1 %v13147_v62  ;;  %v13157_v12 = vld [vmem:[#allocation38_spill] sm:$0xff] }
 0x1ca   :  { %7608 = vmatprep.subr.bf16.mxu0 %v13148_v58  ;;  %7640 = vmatprep.subr.bf16.mxu1 %v13149_v45 }
 0x1cd   :  { %7610 = vmatpush1.bf16.msra.mxu0 %v13150_v28  ;;  %7642 = vmatpush1.bf16.msra.mxu1 %v13151_v19 }
 0x1ce   :  { %7612 = vmatprep.subr.bf16.mxu0 %v13152_v25  ;;  %7644 = vmatprep.subr.bf16.mxu1 %v13153_v30 }
 0x1d1   :  { %7614 = vmatpush1.bf16.msra.mxu0 %v13154_v6  ;;  %7646 = vmatpush1.bf16.msra.mxu1 %v13155_v5 }
 0x1d2   :  { %7648 = vmatprep.subr.bf16.mxu0 %v13156_v4  ;;  %7680 = vmatprep.subr.bf16.mxu1 %v13157_v12 }
 0x267   :  { %v1115_v62 = vpop.f32.mrb[8].mxu0  ;;  %v1186_v58 = vpop.f32.mrb[8].mxu1 }
 0x268   :  { %v1117_v24 = vpop.f32.mrb[9].mxu0  ;;  %v1188_v45 = vpop.f32.mrb[9].mxu1 }
 0x269   :  { %v1195_v60 = vcombine.low %v1115_v62, %v1117_v24  ;;  %v1196_v28 = vcombine.low %v1186_v58, %v1188_v45  ;;  %v1222_v58 = vld [vmem:[#allocation3 + $0x6] ss:$8 sm:$0xf] }
 0x26b   :  { %v1203_v19 = vrot.slane %v1195_v60, %v10877_v40  ;;  %v1210_v25 = vrot.slane %v1196_v28, %v10877_v40 }
 0x26d   :  { %v1211_v38 = vcombine.low %v1203_v19, %v1210_v25 }
 0x26f   :  { %v1218_v4 = vrot.slane %v1211_v38, %v10877_v40 }
 0x271   :  { %v1220_v62 = vadd.f32 %v1218_v4, %v1048_v34 }
 0x273   :  { %v1402_v19 = vrot.slane %v1220_v62, %v10862_v0  ;;  %v1406_v25 = vrot.slane %v1220_v62, %v10869_v31 }
 0x287   :  { %v1292_v30 = vpop.f32.mrb[10].mxu0  ;;  %v1363_v39 = vpop.f32.mrb[10].mxu1 }
 0x288   :  { %v1294_v6 = vpop.f32.mrb[11].mxu0  ;;  %v1365_v44 = vpop.f32.mrb[11].mxu1 }
 0x289   :  { %v1372_v5 = vcombine.low %v1292_v30, %v1294_v6  ;;  %v1373_v43 = vcombine.low %v1363_v39, %v1365_v44  ;;  %v1410_v30 = vrot.slane %v1220_v62, %v10867_v49  ;;  %v1414_v44 = vrot.slane %v1220_v62, %v10871_v47 }
 0x28b   :  { %v1380_v12 = vrot.slane %v1372_v5, %v10877_v40  ;;  %v1387_v37 = vrot.slane %v1373_v43, %v10877_v40 }
 0x28d   :  { %v1388_v24 = vcombine.low %v1380_v12, %v1387_v37 }
 0x28f   :  { %v1395_v60 = vrot.slane %v1388_v24, %v10877_v40 }
 0x291   :  { %v1397_v45 = vadd.f32 %v1395_v60, %v1222_v58 }
 0x293   :  { %v1423_v39 = vrot.slane %v1397_v45, %v10862_v0  ;;  %v1427_v38 = vrot.slane %v1397_v45, %v10869_v31  ;;  %v1431_v43 = vrot.slane %v1397_v45, %v10867_v49  ;;  %v1435_v34 = vrot.slane %v1397_v45, %v10871_v47 }
 0x295   :  { %v1440_v37 = vsel %vm1016_vm0, %v1402_v19, %v1423_v39  ;;  %v1441_v6 = vsel %vm1016_vm0, %v1406_v25, %v1427_v38  ;;  %v1442_v5 = vsel %vm1016_vm0, %v1410_v30, %v1431_v43  ;;  %v1443_v4 = vsel %vm1016_vm0, %v1414_v44, %v1435_v34 }
 0x296   :  { %v7034_v12 = vmul.f32 -1.442695, %v1440_v37  ;;  %v7035_v28 = vmul.f32 -1.442695, %v1441_v6  ;;  %v7036_v24 = vmul.f32 -1.442695, %v1443_v4 }
 0x297   :  { %v13160_v4 = vld [vmem:[#allocation15_spill] sm:$0xff] }
 0x298   :  { %9460 = vpow2.f32 %v7034_v12  ;;  %v13161_v12 = vld [vmem:[#allocation16_spill] sm:$0xff] }
 0x299   :  { %9462 = vpow2.f32 %v7035_v28  ;;  %v13162_v28 = vld [vmem:[#allocation17_spill] sm:$0xff] }
 0x29a   :  { %9464 = vpow2.f32 %v7036_v24  ;;  %v13163_v24 = vld [vmem:[#allocation18_spill] sm:$0xff] }
 0x29b   :  { %9466 = vtanh.f32 %v1442_v5  ;;  %v13159_v5 = vld [vmem:[#allocation14_spill] sm:$0xff] }
 0x2a2   :  { %v9461_v62 = vpop.eup %9460 }
 0x2a3   :  { %v9463_v60 = vpop.eup %9462  ;;  %v1447_v58 = vadd.f32 1.0, %v9461_v62  ;;  %v13164_v62 = vld [vmem:[#allocation19_spill] sm:$0xff] }
 0x2a4   :  { %v1453_v49 = vadd.f32 1.0, %v9463_v60  ;;  %v9465_v45 = vpop.eup %9464  ;;  %v13165_v60 = vld [vmem:[#allocation20_spill] sm:$0xff] }
 0x2a5   :  { %9468 = vrcp.f32 %v1447_v58  ;;  %v9467_v19 = vpop.eup %9466  ;;  %v1460_v30 = vadd.f32 1.0, %v9465_v45  ;;  %v13166_v58 = vld [vmem:[#allocation21_spill] sm:$0xff]  ;;  %v13167_v45 = vld [vmem:[#allocation22_spill] sm:$0xff] }
 0x2a6   :  { %9470 = vrcp.f32 %v1453_v49 }
 0x2a7   :  { %9472 = vrcp.f32 %v1460_v30  ;;  %v13171_v30 = vld [vmem:[#allocation26_spill] sm:$0xff] }
 0x2af   :  { %v9469_v25 = vpop.eup %9468 }
 0x2b0   :  { %v9471_v39 = vpop.eup %9470  ;;  %v1464_v38 = vmul.f32 %v9469_v25, %v9467_v19  ;;  %v13168_v19 = vld [vmem:[#allocation23_spill] sm:$0xff]  ;;  %v13169_v25 = vld [vmem:[#allocation24_spill] sm:$0xff] }
 0x2b1   :  { %v1463_v44 = vmul.f32 %v9471_v39, %v10897_v50  ;;  %v9473_v34 = vpop.eup %9472  ;;  %v13158_v50 = vld [vmem:[#allocation13_spill] sm:$0xff] }
 0x2b2   :  { %v13170_v39 = vld [vmem:[#allocation25_spill] sm:$0xff] }
 0x2b3   :  { %v10987_v43 = vadd.f32 %v1464_v38, %v1463_v44  ;;  %v13172_v38 = vld [vmem:[#allocation27_spill] sm:$0xff]  ;;  %v13173_v44 = vld [vmem:[#allocation28_spill] sm:$0xff] }
 0x2b5   :  { %9474 = vtanh.f32 %v10987_v43 }
 0x2bf   :  { %v9475_v37 = vpop.eup %9474 }
 0x2c0   :  { %v1467_v6 = vmul.f32 %v9475_v37, %v9473_v34  ;;  %v13174_v34 = vld [vmem:[#allocation29_spill] sm:$0xff]  ;;  %v13175_v37 = vld [vmem:[#allocation30_spill] sm:$0xff] }
 0x2c2   :  { %1468 = vst [vmem:[#allocation4 + $0x1] sm:$0x1] %v1467_v6  ;;  %1469 = vst [vmem:[#allocation5 + $0x5] sm:$0x2] %v1467_v6  ;;  %1537 = vmatmul.mubr.f32.vlgmr.msra.gmra.mrb[12].mxu0 %v1467_v6  ;;  %1608 = vmatmul.mubr.f32.vlgmr.msra.gmra.mrb[12].mxu1 %v1467_v6  ;;  %v1647_v49 = vrot.slane %v1467_v6, 1  ;;  %v13176_v6 = vld [vmem:[#allocation31_spill] sm:$0xff] }
 0x2c3   :  { %7650 = vmatpush1.bf16.msra.mxu0 %v10571_v13  ;;  %7682 = vmatpush1.bf16.msra.mxu1 %v10575_v15 }
 0x2c4   :  { %7652 = vmatprep.subr.bf16.mxu0 %v10577_v16  ;;  %7684 = vmatprep.subr.bf16.mxu1 %v10589_v27 }
 0x2c5   :  { %1713 = vmatprep.mubr.f32.mxu0 %v13126_v63  ;;  %1784 = vmatprep.mubr.f32.mxu1 %v13126_v63 }
 0x2c7   :  { %7654 = vmatpush1.bf16.msra.mxu0 %v10609_v36  ;;  %7686 = vmatpush1.bf16.msra.mxu1 %v10613_v41 }
 0x2c8   :  { %7656 = vmatprep.subr.bf16.mxu0 %v10615_v42  ;;  %7688 = vmatprep.subr.bf16.mxu1 %v10627_v52 }
 0x2cb   :  { %7658 = vmatpush1.bf16.msra.mxu0 %v10647_v2  ;;  %7690 = vmatpush1.bf16.msra.mxu1 %v10651_v3 }
 0x2cc   :  { %7660 = vmatprep.subr.bf16.mxu0 %v10653_v8  ;;  %7692 = vmatprep.subr.bf16.mxu1 %v10665_v18 }
 0x2cf   :  { %7662 = vmatpush1.bf16.msra.mxu0 %v10683_v48  ;;  %7694 = vmatpush1.bf16.msra.mxu1 %v13129_v57 }
 0x2d0   :  { %7664 = vmatprep.subr.bf16.mxu0 %v13130_v56  ;;  %7696 = vmatprep.subr.bf16.mxu1 %v13131_v1 }
 0x2d3   :  { %7666 = vmatpush1.bf16.msra.mxu0 %v13132_v9  ;;  %7698 = vmatpush1.bf16.msra.mxu1 %v13133_v23 }
 0x2d4   :  { %7668 = vmatprep.subr.bf16.mxu0 %v13134_v55  ;;  %7700 = vmatprep.subr.bf16.mxu1 %v13135_v59 }
 0x2d7   :  { %7670 = vmatpush1.bf16.msra.mxu0 %v10755_v17  ;;  %7702 = vmatpush1.bf16.msra.mxu1 %v10759_v7 }
 0x2d8   :  { %7672 = vmatprep.subr.bf16.mxu0 %v10761_v61  ;;  %7704 = vmatprep.subr.bf16.mxu1 %v10773_v35 }
 0x2db   :  { %7674 = vmatpush1.bf16.msra.mxu0 %v10791_v11  ;;  %7706 = vmatpush1.bf16.msra.mxu1 %v10795_v53 }
 0x2dc   :  { %7676 = vmatprep.subr.bf16.mxu0 %v10797_v29  ;;  %7708 = vmatprep.subr.bf16.mxu1 %v10806_v46 }
 0x2df   :  { %7678 = vmatpush1.bf16.msra.mxu0 %v10815_v51  ;;  %7710 = vmatpush1.bf16.msra.mxu1 %v10819_v54 }
 0x2e0   :  { %7712 = vmatprep.subr.bf16.mxu0 %v10252_v10  ;;  %7744 = vmatprep.subr.bf16.mxu1 %v10263_v14 }
 0x2e2   :  { %1714 = vmatmul.mubr.f32.vlgmr.msra.gmra.mrb[14].mxu0 %v1647_v49  ;;  %1785 = vmatmul.mubr.f32.vlgmr.msra.gmra.mrb[14].mxu1 %v1647_v49  ;;  %v13177_v49 = vld [vmem:[#allocation32_spill] sm:$0xff] }
 0x2e3   :  { %7714 = vmatpush1.bf16.msra.mxu0 %v10280_v20  ;;  %7746 = vmatpush1.bf16.msra.mxu1 %v10283_v21 }
 0x2e4   :  { %7716 = vmatprep.subr.bf16.mxu0 %v10285_v22  ;;  %7748 = vmatprep.subr.bf16.mxu1 %v10297_v26 }
 0x2e5   :  { %1959 = vmatprep.mubr.f32.mxu0 %v13126_v63  ;;  %2030 = vmatprep.mubr.f32.mxu1 %v13126_v63 }
 0x2e7   :  { %7718 = vmatpush1.bf16.msra.mxu0 %v10317_v32  ;;  %7750 = vmatpush1.bf16.msra.mxu1 %v10321_v33 }
 0x2e8   :  { %7720 = vmatprep.subr.bf16.mxu0 %v13158_v50  ;;  %7752 = vmatprep.subr.bf16.mxu1 %v13159_v5  ;;  %v1471_v5 = vld [vmem:[#allocation2 + $0x2] ss:$8 sm:$0xf] }
 0x2eb   :  { %7722 = vmatpush1.bf16.msra.mxu0 %v13160_v4  ;;  %7754 = vmatpush1.bf16.msra.mxu1 %v13161_v12 }
 0x2ec   :  { %7724 = vmatprep.subr.bf16.mxu0 %v13162_v28  ;;  %7756 = vmatprep.subr.bf16.mxu1 %v13163_v24 }
 0x2ef   :  { %7726 = vmatpush1.bf16.msra.mxu0 %v13164_v62  ;;  %7758 = vmatpush1.bf16.msra.mxu1 %v13165_v60 }
 0x2f0   :  { %7728 = vmatprep.subr.bf16.mxu0 %v13166_v58  ;;  %7760 = vmatprep.subr.bf16.mxu1 %v13167_v45  ;;  %v13178_v45 = vld [vmem:[#allocation33_spill] sm:$0xff] }
 0x2f3   :  { %7730 = vmatpush1.bf16.msra.mxu0 %v13168_v19  ;;  %7762 = vmatpush1.bf16.msra.mxu1 %v13169_v25  ;;  %v13179_v19 = vld [vmem:[#allocation34_spill] sm:$0xff]  ;;  %v13180_v25 = vld [vmem:[#allocation35_spill] sm:$0xff] }
 0x2f4   :  { %7732 = vmatprep.subr.bf16.mxu0 %v13170_v39  ;;  %7764 = vmatprep.subr.bf16.mxu1 %v13171_v30  ;;  %v13181_v39 = vld [vmem:[#allocation36_spill] sm:$0xff]  ;;  %v13182_v30 = vld [vmem:[#allocation37_spill] sm:$0xff] }
 0x2f7   :  { %7734 = vmatpush1.bf16.msra.mxu0 %v13172_v38  ;;  %7766 = vmatpush1.bf16.msra.mxu1 %v13173_v44  ;;  %v13183_v38 = vld [vmem:[#allocation38_spill] sm:$0xff] }
 0x2f8   :  { %7736 = vmatprep.subr.bf16.mxu0 %v13174_v34  ;;  %7768 = vmatprep.subr.bf16.mxu1 %v13175_v37 }
 0x2fb   :  { %7738 = vmatpush1.bf16.msra.mxu0 %v13176_v6  ;;  %7770 = vmatpush1.bf16.msra.mxu1 %v13177_v49 }
 0x2fc   :  { %7740 = vmatprep.subr.bf16.mxu0 %v13178_v45  ;;  %7772 = vmatprep.subr.bf16.mxu1 %v13179_v19 }
 0x2ff   :  { %7742 = vmatpush1.bf16.msra.mxu0 %v13180_v25  ;;  %7774 = vmatpush1.bf16.msra.mxu1 %v13181_v39 }
 0x300   :  { %7776 = vmatprep.subr.bf16.mxu0 %v13182_v30  ;;  %7808 = vmatprep.subr.bf16.mxu1 %v13183_v38 }
 0x395   :  { %v1538_v44 = vpop.f32.mrb[12].mxu0  ;;  %v1609_v34 = vpop.f32.mrb[12].mxu1 }
 0x396   :  { %v1540_v58 = vpop.f32.mrb[13].mxu0  ;;  %v1611_v37 = vpop.f32.mrb[13].mxu1 }
 0x397   :  { %v1618_v60 = vcombine.low %v1538_v44, %v1540_v58  ;;  %v1619_v6 = vcombine.low %v1609_v34, %v1611_v37  ;;  %v1645_v34 = vld [vmem:[#allocation3 + $0x5] ss:$8 sm:$0xf] }
 0x399   :  { %v1626_v49 = vrot.slane %v1618_v60, %v10877_v40  ;;  %v1633_v45 = vrot.slane %v1619_v6, %v10877_v40 }
 0x39b   :  { %v1634_v62 = vcombine.low %v1626_v49, %v1633_v45  ;;  %v13184_v49 = vld [vmem:[#allocation46_spill] sm:$0xff] }
 0x39d   :  { %v1641_v30 = vrot.slane %v1634_v62, %v10877_v40 }
 0x39f   :  { %v1643_v44 = vadd.f32 %v1641_v30, %v1471_v5 }
 0x3a1   :  { %v1825_v45 = vrot.slane %v1643_v44, %v10862_v0  ;;  %v1829_v6 = vrot.slane %v1643_v44, %v10869_v31 }
 0x3b5   :  { %v1715_v19 = vpop.f32.mrb[14].mxu0  ;;  %v1786_v24 = vpop.f32.mrb[14].mxu1 }
 0x3b6   :  { %v1717_v25 = vpop.f32.mrb[15].mxu0  ;;  %v1788_v28 = vpop.f32.mrb[15].mxu1 }
 0x3b7   :  { %v1795_v39 = vcombine.low %v1715_v19, %v1717_v25  ;;  %v1796_v12 = vcombine.low %v1786_v24, %v1788_v28  ;;  %v1833_v19 = vrot.slane %v1643_v44, %v13184_v49  ;;  %v1837_v28 = vrot.slane %v1643_v44, %v10871_v47 }
 0x3b9   :  { %v1803_v38 = vrot.slane %v1795_v39, %v10877_v40  ;;  %v1810_v4 = vrot.slane %v1796_v12, %v10877_v40 }
 0x3bb   :  { %v1811_v58 = vcombine.low %v1803_v38, %v1810_v4 }
 0x3bd   :  { %v1818_v60 = vrot.slane %v1811_v58, %v10877_v40 }
 0x3bf   :  { %v1820_v37 = vadd.f32 %v1818_v60, %v1645_v34 }
 0x3c1   :  { %v1846_v24 = vrot.slane %v1820_v37, %v10862_v0  ;;  %v1850_v62 = vrot.slane %v1820_v37, %v10869_v31  ;;  %v1854_v12 = vrot.slane %v1820_v37, %v13184_v49  ;;  %v1858_v5 = vrot.slane %v1820_v37, %v10871_v47 }
 0x3c3   :  { %v1863_v4 = vsel %vm1016_vm0, %v1825_v45, %v1846_v24  ;;  %v1864_v25 = vsel %vm1016_vm0, %v1829_v6, %v1850_v62  ;;  %v1865_v39 = vsel %vm1016_vm0, %v1833_v19, %v1854_v12  ;;  %v1866_v30 = vsel %vm1016_vm0, %v1837_v28, %v1858_v5 }
 0x3c4   :  { %v7037_v38 = vmul.f32 -1.442695, %v1863_v4  ;;  %v7038_v58 = vmul.f32 -1.442695, %v1864_v25  ;;  %v7039_v44 = vmul.f32 -1.442695, %v1866_v30 }
 0x3c5   :  { %v13188_v30 = vld [vmem:[#allocation17_spill] sm:$0xff] }
 0x3c6   :  { %9476 = vpow2.f32 %v7037_v38  ;;  %v13189_v38 = vld [vmem:[#allocation18_spill] sm:$0xff] }
 0x3c7   :  { %9478 = vpow2.f32 %v7038_v58  ;;  %v13190_v58 = vld [vmem:[#allocation19_spill] sm:$0xff] }
 0x3c8   :  { %9480 = vpow2.f32 %v7039_v44  ;;  %v13191_v44 = vld [vmem:[#allocation20_spill] sm:$0xff] }
 0x3c9   :  { %9482 = vtanh.f32 %v1865_v39  ;;  %v13187_v39 = vld [vmem:[#allocation16_spill] sm:$0xff] }
 0x3d0   :  { %v9477_v60 = vpop.eup %9476 }
 0x3d1   :  { %v9479_v34 = vpop.eup %9478  ;;  %v1870_v31 = vadd.f32 1.0, %v9477_v60  ;;  %v13192_v60 = vld [vmem:[#allocation21_spill] sm:$0xff] }
 0x3d2   :  { %v1876_v49 = vadd.f32 1.0, %v9479_v34  ;;  %v9481_v37 = vpop.eup %9480  ;;  %v13193_v34 = vld [vmem:[#allocation22_spill] sm:$0xff] }
 0x3d3   :  { %9484 = vrcp.f32 %v1870_v31  ;;  %v9483_v45 = vpop.eup %9482  ;;  %v1883_v19 = vadd.f32 1.0, %v9481_v37  ;;  %v13194_v37 = vld [vmem:[#allocation23_spill] sm:$0xff] }
 0x3d4   :  { %9486 = vrcp.f32 %v1876_v49  ;;  %v13186_v49 = vld [vmem:[#allocation15_spill] sm:$0xff] }
 0x3d5   :  { %9488 = vrcp.f32 %v1883_v19  ;;  %v13198_v19 = vld [vmem:[#allocation27_spill] sm:$0xff] }
 0x3dd   :  { %v9485_v6 = vpop.eup %9484 }
 0x3de   :  { %v9487_v24 = vpop.eup %9486  ;;  %v1887_v62 = vmul.f32 %v9485_v6, %v9483_v45  ;;  %v13195_v45 = vld [vmem:[#allocation24_spill] sm:$0xff]  ;;  %v13196_v6 = vld [vmem:[#allocation25_spill] sm:$0xff] }
 0x3df   :  { %v1886_v28 = vmul.f32 %v9487_v24, %v10987_v43  ;;  %v9489_v5 = vpop.eup %9488  ;;  %v13185_v43 = vld [vmem:[#allocation14_spill] sm:$0xff] }
 0x3e0   :  { %v13197_v24 = vld [vmem:[#allocation26_spill] sm:$0xff] }
 0x3e1   :  { %v11077_v12 = vadd.f32 %v1887_v62, %v1886_v28  ;;  %v13199_v62 = vld [vmem:[#allocation28_spill] sm:$0xff]  ;;  %v13200_v28 = vld [vmem:[#allocation29_spill] sm:$0xff] }
 0x3e3   :  { %9490 = vtanh.f32 %v11077_v12 }
 0x3ed   :  { %v9491_v4 = vpop.eup %9490 }
 0x3ee   :  { %v1890_v25 = vmul.f32 %v9491_v4, %v9489_v5  ;;  %v13201_v5 = vld [vmem:[#allocation30_spill] sm:$0xff]  ;;  %v13202_v4 = vld [vmem:[#allocation31_spill] sm:$0xff] }
 0x3f0   :  { %1891 = vst [vmem:[#allocation4 + $0x2] sm:$0x1] %v1890_v25  ;;  %1892 = vst [vmem:[#allocation5 + $0x4] sm:$0x2] %v1890_v25  ;;  %1960 = vmatmul.mubr.f32.vlgmr.msra.gmra.mrb[16].mxu0 %v1890_v25  ;;  %2031 = vmatmul.mubr.f32.vlgmr.msra.gmra.mrb[16].mxu1 %v1890_v25  ;;  %v2070_v31 = vrot.slane %v1890_v25, 1  ;;  %v13203_v25 = vld [vmem:[#allocation32_spill] sm:$0xff] }
 0x3f1   :  { %7778 = vmatpush1.bf16.msra.mxu0 %v10571_v13  ;;  %7810 = vmatpush1.bf16.msra.mxu1 %v10575_v15 }
 0x3f2   :  { %7780 = vmatprep.subr.bf16.mxu0 %v10577_v16  ;;  %7812 = vmatprep.subr.bf16.mxu1 %v10589_v27 }
 0x3f3   :  { %2136 = vmatprep.mubr.f32.mxu0 %v13126_v63  ;;  %2207 = vmatprep.mubr.f32.mxu1 %v13126_v63 }
 0x3f5   :  { %7782 = vmatpush1.bf16.msra.mxu0 %v10609_v36  ;;  %7814 = vmatpush1.bf16.msra.mxu1 %v10613_v41 }
 0x3f6   :  { %7784 = vmatprep.subr.bf16.mxu0 %v10615_v42  ;;  %7816 = vmatprep.subr.bf16.mxu1 %v10627_v52 }
 0x3f9   :  { %7786 = vmatpush1.bf16.msra.mxu0 %v10647_v2  ;;  %7818 = vmatpush1.bf16.msra.mxu1 %v10651_v3 }
 0x3fa   :  { %7788 = vmatprep.subr.bf16.mxu0 %v10653_v8  ;;  %7820 = vmatprep.subr.bf16.mxu1 %v10665_v18 }
 0x3fd   :  { %7790 = vmatpush1.bf16.msra.mxu0 %v10683_v48  ;;  %7822 = vmatpush1.bf16.msra.mxu1 %v13129_v57 }
 0x3fe   :  { %7792 = vmatprep.subr.bf16.mxu0 %v13130_v56  ;;  %7824 = vmatprep.subr.bf16.mxu1 %v13131_v1 }
 0x401   :  { %7794 = vmatpush1.bf16.msra.mxu0 %v13132_v9  ;;  %7826 = vmatpush1.bf16.msra.mxu1 %v13133_v23 }
 0x402   :  { %7796 = vmatprep.subr.bf16.mxu0 %v13134_v55  ;;  %7828 = vmatprep.subr.bf16.mxu1 %v13135_v59 }
 0x405   :  { %7798 = vmatpush1.bf16.msra.mxu0 %v10755_v17  ;;  %7830 = vmatpush1.bf16.msra.mxu1 %v10759_v7 }
 0x406   :  { %7800 = vmatprep.subr.bf16.mxu0 %v10761_v61  ;;  %7832 = vmatprep.subr.bf16.mxu1 %v10773_v35 }
 0x409   :  { %7802 = vmatpush1.bf16.msra.mxu0 %v10791_v11  ;;  %7834 = vmatpush1.bf16.msra.mxu1 %v10795_v53 }
 0x40a   :  { %7804 = vmatprep.subr.bf16.mxu0 %v10797_v29  ;;  %7836 = vmatprep.subr.bf16.mxu1 %v10806_v46 }
 0x40d   :  { %7806 = vmatpush1.bf16.msra.mxu0 %v10815_v51  ;;  %7838 = vmatpush1.bf16.msra.mxu1 %v10819_v54 }
 0x40e   :  { %7840 = vmatprep.subr.bf16.mxu0 %v10252_v10  ;;  %7872 = vmatprep.subr.bf16.mxu1 %v10263_v14 }
 0x410   :  { %2137 = vmatmul.mubr.f32.vlgmr.msra.gmra.mrb[18].mxu0 %v2070_v31  ;;  %2208 = vmatmul.mubr.f32.vlgmr.msra.gmra.mrb[18].mxu1 %v2070_v31  ;;  %v13204_v31 = vld [vmem:[#allocation33_spill] sm:$0xff] }
 0x411   :  { %7842 = vmatpush1.bf16.msra.mxu0 %v10280_v20  ;;  %7874 = vmatpush1.bf16.msra.mxu1 %v10283_v21 }
 0x412   :  { %7844 = vmatprep.subr.bf16.mxu0 %v10285_v22  ;;  %7876 = vmatprep.subr.bf16.mxu1 %v10297_v26 }
 0x413   :  { %2382 = vmatprep.mubr.f32.mxu0 %v13126_v63  ;;  %2453 = vmatprep.mubr.f32.mxu1 %v13126_v63 }
 0x415   :  { %7846 = vmatpush1.bf16.msra.mxu0 %v10317_v32  ;;  %7878 = vmatpush1.bf16.msra.mxu1 %v10321_v33 }
 0x416   :  { %7848 = vmatprep.subr.bf16.mxu0 %v13158_v50  ;;  %7880 = vmatprep.subr.bf16.mxu1 %v13185_v43  ;;  %v13211_v43 = vld [vmem:[#allocation46_spill] sm:$0xff] }
 0x419   :  { %7850 = vmatpush1.bf16.msra.mxu0 %v13186_v49  ;;  %7882 = vmatpush1.bf16.msra.mxu1 %v13187_v39  ;;  %v1894_v49 = vld [vmem:[#allocation2 + $0x3] ss:$8 sm:$0xf] }
 0x41a   :  { %7852 = vmatprep.subr.bf16.mxu0 %v13188_v30  ;;  %7884 = vmatprep.subr.bf16.mxu1 %v13189_v38 }
 0x41d   :  { %7854 = vmatpush1.bf16.msra.mxu0 %v13190_v58  ;;  %7886 = vmatpush1.bf16.msra.mxu1 %v13191_v44 }
 0x41e   :  { %7856 = vmatprep.subr.bf16.mxu0 %v13192_v60  ;;  %7888 = vmatprep.subr.bf16.mxu1 %v13193_v34 }
 0x421   :  { %7858 = vmatpush1.bf16.msra.mxu0 %v13194_v37  ;;  %7890 = vmatpush1.bf16.msra.mxu1 %v13195_v45  ;;  %v13205_v37 = vld [vmem:[#allocation34_spill] sm:$0xff]  ;;  %v13206_v45 = vld [vmem:[#allocation35_spill] sm:$0xff] }
 0x422   :  { %7860 = vmatprep.subr.bf16.mxu0 %v13196_v6  ;;  %7892 = vmatprep.subr.bf16.mxu1 %v13197_v24  ;;  %v13207_v6 = vld [vmem:[#allocation36_spill] sm:$0xff]  ;;  %v13208_v24 = vld [vmem:[#allocation37_spill] sm:$0xff] }
 0x425   :  { %7862 = vmatpush1.bf16.msra.mxu0 %v13198_v19  ;;  %7894 = vmatpush1.bf16.msra.mxu1 %v13199_v62  ;;  %v13209_v19 = vld [vmem:[#allocation38_spill] sm:$0xff] }
 0x426   :  { %7864 = vmatprep.subr.bf16.mxu0 %v13200_v28  ;;  %7896 = vmatprep.subr.bf16.mxu1 %v13201_v5 }
 0x429   :  { %7866 = vmatpush1.bf16.msra.mxu0 %v13202_v4  ;;  %7898 = vmatpush1.bf16.msra.mxu1 %v13203_v25 }
 0x42a   :  { %7868 = vmatprep.subr.bf16.mxu0 %v13204_v31  ;;  %7900 = vmatprep.subr.bf16.mxu1 %v13205_v37 }
 0x42d   :  { %7870 = vmatpush1.bf16.msra.mxu0 %v13206_v45  ;;  %7902 = vmatpush1.bf16.msra.mxu1 %v13207_v6 }
 0x42e   :  { %7904 = vmatprep.subr.bf16.mxu0 %v13208_v24  ;;  %7936 = vmatprep.subr.bf16.mxu1 %v13209_v19 }
 0x4c3   :  { %v1961_v62 = vpop.f32.mrb[16].mxu0  ;;  %v2032_v28 = vpop.f32.mrb[16].mxu1 }
 0x4c4   :  { %v1963_v34 = vpop.f32.mrb[17].mxu0  ;;  %v2034_v5 = vpop.f32.mrb[17].mxu1 }
 0x4c5   :  { %v2041_v60 = vcombine.low %v1961_v62, %v1963_v34  ;;  %v2042_v4 = vcombine.low %v2032_v28, %v2034_v5  ;;  %v2068_v28 = vld [vmem:[#allocation3 + $0x4] ss:$8 sm:$0xf] }
 0x4c7   :  { %v2049_v25 = vrot.slane %v2041_v60, %v10877_v40  ;;  %v2056_v31 = vrot.slane %v2042_v4, %v10877_v40 }
 0x4c9   :  { %v2057_v44 = vcombine.low %v2049_v25, %v2056_v31  ;;  %v13210_v25 = vld [vmem:[#allocation47_spill] sm:$0xff] }
 0x4cb   :  { %v2064_v24 = vrot.slane %v2057_v44, %v10877_v40 }
 0x4cd   :  { %v2066_v62 = vadd.f32 %v2064_v24, %v1894_v49 }
 0x4cf   :  { %v2248_v4 = vrot.slane %v2066_v62, %v10862_v0  ;;  %v2252_v31 = vrot.slane %v2066_v62, %v13210_v25 }
 0x4e3   :  { %v2138_v37 = vpop.f32.mrb[18].mxu0  ;;  %v2209_v58 = vpop.f32.mrb[18].mxu1 }
 0x4e4   :  { %v2140_v45 = vpop.f32.mrb[19].mxu0  ;;  %v2211_v38 = vpop.f32.mrb[19].mxu1 }
 0x4e5   :  { %v2218_v6 = vcombine.low %v2138_v37, %v2140_v45  ;;  %v2219_v30 = vcombine.low %v2209_v58, %v2211_v38  ;;  %v2256_v37 = vrot.slane %v2066_v62, %v13211_v43  ;;  %v2260_v38 = vrot.slane %v2066_v62, %v10871_v47 }
 0x4e7   :  { %v2226_v19 = vrot.slane %v2218_v6, %v10877_v40  ;;  %v2233_v39 = vrot.slane %v2219_v30, %v10877_v40 }
 0x4e9   :  { %v2234_v34 = vcombine.low %v2226_v19, %v2233_v39 }
 0x4eb   :  { %v2241_v60 = vrot.slane %v2234_v34, %v10877_v40 }
 0x4ed   :  { %v2243_v5 = vadd.f32 %v2241_v60, %v2068_v28 }
 0x4ef   :  { %v2269_v58 = vrot.slane %v2243_v5, %v10862_v0  ;;  %v2273_v44 = vrot.slane %v2243_v5, %v13210_v25  ;;  %v2277_v30 = vrot.slane %v2243_v5, %v13211_v43  ;;  %v2281_v49 = vrot.slane %v2243_v5, %v10871_v47 }
 0x4f1   :  { %v2286_v39 = vsel %vm1016_vm0, %v2248_v4, %v2269_v58  ;;  %v2287_v45 = vsel %vm1016_vm0, %v2252_v31, %v2273_v44  ;;  %v2288_v6 = vsel %vm1016_vm0, %v2256_v37, %v2277_v30  ;;  %v2289_v24 = vsel %vm1016_vm0, %v2260_v38, %v2281_v49 }
 0x4f2   :  { %v7040_v19 = vmul.f32 -1.442695, %v2286_v39  ;;  %v7041_v34 = vmul.f32 -1.442695, %v2287_v45  ;;  %v7042_v62 = vmul.f32 -1.442695, %v2289_v24 }
 0x4f3   :  { %v13215_v24 = vld [vmem:[#allocation17_spill] sm:$0xff] }
 0x4f4   :  { %9492 = vpow2.f32 %v7040_v19  ;;  %v13216_v19 = vld [vmem:[#allocation18_spill] sm:$0xff] }
 0x4f5   :  { %9494 = vpow2.f32 %v7041_v34  ;;  %v13217_v34 = vld [vmem:[#allocation19_spill] sm:$0xff] }
 0x4f6   :  { %9496 = vpow2.f32 %v7042_v62  ;;  %v13218_v62 = vld [vmem:[#allocation20_spill] sm:$0xff] }
 0x4f7   :  { %9498 = vtanh.f32 %v2288_v6  ;;  %v13214_v6 = vld [vmem:[#allocation16_spill] sm:$0xff] }
 0x4fe   :  { %v9493_v60 = vpop.eup %9492 }
 0x4ff   :  { %v9495_v28 = vpop.eup %9494  ;;  %v2293_v25 = vadd.f32 1.0, %v9493_v60  ;;  %v13219_v60 = vld [vmem:[#allocation21_spill] sm:$0xff] }
 0x500   :  { %v2299_v43 = vadd.f32 1.0, %v9495_v28  ;;  %v9497_v5 = vpop.eup %9496  ;;  %v13220_v28 = vld [vmem:[#allocation22_spill] sm:$0xff] }
 0x501   :  { %9500 = vrcp.f32 %v2293_v25  ;;  %v9499_v4 = vpop.eup %9498  ;;  %v2306_v37 = vadd.f32 1.0, %v9497_v5  ;;  %v13213_v25 = vld [vmem:[#allocation15_spill] sm:$0xff] }
 0x502   :  { %9502 = vrcp.f32 %v2299_v43  ;;  %v13212_v43 = vld [vmem:[#allocation14_spill] sm:$0xff]  ;;  %v13221_v5 = vld [vmem:[#allocation23_spill] sm:$0xff] }
 0x503   :  { %9504 = vrcp.f32 %v2306_v37  ;;  %v13225_v37 = vld [vmem:[#allocation27_spill] sm:$0xff] }
 0x50b   :  { %v9501_v31 = vpop.eup %9500 }
 0x50c   :  { %v9503_v58 = vpop.eup %9502  ;;  %v2310_v44 = vmul.f32 %v9501_v31, %v9499_v4  ;;  %v13222_v4 = vld [vmem:[#allocation24_spill] sm:$0xff]  ;;  %v13223_v31 = vld [vmem:[#allocation25_spill] sm:$0xff] }
 0x50d   :  { %v2309_v38 = vmul.f32 %v9503_v58, %v11077_v12  ;;  %v9505_v49 = vpop.eup %9504  ;;  %v13224_v58 = vld [vmem:[#allocation26_spill] sm:$0xff] }
 0x50f   :  { %v11167_v30 = vadd.f32 %v2310_v44, %v2309_v38  ;;  %v13226_v44 = vld [vmem:[#allocation28_spill] sm:$0xff]  ;;  %v13227_v38 = vld [vmem:[#allocation29_spill] sm:$0xff] }
 0x511   :  { %9506 = vtanh.f32 %v11167_v30 }
 0x51b   :  { %v9507_v39 = vpop.eup %9506 }
 0x51c   :  { %v2313_v45 = vmul.f32 %v9507_v39, %v9505_v49  ;;  %v13228_v49 = vld [vmem:[#allocation30_spill] sm:$0xff]  ;;  %v13229_v39 = vld [vmem:[#allocation31_spill] sm:$0xff] }
 0x51e   :  { %2314 = vst [vmem:[#allocation4 + $0x3] sm:$0x1] %v2313_v45  ;;  %2315 = vst [vmem:[#allocation5 + $0x3] sm:$0x2] %v2313_v45  ;;  %2383 = vmatmul.mubr.f32.vlgmr.msra.gmra.mrb[20].mxu0 %v2313_v45  ;;  %2454 = vmatmul.mubr.f32.vlgmr.msra.gmra.mrb[20].mxu1 %v2313_v45  ;;  %v2493_v12 = vrot.slane %v2313_v45, 1  ;;  %v13230_v45 = vld [vmem:[#allocation32_spill] sm:$0xff] }
 0x51f   :  { %7906 = vmatpush1.bf16.msra.mxu0 %v10571_v13  ;;  %7938 = vmatpush1.bf16.msra.mxu1 %v10575_v15 }
 0x520   :  { %7908 = vmatprep.subr.bf16.mxu0 %v10577_v16  ;;  %7940 = vmatprep.subr.bf16.mxu1 %v10589_v27 }
 0x521   :  { %2559 = vmatprep.mubr.f32.mxu0 %v13126_v63  ;;  %2630 = vmatprep.mubr.f32.mxu1 %v13126_v63 }
 0x523   :  { %7910 = vmatpush1.bf16.msra.mxu0 %v10609_v36  ;;  %7942 = vmatpush1.bf16.msra.mxu1 %v10613_v41 }
 0x524   :  { %7912 = vmatprep.subr.bf16.mxu0 %v10615_v42  ;;  %7944 = vmatprep.subr.bf16.mxu1 %v10627_v52 }
 0x527   :  { %7914 = vmatpush1.bf16.msra.mxu0 %v10647_v2  ;;  %7946 = vmatpush1.bf16.msra.mxu1 %v10651_v3 }
 0x528   :  { %7916 = vmatprep.subr.bf16.mxu0 %v10653_v8  ;;  %7948 = vmatprep.subr.bf16.mxu1 %v10665_v18 }
 0x52b   :  { %7918 = vmatpush1.bf16.msra.mxu0 %v10683_v48  ;;  %7950 = vmatpush1.bf16.msra.mxu1 %v13129_v57 }
 0x52c   :  { %7920 = vmatprep.subr.bf16.mxu0 %v13130_v56  ;;  %7952 = vmatprep.subr.bf16.mxu1 %v13131_v1 }
 0x52f   :  { %7922 = vmatpush1.bf16.msra.mxu0 %v13132_v9  ;;  %7954 = vmatpush1.bf16.msra.mxu1 %v13133_v23 }
 0x530   :  { %7924 = vmatprep.subr.bf16.mxu0 %v13134_v55  ;;  %7956 = vmatprep.subr.bf16.mxu1 %v13135_v59 }
 0x533   :  { %7926 = vmatpush1.bf16.msra.mxu0 %v10755_v17  ;;  %7958 = vmatpush1.bf16.msra.mxu1 %v10759_v7 }
 0x534   :  { %7928 = vmatprep.subr.bf16.mxu0 %v10761_v61  ;;  %7960 = vmatprep.subr.bf16.mxu1 %v10773_v35 }
 0x537   :  { %7930 = vmatpush1.bf16.msra.mxu0 %v10791_v11  ;;  %7962 = vmatpush1.bf16.msra.mxu1 %v10795_v53 }
 0x538   :  { %7932 = vmatprep.subr.bf16.mxu0 %v10797_v29  ;;  %7964 = vmatprep.subr.bf16.mxu1 %v10806_v46 }
 0x53b   :  { %7934 = vmatpush1.bf16.msra.mxu0 %v10815_v51  ;;  %7966 = vmatpush1.bf16.msra.mxu1 %v10819_v54 }
 0x53c   :  { %7968 = vmatprep.subr.bf16.mxu0 %v10252_v10  ;;  %8000 = vmatprep.subr.bf16.mxu1 %v10263_v14 }
 0x53e   :  { %2560 = vmatmul.mubr.f32.vlgmr.msra.gmra.mrb[22].mxu0 %v2493_v12  ;;  %2631 = vmatmul.mubr.f32.vlgmr.msra.gmra.mrb[22].mxu1 %v2493_v12  ;;  %v13231_v12 = vld [vmem:[#allocation33_spill] sm:$0xff] }
 0x53f   :  { %7970 = vmatpush1.bf16.msra.mxu0 %v10280_v20  ;;  %8002 = vmatpush1.bf16.msra.mxu1 %v10283_v21 }
 0x540   :  { %7972 = vmatprep.subr.bf16.mxu0 %v10285_v22  ;;  %8004 = vmatprep.subr.bf16.mxu1 %v10297_v26 }
 0x541   :  { %2805 = vmatprep.mubr.f32.mxu0 %v13126_v63  ;;  %2876 = vmatprep.mubr.f32.mxu1 %v13126_v63 }
 0x543   :  { %7974 = vmatpush1.bf16.msra.mxu0 %v10317_v32  ;;  %8006 = vmatpush1.bf16.msra.mxu1 %v10321_v33 }
 0x544   :  { %7976 = vmatprep.subr.bf16.mxu0 %v13158_v50  ;;  %8008 = vmatprep.subr.bf16.mxu1 %v13212_v43  ;;  %v13238_v43 = vld [vmem:[#allocation46_spill] sm:$0xff] }
 0x547   :  { %7978 = vmatpush1.bf16.msra.mxu0 %v13213_v25  ;;  %8010 = vmatpush1.bf16.msra.mxu1 %v13214_v6  ;;  %v2317_v25 = vld [vmem:[#allocation2 + $0x4] ss:$8 sm:$0xf] }
 0x548   :  { %7980 = vmatprep.subr.bf16.mxu0 %v13215_v24  ;;  %8012 = vmatprep.subr.bf16.mxu1 %v13216_v19 }
 0x54b   :  { %7982 = vmatpush1.bf16.msra.mxu0 %v13217_v34  ;;  %8014 = vmatpush1.bf16.msra.mxu1 %v13218_v62 }
 0x54c   :  { %7984 = vmatprep.subr.bf16.mxu0 %v13219_v60  ;;  %8016 = vmatprep.subr.bf16.mxu1 %v13220_v28 }
 0x54f   :  { %7986 = vmatpush1.bf16.msra.mxu0 %v13221_v5  ;;  %8018 = vmatpush1.bf16.msra.mxu1 %v13222_v4  ;;  %v13232_v5 = vld [vmem:[#allocation34_spill] sm:$0xff]  ;;  %v13233_v4 = vld [vmem:[#allocation35_spill] sm:$0xff] }
 0x550   :  { %7988 = vmatprep.subr.bf16.mxu0 %v13223_v31  ;;  %8020 = vmatprep.subr.bf16.mxu1 %v13224_v58  ;;  %v13234_v31 = vld [vmem:[#allocation36_spill] sm:$0xff]  ;;  %v13235_v58 = vld [vmem:[#allocation37_spill] sm:$0xff] }
 0x553   :  { %7990 = vmatpush1.bf16.msra.mxu0 %v13225_v37  ;;  %8022 = vmatpush1.bf16.msra.mxu1 %v13226_v44  ;;  %v13236_v37 = vld [vmem:[#allocation38_spill] sm:$0xff] }
 0x554   :  { %7992 = vmatprep.subr.bf16.mxu0 %v13227_v38  ;;  %8024 = vmatprep.subr.bf16.mxu1 %v13228_v49 }
 0x557   :  { %7994 = vmatpush1.bf16.msra.mxu0 %v13229_v39  ;;  %8026 = vmatpush1.bf16.msra.mxu1 %v13230_v45 }
 0x558   :  { %7996 = vmatprep.subr.bf16.mxu0 %v13231_v12  ;;  %8028 = vmatprep.subr.bf16.mxu1 %v13232_v5 }
 0x55b   :  { %7998 = vmatpush1.bf16.msra.mxu0 %v13233_v4  ;;  %8030 = vmatpush1.bf16.msra.mxu1 %v13234_v31 }
 0x55c   :  { %8032 = vmatprep.subr.bf16.mxu0 %v13235_v58  ;;  %8064 = vmatprep.subr.bf16.mxu1 %v13236_v37 }
 0x5f1   :  { %v2384_v44 = vpop.f32.mrb[20].mxu0  ;;  %v2455_v38 = vpop.f32.mrb[20].mxu1 }
 0x5f2   :  { %v2386_v28 = vpop.f32.mrb[21].mxu0  ;;  %v2457_v49 = vpop.f32.mrb[21].mxu1 }
 0x5f3   :  { %v2464_v60 = vcombine.low %v2384_v44, %v2386_v28  ;;  %v2465_v39 = vcombine.low %v2455_v38, %v2457_v49  ;;  %v2491_v38 = vld [vmem:[#allocation3 + $0x3] ss:$8 sm:$0xf] }
 0x5f5   :  { %v2472_v45 = vrot.slane %v2464_v60, %v10877_v40  ;;  %v2479_v12 = vrot.slane %v2465_v39, %v10877_v40 }
 0x5f7   :  { %v2480_v62 = vcombine.low %v2472_v45, %v2479_v12  ;;  %v13237_v45 = vld [vmem:[#allocation47_spill] sm:$0xff] }
 0x5f9   :  { %v2487_v58 = vrot.slane %v2480_v62, %v10877_v40 }
 0x5fb   :  { %v2489_v44 = vadd.f32 %v2487_v58, %v2317_v25 }
 0x5fd   :  { %v2671_v39 = vrot.slane %v2489_v44, %v10862_v0  ;;  %v2675_v12 = vrot.slane %v2489_v44, %v13237_v45 }
 0x611   :  { %v2561_v5 = vpop.f32.mrb[22].mxu0  ;;  %v2632_v34 = vpop.f32.mrb[22].mxu1 }
 0x612   :  { %v2563_v4 = vpop.f32.mrb[23].mxu0  ;;  %v2634_v19 = vpop.f32.mrb[23].mxu1 }
 0x613   :  { %v2641_v31 = vcombine.low %v2561_v5, %v2563_v4  ;;  %v2642_v24 = vcombine.low %v2632_v34, %v2634_v19  ;;  %v2679_v5 = vrot.slane %v2489_v44, %v13238_v43  ;;  %v2683_v19 = vrot.slane %v2489_v44, %v10871_v47 }
 0x615   :  { %v2649_v37 = vrot.slane %v2641_v31, %v10877_v40  ;;  %v2656_v6 = vrot.slane %v2642_v24, %v10877_v40 }
 0x617   :  { %v2657_v28 = vcombine.low %v2649_v37, %v2656_v6 }
 0x619   :  { %v2664_v60 = vrot.slane %v2657_v28, %v10877_v40 }
 0x61b   :  { %v2666_v49 = vadd.f32 %v2664_v60, %v2491_v38 }
 0x61d   :  { %v2692_v34 = vrot.slane %v2666_v49, %v10862_v0  ;;  %v2696_v62 = vrot.slane %v2666_v49, %v13237_v45  ;;  %v2700_v24 = vrot.slane %v2666_v49, %v13238_v43  ;;  %v2704_v25 = vrot.slane %v2666_v49, %v10871_v47 }
 0x61f   :  { %v2709_v6 = vsel %vm1016_vm0, %v2671_v39, %v2692_v34  ;;  %v2710_v4 = vsel %vm1016_vm0, %v2675_v12, %v2696_v62  ;;  %v2711_v31 = vsel %vm1016_vm0, %v2679_v5, %v2700_v24  ;;  %v2712_v58 = vsel %vm1016_vm0, %v2683_v19, %v2704_v25 }
 0x620   :  { %v7043_v37 = vmul.f32 -1.442695, %v2709_v6  ;;  %v7044_v28 = vmul.f32 -1.442695, %v2710_v4  ;;  %v7045_v44 = vmul.f32 -1.442695, %v2712_v58 }
 0x621   :  { %v13242_v58 = vld [vmem:[#allocation17_spill] sm:$0xff] }
 0x622   :  { %9508 = vpow2.f32 %v7043_v37  ;;  %v13243_v37 = vld [vmem:[#allocation18_spill] sm:$0xff] }
 0x623   :  { %9510 = vpow2.f32 %v7044_v28  ;;  %v13244_v28 = vld [vmem:[#allocation19_spill] sm:$0xff] }
 0x624   :  { %9512 = vpow2.f32 %v7045_v44  ;;  %v13245_v44 = vld [vmem:[#allocation20_spill] sm:$0xff] }
 0x625   :  { %9514 = vtanh.f32 %v2711_v31  ;;  %v13241_v31 = vld [vmem:[#allocation16_spill] sm:$0xff] }
 0x62c   :  { %v9509_v60 = vpop.eup %9508 }
 0x62d   :  { %v9511_v38 = vpop.eup %9510  ;;  %v2716_v45 = vadd.f32 1.0, %v9509_v60  ;;  %v13246_v60 = vld [vmem:[#allocation21_spill] sm:$0xff] }
 0x62e   :  { %v2722_v43 = vadd.f32 1.0, %v9511_v38  ;;  %v9513_v49 = vpop.eup %9512  ;;  %v13247_v38 = vld [vmem:[#allocation22_spill] sm:$0xff] }
 0x62f   :  { %9516 = vrcp.f32 %v2716_v45  ;;  %v9515_v39 = vpop.eup %9514  ;;  %v2729_v5 = vadd.f32 1.0, %v9513_v49  ;;  %v13240_v45 = vld [vmem:[#allocation15_spill] sm:$0xff] }
 0x630   :  { %9518 = vrcp.f32 %v2722_v43  ;;  %v13239_v43 = vld [vmem:[#allocation14_spill] sm:$0xff]  ;;  %v13248_v49 = vld [vmem:[#allocation23_spill] sm:$0xff] }
 0x631   :  { %9520 = vrcp.f32 %v2729_v5  ;;  %v13252_v5 = vld [vmem:[#allocation27_spill] sm:$0xff] }
 0x639   :  { %v9517_v12 = vpop.eup %9516 }
 0x63a   :  { %v9519_v34 = vpop.eup %9518  ;;  %v2733_v62 = vmul.f32 %v9517_v12, %v9515_v39  ;;  %v13249_v39 = vld [vmem:[#allocation24_spill] sm:$0xff]  ;;  %v13250_v12 = vld [vmem:[#allocation25_spill] sm:$0xff] }
 0x63b   :  { %v2732_v19 = vmul.f32 %v9519_v34, %v11167_v30  ;;  %v9521_v25 = vpop.eup %9520  ;;  %v13251_v34 = vld [vmem:[#allocation26_spill] sm:$0xff] }
 0x63d   :  { %v11257_v24 = vadd.f32 %v2733_v62, %v2732_v19  ;;  %v13253_v62 = vld [vmem:[#allocation28_spill] sm:$0xff]  ;;  %v13254_v19 = vld [vmem:[#allocation29_spill] sm:$0xff] }
 0x63f   :  { %9522 = vtanh.f32 %v11257_v24 }
 0x649   :  { %v9523_v6 = vpop.eup %9522 }
 0x64a   :  { %v2736_v4 = vmul.f32 %v9523_v6, %v9521_v25  ;;  %v13255_v25 = vld [vmem:[#allocation30_spill] sm:$0xff]  ;;  %v13256_v6 = vld [vmem:[#allocation31_spill] sm:$0xff] }
 0x64c   :  { %2737 = vst [vmem:[#allocation4 + $0x4] sm:$0x1] %v2736_v4  ;;  %2738 = vst [vmem:[#allocation5 + $0x2] sm:$0x2] %v2736_v4  ;;  %2806 = vmatmul.mubr.f32.vlgmr.msra.gmra.mrb[24].mxu0 %v2736_v4  ;;  %2877 = vmatmul.mubr.f32.vlgmr.msra.gmra.mrb[24].mxu1 %v2736_v4  ;;  %v2916_v30 = vrot.slane %v2736_v4, 1  ;;  %v13257_v4 = vld [vmem:[#allocation32_spill] sm:$0xff] }
 0x64d   :  { %8034 = vmatpush1.bf16.msra.mxu0 %v10571_v13  ;;  %8066 = vmatpush1.bf16.msra.mxu1 %v10575_v15 }
 0x64e   :  { %8036 = vmatprep.subr.bf16.mxu0 %v10577_v16  ;;  %8068 = vmatprep.subr.bf16.mxu1 %v10589_v27 }
 0x64f   :  { %2982 = vmatprep.mubr.f32.mxu0 %v13126_v63  ;;  %3053 = vmatprep.mubr.f32.mxu1 %v13126_v63 }
 0x651   :  { %8038 = vmatpush1.bf16.msra.mxu0 %v10609_v36  ;;  %8070 = vmatpush1.bf16.msra.mxu1 %v10613_v41 }
 0x652   :  { %8040 = vmatprep.subr.bf16.mxu0 %v10615_v42  ;;  %8072 = vmatprep.subr.bf16.mxu1 %v10627_v52 }
 0x655   :  { %8042 = vmatpush1.bf16.msra.mxu0 %v10647_v2  ;;  %8074 = vmatpush1.bf16.msra.mxu1 %v10651_v3 }
 0x656   :  { %8044 = vmatprep.subr.bf16.mxu0 %v10653_v8  ;;  %8076 = vmatprep.subr.bf16.mxu1 %v10665_v18 }
 0x659   :  { %8046 = vmatpush1.bf16.msra.mxu0 %v10683_v48  ;;  %8078 = vmatpush1.bf16.msra.mxu1 %v13129_v57 }
 0x65a   :  { %8048 = vmatprep.subr.bf16.mxu0 %v13130_v56  ;;  %8080 = vmatprep.subr.bf16.mxu1 %v13131_v1 }
 0x65d   :  { %8050 = vmatpush1.bf16.msra.mxu0 %v13132_v9  ;;  %8082 = vmatpush1.bf16.msra.mxu1 %v13133_v23 }
 0x65e   :  { %8052 = vmatprep.subr.bf16.mxu0 %v13134_v55  ;;  %8084 = vmatprep.subr.bf16.mxu1 %v13135_v59 }
 0x661   :  { %8054 = vmatpush1.bf16.msra.mxu0 %v10755_v17  ;;  %8086 = vmatpush1.bf16.msra.mxu1 %v10759_v7 }
 0x662   :  { %8056 = vmatprep.subr.bf16.mxu0 %v10761_v61  ;;  %8088 = vmatprep.subr.bf16.mxu1 %v10773_v35 }
 0x665   :  { %8058 = vmatpush1.bf16.msra.mxu0 %v10791_v11  ;;  %8090 = vmatpush1.bf16.msra.mxu1 %v10795_v53 }
 0x666   :  { %8060 = vmatprep.subr.bf16.mxu0 %v10797_v29  ;;  %8092 = vmatprep.subr.bf16.mxu1 %v10806_v46 }
 0x669   :  { %8062 = vmatpush1.bf16.msra.mxu0 %v10815_v51  ;;  %8094 = vmatpush1.bf16.msra.mxu1 %v10819_v54 }
 0x66a   :  { %8096 = vmatprep.subr.bf16.mxu0 %v10252_v10  ;;  %8128 = vmatprep.subr.bf16.mxu1 %v10263_v14 }
 0x66c   :  { %2983 = vmatmul.mubr.f32.vlgmr.msra.gmra.mrb[26].mxu0 %v2916_v30  ;;  %3054 = vmatmul.mubr.f32.vlgmr.msra.gmra.mrb[26].mxu1 %v2916_v30  ;;  %v13258_v30 = vld [vmem:[#allocation33_spill] sm:$0xff] }
 0x66d   :  { %8098 = vmatpush1.bf16.msra.mxu0 %v10280_v20  ;;  %8130 = vmatpush1.bf16.msra.mxu1 %v10283_v21 }
 0x66e   :  { %8100 = vmatprep.subr.bf16.mxu0 %v10285_v22  ;;  %8132 = vmatprep.subr.bf16.mxu1 %v10297_v26 }
 0x66f   :  { %3228 = vmatprep.mubr.f32.mxu0 %v13126_v63  ;;  %3299 = vmatprep.mubr.f32.mxu1 %v13126_v63 }
 0x671   :  { %8102 = vmatpush1.bf16.msra.mxu0 %v10317_v32  ;;  %8134 = vmatpush1.bf16.msra.mxu1 %v10321_v33 }
 0x672   :  { %8104 = vmatprep.subr.bf16.mxu0 %v13158_v50  ;;  %8136 = vmatprep.subr.bf16.mxu1 %v13239_v43  ;;  %v13265_v43 = vld [vmem:[#allocation46_spill] sm:$0xff] }
 0x675   :  { %8106 = vmatpush1.bf16.msra.mxu0 %v13240_v45  ;;  %8138 = vmatpush1.bf16.msra.mxu1 %v13241_v31  ;;  %v2740_v45 = vld [vmem:[#allocation2 + $0x5] ss:$8 sm:$0xf] }
 0x676   :  { %8108 = vmatprep.subr.bf16.mxu0 %v13242_v58  ;;  %8140 = vmatprep.subr.bf16.mxu1 %v13243_v37 }
 0x679   :  { %8110 = vmatpush1.bf16.msra.mxu0 %v13244_v28  ;;  %8142 = vmatpush1.bf16.msra.mxu1 %v13245_v44 }
 0x67a   :  { %8112 = vmatprep.subr.bf16.mxu0 %v13246_v60  ;;  %8144 = vmatprep.subr.bf16.mxu1 %v13247_v38 }
 0x67d   :  { %8114 = vmatpush1.bf16.msra.mxu0 %v13248_v49  ;;  %8146 = vmatpush1.bf16.msra.mxu1 %v13249_v39  ;;  %v13259_v49 = vld [vmem:[#allocation34_spill] sm:$0xff]  ;;  %v13260_v39 = vld [vmem:[#allocation35_spill] sm:$0xff] }
 0x67e   :  { %8116 = vmatprep.subr.bf16.mxu0 %v13250_v12  ;;  %8148 = vmatprep.subr.bf16.mxu1 %v13251_v34  ;;  %v13261_v12 = vld [vmem:[#allocation36_spill] sm:$0xff]  ;;  %v13262_v34 = vld [vmem:[#allocation37_spill] sm:$0xff] }
 0x681   :  { %8118 = vmatpush1.bf16.msra.mxu0 %v13252_v5  ;;  %8150 = vmatpush1.bf16.msra.mxu1 %v13253_v62  ;;  %v13263_v5 = vld [vmem:[#allocation38_spill] sm:$0xff] }
 0x682   :  { %8120 = vmatprep.subr.bf16.mxu0 %v13254_v19  ;;  %8152 = vmatprep.subr.bf16.mxu1 %v13255_v25 }
 0x685   :  { %8122 = vmatpush1.bf16.msra.mxu0 %v13256_v6  ;;  %8154 = vmatpush1.bf16.msra.mxu1 %v13257_v4 }
 0x686   :  { %8124 = vmatprep.subr.bf16.mxu0 %v13258_v30  ;;  %8156 = vmatprep.subr.bf16.mxu1 %v13259_v49 }
 0x689   :  { %8126 = vmatpush1.bf16.msra.mxu0 %v13260_v39  ;;  %8158 = vmatpush1.bf16.msra.mxu1 %v13261_v12 }
 0x68a   :  { %8160 = vmatprep.subr.bf16.mxu0 %v13262_v34  ;;  %8192 = vmatprep.subr.bf16.mxu1 %v13263_v5 }
 0x71f   :  { %v2807_v62 = vpop.f32.mrb[24].mxu0  ;;  %v2878_v19 = vpop.f32.mrb[24].mxu1 }
 0x720   :  { %v2809_v38 = vpop.f32.mrb[25].mxu0  ;;  %v2880_v25 = vpop.f32.mrb[25].mxu1 }
 0x721   :  { %v2887_v60 = vcombine.low %v2807_v62, %v2809_v38  ;;  %v2888_v6 = vcombine.low %v2878_v19, %v2880_v25  ;;  %v2914_v19 = vld [vmem:[#allocation3 + $0x2] ss:$8 sm:$0xf] }
 0x723   :  { %v2895_v4 = vrot.slane %v2887_v60, %v10877_v40  ;;  %v2902_v30 = vrot.slane %v2888_v6, %v10877_v40 }
 0x725   :  { %v2903_v44 = vcombine.low %v2895_v4, %v2902_v30  ;;  %v13264_v4 = vld [vmem:[#allocation47_spill] sm:$0xff] }
 0x727   :  { %v2910_v34 = vrot.slane %v2903_v44, %v10877_v40 }
 0x729   :  { %v2912_v62 = vadd.f32 %v2910_v34, %v2740_v45 }
 0x72b   :  { %v3094_v6 = vrot.slane %v2912_v62, %v10862_v0  ;;  %v3098_v30 = vrot.slane %v2912_v62, %v13264_v4 }
 0x73f   :  { %v2984_v49 = vpop.f32.mrb[26].mxu0  ;;  %v3055_v28 = vpop.f32.mrb[26].mxu1 }
 0x740   :  { %v2986_v39 = vpop.f32.mrb[27].mxu0  ;;  %v3057_v37 = vpop.f32.mrb[27].mxu1 }
 0x741   :  { %v3064_v12 = vcombine.low %v2984_v49, %v2986_v39  ;;  %v3065_v58 = vcombine.low %v3055_v28, %v3057_v37  ;;  %v3102_v49 = vrot.slane %v2912_v62, %v13265_v43  ;;  %v3106_v37 = vrot.slane %v2912_v62, %v10871_v47 }
 0x743   :  { %v3072_v5 = vrot.slane %v3064_v12, %v10877_v40  ;;  %v3079_v31 = vrot.slane %v3065_v58, %v10877_v40 }
 0x745   :  { %v3080_v38 = vcombine.low %v3072_v5, %v3079_v31 }
 0x747   :  { %v3087_v60 = vrot.slane %v3080_v38, %v10877_v40 }
 0x749   :  { %v3089_v25 = vadd.f32 %v3087_v60, %v2914_v19 }
 0x74b   :  { %v3115_v28 = vrot.slane %v3089_v25, %v10862_v0  ;;  %v3119_v44 = vrot.slane %v3089_v25, %v13264_v4  ;;  %v3123_v58 = vrot.slane %v3089_v25, %v13265_v43  ;;  %v3127_v45 = vrot.slane %v3089_v25, %v10871_v47 }
 0x74d   :  { %v3132_v31 = vsel %vm1016_vm0, %v3094_v6, %v3115_v28  ;;  %v3133_v39 = vsel %vm1016_vm0, %v3098_v30, %v3119_v44  ;;  %v3134_v12 = vsel %vm1016_vm0, %v3102_v49, %v3123_v58  ;;  %v3135_v34 = vsel %vm1016_vm0, %v3106_v37, %v3127_v45 }
 0x74e   :  { %v7046_v5 = vmul.f32 -1.442695, %v3132_v31  ;;  %v7047_v38 = vmul.f32 -1.442695, %v3133_v39  ;;  %v7048_v62 = vmul.f32 -1.442695, %v3135_v34 }
 0x74f   :  { %v13278_v34 = vld [vmem:[#allocation26_spill] sm:$0xff] }
 0x750   :  { %9524 = vpow2.f32 %v7046_v5  ;;  %v13279_v5 = vld [vmem:[#allocation27_spill] sm:$0xff] }
 0x751   :  { %9526 = vpow2.f32 %v7047_v38  ;;  %v13280_v38 = vld [vmem:[#allocation28_spill] sm:$0xff] }
 0x752   :  { %9528 = vpow2.f32 %v7048_v62  ;;  %v13281_v62 = vld [vmem:[#allocation29_spill] sm:$0xff] }
 0x753   :  { %9530 = vtanh.f32 %v3134_v12  ;;  %v13277_v12 = vld [vmem:[#allocation25_spill] sm:$0xff] }
 0x75a   :  { %v9525_v60 = vpop.eup %9524 }
 0x75b   :  { %v9527_v19 = vpop.eup %9526  ;;  %v3139_v4 = vadd.f32 1.0, %v9525_v60  ;;  %v13282_v60 = vld [vmem:[#allocation30_spill] sm:$0xff] }
 0x75c   :  { %v3145_v43 = vadd.f32 1.0, %v9527_v19  ;;  %v9529_v25 = vpop.eup %9528  ;;  %v13283_v19 = vld [vmem:[#allocation31_spill] sm:$0xff] }
 0x75d   :  { %9532 = vrcp.f32 %v3139_v4  ;;  %v9531_v6 = vpop.eup %9530  ;;  %v3152_v49 = vadd.f32 1.0, %v9529_v25  ;;  %v13273_v4 = vld [vmem:[#allocation21_spill] sm:$0xff]  ;;  %v13284_v25 = vld [vmem:[#allocation32_spill] sm:$0xff] }
 0x75e   :  { %9534 = vrcp.f32 %v3145_v43  ;;  %v13272_v43 = vld [vmem:[#allocation20_spill] sm:$0xff] }
 0x75f   :  { %9536 = vrcp.f32 %v3152_v49  ;;  %v13288_v49 = vld [vmem:[#allocation36_spill] sm:$0xff] }
 0x767   :  { %v9533_v30 = vpop.eup %9532 }
 0x768   :  { %v9535_v28 = vpop.eup %9534  ;;  %v3156_v44 = vmul.f32 %v9533_v30, %v9531_v6  ;;  %v13285_v6 = vld [vmem:[#allocation33_spill] sm:$0xff]  ;;  %v13286_v30 = vld [vmem:[#allocation34_spill] sm:$0xff] }
 0x769   :  { %v3155_v37 = vmul.f32 %v9535_v28, %v11257_v24  ;;  %v9537_v45 = vpop.eup %9536  ;;  %v13287_v28 = vld [vmem:[#allocation35_spill] sm:$0xff] }
 0x76b   :  { %v11347_v58 = vadd.f32 %v3156_v44, %v3155_v37  ;;  %v13289_v44 = vld [vmem:[#allocation37_spill] sm:$0xff]  ;;  %v13290_v37 = vld [vmem:[#allocation38_spill] sm:$0xff] }
 0x76d   :  { %9538 = vtanh.f32 %v11347_v58 }
 0x777   :  { %v9539_v31 = vpop.eup %9538 }
 0x778   :  { %v3159_v39 = vmul.f32 %v9539_v31, %v9537_v45 }
 0x77a   :  { %3160 = vst [vmem:[#allocation4 + $0x5] sm:$0x1] %v3159_v39  ;;  %3161 = vst [vmem:[#allocation5 + $0x1] sm:$0x2] %v3159_v39  ;;  %3229 = vmatmul.mubr.f32.vlgmr.msra.gmra.mrb[28].mxu0 %v3159_v39  ;;  %3300 = vmatmul.mubr.f32.vlgmr.msra.gmra.mrb[28].mxu1 %v3159_v39  ;;  %v3339_v24 = vrot.slane %v3159_v39, 1 }
 0x77b   :  { %8162 = vmatpush1.bf16.msra.mxu0 %v10571_v13  ;;  %8194 = vmatpush1.bf16.msra.mxu1 %v10575_v15 }
 0x77c   :  { %8164 = vmatprep.subr.bf16.mxu0 %v10577_v16  ;;  %8196 = vmatprep.subr.bf16.mxu1 %v10589_v27 }
 0x77d   :  { %3405 = vmatprep.mubr.f32.mxu0 %v13126_v63  ;;  %3476 = vmatprep.mubr.f32.mxu1 %v13126_v63 }
 0x77f   :  { %8166 = vmatpush1.bf16.msra.mxu0 %v10609_v36  ;;  %8198 = vmatpush1.bf16.msra.mxu1 %v10613_v41 }
 0x780   :  { %8168 = vmatprep.subr.bf16.mxu0 %v10615_v42  ;;  %8200 = vmatprep.subr.bf16.mxu1 %v10627_v52 }
 0x783   :  { %8170 = vmatpush1.bf16.msra.mxu0 %v10647_v2  ;;  %8202 = vmatpush1.bf16.msra.mxu1 %v10651_v3 }
 0x784   :  { %8172 = vmatprep.subr.bf16.mxu0 %v10653_v8  ;;  %8204 = vmatprep.subr.bf16.mxu1 %v10665_v18 }
 0x787   :  { %8174 = vmatpush1.bf16.msra.mxu0 %v10683_v48  ;;  %8206 = vmatpush1.bf16.msra.mxu1 %v13129_v57 }
 0x788   :  { %8176 = vmatprep.subr.bf16.mxu0 %v13130_v56  ;;  %8208 = vmatprep.subr.bf16.mxu1 %v13131_v1 }
 0x78b   :  { %8178 = vmatpush1.bf16.msra.mxu0 %v13132_v9  ;;  %8210 = vmatpush1.bf16.msra.mxu1 %v13133_v23 }
 0x78c   :  { %8180 = vmatprep.subr.bf16.mxu0 %v13134_v55  ;;  %8212 = vmatprep.subr.bf16.mxu1 %v13135_v59 }
 0x78f   :  { %8182 = vmatpush1.bf16.msra.mxu0 %v10755_v17  ;;  %8214 = vmatpush1.bf16.msra.mxu1 %v10759_v7 }
 0x790   :  { %8184 = vmatprep.subr.bf16.mxu0 %v10761_v61  ;;  %8216 = vmatprep.subr.bf16.mxu1 %v10773_v35 }
 0x793   :  { %8186 = vmatpush1.bf16.msra.mxu0 %v10791_v11  ;;  %8218 = vmatpush1.bf16.msra.mxu1 %v10795_v53 }
 0x794   :  { %8188 = vmatprep.subr.bf16.mxu0 %v10797_v29  ;;  %8220 = vmatprep.subr.bf16.mxu1 %v10806_v46 }
 0x797   :  { %8190 = vmatpush1.bf16.msra.mxu0 %v10815_v51  ;;  %8222 = vmatpush1.bf16.msra.mxu1 %v10819_v54 }
 0x798   :  { %8224 = vmatprep.subr.bf16.mxu0 %v10252_v10  ;;  %8256 = vmatprep.subr.bf16.mxu1 %v10263_v14  ;;  %v13266_v10 = vld [vmem:[#allocation14_spill] sm:$0xff]  ;;  %v13267_v14 = vld [vmem:[#allocation15_spill] sm:$0xff] }
 0x79a   :  { %3406 = vmatmul.mubr.f32.vlgmr.msra.gmra.mrb[30].mxu0 %v3339_v24  ;;  %3477 = vmatmul.mubr.f32.vlgmr.msra.gmra.mrb[30].mxu1 %v3339_v24 }
 0x79b   :  { %8226 = vmatpush1.bf16.msra.mxu0 %v10280_v20  ;;  %8258 = vmatpush1.bf16.msra.mxu1 %v10283_v21  ;;  %v13268_v20 = vld [vmem:[#allocation16_spill] sm:$0xff]  ;;  %v13269_v21 = vld [vmem:[#allocation17_spill] sm:$0xff] }
 0x79c   :  { %8228 = vmatprep.subr.bf16.mxu0 %v10285_v22  ;;  %8260 = vmatprep.subr.bf16.mxu1 %v10297_v26  ;;  %v13270_v22 = vld [vmem:[#allocation18_spill] sm:$0xff]  ;;  %v13271_v26 = vld [vmem:[#allocation19_spill] sm:$0xff] }
 0x79d   :  { %3651 = vmatprep.mubr.f32.mxu0 %v13126_v63  ;;  %3722 = vmatprep.mubr.f32.mxu1 %v13126_v63 }
 0x79f   :  { %8230 = vmatpush1.bf16.msra.mxu0 %v10317_v32  ;;  %8262 = vmatpush1.bf16.msra.mxu1 %v10321_v33  ;;  %v13274_v32 = vld [vmem:[#allocation22_spill] sm:$0xff]  ;;  %v13275_v33 = vld [vmem:[#allocation23_spill] sm:$0xff] }
 0x7a0   :  { %8232 = vmatprep.subr.bf16.mxu0 %v13158_v50  ;;  %8264 = vmatprep.subr.bf16.mxu1 %v13266_v10  ;;  %v13276_v50 = vld [vmem:[#allocation24_spill] sm:$0xff] }
 0x7a3   :  { %8234 = vmatpush1.bf16.msra.mxu0 %v13267_v14  ;;  %8266 = vmatpush1.bf16.msra.mxu1 %v13268_v20 }
 0x7a4   :  { %8236 = vmatprep.subr.bf16.mxu0 %v13269_v21  ;;  %8268 = vmatprep.subr.bf16.mxu1 %v13270_v22 }
 0x7a7   :  { %8238 = vmatpush1.bf16.msra.mxu0 %v13271_v26  ;;  %8270 = vmatpush1.bf16.msra.mxu1 %v13272_v43 }
 0x7a8   :  { %8240 = vmatprep.subr.bf16.mxu0 %v13273_v4  ;;  %8272 = vmatprep.subr.bf16.mxu1 %v13274_v32 }
 0x7ab   :  { %8242 = vmatpush1.bf16.msra.mxu0 %v13275_v33  ;;  %8274 = vmatpush1.bf16.msra.mxu1 %v13276_v50 }
 0x7ac   :  { %8244 = vmatprep.subr.bf16.mxu0 %v13277_v12  ;;  %8276 = vmatprep.subr.bf16.mxu1 %v13278_v34 }
 0x7af   :  { %8246 = vmatpush1.bf16.msra.mxu0 %v13279_v5  ;;  %8278 = vmatpush1.bf16.msra.mxu1 %v13280_v38  ;;  %v3163_v38 = vld [vmem:[#allocation2 + $0x6] ss:$8 sm:$0xf] }
 0x7b0   :  { %8248 = vmatprep.subr.bf16.mxu0 %v13281_v62  ;;  %8280 = vmatprep.subr.bf16.mxu1 %v13282_v60 }
 0x7b3   :  { %8250 = vmatpush1.bf16.msra.mxu0 %v13283_v19  ;;  %8282 = vmatpush1.bf16.msra.mxu1 %v13284_v25  ;;  %v3337_v25 = vld [vmem:[#allocation3 + $0x1] ss:$8 sm:$0xf] }
 0x7b4   :  { %8252 = vmatprep.subr.bf16.mxu0 %v13285_v6  ;;  %8284 = vmatprep.subr.bf16.mxu1 %v13286_v30 }
 0x7b7   :  { %8254 = vmatpush1.bf16.msra.mxu0 %v13287_v28  ;;  %8286 = vmatpush1.bf16.msra.mxu1 %v13288_v49  ;;  %v13291_v28 = vld [vmem:[#allocation47_spill] sm:$0xff] }
 0x7b8   :  { %8288 = vmatprep.subr.bf16.mxu0 %v13289_v44  ;;  %8320 = vmatprep.subr.bf16.mxu1 %v13290_v37  ;;  %v13292_v44 = vld [vmem:[#allocation46_spill] sm:$0xff] }
 0x84d   :  { %v3230_v45 = vpop.f32.mrb[28].mxu0  ;;  %v3301_v31 = vpop.f32.mrb[28].mxu1 }
 0x84e   :  { %v3232_v39 = vpop.f32.mrb[29].mxu0  ;;  %v3303_v24 = vpop.f32.mrb[29].mxu1 }
 0x84f   :  { %v3310_v10 = vcombine.low %v3230_v45, %v3232_v39  ;;  %v3311_v14 = vcombine.low %v3301_v31, %v3303_v24 }
 0x851   :  { %v3318_v20 = vrot.slane %v3310_v10, %v10877_v40  ;;  %v3325_v21 = vrot.slane %v3311_v14, %v10877_v40 }
 0x853   :  { %v3326_v22 = vcombine.low %v3318_v20, %v3325_v21 }
 0x855   :  { %v3333_v12 = vrot.slane %v3326_v22, %v10877_v40 }
 0x857   :  { %v3335_v60 = vadd.f32 %v3333_v12, %v3163_v38 }
 0x859   :  { %v3517_v30 = vrot.slane %v3335_v60, %v10862_v0  ;;  %v3521_v49 = vrot.slane %v3335_v60, %v13291_v28  ;;  %v3525_v37 = vrot.slane %v3335_v60, %v13292_v44  ;;  %v3529_v45 = vrot.slane %v3335_v60, %v10871_v47 }
 0x86d   :  { %v3407_v26 = vpop.f32.mrb[30].mxu0  ;;  %v3478_v43 = vpop.f32.mrb[30].mxu1 }
 0x86e   :  { %v3409_v4 = vpop.f32.mrb[31].mxu0  ;;  %v3480_v32 = vpop.f32.mrb[31].mxu1 }
 0x86f   :  { %v3487_v33 = vcombine.low %v3407_v26, %v3409_v4  ;;  %v3488_v50 = vcombine.low %v3478_v43, %v3480_v32 }
 0x871   :  { %v3495_v34 = vrot.slane %v3487_v33, %v10877_v40  ;;  %v3502_v5 = vrot.slane %v3488_v50, %v10877_v40 }
 0x873   :  { %v3503_v62 = vcombine.low %v3495_v34, %v3502_v5 }
 0x875   :  { %v3510_v19 = vrot.slane %v3503_v62, %v10877_v40 }
 0x877   :  { %v3512_v6 = vadd.f32 %v3510_v19, %v3337_v25 }
 0x879   :  { %v3538_v31 = vrot.slane %v3512_v6, %v10862_v0  ;;  %v3542_v39 = vrot.slane %v3512_v6, %v13291_v28  ;;  %v3546_v24 = vrot.slane %v3512_v6, %v13292_v44  ;;  %v3550_v10 = vrot.slane %v3512_v6, %v10871_v47 }
 0x87b   :  { %v3555_v14 = vsel %vm1016_vm0, %v3517_v30, %v3538_v31  ;;  %v3556_v20 = vsel %vm1016_vm0, %v3521_v49, %v3542_v39  ;;  %v3557_v21 = vsel %vm1016_vm0, %v3525_v37, %v3546_v24  ;;  %v3558_v22 = vsel %vm1016_vm0, %v3529_v45, %v3550_v10  ;;  %v4038_v45 = vld [vmem:[%s12952_s6 + $0xc8] sm:$0xff]  ;;  %v4037_v24 = vld [vmem:[%s12952_s6 + $0xc0] sm:$0xff] }
 0x87c   :  { %v7049_v26 = vmul.f32 -1.442695, %v3555_v14  ;;  %v7050_v43 = vmul.f32 -1.442695, %v3556_v20  ;;  %v7051_v4 = vmul.f32 -1.442695, %v3558_v22 }
 0x87d   :  { %v4042_v31 = vld [vmem:[%s12952_s6 + $0xe8] sm:$0xff]  ;;  %v4041_v10 = vld [vmem:[%s12952_s6 + $0xe0] sm:$0xff]  ;;  %v4032_v14 = vld [vmem:[%s12952_s6 + $0x98] sm:$0xff] }
 0x87e   :  { %9540 = vpow2.f32 %v7049_v26  ;;  %v8363_v39 = vpack.c.bf16 %v4042_v31, %v4038_v45  ;;  %v8365_v20 = vpack.c.bf16 %v4041_v10, %v4037_v24  ;;  %v4031_v22 = vld [vmem:[%s12952_s6 + $0x90] sm:$0xff]  ;;  %v4072_v24 = vld [vmem:[%s12952_s6 + $0x1d8] sm:$0xff] }
 0x87f   :  { %9542 = vpow2.f32 %v7050_v43  ;;  %v4035_v26 = vld [vmem:[%s12952_s6 + $0xb0] sm:$0xff]  ;;  %v4076_v10 = vld [vmem:[%s12952_s6 + $0x1f8] sm:$0xff] }
 0x880   :  { %9544 = vpow2.f32 %v7051_v4  ;;  %v8393_v4 = vpack.c.bf16 %v4035_v26, %v4031_v22  ;;  %v4067_v45 = vld [vmem:[%s12952_s6 + $0x1b0] sm:$0xff]  ;;  %v11670_v26 = vld [vmem:[%s12947_s1] sm:$0xff] }
 0x881   :  { %9546 = vtanh.f32 %v3557_v21  ;;  %v4036_v21 = vld [vmem:[%s12952_s6 + $0xb8] sm:$0xff] }
 0x882   :  { %v8391_v43 = vpack.c.bf16 %v4036_v21, %v4032_v14  ;;  %v8411_v14 = vpack.c.bf16 %v4076_v10, %v4072_v24  ;;  %v4075_v21 = vld [vmem:[%s12952_s6 + $0x1f0] sm:$0xff] }
 0x888   :  { %v9541_v32 = vpop.eup %9540 }
 0x889   :  { %v9543_v33 = vpop.eup %9542  ;;  %v3562_v50 = vadd.f32 1.0, %v9541_v32  ;;  %v4046_v32 = vld [vmem:[%s12952_s6 + $0x108] sm:$0xff] }
 0x88a   :  { %v3568_v12 = vadd.f32 1.0, %v9543_v33  ;;  %v9545_v34 = vpop.eup %9544  ;;  %v4050_v33 = vld [vmem:[%s12952_s6 + $0x128] sm:$0xff] }
 0x88b   :  { %9548 = vrcp.f32 %v3562_v50  ;;  %v9547_v5 = vpop.eup %9546  ;;  %v3575_v60 = vadd.f32 1.0, %v9545_v34  ;;  %v8367_v50 = vpack.c.bf16 %v4050_v33, %v4046_v32  ;;  %v4049_v34 = vld [vmem:[%s12952_s6 + $0x120] sm:$0xff] }
 0x88c   :  { %9550 = vrcp.f32 %v3568_v12  ;;  %v4045_v12 = vld [vmem:[%s12952_s6 + $0x100] sm:$0xff] }
 0x88d   :  { %9552 = vrcp.f32 %v3575_v60  ;;  %v4039_v60 = vld [vmem:[%s12952_s6 + $0xd0] sm:$0xff] }
 0x895   :  { %v9549_v38 = vpop.eup %9548 }
 0x896   :  { %v9551_v62 = vpop.eup %9550  ;;  %v3579_v19 = vmul.f32 %v9549_v38, %v9547_v5  ;;  %v4040_v5 = vld [vmem:[%s12952_s6 + $0xd8] sm:$0xff]  ;;  %v8369_v38 = vpack.c.bf16 %v4049_v34, %v4045_v12 }
 0x897   :  { %v3578_v25 = vmul.f32 %v9551_v62, %v11347_v58  ;;  %v9553_v30 = vpop.eup %9552  ;;  %v4044_v62 = vld [vmem:[%s12952_s6 + $0xf8] sm:$0xff] }
 0x899   :  { %v11437_v6 = vadd.f32 %v3579_v19, %v3578_v25  ;;  %v4043_v19 = vld [vmem:[%s12952_s6 + $0xf0] sm:$0xff]  ;;  %v8395_v25 = vpack.c.bf16 %v4044_v62, %v4040_v5 }
 0x89b   :  { %9554 = vtanh.f32 %v11437_v6 }
 0x8a5   :  { %v9555_v49 = vpop.eup %9554 }
 0x8a6   :  { %v3582_v37 = vmul.f32 %v9555_v49, %v9553_v30  ;;  %v8397_v30 = vpack.c.bf16 %v4043_v19, %v4039_v60  ;;  %v4054_v49 = vld [vmem:[%s12952_s6 + $0x148] sm:$0xff] }
 0x8a8   :  { %3583 = vst [vmem:[#allocation4 + $0x6] sm:$0x1] %v3582_v37  ;;  %3584 = vst [vmem:[#allocation5] sm:$0x2] %v3582_v37  ;;  %3652 = vmatmul.mubr.f32.vlgmr.msra.gmra.mrb[32].mxu0 %v3582_v37  ;;  %3723 = vmatmul.mubr.f32.vlgmr.msra.gmra.mrb[32].mxu1 %v3582_v37 }
 0x8a9   :  { %8290 = vmatpush1.bf16.msra.mxu0 %v10571_v13  ;;  %8322 = vmatpush1.bf16.msra.mxu1 %v10575_v15  ;;  %v3761_v13 = vrot.slane %v3582_v37, 1  ;;  %v4018_v15 = vld [vmem:[%s12952_s6 + $0x28] sm:$0xff] }
 0x8aa   :  { %8292 = vmatprep.subr.bf16.mxu0 %v10577_v16  ;;  %8324 = vmatprep.subr.bf16.mxu1 %v10589_v27  ;;  %v4013_v27 = vld [vmem:[%s12952_s6] sm:$0xff]  ;;  %v4058_v37 = vld [vmem:[%s12952_s6 + $0x168] sm:$0xff] }
 0x8ab   :  { %3827 = vmatprep.mubr.f32.mxu0 %v13126_v63  ;;  %3898 = vmatprep.mubr.f32.mxu1 %v13126_v63 }
 0x8ad   :  { %8294 = vmatpush1.bf16.msra.mxu0 %v10609_v36  ;;  %8326 = vmatpush1.bf16.msra.mxu1 %v10613_v41  ;;  %v4017_v36 = vld [vmem:[%s12952_s6 + $0x20] sm:$0xff] }
 0x8ae   :  { %8296 = vmatprep.subr.bf16.mxu0 %v10615_v42  ;;  %8328 = vmatprep.subr.bf16.mxu1 %v10627_v52  ;;  %v8353_v41 = vpack.c.bf16 %v4017_v36, %v4013_v27  ;;  %v4022_v42 = vld [vmem:[%s12952_s6 + $0x48] sm:$0xff]  ;;  %v4052_v36 = vld [vmem:[%s12952_s6 + $0x138] sm:$0xff] }
 0x8af   :  { %v4026_v52 = vld [vmem:[%s12952_s6 + $0x68] sm:$0xff] }
 0x8b1   :  { %8298 = vmatpush1.bf16.msra.mxu0 %v10647_v2  ;;  %8330 = vmatpush1.bf16.msra.mxu1 %v10651_v3  ;;  %v8355_v2 = vpack.c.bf16 %v4026_v52, %v4022_v42  ;;  %v4021_v3 = vld [vmem:[%s12952_s6 + $0x40] sm:$0xff]  ;;  %v4051_v42 = vld [vmem:[%s12952_s6 + $0x130] sm:$0xff] }
 0x8b2   :  { %8300 = vmatprep.subr.bf16.mxu0 %v10653_v8  ;;  %8332 = vmatprep.subr.bf16.mxu1 %v10665_v18  ;;  %v4025_v8 = vld [vmem:[%s12952_s6 + $0x60] sm:$0xff]  ;;  %v4016_v18 = vld [vmem:[%s12952_s6 + $0x18] sm:$0xff] }
 0x8b5   :  { %8302 = vmatpush1.bf16.msra.mxu0 %v10683_v48  ;;  %8334 = vmatpush1.bf16.msra.mxu1 %v13129_v57  ;;  %v8357_v48 = vpack.c.bf16 %v4025_v8, %v4021_v3  ;;  %v4033_v57 = vld [vmem:[%s12952_s6 + $0xa0] sm:$0xff]  ;;  %v4062_v3 = vld [vmem:[%s12952_s6 + $0x188] sm:$0xff] }
 0x8b6   :  { %8304 = vmatprep.subr.bf16.mxu0 %v13130_v56  ;;  %8336 = vmatprep.subr.bf16.mxu1 %v13131_v1  ;;  %v4024_v56 = vld [vmem:[%s12952_s6 + $0x58] sm:$0xff]  ;;  %v4066_v8 = vld [vmem:[%s12952_s6 + $0x1a8] sm:$0xff] }
 0x8b9   :  { %8306 = vmatpush1.bf16.msra.mxu0 %v13132_v9  ;;  %8338 = vmatpush1.bf16.msra.mxu1 %v13133_v23  ;;  %v4028_v9 = vld [vmem:[%s12952_s6 + $0x78] sm:$0xff]  ;;  %v4023_v23 = vld [vmem:[%s12952_s6 + $0x50] sm:$0xff] }
 0x8ba   :  { %8308 = vmatprep.subr.bf16.mxu0 %v13134_v55  ;;  %8340 = vmatprep.subr.bf16.mxu1 %v13135_v59  ;;  %v4027_v55 = vld [vmem:[%s12952_s6 + $0x70] sm:$0xff]  ;;  %v8387_v59 = vpack.c.bf16 %v4028_v9, %v4024_v56  ;;  %v4073_v9 = vld [vmem:[%s12952_s6 + $0x1e0] sm:$0xff] }
 0x8bb   :  { %v8389_v58 = vpack.c.bf16 %v4027_v55, %v4023_v23  ;;  %v4064_v23 = vld [vmem:[%s12952_s6 + $0x198] sm:$0xff] }
 0x8bd   :  { %8310 = vmatpush1.bf16.msra.mxu0 %v10755_v17  ;;  %8342 = vmatpush1.bf16.msra.mxu1 %v10759_v7  ;;  %v4014_v7 = vld [vmem:[%s12952_s6 + $0x8] sm:$0xff] }
 0x8be   :  { %8312 = vmatprep.subr.bf16.mxu0 %v10761_v61  ;;  %8344 = vmatprep.subr.bf16.mxu1 %v10773_v35  ;;  %v8351_v16 = vpack.c.bf16 %v4018_v15, %v4014_v7  ;;  %v4020_v61 = vld [vmem:[%s12952_s6 + $0x38] sm:$0xff]  ;;  %v4053_v7 = vld [vmem:[%s12952_s6 + $0x140] sm:$0xff] }
 0x8bf   :  { %v8383_v17 = vpack.c.bf16 %v4020_v61, %v4016_v18  ;;  %v4057_v15 = vld [vmem:[%s12952_s6 + $0x160] sm:$0xff]  ;;  %v8375_v18 = vpack.c.bf16 %v4066_v8, %v4062_v3 }
 0x8c0   :  { %v8373_v27 = vpack.c.bf16 %v4057_v15, %v4053_v7  ;;  %v4065_v61 = vld [vmem:[%s12952_s6 + $0x1a0] sm:$0xff] }
 0x8c1   :  { %8314 = vmatpush1.bf16.msra.mxu0 %v10791_v11  ;;  %8346 = vmatpush1.bf16.msra.mxu1 %v10795_v53  ;;  %v4019_v53 = vld [vmem:[%s12952_s6 + $0x30] sm:$0xff]  ;;  %v4030_v11 = vld [vmem:[%s12952_s6 + $0x88] sm:$0xff] }
 0x8c2   :  { %8316 = vmatprep.subr.bf16.mxu0 %v10797_v29  ;;  %8348 = vmatprep.subr.bf16.mxu1 %v10806_v46  ;;  %v4015_v29 = vld [vmem:[%s12952_s6 + $0x10] sm:$0xff]  ;;  %v4034_v46 = vld [vmem:[%s12952_s6 + $0xa8] sm:$0xff] }
 0x8c3   :  { %v8385_v35 = vpack.c.bf16 %v4019_v53, %v4015_v29  ;;  %v4056_v29 = vld [vmem:[%s12952_s6 + $0x158] sm:$0xff] }
 0x8c4   :  { %v3586_v15 = vld [vmem:[#allocation2 + $0x7] ss:$8 sm:$0xf] }
 0x8c5   :  { %8318 = vmatpush1.bf16.msra.mxu0 %v10815_v51  ;;  %8350 = vmatpush1.bf16.msra.mxu1 %v10819_v54  ;;  %v8359_v51 = vpack.c.bf16 %v4034_v46, %v4030_v11  ;;  %v4029_v54 = vld [vmem:[%s12952_s6 + $0x80] sm:$0xff]  ;;  %v4059_v11 = vld [vmem:[%s12952_s6 + $0x170] sm:$0xff] }
 0x8c6   :  { %8352 = vmatprep.subr.bf16.mxu0 %v8351_v16  ;;  %8384 = vmatprep.subr.bf16.mxu1 %v8383_v17  ;;  %v8361_v1 = vpack.c.bf16 %v4033_v57, %v4029_v54  ;;  %v4048_v16 = vld [vmem:[%s12952_s6 + $0x118] sm:$0xff]  ;;  %v4070_v54 = vld [vmem:[%s12952_s6 + $0x1c8] sm:$0xff] }
 0x8c7   :  { %v8399_v52 = vpack.c.bf16 %v4052_v36, %v4048_v16  ;;  %v4060_v17 = vld [vmem:[%s12952_s6 + $0x178] sm:$0xff]  ;;  %v4074_v57 = vld [vmem:[%s12952_s6 + $0x1e8] sm:$0xff] }
 0x8c8   :  { %3828 = vmatmul.mubr.f32.vlgmr.msra.gmra.mrb[34].mxu0 %v3761_v13  ;;  %3899 = vmatmul.mubr.f32.vlgmr.msra.gmra.mrb[34].mxu1 %v3761_v13  ;;  %v8371_v13 = vpack.c.bf16 %v4058_v37, %v4054_v49  ;;  %v8403_v46 = vpack.c.bf16 %v4060_v17, %v4056_v29  ;;  %v8379_v56 = vpack.c.bf16 %v4074_v57, %v4070_v54 }
 0x8c9   :  { %4163 = vmatprep.mubr.f32.mxu0 %v13126_v63  ;;  %4234 = vmatprep.mubr.f32.mxu1 %v13126_v63 }
 0x8ca   :  { %8354 = vmatpush1.bf16.msra.mxu0 %v8353_v41  ;;  %8386 = vmatpush1.bf16.msra.mxu1 %v8385_v35  ;;  %v4047_v41 = vld [vmem:[%s12952_s6 + $0x110] sm:$0xff] }
 0x8cb   :  { %8356 = vmatprep.subr.bf16.mxu0 %v8355_v2  ;;  %8388 = vmatprep.subr.bf16.mxu1 %v8387_v59  ;;  %v8401_v2 = vpack.c.bf16 %v4051_v42, %v4047_v41  ;;  %v4055_v35 = vld [vmem:[%s12952_s6 + $0x150] sm:$0xff]  ;;  %v4068_v59 = vld [vmem:[%s12952_s6 + $0x1b8] sm:$0xff] }
 0x8cc   :  { %v8407_v31 = vpack.c.bf16 %v4068_v59, %v4064_v23  ;;  %v3759_v41 = vld [vmem:[#allocation3] ss:$8 sm:$0xf] }
 0x8ce   :  { %8358 = vmatpush1.bf16.msra.mxu0 %v8357_v48  ;;  %8390 = vmatpush1.bf16.msra.mxu1 %v8389_v58  ;;  %v4061_v48 = vld [vmem:[%s12952_s6 + $0x180] sm:$0xff]  ;;  %v4063_v58 = vld [vmem:[%s12952_s6 + $0x190] sm:$0xff] }
 0x8cf   :  { %8360 = vmatprep.subr.bf16.mxu0 %v8359_v51  ;;  %8392 = vmatprep.subr.bf16.mxu1 %v8391_v43  ;;  %v8377_v53 = vpack.c.bf16 %v4065_v61, %v4061_v48  ;;  %v8405_v51 = vpack.c.bf16 %v4059_v11, %v4055_v35 }
 0x8d2   :  { %8362 = vmatpush1.bf16.msra.mxu0 %v8361_v1  ;;  %8394 = vmatpush1.bf16.msra.mxu1 %v8393_v4  ;;  %v4069_v1 = vld [vmem:[%s12952_s6 + $0x1c0] sm:$0xff] }
 0x8d3   :  { %8364 = vmatprep.subr.bf16.mxu0 %v8363_v39  ;;  %8396 = vmatprep.subr.bf16.mxu1 %v8395_v25  ;;  %v8381_v55 = vpack.c.bf16 %v4073_v9, %v4069_v1  ;;  %v8409_v39 = vpack.c.bf16 %v4067_v45, %v4063_v58 }
 0x8d6   :  { %8366 = vmatpush1.bf16.msra.mxu0 %v8365_v20  ;;  %8398 = vmatpush1.bf16.msra.mxu1 %v8397_v30  ;;  %v4071_v20 = vld [vmem:[%s12952_s6 + $0x1d0] sm:$0xff] }
 0x8d7   :  { %8368 = vmatprep.subr.bf16.mxu0 %v8367_v50  ;;  %8400 = vmatprep.subr.bf16.mxu1 %v8399_v52  ;;  %v8413_v22 = vpack.c.bf16 %v4075_v21, %v4071_v20  ;;  %v9732_v21 = vld [vmem:[%s12946_s0] sm:$0xff] }
 0x8da   :  { %8370 = vmatpush1.bf16.msra.mxu0 %v8369_v38  ;;  %8402 = vmatpush1.bf16.msra.mxu1 %v8401_v2 }
 0x8db   :  { %8372 = vmatprep.subr.bf16.mxu0 %v8371_v13  ;;  %8404 = vmatprep.subr.bf16.mxu1 %v8403_v46 }
 0x8de   :  { %8374 = vmatpush1.bf16.msra.mxu0 %v8373_v27  ;;  %8406 = vmatpush1.bf16.msra.mxu1 %v8405_v51 }
 0x8df   :  { %8376 = vmatprep.subr.bf16.mxu0 %v8375_v18  ;;  %8408 = vmatprep.subr.bf16.mxu1 %v8407_v31 }
 0x8e2   :  { %8378 = vmatpush1.bf16.msra.mxu0 %v8377_v53  ;;  %8410 = vmatpush1.bf16.msra.mxu1 %v8409_v39 }
 0x8e3   :  { %8380 = vmatprep.subr.bf16.mxu0 %v8379_v56  ;;  %8412 = vmatprep.subr.bf16.mxu1 %v8411_v14 }
 0x8e6   :  { %8382 = vmatpush1.bf16.msra.mxu0 %v8381_v55  ;;  %8414 = vmatpush1.bf16.msra.mxu1 %v8413_v22 }
 0x8e7   :  { %7119 = vmatprep.subr.mxu0 %v13126_v63  ;;  %7124 = vmatprep.subr.mxu1 %v13126_v63 }
 0x8e9   :  { %4164 = vmatmul.mubr.f32.vlgmr.msra.gmra.mrb[36].mxu0 %v11670_v26  ;;  %4235 = vmatmul.mubr.f32.vlgmr.msra.gmra.mrb[36].mxu1 %v11670_v26 }
 0x8ea   :  { %7121 = vmatprep.mubr.msk.f32.mxu0 %vm9787_vm1, %v13126_v63  ;;  %7126 = vmatprep.mubr.msk.f32.mxu1 %vm9787_vm1, %v13126_v63 }
 0x97b   :  { %v3653_v43 = vpop.f32.mrb[32].mxu0  ;;  %v3724_v4 = vpop.f32.mrb[32].mxu1 }
 0x97c   :  { %v3655_v32 = vpop.f32.mrb[33].mxu0  ;;  %v3726_v33 = vpop.f32.mrb[33].mxu1 }
 0x97d   :  { %v3733_v50 = vcombine.low %v3653_v43, %v3655_v32  ;;  %v3734_v12 = vcombine.low %v3724_v4, %v3726_v33 }
 0x97f   :  { %v3741_v34 = vrot.slane %v3733_v50, %v10877_v40  ;;  %v3748_v5 = vrot.slane %v3734_v12, %v10877_v40 }
 0x981   :  { %v3749_v38 = vcombine.low %v3741_v34, %v3748_v5 }
 0x983   :  { %v3756_v37 = vrot.slane %v3749_v38, %v10877_v40 }
 0x985   :  { %v3758_v27 = vadd.f32 %v3756_v37, %v3586_v15  ;;  %v4245_v37 = vld [vmem:[%s12953_s7 + $0x20] sm:$0xff] }
 0x987   :  { %v3939_v52 = vrot.slane %v3758_v27, %v10862_v0  ;;  %v3943_v2 = vrot.slane %v3758_v27, %v13291_v28  ;;  %v3947_v3 = vrot.slane %v3758_v27, %v13292_v44  ;;  %v3951_v8 = vrot.slane %v3758_v27, %v10871_v47  ;;  %v4249_v27 = vld [vmem:[%s12953_s7 + $0x40] sm:$0xff] }
 0x99b   :  { %v3829_v62 = vpop.f32.mrb[34].mxu0  ;;  %v3900_v60 = vpop.f32.mrb[34].mxu1 }
 0x99c   :  { %v3831_v19 = vpop.f32.mrb[35].mxu0  ;;  %v3902_v25 = vpop.f32.mrb[35].mxu1 }
 0x99d   :  { %v3909_v30 = vcombine.low %v3829_v62, %v3831_v19  ;;  %v3910_v49 = vcombine.low %v3900_v60, %v3902_v25  ;;  %v4242_v19 = vld [vmem:[%s12953_s7 + $0x8] sm:$0xff] }
 0x99e   :  { %v4246_v25 = vld [vmem:[%s12953_s7 + $0x28] sm:$0xff] }
 0x99f   :  { %v3917_v13 = vrot.slane %v3909_v30, %v10877_v40  ;;  %v3924_v7 = vrot.slane %v3910_v49, %v10877_v40  ;;  %v4241_v30 = vld [vmem:[%s12953_s7] sm:$0xff]  ;;  %v11726_v49 = vpack.c.bf16 %v4246_v25, %v4242_v19 }
 0x9a0   :  { %v11737_v15 = vpack.c.bf16 %v4245_v37, %v4241_v30  ;;  %v4305_v19 = vld [vmem:[%s12953_s7 + $0x200] sm:$0xff]  ;;  %v4314_v30 = vld [vmem:[%s12953_s7 + $0x248] sm:$0xff] }
 0x9a1   :  { %v3925_v16 = vcombine.low %v3917_v13, %v3924_v7  ;;  %13294 = vst [vmem:[#allocation40_spill] sm:$0xff] %v11726_v49  ;;  %v4250_v13 = vld [vmem:[%s12953_s7 + $0x48] sm:$0xff]  ;;  %v4309_v25 = vld [vmem:[%s12953_s7 + $0x220] sm:$0xff] }
 0x9a2   :  { %v4254_v7 = vld [vmem:[%s12953_s7 + $0x68] sm:$0xff] }
 0x9a3   :  { %v3932_v36 = vrot.slane %v3925_v16, %v10877_v40  ;;  %v11739_v16 = vpack.c.bf16 %v4254_v7, %v4250_v13  ;;  %v4318_v37 = vld [vmem:[%s12953_s7 + $0x268] sm:$0xff]  ;;  %v11890_v13 = vpack.c.bf16 %v4309_v25, %v4305_v19  ;;  %v4353_v19 = vld [vmem:[%s12953_s7 + $0x380] sm:$0xff] }
 0x9a4   :  { %v11893_v7 = vpack.c.bf16 %v4318_v37, %v4314_v30  ;;  %v4357_v25 = vld [vmem:[%s12953_s7 + $0x3a0] sm:$0xff]  ;;  %v4362_v30 = vld [vmem:[%s12953_s7 + $0x3c8] sm:$0xff] }
 0x9a5   :  { %v3934_v42 = vadd.f32 %v3932_v36, %v3759_v41  ;;  %v4253_v36 = vld [vmem:[%s12953_s7 + $0x60] sm:$0xff]  ;;  %v4244_v41 = vld [vmem:[%s12953_s7 + $0x18] sm:$0xff]  ;;  %v4366_v37 = vld [vmem:[%s12953_s7 + $0x3e8] sm:$0xff] }
 0x9a7   :  { %v3960_v18 = vrot.slane %v3934_v42, %v10862_v0  ;;  %v3964_v48 = vrot.slane %v3934_v42, %v13291_v28  ;;  %v3968_v61 = vrot.slane %v3934_v42, %v13292_v44  ;;  %v3972_v29 = vrot.slane %v3934_v42, %v10871_v47  ;;  %v4248_v42 = vld [vmem:[%s12953_s7 + $0x38] sm:$0xff] }
 0x9a9   :  { %v3977_v40 = vsel %vm1016_vm0, %v3939_v52, %v3960_v18  ;;  %v3978_v53 = vsel %vm1016_vm0, %v3943_v2, %v3964_v48  ;;  %v3979_v17 = vsel %vm1016_vm0, %v3947_v3, %v3968_v61  ;;  %v3980_v35 = vsel %vm1016_vm0, %v3951_v8, %v3972_v29  ;;  %v4258_v3 = vld [vmem:[%s12953_s7 + $0x88] sm:$0xff]  ;;  %v4257_v48 = vld [vmem:[%s12953_s7 + $0x80] sm:$0xff] }
 0x9aa   :  { %v7052_v11 = vmul.f32 -1.442695, %v3977_v40  ;;  %v7053_v46 = vmul.f32 -1.442695, %v3978_v53  ;;  %v7054_v51 = vmul.f32 -1.442695, %v3980_v35  ;;  %v11755_v52 = vpack.c.bf16 %v4253_v36, %v4249_v27 }
 0x9ab   :  { %v11757_v2 = vpack.c.bf16 %v4248_v42, %v4244_v41  ;;  %v4262_v8 = vld [vmem:[%s12953_s7 + $0xa8] sm:$0xff]  ;;  %v4261_v61 = vld [vmem:[%s12953_s7 + $0xa0] sm:$0xff] }
 0x9ac   :  { %9556 = vpow2.f32 %v7052_v11  ;;  %v11766_v18 = vpack.c.bf16 %v4262_v8, %v4258_v3  ;;  %v4266_v29 = vld [vmem:[%s12953_s7 + $0xc8] sm:$0xff]  ;;  %v11782_v53 = vpack.c.bf16 %v4261_v61, %v4257_v48  ;;  %v4265_v35 = vld [vmem:[%s12953_s7 + $0xc0] sm:$0xff] }
 0x9ad   :  { %9558 = vpow2.f32 %v7053_v46  ;;  %13295 = vst [vmem:[#allocation41_spill] sm:$0xff] %v11757_v2  ;;  %v4270_v40 = vld [vmem:[%s12953_s7 + $0xe8] sm:$0xff]  ;;  %v4269_v11 = vld [vmem:[%s12953_s7 + $0xe0] sm:$0xff] }
 0x9ae   :  { %9560 = vpow2.f32 %v7054_v51  ;;  %v4274_v46 = vld [vmem:[%s12953_s7 + $0x108] sm:$0xff]  ;;  %v4313_v27 = vld [vmem:[%s12953_s7 + $0x240] sm:$0xff] }
 0x9af   :  { %9562 = vtanh.f32 %v3979_v17  ;;  %v11785_v17 = vpack.c.bf16 %v4270_v40, %v4266_v29  ;;  %v4278_v51 = vld [vmem:[%s12953_s7 + $0x128] sm:$0xff]  ;;  %v4317_v36 = vld [vmem:[%s12953_s7 + $0x260] sm:$0xff] }
 0x9b0   :  { %v4322_v41 = vld [vmem:[%s12953_s7 + $0x288] sm:$0xff]  ;;  %v11908_v3 = vpack.c.bf16 %v4317_v36, %v4313_v27  ;;  %v4321_v48 = vld [vmem:[%s12953_s7 + $0x280] sm:$0xff]  ;;  %v11998_v27 = vpack.c.bf16 %v4357_v25, %v4353_v19  ;;  %v12001_v36 = vpack.c.bf16 %v4366_v37, %v4362_v30  ;;  %v4259_v25 = vld [vmem:[%s12953_s7 + $0x90] sm:$0xff] }
 0x9b1   :  { %v4326_v42 = vld [vmem:[%s12953_s7 + $0x2a8] sm:$0xff]  ;;  %v4325_v61 = vld [vmem:[%s12953_s7 + $0x2a0] sm:$0xff]  ;;  %v4263_v30 = vld [vmem:[%s12953_s7 + $0xb0] sm:$0xff] }
 0x9b2   :  { %v11911_v8 = vpack.c.bf16 %v4326_v42, %v4322_v41  ;;  %v4330_v29 = vld [vmem:[%s12953_s7 + $0x2c8] sm:$0xff]  ;;  %v4361_v41 = vld [vmem:[%s12953_s7 + $0x3c0] sm:$0xff]  ;;  %v4268_v37 = vld [vmem:[%s12953_s7 + $0xd8] sm:$0xff] }
 0x9b3   :  { %v4334_v40 = vld [vmem:[%s12953_s7 + $0x2e8] sm:$0xff]  ;;  %v4365_v42 = vld [vmem:[%s12953_s7 + $0x3e0] sm:$0xff] }
 0x9b6   :  { %v9557_v54 = vpop.eup %9556 }
 0x9b7   :  { %v9559_v57 = vpop.eup %9558  ;;  %v3984_v56 = vadd.f32 1.0, %v9557_v54  ;;  %v11800_v54 = vpack.c.bf16 %v4269_v11, %v4265_v35  ;;  %v11926_v35 = vpack.c.bf16 %v4325_v61, %v4321_v48  ;;  %v11929_v11 = vpack.c.bf16 %v4334_v40, %v4330_v29 }
 0x9b8   :  { %v3990_v1 = vadd.f32 1.0, %v9559_v57  ;;  %v9561_v9 = vpop.eup %9560  ;;  %v11803_v57 = vpack.c.bf16 %v4278_v51, %v4274_v46  ;;  %v4329_v46 = vld [vmem:[%s12953_s7 + $0x2c0] sm:$0xff]  ;;  %v12014_v29 = vpack.c.bf16 %v4365_v42, %v4361_v41  ;;  %v4272_v41 = vld [vmem:[%s12953_s7 + $0xf8] sm:$0xff]  ;;  %v12069_v42 = vpack.c.bf16 %v4263_v30, %v4259_v25 }
 0x9b9   :  { %9564 = vrcp.f32 %v3984_v56  ;;  %v9563_v23 = vpop.eup %9562  ;;  %v3997_v58 = vadd.f32 1.0, %v9561_v9  ;;  %v4273_v56 = vld [vmem:[%s12953_s7 + $0x100] sm:$0xff]  ;;  %v4282_v9 = vld [vmem:[%s12953_s7 + $0x148] sm:$0xff] }
 0x9ba   :  { %9566 = vrcp.f32 %v3990_v1  ;;  %v4277_v1 = vld [vmem:[%s12953_s7 + $0x120] sm:$0xff] }
 0x9bb   :  { %9568 = vrcp.f32 %v3997_v58  ;;  %v4281_v58 = vld [vmem:[%s12953_s7 + $0x140] sm:$0xff] }
 0x9bc   :  { %v4333_v51 = vld [vmem:[%s12953_s7 + $0x2e0] sm:$0xff]  ;;  %v12009_v48 = vpop.f32.mrb[36].mxu1 }
 0x9bd   :  { %v12011_v61 = vpop.f32.mrb[37].mxu1 }
 0x9c3   :  { %v9565_v55 = vpop.eup %9564 }
 0x9c4   :  { %v9567_v59 = vpop.eup %9566  ;;  %v4001_v45 = vmul.f32 %v9565_v55, %v9563_v23  ;;  %v4286_v23 = vld [vmem:[%s12953_s7 + $0x168] sm:$0xff]  ;;  %v11818_v55 = vpack.c.bf16 %v4277_v1, %v4273_v56 }
 0x9c5   :  { %v4000_v31 = vmul.f32 %v9567_v59, %v11437_v6  ;;  %v9569_v24 = vpop.eup %9568  ;;  %v11708_v6 = vpop.f32.mrb[36].mxu0  ;;  %v11821_v59 = vpack.c.bf16 %v4286_v23, %v4282_v9  ;;  %v4338_v56 = vld [vmem:[%s12953_s7 + $0x308] sm:$0xff]  ;;  %v11944_v9 = vpack.c.bf16 %v4333_v51, %v4329_v46  ;;  %v4243_v46 = vld [vmem:[%s12953_s7 + $0x10] sm:$0xff] }
 0x9c6   :  { %v11710_v32 = vpop.f32.mrb[37].mxu0  ;;  %v4342_v1 = vld [vmem:[%s12953_s7 + $0x328] sm:$0xff]  ;;  %v4247_v51 = vld [vmem:[%s12953_s7 + $0x30] sm:$0xff] }
 0x9c7   :  { %v4002_v39 = vadd.f32 %v4001_v45, %v4000_v31  ;;  %v4285_v45 = vld [vmem:[%s12953_s7 + $0x160] sm:$0xff]  ;;  %v4290_v31 = vld [vmem:[%s12953_s7 + $0x188] sm:$0xff]  ;;  %v11947_v23 = vpack.c.bf16 %v4342_v1, %v4338_v56  ;;  %v4252_v56 = vld [vmem:[%s12953_s7 + $0x58] sm:$0xff] }
 0x9c8   :  { %v4256_v1 = vld [vmem:[%s12953_s7 + $0x78] sm:$0xff] }
 0x9c9   :  { %9570 = vtanh.f32 %v4002_v39  ;;  %v4294_v39 = vld [vmem:[%s12953_s7 + $0x1a8] sm:$0xff] }
 0x9d3   :  { %v9571_v10 = vpop.eup %9570 }
 0x9d4   :  { %v4004_v14 = vmul.f32 %v9571_v10, %v9569_v24  ;;  %v11836_v24 = vpack.c.bf16 %v4285_v45, %v4281_v58  ;;  %v11839_v10 = vpack.c.bf16 %v4294_v39, %v4290_v31  ;;  %v4337_v58 = vld [vmem:[%s12953_s7 + $0x300] sm:$0xff]  ;;  %v4346_v31 = vld [vmem:[%s12953_s7 + $0x348] sm:$0xff] }
 0x9d5   :  { %v4341_v45 = vld [vmem:[%s12953_s7 + $0x320] sm:$0xff]  ;;  %v4350_v39 = vld [vmem:[%s12953_s7 + $0x368] sm:$0xff] }
 0x9d6   :  { %4005 = vst [vmem:[#allocation4 + $0x7] sm:$0x1] %v4004_v14  ;;  %4006 = vst [vmem:[#allocation5 - $0x1] sm:$0x2] %v4004_v14  ;;  %v4289_v14 = vld [vmem:[%s12953_s7 + $0x180] sm:$0xff] }
 0x9dd   :  { %v4007_v20 = vld [vmem:[#allocation4] sm:$0xff]  ;;  %v4009_v43 = vld [vmem:[#allocation5] sm:$0xff] }
 0x9de   :  { %v4008_v22 = vadd.f32 %v9732_v21, %v4007_v20  ;;  %v4293_v20 = vld [vmem:[%s12953_s7 + $0x1a0] sm:$0xff]  ;;  %v4298_v21 = vld [vmem:[%s12953_s7 + $0x1c8] sm:$0xff] }
 0x9e0   :  { %v11701_v4 = vadd.f32 %v4009_v43, %v4008_v22  ;;  %v4302_v22 = vld [vmem:[%s12953_s7 + $0x1e8] sm:$0xff]  ;;  %v11854_v43 = vpack.c.bf16 %v4293_v20, %v4289_v14  ;;  %v11962_v14 = vpack.c.bf16 %v4341_v45, %v4337_v58  ;;  %v11965_v20 = vpack.c.bf16 %v4350_v39, %v4346_v31 }
 0x9e1   :  { %v12031_v45 = vpack.c.bf16 %v4247_v51, %v4243_v46  ;;  %v12034_v39 = vpack.c.bf16 %v4256_v1, %v4252_v56  ;;  %v4267_v46 = vld [vmem:[%s12953_s7 + $0xd0] sm:$0xff]  ;;  %v4276_v56 = vld [vmem:[%s12953_s7 + $0x118] sm:$0xff] }
 0x9e2   :  { %13293 = vst [vmem:[#allocation39_spill] sm:$0xff] %v11701_v4  ;;  %4011 = vst [vmem:[#allocation7] sm:$0xff] %v11701_v4  ;;  %7120 = vmatpush3.xpose.msra.mxu0 %v11701_v4  ;;  %7125 = vmatpush3.msra.mxu1 %v11701_v4  ;;  %v4271_v51 = vld [vmem:[%s12953_s7 + $0xf0] sm:$0xff]  ;;  %v4280_v1 = vld [vmem:[%s12953_s7 + $0x138] sm:$0xff] }
 0x9e3   :  { %8416 = vmatprep.subr.bf16.mxu0 %v11726_v49  ;;  %8480 = vmatprep.subr.bf16.mxu1 %v11757_v2 }
 0x9e5   :  { %7122 = vmatmul.mubr.f32.vlgmr.msra.gmra.mrb[38].mxu0 %v11670_v26 }
 0x9e6   :  { %4592 = vmatprep.mubr.f32.mxu0 %v11670_v26  ;;  %8418 = vmatpush1.bf16.msra.mxu0 %v11737_v15 }
 0x9e7   :  { %8420 = vmatprep.subr.bf16.mxu0 %v11739_v16 }
 0x9ea   :  { %8422 = vmatpush1.bf16.msra.mxu0 %v11755_v52 }
 0x9eb   :  { %8424 = vmatprep.subr.bf16.mxu0 %v11766_v18 }
 0x9ee   :  { %8426 = vmatpush1.bf16.msra.mxu0 %v11782_v53 }
 0x9ef   :  { %8428 = vmatprep.subr.bf16.mxu0 %v11785_v17 }
 0x9f2   :  { %8430 = vmatpush1.bf16.msra.mxu0 %v11800_v54 }
 0x9f3   :  { %8432 = vmatprep.subr.bf16.mxu0 %v11803_v57 }
 0x9f6   :  { %8434 = vmatpush1.bf16.msra.mxu0 %v11818_v55 }
 0x9f7   :  { %8436 = vmatprep.subr.bf16.mxu0 %v11821_v59 }
 0x9fa   :  { %8438 = vmatpush1.bf16.msra.mxu0 %v11836_v24 }
 0x9fb   :  { %8440 = vmatprep.subr.bf16.mxu0 %v11839_v10 }
 0x9fe   :  { %8442 = vmatpush1.bf16.msra.mxu0 %v11854_v43 }
 0xab8   :  { %v4435_v33 = vpop.f32.mrb[38].mxu0 }
 0xab9   :  { %v7123_v50 = vpop.f32.mrb[39].mxu0  ;;  %v4440_v12 = vsel %vm4439_vm2, %v4435_v33, -inf }
 0xaba   :  { %4441 = vmax.xlane.f32.xlu0 %v4440_v12  ;;  %v4297_v50 = vld [vmem:[%s12953_s7 + $0x1c0] sm:$0xff] }
 0xabb   :  { %v4301_v12 = vld [vmem:[%s12953_s7 + $0x1e0] sm:$0xff] }
 0xb47   :  { %v4442_v34 = vpop.xlane.xlu0 %4441 }
 0xb48   :  { %v4443_v5 = vsub.f32 %v4435_v33, %v4442_v34  ;;  %v11857_v33 = vpack.c.bf16 %v4302_v22, %v4298_v21  ;;  %v4306_v34 = vld [vmem:[%s12953_s7 + $0x208] sm:$0xff]  ;;  %v4345_v21 = vld [vmem:[%s12953_s7 + $0x340] sm:$0xff] }
 0xb49   :  { %v4349_v22 = vld [vmem:[%s12953_s7 + $0x360] sm:$0xff] }
 0xb4a   :  { %v4444_v38 = vmul.f32 1.442695, %v4443_v5  ;;  %v4310_v5 = vld [vmem:[%s12953_s7 + $0x228] sm:$0xff]  ;;  %8444 = vmatprep.subr.bf16.mxu0 %v11857_v33 }
 0xb4c   :  { %9572 = vpow2.f32 %v4444_v38  ;;  %v11872_v38 = vpack.c.bf16 %v4301_v12, %v4297_v50  ;;  %v4354_v50 = vld [vmem:[%s12953_s7 + $0x388] sm:$0xff] }
 0xb4d   :  { %v4358_v12 = vld [vmem:[%s12953_s7 + $0x3a8] sm:$0xff] }
 0xb4e   :  { %8446 = vmatpush1.bf16.msra.mxu0 %v11872_v38 }
 0xb56   :  { %v11713_v62 = vpop.eup %9572 }
 0xb57   :  { %v4446_v60 = vsel %vm4439_vm2, %v11713_v62, 0.0 }
 0xb58   :  { %4447 = vadd.xlane.f32.xlu0 %v4446_v60  ;;  %v11875_v60 = vpack.c.bf16 %v4310_v5, %v4306_v34  ;;  %v11980_v34 = vpack.c.bf16 %v4349_v22, %v4345_v21  ;;  %v11983_v5 = vpack.c.bf16 %v4358_v12, %v4354_v50  ;;  %v4251_v21 = vld [vmem:[%s12953_s7 + $0x50] sm:$0xff]  ;;  %v4260_v50 = vld [vmem:[%s12953_s7 + $0x98] sm:$0xff] }
 0xb59   :  { %v4255_v22 = vld [vmem:[%s12953_s7 + $0x70] sm:$0xff]  ;;  %v4264_v12 = vld [vmem:[%s12953_s7 + $0xb8] sm:$0xff] }
 0xb5a   :  { %8448 = vmatprep.subr.bf16.mxu0 %v11875_v60  ;;  %v12054_v19 = vpack.c.bf16 %v4264_v12, %v4260_v50  ;;  %v4284_v50 = vld [vmem:[%s12953_s7 + $0x158] sm:$0xff] }
 0xb5b   :  { %8450 = vmatpush1.bf16.msra.mxu0 %v11890_v13  ;;  %v4288_v12 = vld [vmem:[%s12953_s7 + $0x178] sm:$0xff] }
 0xb5c   :  { %8452 = vmatprep.subr.bf16.mxu0 %v11893_v7  ;;  %v12108_v30 = vpack.c.bf16 %v4288_v12, %v4284_v50  ;;  %v4300_v50 = vld [vmem:[%s12953_s7 + $0x1d8] sm:$0xff] }
 0xb5d   :  { %v4304_v12 = vld [vmem:[%s12953_s7 + $0x1f8] sm:$0xff] }
 0xb5e   :  { %13296 = vst [vmem:[#allocation42_spill] sm:$0xff] %v12108_v30 }
 0xb5f   :  { %8454 = vmatpush1.bf16.msra.mxu0 %v11908_v3 }
 0xb60   :  { %8456 = vmatprep.subr.bf16.mxu0 %v11911_v8 }
 0xb63   :  { %8458 = vmatpush1.bf16.msra.mxu0 %v11926_v35 }
 0xb64   :  { %8460 = vmatprep.subr.bf16.mxu0 %v11929_v11 }
 0xb67   :  { %8462 = vmatpush1.bf16.msra.mxu0 %v11944_v9 }
 0xb68   :  { %8464 = vmatprep.subr.bf16.mxu0 %v11947_v23 }
 0xb6b   :  { %8466 = vmatpush1.bf16.msra.mxu0 %v11962_v14 }
 0xb6c   :  { %8468 = vmatprep.subr.bf16.mxu0 %v11965_v20 }
 0xb6f   :  { %8470 = vmatpush1.bf16.msra.mxu0 %v11980_v34 }
 0xb70   :  { %8472 = vmatprep.subr.bf16.mxu0 %v11983_v5 }
 0xb73   :  { %8474 = vmatpush1.bf16.msra.mxu0 %v11998_v27 }
 0xb74   :  { %8476 = vmatprep.subr.bf16.mxu0 %v12001_v36 }
 0xb77   :  { %8478 = vmatpush1.bf16.msra.mxu0 %v12014_v29 }
 0xb78   :  { %7129 = vmatprep.subr.mxu0 %v13126_v63 }
 0xbe5   :  { %v4448_v40 = vpop.xlane.xlu0 %4447 }
 0xbe6   :  { %9574 = vrcp.f32 %v4448_v40  ;;  %v12072_v40 = vpack.c.bf16 %v4272_v41, %v4268_v37  ;;  %v4283_v37 = vld [vmem:[%s12953_s7 + $0x150] sm:$0xff] }
 0xbe7   :  { %v4287_v41 = vld [vmem:[%s12953_s7 + $0x170] sm:$0xff] }
 0xbf0   :  { %v9575_v58 = vpop.eup %9574 }
 0xbf1   :  { %v4450_v31 = vmul.f32 %v9575_v58, %v11713_v62  ;;  %v12050_v62 = vpack.c.bf16 %v4255_v22, %v4251_v21  ;;  %v12087_v58 = vpack.c.bf16 %v4271_v51, %v4267_v46  ;;  %v4275_v21 = vld [vmem:[%s12953_s7 + $0x110] sm:$0xff]  ;;  %v4292_v46 = vld [vmem:[%s12953_s7 + $0x198] sm:$0xff] }
 0xbf2   :  { %v4279_v22 = vld [vmem:[%s12953_s7 + $0x130] sm:$0xff]  ;;  %v4296_v51 = vld [vmem:[%s12953_s7 + $0x1b8] sm:$0xff] }
 0xbf3   :  { %7127 = vmatmul.mubr.msk.f32.vlgmr.msra.gmra.mrb[38].mxu1 %vm4439_vm2, %v4450_v31  ;;  %v12090_v31 = vpack.c.bf16 %v4280_v1, %v4276_v56  ;;  %v12105_v25 = vpack.c.bf16 %v4279_v22, %v4275_v21  ;;  %v12123_v56 = vpack.c.bf16 %v4287_v41, %v4283_v37  ;;  %v12126_v1 = vpack.c.bf16 %v4296_v51, %v4292_v46  ;;  %v4291_v21 = vld [vmem:[%s12953_s7 + $0x190] sm:$0xff] }
 0xbf4   :  { %8482 = vmatpush1.bf16.msra.mxu1 %v12031_v45  ;;  %4663 = vmatprep.mubr.f32.mxu1 %v11670_v26  ;;  %v4295_v22 = vld [vmem:[%s12953_s7 + $0x1b0] sm:$0xff]  ;;  %v12144_v41 = vpack.c.bf16 %v4304_v12, %v4300_v50 }
 0xbf5   :  { %8484 = vmatprep.subr.bf16.mxu1 %v12034_v39  ;;  %13297 = vst [vmem:[#allocation43_spill] sm:$0xff] %v12123_v56  ;;  %13298 = vst [vmem:[#allocation44_spill] sm:$0xff] %v12126_v1  ;;  %v12141_v37 = vpack.c.bf16 %v4295_v22, %v4291_v21  ;;  %v4299_v46 = vld [vmem:[%s12953_s7 + $0x1d0] sm:$0xff]  ;;  %v4312_v21 = vld [vmem:[%s12953_s7 + $0x238] sm:$0xff] }
 0xbf6   :  { %13300 = vst [vmem:[#allocation13_spill] sm:$0xff] %v12144_v41  ;;  %v4303_v51 = vld [vmem:[%s12953_s7 + $0x1f0] sm:$0xff] }
 0xbf7   :  { %13299 = vst [vmem:[#allocation45_spill] sm:$0xff] %v12141_v37  ;;  %v12159_v22 = vpack.c.bf16 %v4303_v51, %v4299_v46  ;;  %v4307_v12 = vld [vmem:[%s12953_s7 + $0x210] sm:$0xff]  ;;  %v4320_v46 = vld [vmem:[%s12953_s7 + $0x278] sm:$0xff] }
 0xbf8   :  { %8486 = vmatpush1.bf16.msra.mxu1 %v12050_v62 }
 0xbf9   :  { %8488 = vmatprep.subr.bf16.mxu1 %v12054_v19  ;;  %13301 = vst [vmem:[#allocation14_spill] sm:$0xff] %v12159_v22 }
 0xbfc   :  { %8490 = vmatpush1.bf16.msra.mxu1 %v12069_v42 }
 0xbfd   :  { %8492 = vmatprep.subr.bf16.mxu1 %v12072_v40 }
 0xc00   :  { %8494 = vmatpush1.bf16.msra.mxu1 %v12087_v58 }
 0xc01   :  { %8496 = vmatprep.subr.bf16.mxu1 %v12090_v31 }
 0xc04   :  { %8498 = vmatpush1.bf16.msra.mxu1 %v12105_v25 }
 0xc05   :  { %8500 = vmatprep.subr.bf16.mxu1 %v12108_v30  ;;  %v4308_v30 = vld [vmem:[%s12953_s7 + $0x218] sm:$0xff] }
 0xc06   :  { %v12162_v50 = vpack.c.bf16 %v4312_v21, %v4308_v30  ;;  %v4315_v21 = vld [vmem:[%s12953_s7 + $0x250] sm:$0xff] }
 0xc08   :  { %8502 = vmatpush1.bf16.msra.mxu1 %v12123_v56  ;;  %13302 = vst [vmem:[#allocation15_spill] sm:$0xff] %v12162_v50  ;;  %v4316_v56 = vld [vmem:[%s12953_s7 + $0x258] sm:$0xff] }
 0xc09   :  { %8504 = vmatprep.subr.bf16.mxu1 %v12126_v1  ;;  %v4311_v1 = vld [vmem:[%s12953_s7 + $0x230] sm:$0xff]  ;;  %v12180_v51 = vpack.c.bf16 %v4320_v46, %v4316_v56 }
 0xc0a   :  { %v12177_v30 = vpack.c.bf16 %v4311_v1, %v4307_v12  ;;  %v4328_v1 = vld [vmem:[%s12953_s7 + $0x2b8] sm:$0xff]  ;;  %v4323_v46 = vld [vmem:[%s12953_s7 + $0x290] sm:$0xff] }
 0xc0b   :  { %13304 = vst [vmem:[#allocation17_spill] sm:$0xff] %v12180_v51 }
 0xc0c   :  { %8506 = vmatpush1.bf16.msra.mxu1 %v12141_v37  ;;  %13303 = vst [vmem:[#allocation16_spill] sm:$0xff] %v12177_v30  ;;  %v4324_v37 = vld [vmem:[%s12953_s7 + $0x298] sm:$0xff] }
 0xc0d   :  { %8508 = vmatprep.subr.bf16.mxu1 %v12144_v41  ;;  %v4319_v41 = vld [vmem:[%s12953_s7 + $0x270] sm:$0xff]  ;;  %v12198_v12 = vpack.c.bf16 %v4328_v1, %v4324_v37 }
 0xc0e   :  { %v12195_v56 = vpack.c.bf16 %v4319_v41, %v4315_v21  ;;  %v4336_v41 = vld [vmem:[%s12953_s7 + $0x2f8] sm:$0xff]  ;;  %v4331_v1 = vld [vmem:[%s12953_s7 + $0x2d0] sm:$0xff] }
 0xc0f   :  { %13306 = vst [vmem:[#allocation19_spill] sm:$0xff] %v12198_v12 }
 0xc10   :  { %8510 = vmatpush1.bf16.msra.mxu1 %v12159_v22  ;;  %13305 = vst [vmem:[#allocation18_spill] sm:$0xff] %v12195_v56  ;;  %v4332_v22 = vld [vmem:[%s12953_s7 + $0x2d8] sm:$0xff] }
 0xc11   :  { %8512 = vmatprep.subr.bf16.mxu1 %v12162_v50  ;;  %v4327_v50 = vld [vmem:[%s12953_s7 + $0x2b0] sm:$0xff]  ;;  %v12216_v21 = vpack.c.bf16 %v4336_v41, %v4332_v22 }
 0xc12   :  { %v12213_v37 = vpack.c.bf16 %v4327_v50, %v4323_v46  ;;  %v4344_v50 = vld [vmem:[%s12953_s7 + $0x338] sm:$0xff]  ;;  %v4339_v41 = vld [vmem:[%s12953_s7 + $0x310] sm:$0xff] }
 0xc13   :  { %13308 = vst [vmem:[#allocation21_spill] sm:$0xff] %v12216_v21 }
 0xc14   :  { %8514 = vmatpush1.bf16.msra.mxu1 %v12177_v30  ;;  %13307 = vst [vmem:[#allocation20_spill] sm:$0xff] %v12213_v37  ;;  %v4340_v30 = vld [vmem:[%s12953_s7 + $0x318] sm:$0xff] }
 0xc15   :  { %8516 = vmatprep.subr.bf16.mxu1 %v12180_v51  ;;  %v4335_v51 = vld [vmem:[%s12953_s7 + $0x2f0] sm:$0xff]  ;;  %v12234_v46 = vpack.c.bf16 %v4344_v50, %v4340_v30 }
 0xc16   :  { %v12231_v22 = vpack.c.bf16 %v4335_v51, %v4331_v1  ;;  %v4352_v51 = vld [vmem:[%s12953_s7 + $0x378] sm:$0xff]  ;;  %v4347_v50 = vld [vmem:[%s12953_s7 + $0x350] sm:$0xff] }
 0xc17   :  { %13310 = vst [vmem:[#allocation23_spill] sm:$0xff] %v12234_v46 }
 0xc18   :  { %8518 = vmatpush1.bf16.msra.mxu1 %v12195_v56  ;;  %13309 = vst [vmem:[#allocation22_spill] sm:$0xff] %v12231_v22  ;;  %v4348_v56 = vld [vmem:[%s12953_s7 + $0x358] sm:$0xff] }
 0xc19   :  { %8520 = vmatprep.subr.bf16.mxu1 %v12198_v12  ;;  %v4343_v12 = vld [vmem:[%s12953_s7 + $0x330] sm:$0xff]  ;;  %v12252_v1 = vpack.c.bf16 %v4352_v51, %v4348_v56 }
 0xc1a   :  { %v12249_v30 = vpack.c.bf16 %v4343_v12, %v4339_v41  ;;  %v4360_v12 = vld [vmem:[%s12953_s7 + $0x3b8] sm:$0xff]  ;;  %v4355_v51 = vld [vmem:[%s12953_s7 + $0x390] sm:$0xff] }
 0xc1b   :  { %13312 = vst [vmem:[#allocation25_spill] sm:$0xff] %v12252_v1 }
 0xc1c   :  { %8522 = vmatpush1.bf16.msra.mxu1 %v12213_v37  ;;  %13311 = vst [vmem:[#allocation24_spill] sm:$0xff] %v12249_v30  ;;  %v4356_v37 = vld [vmem:[%s12953_s7 + $0x398] sm:$0xff] }
 0xc1d   :  { %8524 = vmatprep.subr.bf16.mxu1 %v12216_v21  ;;  %v4351_v21 = vld [vmem:[%s12953_s7 + $0x370] sm:$0xff]  ;;  %v12270_v41 = vpack.c.bf16 %v4360_v12, %v4356_v37 }
 0xc1e   :  { %v12267_v56 = vpack.c.bf16 %v4351_v21, %v4347_v50  ;;  %v4368_v21 = vld [vmem:[%s12953_s7 + $0x3f8] sm:$0xff]  ;;  %v4363_v12 = vld [vmem:[%s12953_s7 + $0x3d0] sm:$0xff] }
 0xc1f   :  { %13314 = vst [vmem:[#allocation27_spill] sm:$0xff] %v12270_v41 }
 0xc20   :  { %8526 = vmatpush1.bf16.msra.mxu1 %v12231_v22  ;;  %13313 = vst [vmem:[#allocation26_spill] sm:$0xff] %v12267_v56  ;;  %v4364_v22 = vld [vmem:[%s12953_s7 + $0x3d8] sm:$0xff] }
 0xc21   :  { %8528 = vmatprep.subr.bf16.mxu1 %v12234_v46  ;;  %v4359_v46 = vld [vmem:[%s12953_s7 + $0x3b0] sm:$0xff]  ;;  %v12288_v50 = vpack.c.bf16 %v4368_v21, %v4364_v22 }
 0xc22   :  { %v12285_v37 = vpack.c.bf16 %v4359_v46, %v4355_v51 }
 0xc23   :  { %13316 = vst [vmem:[#allocation29_spill] sm:$0xff] %v12288_v50 }
 0xc24   :  { %8530 = vmatpush1.bf16.msra.mxu1 %v12249_v30  ;;  %13315 = vst [vmem:[#allocation28_spill] sm:$0xff] %v12285_v37 }
 0xc25   :  { %8532 = vmatprep.subr.bf16.mxu1 %v12252_v1  ;;  %v4367_v1 = vld [vmem:[%s12953_s7 + $0x3f0] sm:$0xff] }
 0xc26   :  { %v12297_v30 = vpack.c.bf16 %v4367_v1, %v4363_v12  ;;  %v4077_v1 = vld [vmem:[%s12954_s8] sm:$0xf] }
 0xc27   :  { %v4082_v51 = vrot.slane %v4077_v1, %v10862_v0  ;;  %v4086_v21 = vrot.slane %v4077_v1, %v13291_v28 }
 0xc28   :  { %8534 = vmatpush1.bf16.msra.mxu1 %v12267_v56  ;;  %13317 = vst [vmem:[#allocation30_spill] sm:$0xff] %v12297_v30 }
 0xc29   :  { %8536 = vmatprep.subr.bf16.mxu1 %v12270_v41  ;;  %v12316_v12 = vadd.f32 %v11708_v6, %v4082_v51  ;;  %v4090_v6 = vrot.slane %v4077_v1, %v13292_v44 }
 0xc2b   :  { %13318 = vst [vmem:[#allocation31_spill] sm:$0xff] %v12316_v12  ;;  %v12330_v51 = vadd.f32 %v12009_v48, %v4090_v6 }
 0xc2c   :  { %8538 = vmatpush1.bf16.msra.mxu1 %v12285_v37 }
 0xc2d   :  { %8540 = vmatprep.subr.bf16.mxu1 %v12288_v50  ;;  %v4094_v50 = vrot.slane %v4077_v1, %v10871_v47 }
 0xc2f   :  { %v12325_v28 = vadd.f32 %v12011_v61, %v4094_v50 }
 0xc30   :  { %8542 = vmatpush1.bf16.msra.mxu1 %v12297_v30 }
 0xc31   :  { %7134 = vmatprep.subr.mxu1 %v13126_v63 }
 0xcc6   :  { %v4520_v22 = vpop.f32.mrb[38].mxu1 }
 0xcc7   :  { %v7128_v46 = vpop.f32.mrb[39].mxu1  ;;  %4593 = vmatmul.mubr.f32.vlgmr.msra.gmra.mrb[40].mxu0 %v4520_v22  ;;  %4664 = vmatmul.mubr.f32.vlgmr.msra.gmra.mrb[40].mxu1 %v4520_v22  ;;  %v12319_v22 = vadd.f32 %v11710_v32, %v4086_v21 }
 0xcc8   :  { %7130 = vmatpush3.xpose.msra.mxu0 %v11701_v4  ;;  %7135 = vmatpush3.msra.mxu1 %v11701_v4 }
 0xcc9   :  { %7131 = vmatprep.mubr.msk.f32.mxu0 %vm9787_vm1, %v13126_v63  ;;  %7136 = vmatprep.mubr.msk.f32.mxu1 %vm9787_vm1, %v13126_v63 }
 0xcca   :  { %8544 = vmatprep.subr.bf16.mxu0 %v11726_v49  ;;  %8608 = vmatprep.subr.bf16.mxu1 %v11757_v2 }
 0xd9a   :  { %v4594_v46 = vpop.f32.mrb[40].mxu0  ;;  %v4665_v4 = vpop.f32.mrb[40].mxu1 }
 0xd9b   :  { %v4670_v49 = vadd.f32 %v4594_v46, %v12316_v12  ;;  %v4596_v30 = vpop.f32.mrb[41].mxu0  ;;  %v4667_v2 = vpop.f32.mrb[41].mxu1  ;;  %v4672_v46 = vadd.f32 %v4665_v4, %v12330_v51 }
 0xd9c   :  { %v4671_v37 = vadd.f32 %v4596_v30, %v12319_v22  ;;  %v4673_v32 = vadd.f32 %v4667_v2, %v12325_v28 }
 0xd9d   :  { %v7056_v41 = vmul.f32 -1.442695, %v4670_v49 }
 0xd9e   :  { %v7057_v0 = vmul.f32 -1.442695, %v4671_v37  ;;  %v7058_v21 = vmul.f32 -1.442695, %v4673_v32 }
 0xd9f   :  { %9576 = vpow2.f32 %v7056_v41 }
 0xda0   :  { %9578 = vpow2.f32 %v7057_v0 }
 0xda1   :  { %9580 = vpow2.f32 %v7058_v21 }
 0xda2   :  { %9582 = vtanh.f32 %v4672_v46 }
 0xda9   :  { %v9577_v47 = vpop.eup %9576 }
 0xdaa   :  { %v9579_v12 = vpop.eup %9578  ;;  %v4677_v30 = vadd.f32 1.0, %v9577_v47 }
 0xdab   :  { %v4683_v49 = vadd.f32 1.0, %v9579_v12  ;;  %v9581_v61 = vpop.eup %9580 }
 0xdac   :  { %9584 = vrcp.f32 %v4677_v30  ;;  %v9583_v41 = vpop.eup %9582  ;;  %v4690_v2 = vadd.f32 1.0, %v9581_v61 }
 0xdad   :  { %9586 = vrcp.f32 %v4683_v49 }
 0xdae   :  { %9588 = vrcp.f32 %v4690_v2  ;;  %v13320_v2 = vld [vmem:[#allocation43_spill] sm:$0xff] }
 0xdb6   :  { %v9585_v37 = vpop.eup %9584 }
 0xdb7   :  { %v9587_v44 = vpop.eup %9586  ;;  %v4694_v50 = vmul.f32 %v9585_v37, %v9583_v41 }
 0xdb8   :  { %v4693_v1 = vmul.f32 0.0, %v9587_v44  ;;  %v9589_v4 = vpop.eup %9588 }
 0xdba   :  { %v12333_v48 = vadd.f32 %v4694_v50, %v4693_v1  ;;  %v13319_v50 = vld [vmem:[#allocation42_spill] sm:$0xff]  ;;  %v13321_v1 = vld [vmem:[#allocation44_spill] sm:$0xff] }
 0xdbc   :  { %9590 = vtanh.f32 %v12333_v48 }
 0xdc6   :  { %v9591_v0 = vpop.eup %9590 }
 0xdc7   :  { %v4697_v6 = vmul.f32 %v9591_v0, %v9589_v4  ;;  %v13322_v4 = vld [vmem:[#allocation45_spill] sm:$0xff] }
 0xdc8   :  { %v13323_v0 = vld [vmem:[#allocation13_spill] sm:$0xff] }
 0xdc9   :  { %v4698_v32 = vadd.f32 %v4697_v6, %v11670_v26  ;;  %v13324_v6 = vld [vmem:[#allocation14_spill] sm:$0xff] }
 0xdcb   :  { %7132 = vmatmul.mubr.f32.vlgmr.msra.gmra.mrb[42].mxu0 %v4698_v32 }
 0xdcc   :  { %4921 = vmatprep.mubr.f32.mxu0 %v4698_v32  ;;  %8546 = vmatpush1.bf16.msra.mxu0 %v11737_v15 }
 0xdcd   :  { %8548 = vmatprep.subr.bf16.mxu0 %v11739_v16 }
 0xdd0   :  { %8550 = vmatpush1.bf16.msra.mxu0 %v11755_v52 }
 0xdd1   :  { %8552 = vmatprep.subr.bf16.mxu0 %v11766_v18 }
 0xdd4   :  { %8554 = vmatpush1.bf16.msra.mxu0 %v11782_v53 }
 0xdd5   :  { %8556 = vmatprep.subr.bf16.mxu0 %v11785_v17 }
 0xdd8   :  { %8558 = vmatpush1.bf16.msra.mxu0 %v11800_v54 }
 0xdd9   :  { %8560 = vmatprep.subr.bf16.mxu0 %v11803_v57 }
 0xddc   :  { %8562 = vmatpush1.bf16.msra.mxu0 %v11818_v55 }
 0xddd   :  { %8564 = vmatprep.subr.bf16.mxu0 %v11821_v59 }
 0xde0   :  { %8566 = vmatpush1.bf16.msra.mxu0 %v11836_v24 }
 0xde1   :  { %8568 = vmatprep.subr.bf16.mxu0 %v11839_v10 }
 0xde4   :  { %8570 = vmatpush1.bf16.msra.mxu0 %v11854_v43 }
 0xde5   :  { %8572 = vmatprep.subr.bf16.mxu0 %v11857_v33 }
 0xde8   :  { %8574 = vmatpush1.bf16.msra.mxu0 %v11872_v38 }
 0xde9   :  { %8576 = vmatprep.subr.bf16.mxu0 %v11875_v60 }
 0xdec   :  { %8578 = vmatpush1.bf16.msra.mxu0 %v11890_v13 }
 0xded   :  { %8580 = vmatprep.subr.bf16.mxu0 %v11893_v7 }
 0xdf0   :  { %8582 = vmatpush1.bf16.msra.mxu0 %v11908_v3 }
 0xdf1   :  { %8584 = vmatprep.subr.bf16.mxu0 %v11911_v8 }
 0xdf4   :  { %8586 = vmatpush1.bf16.msra.mxu0 %v11926_v35 }
 0xdf5   :  { %8588 = vmatprep.subr.bf16.mxu0 %v11929_v11 }
 0xdf8   :  { %8590 = vmatpush1.bf16.msra.mxu0 %v11944_v9 }
 0xdf9   :  { %8592 = vmatprep.subr.bf16.mxu0 %v11947_v23 }
 0xdfc   :  { %8594 = vmatpush1.bf16.msra.mxu0 %v11962_v14 }
 0xdfd   :  { %8596 = vmatprep.subr.bf16.mxu0 %v11965_v20 }
 0xe00   :  { %8598 = vmatpush1.bf16.msra.mxu0 %v11980_v34 }
 0xe01   :  { %8600 = vmatprep.subr.bf16.mxu0 %v11983_v5 }
 0xe04   :  { %8602 = vmatpush1.bf16.msra.mxu0 %v11998_v27 }
 0xe05   :  { %8604 = vmatprep.subr.bf16.mxu0 %v12001_v36 }
 0xe08   :  { %8606 = vmatpush1.bf16.msra.mxu0 %v12014_v29 }
 0xe09   :  { %7139 = vmatprep.subr.mxu0 %v13126_v63 }
 0xe9e   :  { %v4765_v26 = vpop.f32.mrb[42].mxu0 }
 0xe9f   :  { %v7133_v12 = vpop.f32.mrb[43].mxu0  ;;  %v4769_v21 = vsel %vm4439_vm2, %v4765_v26, -inf }
 0xea0   :  { %4770 = vmax.xlane.f32.xlu1 %v4769_v21  ;;  %v13327_v12 = vld [vmem:[#allocation17_spill] sm:$0xff]  ;;  %v13328_v21 = vld [vmem:[#allocation18_spill] sm:$0xff] }
 0xf2d   :  { %v4771_v46 = vpop.xlane.xlu1 %4770 }
 0xf2e   :  { %v4772_v47 = vsub.f32 %v4765_v26, %v4771_v46  ;;  %v13326_v26 = vld [vmem:[#allocation16_spill] sm:$0xff]  ;;  %v13329_v46 = vld [vmem:[#allocation19_spill] sm:$0xff] }
 0xf30   :  { %v4773_v30 = vmul.f32 1.442695, %v4772_v47  ;;  %v13330_v47 = vld [vmem:[#allocation20_spill] sm:$0xff] }
 0xf32   :  { %9592 = vpow2.f32 %v4773_v30  ;;  %v13331_v30 = vld [vmem:[#allocation21_spill] sm:$0xff] }
 0xf3c   :  { %v9593_v49 = vpop.eup %9592 }
 0xf3d   :  { %v4775_v61 = vsel %vm4439_vm2, %v9593_v49, 0.0 }
 0xf3e   :  { %4776 = vadd.xlane.f32.xlu1 %v4775_v61  ;;  %v13333_v61 = vld [vmem:[#allocation23_spill] sm:$0xff] }
 0xfcb   :  { %v4777_v41 = vpop.xlane.xlu1 %4776 }
 0xfcc   :  { %9594 = vrcp.f32 %v4777_v41  ;;  %v13334_v41 = vld [vmem:[#allocation24_spill] sm:$0xff] }
 0xfd6   :  { %v9595_v37 = vpop.eup %9594 }
 0xfd7   :  { %v4779_v44 = vmul.f32 %v9595_v37, %v9593_v49  ;;  %v13332_v49 = vld [vmem:[#allocation22_spill] sm:$0xff]  ;;  %v13335_v37 = vld [vmem:[#allocation25_spill] sm:$0xff] }
 0xfd9   :  { %7137 = vmatmul.mubr.msk.f32.vlgmr.msra.gmra.mrb[42].mxu1 %vm4439_vm2, %v4779_v44  ;;  %v13336_v44 = vld [vmem:[#allocation27_spill] sm:$0xff] }
 0xfda   :  { %4992 = vmatprep.mubr.f32.mxu1 %v4698_v32  ;;  %8610 = vmatpush1.bf16.msra.mxu1 %v12031_v45  ;;  %v13325_v32 = vld [vmem:[#allocation15_spill] sm:$0xff] }
 0xfdb   :  { %8612 = vmatprep.subr.bf16.mxu1 %v12034_v39 }
 0xfde   :  { %8614 = vmatpush1.bf16.msra.mxu1 %v12050_v62 }
 0xfdf   :  { %8616 = vmatprep.subr.bf16.mxu1 %v12054_v19 }
 0xfe2   :  { %8618 = vmatpush1.bf16.msra.mxu1 %v12069_v42 }
 0xfe3   :  { %8620 = vmatprep.subr.bf16.mxu1 %v12072_v40 }
 0xfe6   :  { %8622 = vmatpush1.bf16.msra.mxu1 %v12087_v58 }
 0xfe7   :  { %8624 = vmatprep.subr.bf16.mxu1 %v12090_v31 }
 0xfea   :  { %8626 = vmatpush1.bf16.msra.mxu1 %v12105_v25 }
 0xfeb   :  { %8628 = vmatprep.subr.bf16.mxu1 %v13319_v50 }
 0xfee   :  { %8630 = vmatpush1.bf16.msra.mxu1 %v13320_v2 }
 0xfef   :  { %8632 = vmatprep.subr.bf16.mxu1 %v13321_v1 }
 0xff2   :  { %8634 = vmatpush1.bf16.msra.mxu1 %v13322_v4 }
 0xff3   :  { %8636 = vmatprep.subr.bf16.mxu1 %v13323_v0 }
 0xff6   :  { %8638 = vmatpush1.bf16.msra.mxu1 %v13324_v6 }
 0xff7   :  { %8640 = vmatprep.subr.bf16.mxu1 %v13325_v32 }
 0xffa   :  { %8642 = vmatpush1.bf16.msra.mxu1 %v13326_v26 }
 0xffb   :  { %8644 = vmatprep.subr.bf16.mxu1 %v13327_v12  ;;  %v13337_v12 = vld [vmem:[#allocation28_spill] sm:$0xff] }
 0xffe   :  { %8646 = vmatpush1.bf16.msra.mxu1 %v13328_v21  ;;  %v13338_v21 = vld [vmem:[#allocation29_spill] sm:$0xff] }
 0xfff   :  { %8648 = vmatprep.subr.bf16.mxu1 %v13329_v46  ;;  %v13339_v46 = vld [vmem:[#allocation30_spill] sm:$0xff] }
0x1002   :  { %8650 = vmatpush1.bf16.msra.mxu1 %v13330_v47 }
0x1003   :  { %8652 = vmatprep.subr.bf16.mxu1 %v13331_v30 }
0x1006   :  { %8654 = vmatpush1.bf16.msra.mxu1 %v13332_v49 }
0x1007   :  { %8656 = vmatprep.subr.bf16.mxu1 %v13333_v61  ;;  %v13340_v61 = vld [vmem:[#allocation39_spill] sm:$0xff] }
0x100a   :  { %8658 = vmatpush1.bf16.msra.mxu1 %v13334_v41 }
0x100b   :  { %8660 = vmatprep.subr.bf16.mxu1 %v13335_v37 }
0x100e   :  { %8662 = vmatpush1.bf16.msra.mxu1 %v12267_v56  ;;  %v13343_v56 = vld [vmem:[#allocation31_spill] sm:$0xff] }
0x100f   :  { %8664 = vmatprep.subr.bf16.mxu1 %v13336_v44 }
0x1012   :  { %8666 = vmatpush1.bf16.msra.mxu1 %v13337_v12  ;;  %v13341_v12 = vld [vmem:[#allocation40_spill] sm:$0xff] }
0x1013   :  { %8668 = vmatprep.subr.bf16.mxu1 %v13338_v21  ;;  %v13342_v21 = vld [vmem:[#allocation41_spill] sm:$0xff] }
0x1016   :  { %8670 = vmatpush1.bf16.msra.mxu1 %v13339_v46 }
0x1017   :  { %7144 = vmatprep.subr.mxu1 %v13126_v63 }
0x10ac   :  { %v4849_v30 = vpop.f32.mrb[42].mxu1 }
0x10ad   :  { %v7138_v49 = vpop.f32.mrb[43].mxu1  ;;  %4922 = vmatmul.mubr.f32.vlgmr.msra.gmra.mrb[44].mxu0 %v4849_v30  ;;  %4993 = vmatmul.mubr.f32.vlgmr.msra.gmra.mrb[44].mxu1 %v4849_v30 }
0x10ae   :  { %7140 = vmatpush3.xpose.msra.mxu0 %v13340_v61  ;;  %7145 = vmatpush3.msra.mxu1 %v13340_v61 }
0x10af   :  { %7141 = vmatprep.mubr.msk.f32.mxu0 %vm9787_vm1, %v13126_v63  ;;  %7146 = vmatprep.mubr.msk.f32.mxu1 %vm9787_vm1, %v13126_v63 }
0x10b0   :  { %8672 = vmatprep.subr.bf16.mxu0 %v13341_v12  ;;  %8736 = vmatprep.subr.bf16.mxu1 %v13342_v21 }
0x1180   :  { %v4923_v46 = vpop.f32.mrb[44].mxu0  ;;  %v4994_v44 = vpop.f32.mrb[44].mxu1 }
0x1181   :  { %v4999_v49 = vadd.f32 %v4923_v46, %v13343_v56  ;;  %v4925_v37 = vpop.f32.mrb[45].mxu0  ;;  %v4996_v30 = vpop.f32.mrb[45].mxu1  ;;  %v5001_v6 = vadd.f32 %v4994_v44, %v12330_v51 }
0x1182   :  { %v5000_v41 = vadd.f32 %v4925_v37, %v12319_v22  ;;  %v5002_v26 = vadd.f32 %v4996_v30, %v12325_v28 }
0x1183   :  { %v7060_v47 = vmul.f32 -1.442695, %v4999_v49 }
0x1184   :  { %v7061_v61 = vmul.f32 -1.442695, %v5000_v41  ;;  %v7062_v32 = vmul.f32 -1.442695, %v5002_v26 }
0x1185   :  { %9596 = vpow2.f32 %v7060_v47 }
0x1186   :  { %9598 = vpow2.f32 %v7061_v61 }
0x1187   :  { %9600 = vpow2.f32 %v7062_v32 }
0x1188   :  { %9602 = vtanh.f32 %v5001_v6 }
0x118f   :  { %v9597_v12 = vpop.eup %9596 }
0x1190   :  { %v9599_v0 = vpop.eup %9598  ;;  %v5006_v21 = vadd.f32 1.0, %v9597_v12 }
0x1191   :  { %v5012_v4 = vadd.f32 1.0, %v9599_v0  ;;  %v9601_v46 = vpop.eup %9600 }
0x1192   :  { %9604 = vrcp.f32 %v5006_v21  ;;  %v9603_v56 = vpop.eup %9602  ;;  %v5019_v47 = vadd.f32 1.0, %v9601_v46 }
0x1193   :  { %9606 = vrcp.f32 %v5012_v4  ;;  %v12423_v4 = vld [vmem:[%s12947_s1] sm:$0xff] }
0x1194   :  { %9608 = vrcp.f32 %v5019_v47 }
0x119c   :  { %v9605_v37 = vpop.eup %9604 }
0x119d   :  { %v9607_v49 = vpop.eup %9606  ;;  %v5023_v41 = vmul.f32 %v9605_v37, %v9603_v56 }
0x119e   :  { %v5022_v61 = vmul.f32 %v9607_v49, %v12333_v48  ;;  %v9609_v26 = vpop.eup %9608 }
0x11a0   :  { %v12417_v30 = vadd.f32 %v5023_v41, %v5022_v61 }
0x11a2   :  { %9610 = vtanh.f32 %v12417_v30 }
0x11ac   :  { %v9611_v12 = vpop.eup %9610 }
0x11ad   :  { %v5026_v32 = vmul.f32 %v9611_v12, %v9609_v26  ;;  %v13344_v26 = vld [vmem:[#allocation45_spill] sm:$0xff] }
0x11ae   :  { %v13345_v12 = vld [vmem:[#allocation13_spill] sm:$0xff] }
0x11af   :  { %v5027_v0 = vadd.f32 %v12423_v4, %v5026_v32  ;;  %v13346_v32 = vld [vmem:[#allocation14_spill] sm:$0xff] }
0x11b1   :  { %7142 = vmatmul.mubr.f32.vlgmr.msra.gmra.mrb[46].mxu0 %v5027_v0 }
0x11b2   :  { %5250 = vmatprep.mubr.f32.mxu0 %v5027_v0  ;;  %8674 = vmatpush1.bf16.msra.mxu0 %v11737_v15 }
0x11b3   :  { %8676 = vmatprep.subr.bf16.mxu0 %v11739_v16 }
0x11b6   :  { %8678 = vmatpush1.bf16.msra.mxu0 %v11755_v52 }
0x11b7   :  { %8680 = vmatprep.subr.bf16.mxu0 %v11766_v18 }
0x11ba   :  { %8682 = vmatpush1.bf16.msra.mxu0 %v11782_v53 }
0x11bb   :  { %8684 = vmatprep.subr.bf16.mxu0 %v11785_v17 }
0x11be   :  { %8686 = vmatpush1.bf16.msra.mxu0 %v11800_v54 }
0x11bf   :  { %8688 = vmatprep.subr.bf16.mxu0 %v11803_v57 }
0x11c2   :  { %8690 = vmatpush1.bf16.msra.mxu0 %v11818_v55 }
0x11c3   :  { %8692 = vmatprep.subr.bf16.mxu0 %v11821_v59 }
0x11c6   :  { %8694 = vmatpush1.bf16.msra.mxu0 %v11836_v24 }
0x11c7   :  { %8696 = vmatprep.subr.bf16.mxu0 %v11839_v10 }
0x11ca   :  { %8698 = vmatpush1.bf16.msra.mxu0 %v11854_v43 }
0x11cb   :  { %8700 = vmatprep.subr.bf16.mxu0 %v11857_v33 }
0x11ce   :  { %8702 = vmatpush1.bf16.msra.mxu0 %v11872_v38 }
0x11cf   :  { %8704 = vmatprep.subr.bf16.mxu0 %v11875_v60 }
0x11d2   :  { %8706 = vmatpush1.bf16.msra.mxu0 %v11890_v13 }
0x11d3   :  { %8708 = vmatprep.subr.bf16.mxu0 %v11893_v7 }
0x11d6   :  { %8710 = vmatpush1.bf16.msra.mxu0 %v11908_v3 }
0x11d7   :  { %8712 = vmatprep.subr.bf16.mxu0 %v11911_v8 }
0x11da   :  { %8714 = vmatpush1.bf16.msra.mxu0 %v11926_v35 }
0x11db   :  { %8716 = vmatprep.subr.bf16.mxu0 %v11929_v11 }
0x11de   :  { %8718 = vmatpush1.bf16.msra.mxu0 %v11944_v9 }
0x11df   :  { %8720 = vmatprep.subr.bf16.mxu0 %v11947_v23 }
0x11e2   :  { %8722 = vmatpush1.bf16.msra.mxu0 %v11962_v14 }
0x11e3   :  { %8724 = vmatprep.subr.bf16.mxu0 %v11965_v20 }
0x11e6   :  { %8726 = vmatpush1.bf16.msra.mxu0 %v11980_v34 }
0x11e7   :  { %8728 = vmatprep.subr.bf16.mxu0 %v11983_v5 }
0x11ea   :  { %8730 = vmatpush1.bf16.msra.mxu0 %v11998_v27 }
0x11eb   :  { %8732 = vmatprep.subr.bf16.mxu0 %v12001_v36 }
0x11ee   :  { %8734 = vmatpush1.bf16.msra.mxu0 %v12014_v29 }
0x11ef   :  { %7149 = vmatprep.subr.mxu0 %v13126_v63 }
0x1284   :  { %v5094_v56 = vpop.f32.mrb[46].mxu0 }
0x1285   :  { %v7143_v48 = vpop.f32.mrb[47].mxu0  ;;  %v5098_v6 = vsel %vm4439_vm2, %v5094_v56, -inf }
0x1286   :  { %5099 = vmax.xlane.f32.xlu0 %v5098_v6  ;;  %v13349_v48 = vld [vmem:[#allocation17_spill] sm:$0xff]  ;;  %v13350_v6 = vld [vmem:[#allocation18_spill] sm:$0xff] }
0x1313   :  { %v5100_v21 = vpop.xlane.xlu0 %5099 }
0x1314   :  { %v5101_v44 = vsub.f32 %v5094_v56, %v5100_v21  ;;  %v13348_v56 = vld [vmem:[#allocation16_spill] sm:$0xff]  ;;  %v13351_v21 = vld [vmem:[#allocation19_spill] sm:$0xff] }
0x1316   :  { %v5102_v46 = vmul.f32 1.442695, %v5101_v44  ;;  %v13352_v44 = vld [vmem:[#allocation20_spill] sm:$0xff] }
0x1318   :  { %9612 = vpow2.f32 %v5102_v46  ;;  %v13353_v46 = vld [vmem:[#allocation21_spill] sm:$0xff] }
0x1322   :  { %v9613_v37 = vpop.eup %9612 }
0x1323   :  { %v5104_v49 = vsel %vm4439_vm2, %v9613_v37, 0.0 }
0x1324   :  { %5105 = vadd.xlane.f32.xlu1 %v5104_v49  ;;  %v13355_v49 = vld [vmem:[#allocation23_spill] sm:$0xff] }
0x13b1   :  { %v5106_v41 = vpop.xlane.xlu1 %5105 }
0x13b2   :  { %9614 = vrcp.f32 %v5106_v41  ;;  %v13356_v41 = vld [vmem:[#allocation24_spill] sm:$0xff] }
0x13bc   :  { %v9615_v47 = vpop.eup %9614 }
0x13bd   :  { %v5108_v61 = vmul.f32 %v9615_v47, %v9613_v37  ;;  %v13354_v37 = vld [vmem:[#allocation22_spill] sm:$0xff]  ;;  %v13357_v47 = vld [vmem:[#allocation25_spill] sm:$0xff] }
0x13bf   :  { %7147 = vmatmul.mubr.msk.f32.vlgmr.msra.gmra.mrb[46].mxu1 %vm4439_vm2, %v5108_v61  ;;  %v13358_v61 = vld [vmem:[#allocation26_spill] sm:$0xff] }
0x13c0   :  { %5321 = vmatprep.mubr.f32.mxu1 %v5027_v0  ;;  %8738 = vmatpush1.bf16.msra.mxu1 %v12031_v45  ;;  %v13347_v0 = vld [vmem:[#allocation15_spill] sm:$0xff] }
0x13c1   :  { %8740 = vmatprep.subr.bf16.mxu1 %v12034_v39 }
0x13c4   :  { %8742 = vmatpush1.bf16.msra.mxu1 %v12050_v62 }
0x13c5   :  { %8744 = vmatprep.subr.bf16.mxu1 %v12054_v19 }
0x13c8   :  { %8746 = vmatpush1.bf16.msra.mxu1 %v12069_v42 }
0x13c9   :  { %8748 = vmatprep.subr.bf16.mxu1 %v12072_v40 }
0x13cc   :  { %8750 = vmatpush1.bf16.msra.mxu1 %v12087_v58 }
0x13cd   :  { %8752 = vmatprep.subr.bf16.mxu1 %v12090_v31 }
0x13d0   :  { %8754 = vmatpush1.bf16.msra.mxu1 %v12105_v25 }
0x13d1   :  { %8756 = vmatprep.subr.bf16.mxu1 %v13319_v50 }
0x13d4   :  { %8758 = vmatpush1.bf16.msra.mxu1 %v13320_v2 }
0x13d5   :  { %8760 = vmatprep.subr.bf16.mxu1 %v13321_v1 }
0x13d8   :  { %8762 = vmatpush1.bf16.msra.mxu1 %v13344_v26 }
0x13d9   :  { %8764 = vmatprep.subr.bf16.mxu1 %v13345_v12 }
0x13dc   :  { %8766 = vmatpush1.bf16.msra.mxu1 %v13346_v32 }
0x13dd   :  { %8768 = vmatprep.subr.bf16.mxu1 %v13347_v0 }
0x13e0   :  { %8770 = vmatpush1.bf16.msra.mxu1 %v13348_v56  ;;  %v13359_v56 = vld [vmem:[#allocation27_spill] sm:$0xff] }
0x13e1   :  { %8772 = vmatprep.subr.bf16.mxu1 %v13349_v48  ;;  %v13360_v48 = vld [vmem:[#allocation28_spill] sm:$0xff] }
0x13e4   :  { %8774 = vmatpush1.bf16.msra.mxu1 %v13350_v6  ;;  %v13361_v6 = vld [vmem:[#allocation29_spill] sm:$0xff] }
0x13e5   :  { %8776 = vmatprep.subr.bf16.mxu1 %v13351_v21  ;;  %v13362_v21 = vld [vmem:[#allocation30_spill] sm:$0xff] }
0x13e8   :  { %8778 = vmatpush1.bf16.msra.mxu1 %v13352_v44 }
0x13e9   :  { %8780 = vmatprep.subr.bf16.mxu1 %v13353_v46 }
0x13ec   :  { %8782 = vmatpush1.bf16.msra.mxu1 %v13354_v37 }
0x13ed   :  { %8784 = vmatprep.subr.bf16.mxu1 %v13355_v49  ;;  %v12493_v49 = vld [vmem:[#allocation7] sm:$0xff] }
0x13ee   :  { %13363 = vst [vmem:[#allocation32_spill] sm:$0xff] %v12493_v49 }
0x13f0   :  { %8786 = vmatpush1.bf16.msra.mxu1 %v13356_v41 }
0x13f1   :  { %8788 = vmatprep.subr.bf16.mxu1 %v13357_v47 }
0x13f4   :  { %8790 = vmatpush1.bf16.msra.mxu1 %v13358_v61 }
0x13f5   :  { %8792 = vmatprep.subr.bf16.mxu1 %v13359_v56  ;;  %v13366_v56 = vld [vmem:[#allocation31_spill] sm:$0xff] }
0x13f8   :  { %8794 = vmatpush1.bf16.msra.mxu1 %v13360_v48 }
0x13f9   :  { %8796 = vmatprep.subr.bf16.mxu1 %v13361_v6  ;;  %v13364_v6 = vld [vmem:[#allocation40_spill] sm:$0xff] }
0x13fc   :  { %8798 = vmatpush1.bf16.msra.mxu1 %v13362_v21  ;;  %v13365_v21 = vld [vmem:[#allocation41_spill] sm:$0xff] }
0x13fd   :  { %7154 = vmatprep.subr.mxu1 %v13126_v63 }
0x1492   :  { %v5178_v46 = vpop.f32.mrb[46].mxu1 }
0x1493   :  { %v7148_v37 = vpop.f32.mrb[47].mxu1  ;;  %5251 = vmatmul.mubr.f32.vlgmr.msra.gmra.mrb[48].mxu0 %v5178_v46  ;;  %5322 = vmatmul.mubr.f32.vlgmr.msra.gmra.mrb[48].mxu1 %v5178_v46 }
0x1494   :  { %7150 = vmatpush3.xpose.msra.mxu0 %v12493_v49  ;;  %7155 = vmatpush3.msra.mxu1 %v12493_v49 }
0x1495   :  { %7151 = vmatprep.mubr.msk.f32.mxu0 %vm9787_vm1, %v13126_v63  ;;  %7156 = vmatprep.mubr.msk.f32.mxu1 %vm9787_vm1, %v13126_v63 }
0x1496   :  { %8800 = vmatprep.subr.bf16.mxu0 %v13364_v6  ;;  %8864 = vmatprep.subr.bf16.mxu1 %v13365_v21 }
0x1566   :  { %v5252_v48 = vpop.f32.mrb[48].mxu0  ;;  %v5323_v37 = vpop.f32.mrb[48].mxu1 }
0x1567   :  { %v5328_v46 = vadd.f32 %v5252_v48, %v13366_v56  ;;  %v5254_v61 = vpop.f32.mrb[49].mxu0  ;;  %v5325_v47 = vpop.f32.mrb[49].mxu1  ;;  %v5330_v12 = vadd.f32 %v5323_v37, %v12330_v51 }
0x1568   :  { %v5329_v41 = vadd.f32 %v5254_v61, %v12319_v22  ;;  %v5331_v0 = vadd.f32 %v5325_v47, %v12325_v28 }
0x1569   :  { %v7064_v44 = vmul.f32 -1.442695, %v5328_v46 }
0x156a   :  { %v7065_v49 = vmul.f32 -1.442695, %v5329_v41  ;;  %v7066_v32 = vmul.f32 -1.442695, %v5331_v0 }
0x156b   :  { %9616 = vpow2.f32 %v7064_v44 }
0x156c   :  { %9618 = vpow2.f32 %v7065_v49 }
0x156d   :  { %9620 = vpow2.f32 %v7066_v32 }
0x156e   :  { %9622 = vtanh.f32 %v5330_v12 }
0x1575   :  { %v9617_v6 = vpop.eup %9616 }
0x1576   :  { %v9619_v26 = vpop.eup %9618  ;;  %v5335_v21 = vadd.f32 1.0, %v9617_v6 }
0x1577   :  { %v5341_v1 = vadd.f32 1.0, %v9619_v26  ;;  %v9621_v48 = vpop.eup %9620 }
0x1578   :  { %9624 = vrcp.f32 %v5335_v21  ;;  %v9623_v56 = vpop.eup %9622  ;;  %v5348_v44 = vadd.f32 1.0, %v9621_v48 }
0x1579   :  { %9626 = vrcp.f32 %v5341_v1 }
0x157a   :  { %9628 = vrcp.f32 %v5348_v44 }
0x1582   :  { %v9625_v61 = vpop.eup %9624 }
0x1583   :  { %v9627_v46 = vpop.eup %9626  ;;  %v5352_v41 = vmul.f32 %v9625_v61, %v9623_v56 }
0x1584   :  { %v5351_v49 = vmul.f32 %v9627_v46, %v12417_v30  ;;  %v9629_v0 = vpop.eup %9628 }
0x1586   :  { %v12508_v47 = vadd.f32 %v5352_v41, %v5351_v49  ;;  %v13367_v49 = vld [vmem:[#allocation44_spill] sm:$0xff] }
0x1588   :  { %9630 = vtanh.f32 %v12508_v47 }
0x1592   :  { %v9631_v6 = vpop.eup %9630 }
0x1593   :  { %v5355_v32 = vmul.f32 %v9631_v6, %v9629_v0  ;;  %v13368_v0 = vld [vmem:[#allocation45_spill] sm:$0xff] }
0x1594   :  { %v13369_v6 = vld [vmem:[#allocation13_spill] sm:$0xff] }
0x1595   :  { %v5356_v26 = vadd.f32 %v12423_v4, %v5355_v32  ;;  %v13370_v32 = vld [vmem:[#allocation14_spill] sm:$0xff] }
0x1597   :  { %7152 = vmatmul.mubr.f32.vlgmr.msra.gmra.mrb[50].mxu0 %v5356_v26 }
0x1598   :  { %5579 = vmatprep.mubr.f32.mxu0 %v5356_v26  ;;  %8802 = vmatpush1.bf16.msra.mxu0 %v11737_v15 }
0x1599   :  { %8804 = vmatprep.subr.bf16.mxu0 %v11739_v16 }
0x159c   :  { %8806 = vmatpush1.bf16.msra.mxu0 %v11755_v52 }
0x159d   :  { %8808 = vmatprep.subr.bf16.mxu0 %v11766_v18 }
0x15a0   :  { %8810 = vmatpush1.bf16.msra.mxu0 %v11782_v53 }
0x15a1   :  { %8812 = vmatprep.subr.bf16.mxu0 %v11785_v17 }
0x15a4   :  { %8814 = vmatpush1.bf16.msra.mxu0 %v11800_v54 }
0x15a5   :  { %8816 = vmatprep.subr.bf16.mxu0 %v11803_v57 }
0x15a8   :  { %8818 = vmatpush1.bf16.msra.mxu0 %v11818_v55 }
0x15a9   :  { %8820 = vmatprep.subr.bf16.mxu0 %v11821_v59 }
0x15ac   :  { %8822 = vmatpush1.bf16.msra.mxu0 %v11836_v24 }
0x15ad   :  { %8824 = vmatprep.subr.bf16.mxu0 %v11839_v10 }
0x15b0   :  { %8826 = vmatpush1.bf16.msra.mxu0 %v11854_v43 }
0x15b1   :  { %8828 = vmatprep.subr.bf16.mxu0 %v11857_v33 }
0x15b4   :  { %8830 = vmatpush1.bf16.msra.mxu0 %v11872_v38 }
0x15b5   :  { %8832 = vmatprep.subr.bf16.mxu0 %v11875_v60 }
0x15b8   :  { %8834 = vmatpush1.bf16.msra.mxu0 %v11890_v13 }
0x15b9   :  { %8836 = vmatprep.subr.bf16.mxu0 %v11893_v7 }
0x15bc   :  { %8838 = vmatpush1.bf16.msra.mxu0 %v11908_v3 }
0x15bd   :  { %8840 = vmatprep.subr.bf16.mxu0 %v11911_v8 }
0x15c0   :  { %8842 = vmatpush1.bf16.msra.mxu0 %v11926_v35 }
0x15c1   :  { %8844 = vmatprep.subr.bf16.mxu0 %v11929_v11 }
0x15c4   :  { %8846 = vmatpush1.bf16.msra.mxu0 %v11944_v9 }
0x15c5   :  { %8848 = vmatprep.subr.bf16.mxu0 %v11947_v23 }
0x15c8   :  { %8850 = vmatpush1.bf16.msra.mxu0 %v11962_v14 }
0x15c9   :  { %8852 = vmatprep.subr.bf16.mxu0 %v11965_v20 }
0x15cc   :  { %8854 = vmatpush1.bf16.msra.mxu0 %v11980_v34 }
0x15cd   :  { %8856 = vmatprep.subr.bf16.mxu0 %v11983_v5 }
0x15d0   :  { %8858 = vmatpush1.bf16.msra.mxu0 %v11998_v27 }
0x15d1   :  { %8860 = vmatprep.subr.bf16.mxu0 %v12001_v36 }
0x15d4   :  { %8862 = vmatpush1.bf16.msra.mxu0 %v12014_v29 }
0x15d5   :  { %7159 = vmatprep.subr.mxu0 %v13126_v63 }
0x166a   :  { %v5423_v1 = vpop.f32.mrb[50].mxu0 }
0x166b   :  { %v7153_v30 = vpop.f32.mrb[51].mxu0  ;;  %v5427_v12 = vsel %vm4439_vm2, %v5423_v1, -inf }
0x166c   :  { %5428 = vmax.xlane.f32.xlu0 %v5427_v12  ;;  %v13373_v30 = vld [vmem:[#allocation17_spill] sm:$0xff]  ;;  %v13374_v12 = vld [vmem:[#allocation18_spill] sm:$0xff] }
0x16f9   :  { %v5429_v56 = vpop.xlane.xlu0 %5428 }
0x16fa   :  { %v5430_v21 = vsub.f32 %v5423_v1, %v5429_v56  ;;  %v13372_v1 = vld [vmem:[#allocation16_spill] sm:$0xff]  ;;  %v13375_v56 = vld [vmem:[#allocation19_spill] sm:$0xff] }
0x16fc   :  { %v5431_v37 = vmul.f32 1.442695, %v5430_v21  ;;  %v13376_v21 = vld [vmem:[#allocation20_spill] sm:$0xff] }
0x16fe   :  { %9632 = vpow2.f32 %v5431_v37  ;;  %v13377_v37 = vld [vmem:[#allocation21_spill] sm:$0xff] }
0x1708   :  { %v9633_v48 = vpop.eup %9632 }
0x1709   :  { %v5433_v61 = vsel %vm4439_vm2, %v9633_v48, 0.0 }
0x170a   :  { %5434 = vadd.xlane.f32.xlu1 %v5433_v61  ;;  %v13379_v61 = vld [vmem:[#allocation23_spill] sm:$0xff] }
0x1797   :  { %v5435_v46 = vpop.xlane.xlu1 %5434 }
0x1798   :  { %9634 = vrcp.f32 %v5435_v46  ;;  %v13380_v46 = vld [vmem:[#allocation24_spill] sm:$0xff] }
0x17a2   :  { %v9635_v41 = vpop.eup %9634 }
0x17a3   :  { %v5437_v44 = vmul.f32 %v9635_v41, %v9633_v48  ;;  %v13378_v48 = vld [vmem:[#allocation22_spill] sm:$0xff]  ;;  %v13381_v41 = vld [vmem:[#allocation25_spill] sm:$0xff] }
0x17a5   :  { %7157 = vmatmul.mubr.msk.f32.vlgmr.msra.gmra.mrb[50].mxu1 %vm4439_vm2, %v5437_v44  ;;  %v13382_v44 = vld [vmem:[#allocation26_spill] sm:$0xff] }
0x17a6   :  { %5650 = vmatprep.mubr.f32.mxu1 %v5356_v26  ;;  %8866 = vmatpush1.bf16.msra.mxu1 %v12031_v45  ;;  %v13371_v26 = vld [vmem:[#allocation15_spill] sm:$0xff] }
0x17a7   :  { %8868 = vmatprep.subr.bf16.mxu1 %v12034_v39 }
0x17aa   :  { %8870 = vmatpush1.bf16.msra.mxu1 %v12050_v62 }
0x17ab   :  { %8872 = vmatprep.subr.bf16.mxu1 %v12054_v19 }
0x17ae   :  { %8874 = vmatpush1.bf16.msra.mxu1 %v12069_v42 }
0x17af   :  { %8876 = vmatprep.subr.bf16.mxu1 %v12072_v40 }
0x17b2   :  { %8878 = vmatpush1.bf16.msra.mxu1 %v12087_v58 }
0x17b3   :  { %8880 = vmatprep.subr.bf16.mxu1 %v12090_v31 }
0x17b6   :  { %8882 = vmatpush1.bf16.msra.mxu1 %v12105_v25 }
0x17b7   :  { %8884 = vmatprep.subr.bf16.mxu1 %v13319_v50 }
0x17ba   :  { %8886 = vmatpush1.bf16.msra.mxu1 %v13320_v2 }
0x17bb   :  { %8888 = vmatprep.subr.bf16.mxu1 %v13367_v49 }
0x17be   :  { %8890 = vmatpush1.bf16.msra.mxu1 %v13368_v0 }
0x17bf   :  { %8892 = vmatprep.subr.bf16.mxu1 %v13369_v6 }
0x17c2   :  { %8894 = vmatpush1.bf16.msra.mxu1 %v13370_v32 }
0x17c3   :  { %8896 = vmatprep.subr.bf16.mxu1 %v13371_v26 }
0x17c6   :  { %8898 = vmatpush1.bf16.msra.mxu1 %v13372_v1  ;;  %v13383_v1 = vld [vmem:[#allocation27_spill] sm:$0xff] }
0x17c7   :  { %8900 = vmatprep.subr.bf16.mxu1 %v13373_v30  ;;  %v13384_v30 = vld [vmem:[#allocation28_spill] sm:$0xff] }
0x17ca   :  { %8902 = vmatpush1.bf16.msra.mxu1 %v13374_v12  ;;  %v13385_v12 = vld [vmem:[#allocation29_spill] sm:$0xff] }
0x17cb   :  { %8904 = vmatprep.subr.bf16.mxu1 %v13375_v56  ;;  %v13386_v56 = vld [vmem:[#allocation30_spill] sm:$0xff] }
0x17ce   :  { %8906 = vmatpush1.bf16.msra.mxu1 %v13376_v21 }
0x17cf   :  { %8908 = vmatprep.subr.bf16.mxu1 %v13377_v37 }
0x17d2   :  { %8910 = vmatpush1.bf16.msra.mxu1 %v13378_v48 }
0x17d3   :  { %8912 = vmatprep.subr.bf16.mxu1 %v13379_v61  ;;  %v13387_v61 = vld [vmem:[#allocation32_spill] sm:$0xff] }
0x17d6   :  { %8914 = vmatpush1.bf16.msra.mxu1 %v13380_v46 }
0x17d7   :  { %8916 = vmatprep.subr.bf16.mxu1 %v13381_v41 }
0x17da   :  { %8918 = vmatpush1.bf16.msra.mxu1 %v13382_v44  ;;  %v13390_v44 = vld [vmem:[#allocation31_spill] sm:$0xff] }
0x17db   :  { %8920 = vmatprep.subr.bf16.mxu1 %v13383_v1 }
0x17de   :  { %8922 = vmatpush1.bf16.msra.mxu1 %v13384_v30  ;;  %v13388_v30 = vld [vmem:[#allocation40_spill] sm:$0xff] }
0x17df   :  { %8924 = vmatprep.subr.bf16.mxu1 %v13385_v12  ;;  %v13389_v12 = vld [vmem:[#allocation41_spill] sm:$0xff] }
0x17e2   :  { %8926 = vmatpush1.bf16.msra.mxu1 %v13386_v56 }
0x17e3   :  { %7164 = vmatprep.subr.mxu1 %v13126_v63 }
0x1878   :  { %v5507_v37 = vpop.f32.mrb[50].mxu1 }
0x1879   :  { %v7158_v48 = vpop.f32.mrb[51].mxu1  ;;  %5580 = vmatmul.mubr.f32.vlgmr.msra.gmra.mrb[52].mxu0 %v5507_v37  ;;  %5651 = vmatmul.mubr.f32.vlgmr.msra.gmra.mrb[52].mxu1 %v5507_v37 }
0x187a   :  { %7160 = vmatpush3.xpose.msra.mxu0 %v13387_v61  ;;  %7165 = vmatpush3.msra.mxu1 %v13387_v61 }
0x187b   :  { %7161 = vmatprep.mubr.msk.f32.mxu0 %vm9787_vm1, %v13126_v63  ;;  %7166 = vmatprep.mubr.msk.f32.mxu1 %vm9787_vm1, %v13126_v63 }
0x187c   :  { %8928 = vmatprep.subr.bf16.mxu0 %v13388_v30  ;;  %8992 = vmatprep.subr.bf16.mxu1 %v13389_v12 }
0x194c   :  { %v5581_v56 = vpop.f32.mrb[52].mxu0  ;;  %v5652_v1 = vpop.f32.mrb[52].mxu1 }
0x194d   :  { %v5657_v48 = vadd.f32 %v5581_v56, %v13390_v44  ;;  %v5583_v41 = vpop.f32.mrb[53].mxu0  ;;  %v5654_v37 = vpop.f32.mrb[53].mxu1  ;;  %v5659_v6 = vadd.f32 %v5652_v1, %v12330_v51 }
0x194e   :  { %v5658_v46 = vadd.f32 %v5583_v41, %v12319_v22  ;;  %v5660_v26 = vadd.f32 %v5654_v37, %v12325_v28 }
0x194f   :  { %v7068_v21 = vmul.f32 -1.442695, %v5657_v48 }
0x1950   :  { %v7069_v61 = vmul.f32 -1.442695, %v5658_v46  ;;  %v7070_v32 = vmul.f32 -1.442695, %v5660_v26 }
0x1951   :  { %9636 = vpow2.f32 %v7068_v21 }
0x1952   :  { %9638 = vpow2.f32 %v7069_v61 }
0x1953   :  { %9640 = vpow2.f32 %v7070_v32 }
0x1954   :  { %9642 = vtanh.f32 %v5659_v6 }
0x195b   :  { %v9637_v30 = vpop.eup %9636 }
0x195c   :  { %v9639_v0 = vpop.eup %9638  ;;  %v5664_v12 = vadd.f32 1.0, %v9637_v30 }
0x195d   :  { %v5670_v49 = vadd.f32 1.0, %v9639_v0  ;;  %v9641_v56 = vpop.eup %9640 }
0x195e   :  { %9644 = vrcp.f32 %v5664_v12  ;;  %v9643_v44 = vpop.eup %9642  ;;  %v5677_v21 = vadd.f32 1.0, %v9641_v56 }
0x195f   :  { %9646 = vrcp.f32 %v5670_v49 }
0x1960   :  { %9648 = vrcp.f32 %v5677_v21 }
0x1968   :  { %v9645_v41 = vpop.eup %9644 }
0x1969   :  { %v9647_v48 = vpop.eup %9646  ;;  %v5681_v46 = vmul.f32 %v9645_v41, %v9643_v44 }
0x196a   :  { %v5680_v61 = vmul.f32 %v9647_v48, %v12508_v47  ;;  %v9649_v26 = vpop.eup %9648 }
0x196c   :  { %v12592_v37 = vadd.f32 %v5681_v46, %v5680_v61  ;;  %v13391_v61 = vld [vmem:[#allocation44_spill] sm:$0xff] }
0x196e   :  { %9650 = vtanh.f32 %v12592_v37 }
0x1978   :  { %v9651_v1 = vpop.eup %9650 }
0x1979   :  { %v5684_v32 = vmul.f32 %v9651_v1, %v9649_v26  ;;  %v13392_v26 = vld [vmem:[#allocation45_spill] sm:$0xff] }
0x197a   :  { %v13393_v1 = vld [vmem:[#allocation13_spill] sm:$0xff] }
0x197b   :  { %v5685_v0 = vadd.f32 %v12423_v4, %v5684_v32  ;;  %v13394_v32 = vld [vmem:[#allocation14_spill] sm:$0xff] }
0x197d   :  { %7162 = vmatmul.mubr.f32.vlgmr.msra.gmra.mrb[54].mxu0 %v5685_v0 }
0x197e   :  { %5908 = vmatprep.mubr.f32.mxu0 %v5685_v0  ;;  %8930 = vmatpush1.bf16.msra.mxu0 %v11737_v15 }
0x197f   :  { %8932 = vmatprep.subr.bf16.mxu0 %v11739_v16 }
0x1982   :  { %8934 = vmatpush1.bf16.msra.mxu0 %v11755_v52 }
0x1983   :  { %8936 = vmatprep.subr.bf16.mxu0 %v11766_v18 }
0x1986   :  { %8938 = vmatpush1.bf16.msra.mxu0 %v11782_v53 }
0x1987   :  { %8940 = vmatprep.subr.bf16.mxu0 %v11785_v17 }
0x198a   :  { %8942 = vmatpush1.bf16.msra.mxu0 %v11800_v54 }
0x198b   :  { %8944 = vmatprep.subr.bf16.mxu0 %v11803_v57 }
0x198e   :  { %8946 = vmatpush1.bf16.msra.mxu0 %v11818_v55 }
0x198f   :  { %8948 = vmatprep.subr.bf16.mxu0 %v11821_v59 }
0x1992   :  { %8950 = vmatpush1.bf16.msra.mxu0 %v11836_v24 }
0x1993   :  { %8952 = vmatprep.subr.bf16.mxu0 %v11839_v10 }
0x1996   :  { %8954 = vmatpush1.bf16.msra.mxu0 %v11854_v43 }
0x1997   :  { %8956 = vmatprep.subr.bf16.mxu0 %v11857_v33 }
0x199a   :  { %8958 = vmatpush1.bf16.msra.mxu0 %v11872_v38 }
0x199b   :  { %8960 = vmatprep.subr.bf16.mxu0 %v11875_v60 }
0x199e   :  { %8962 = vmatpush1.bf16.msra.mxu0 %v11890_v13 }
0x199f   :  { %8964 = vmatprep.subr.bf16.mxu0 %v11893_v7 }
0x19a2   :  { %8966 = vmatpush1.bf16.msra.mxu0 %v11908_v3 }
0x19a3   :  { %8968 = vmatprep.subr.bf16.mxu0 %v11911_v8 }
0x19a6   :  { %8970 = vmatpush1.bf16.msra.mxu0 %v11926_v35 }
0x19a7   :  { %8972 = vmatprep.subr.bf16.mxu0 %v11929_v11 }
0x19aa   :  { %8974 = vmatpush1.bf16.msra.mxu0 %v11944_v9 }
0x19ab   :  { %8976 = vmatprep.subr.bf16.mxu0 %v11947_v23 }
0x19ae   :  { %8978 = vmatpush1.bf16.msra.mxu0 %v11962_v14 }
0x19af   :  { %8980 = vmatprep.subr.bf16.mxu0 %v11965_v20 }
0x19b2   :  { %8982 = vmatpush1.bf16.msra.mxu0 %v11980_v34 }
0x19b3   :  { %8984 = vmatprep.subr.bf16.mxu0 %v11983_v5 }
0x19b6   :  { %8986 = vmatpush1.bf16.msra.mxu0 %v11998_v27 }
0x19b7   :  { %8988 = vmatprep.subr.bf16.mxu0 %v12001_v36 }
0x19ba   :  { %8990 = vmatpush1.bf16.msra.mxu0 %v12014_v29 }
0x19bb   :  { %7169 = vmatprep.subr.mxu0 %v13126_v63 }
0x1a50   :  { %v5752_v47 = vpop.f32.mrb[54].mxu0 }
0x1a51   :  { %v7163_v49 = vpop.f32.mrb[55].mxu0  ;;  %v5756_v6 = vsel %vm4439_vm2, %v5752_v47, -inf }
0x1a52   :  { %5757 = vmax.xlane.f32.xlu0 %v5756_v6  ;;  %v13397_v49 = vld [vmem:[#allocation17_spill] sm:$0xff]  ;;  %v13398_v6 = vld [vmem:[#allocation18_spill] sm:$0xff] }
0x1adf   :  { %v5758_v30 = vpop.xlane.xlu0 %5757 }
0x1ae0   :  { %v5759_v12 = vsub.f32 %v5752_v47, %v5758_v30  ;;  %v13396_v47 = vld [vmem:[#allocation16_spill] sm:$0xff]  ;;  %v13399_v30 = vld [vmem:[#allocation19_spill] sm:$0xff] }
0x1ae2   :  { %v5760_v44 = vmul.f32 1.442695, %v5759_v12  ;;  %v13400_v12 = vld [vmem:[#allocation20_spill] sm:$0xff] }
0x1ae4   :  { %9652 = vpow2.f32 %v5760_v44  ;;  %v13401_v44 = vld [vmem:[#allocation21_spill] sm:$0xff] }
0x1aee   :  { %v9653_v56 = vpop.eup %9652 }
0x1aef   :  { %v5762_v41 = vsel %vm4439_vm2, %v9653_v56, 0.0 }
0x1af0   :  { %5763 = vadd.xlane.f32.xlu1 %v5762_v41  ;;  %v13403_v41 = vld [vmem:[#allocation23_spill] sm:$0xff] }
0x1b7d   :  { %v5764_v48 = vpop.xlane.xlu1 %5763 }
0x1b7e   :  { %9654 = vrcp.f32 %v5764_v48  ;;  %v13404_v48 = vld [vmem:[#allocation24_spill] sm:$0xff] }
0x1b88   :  { %v9655_v46 = vpop.eup %9654 }
0x1b89   :  { %v5766_v21 = vmul.f32 %v9655_v46, %v9653_v56  ;;  %v13402_v56 = vld [vmem:[#allocation22_spill] sm:$0xff]  ;;  %v13405_v46 = vld [vmem:[#allocation25_spill] sm:$0xff] }
0x1b8b   :  { %7167 = vmatmul.mubr.msk.f32.vlgmr.msra.gmra.mrb[54].mxu1 %vm4439_vm2, %v5766_v21  ;;  %v13406_v21 = vld [vmem:[#allocation26_spill] sm:$0xff] }
0x1b8c   :  { %5979 = vmatprep.mubr.f32.mxu1 %v5685_v0  ;;  %8994 = vmatpush1.bf16.msra.mxu1 %v12031_v45  ;;  %v13395_v0 = vld [vmem:[#allocation15_spill] sm:$0xff] }
0x1b8d   :  { %8996 = vmatprep.subr.bf16.mxu1 %v12034_v39 }
0x1b90   :  { %8998 = vmatpush1.bf16.msra.mxu1 %v12050_v62 }
0x1b91   :  { %9000 = vmatprep.subr.bf16.mxu1 %v12054_v19 }
0x1b94   :  { %9002 = vmatpush1.bf16.msra.mxu1 %v12069_v42 }
0x1b95   :  { %9004 = vmatprep.subr.bf16.mxu1 %v12072_v40 }
0x1b98   :  { %9006 = vmatpush1.bf16.msra.mxu1 %v12087_v58 }
0x1b99   :  { %9008 = vmatprep.subr.bf16.mxu1 %v12090_v31 }
0x1b9c   :  { %9010 = vmatpush1.bf16.msra.mxu1 %v12105_v25 }
0x1b9d   :  { %9012 = vmatprep.subr.bf16.mxu1 %v13319_v50 }
0x1ba0   :  { %9014 = vmatpush1.bf16.msra.mxu1 %v13320_v2 }
0x1ba1   :  { %9016 = vmatprep.subr.bf16.mxu1 %v13391_v61 }
0x1ba4   :  { %9018 = vmatpush1.bf16.msra.mxu1 %v13392_v26 }
0x1ba5   :  { %9020 = vmatprep.subr.bf16.mxu1 %v13393_v1 }
0x1ba8   :  { %9022 = vmatpush1.bf16.msra.mxu1 %v13394_v32 }
0x1ba9   :  { %9024 = vmatprep.subr.bf16.mxu1 %v13395_v0 }
0x1bac   :  { %9026 = vmatpush1.bf16.msra.mxu1 %v13396_v47  ;;  %v13407_v47 = vld [vmem:[#allocation27_spill] sm:$0xff] }
0x1bad   :  { %9028 = vmatprep.subr.bf16.mxu1 %v13397_v49  ;;  %v13408_v49 = vld [vmem:[#allocation28_spill] sm:$0xff] }
0x1bb0   :  { %9030 = vmatpush1.bf16.msra.mxu1 %v13398_v6  ;;  %v13409_v6 = vld [vmem:[#allocation29_spill] sm:$0xff] }
0x1bb1   :  { %9032 = vmatprep.subr.bf16.mxu1 %v13399_v30  ;;  %v13410_v30 = vld [vmem:[#allocation30_spill] sm:$0xff] }
0x1bb4   :  { %9034 = vmatpush1.bf16.msra.mxu1 %v13400_v12 }
0x1bb5   :  { %9036 = vmatprep.subr.bf16.mxu1 %v13401_v44 }
0x1bb8   :  { %9038 = vmatpush1.bf16.msra.mxu1 %v13402_v56 }
0x1bb9   :  { %9040 = vmatprep.subr.bf16.mxu1 %v13403_v41  ;;  %v13411_v41 = vld [vmem:[#allocation32_spill] sm:$0xff] }
0x1bbc   :  { %9042 = vmatpush1.bf16.msra.mxu1 %v13404_v48 }
0x1bbd   :  { %9044 = vmatprep.subr.bf16.mxu1 %v13405_v46 }
0x1bc0   :  { %9046 = vmatpush1.bf16.msra.mxu1 %v13406_v21  ;;  %v13414_v21 = vld [vmem:[#allocation31_spill] sm:$0xff] }
0x1bc1   :  { %9048 = vmatprep.subr.bf16.mxu1 %v13407_v47 }
0x1bc4   :  { %9050 = vmatpush1.bf16.msra.mxu1 %v13408_v49  ;;  %v13412_v49 = vld [vmem:[#allocation40_spill] sm:$0xff] }
0x1bc5   :  { %9052 = vmatprep.subr.bf16.mxu1 %v13409_v6  ;;  %v13413_v6 = vld [vmem:[#allocation41_spill] sm:$0xff] }
0x1bc8   :  { %9054 = vmatpush1.bf16.msra.mxu1 %v13410_v30 }
0x1bc9   :  { %7174 = vmatprep.subr.mxu1 %v13126_v63 }
0x1c5e   :  { %v5836_v44 = vpop.f32.mrb[54].mxu1 }
0x1c5f   :  { %v7168_v56 = vpop.f32.mrb[55].mxu1  ;;  %5909 = vmatmul.mubr.f32.vlgmr.msra.gmra.mrb[56].mxu0 %v5836_v44  ;;  %5980 = vmatmul.mubr.f32.vlgmr.msra.gmra.mrb[56].mxu1 %v5836_v44 }
0x1c60   :  { %7170 = vmatpush3.xpose.msra.mxu0 %v13411_v41  ;;  %7175 = vmatpush3.msra.mxu1 %v13411_v41 }
0x1c61   :  { %7171 = vmatprep.mubr.msk.f32.mxu0 %vm9787_vm1, %v13126_v63  ;;  %7176 = vmatprep.mubr.msk.f32.mxu1 %vm9787_vm1, %v13126_v63 }
0x1c62   :  { %9056 = vmatprep.subr.bf16.mxu0 %v13412_v49  ;;  %9120 = vmatprep.subr.bf16.mxu1 %v13413_v6 }
0x1d32   :  { %v5910_v30 = vpop.f32.mrb[56].mxu0  ;;  %v5981_v47 = vpop.f32.mrb[56].mxu1 }
0x1d33   :  { %v5986_v56 = vadd.f32 %v5910_v30, %v13414_v21  ;;  %v5912_v46 = vpop.f32.mrb[57].mxu0  ;;  %v5983_v44 = vpop.f32.mrb[57].mxu1  ;;  %v5988_v1 = vadd.f32 %v5981_v47, %v12330_v51 }
0x1d34   :  { %v5987_v48 = vadd.f32 %v5912_v46, %v12319_v22  ;;  %v5989_v0 = vadd.f32 %v5983_v44, %v12325_v28 }
0x1d35   :  { %v7072_v12 = vmul.f32 -1.442695, %v5986_v56 }
0x1d36   :  { %v7073_v41 = vmul.f32 -1.442695, %v5987_v48  ;;  %v7074_v32 = vmul.f32 -1.442695, %v5989_v0 }
0x1d37   :  { %9656 = vpow2.f32 %v7072_v12 }
0x1d38   :  { %9658 = vpow2.f32 %v7073_v41 }
0x1d39   :  { %9660 = vpow2.f32 %v7074_v32 }
0x1d3a   :  { %9662 = vtanh.f32 %v5988_v1 }
0x1d41   :  { %v9657_v49 = vpop.eup %9656 }
0x1d42   :  { %v9659_v26 = vpop.eup %9658  ;;  %v5993_v6 = vadd.f32 1.0, %v9657_v49 }
0x1d43   :  { %v5999_v61 = vadd.f32 1.0, %v9659_v26  ;;  %v9661_v30 = vpop.eup %9660 }
0x1d44   :  { %9664 = vrcp.f32 %v5993_v6  ;;  %v9663_v21 = vpop.eup %9662  ;;  %v6006_v12 = vadd.f32 1.0, %v9661_v30 }
0x1d45   :  { %9666 = vrcp.f32 %v5999_v61 }
0x1d46   :  { %9668 = vrcp.f32 %v6006_v12  ;;  %v13415_v12 = vld [vmem:[#allocation44_spill] sm:$0xff] }
0x1d4e   :  { %v9665_v46 = vpop.eup %9664 }
0x1d4f   :  { %v9667_v56 = vpop.eup %9666  ;;  %v6010_v48 = vmul.f32 %v9665_v46, %v9663_v21 }
0x1d50   :  { %v6009_v41 = vmul.f32 %v9667_v56, %v12592_v37  ;;  %v9669_v0 = vpop.eup %9668 }
0x1d52   :  { %v12676_v44 = vadd.f32 %v6010_v48, %v6009_v41  ;;  %v13416_v41 = vld [vmem:[#allocation45_spill] sm:$0xff] }
0x1d54   :  { %9670 = vtanh.f32 %v12676_v44 }
0x1d5e   :  { %v9671_v47 = vpop.eup %9670 }
0x1d5f   :  { %v6013_v32 = vmul.f32 %v9671_v47, %v9669_v0  ;;  %v13417_v0 = vld [vmem:[#allocation13_spill] sm:$0xff]  ;;  %v13418_v47 = vld [vmem:[#allocation14_spill] sm:$0xff] }
0x1d61   :  { %v6014_v26 = vadd.f32 %v12423_v4, %v6013_v32  ;;  %v13419_v32 = vld [vmem:[#allocation15_spill] sm:$0xff] }
0x1d63   :  { %7172 = vmatmul.mubr.f32.vlgmr.msra.gmra.mrb[58].mxu0 %v6014_v26 }
0x1d64   :  { %6237 = vmatprep.mubr.f32.mxu0 %v6014_v26  ;;  %9058 = vmatpush1.bf16.msra.mxu0 %v11737_v15 }
0x1d65   :  { %9060 = vmatprep.subr.bf16.mxu0 %v11739_v16 }
0x1d68   :  { %9062 = vmatpush1.bf16.msra.mxu0 %v11755_v52 }
0x1d69   :  { %9064 = vmatprep.subr.bf16.mxu0 %v11766_v18 }
0x1d6c   :  { %9066 = vmatpush1.bf16.msra.mxu0 %v11782_v53 }
0x1d6d   :  { %9068 = vmatprep.subr.bf16.mxu0 %v11785_v17 }
0x1d70   :  { %9070 = vmatpush1.bf16.msra.mxu0 %v11800_v54 }
0x1d71   :  { %9072 = vmatprep.subr.bf16.mxu0 %v11803_v57 }
0x1d74   :  { %9074 = vmatpush1.bf16.msra.mxu0 %v11818_v55 }
0x1d75   :  { %9076 = vmatprep.subr.bf16.mxu0 %v11821_v59 }
0x1d78   :  { %9078 = vmatpush1.bf16.msra.mxu0 %v11836_v24 }
0x1d79   :  { %9080 = vmatprep.subr.bf16.mxu0 %v11839_v10 }
0x1d7c   :  { %9082 = vmatpush1.bf16.msra.mxu0 %v11854_v43 }
0x1d7d   :  { %9084 = vmatprep.subr.bf16.mxu0 %v11857_v33 }
0x1d80   :  { %9086 = vmatpush1.bf16.msra.mxu0 %v11872_v38 }
0x1d81   :  { %9088 = vmatprep.subr.bf16.mxu0 %v11875_v60 }
0x1d84   :  { %9090 = vmatpush1.bf16.msra.mxu0 %v11890_v13 }
0x1d85   :  { %9092 = vmatprep.subr.bf16.mxu0 %v11893_v7 }
0x1d88   :  { %9094 = vmatpush1.bf16.msra.mxu0 %v11908_v3 }
0x1d89   :  { %9096 = vmatprep.subr.bf16.mxu0 %v11911_v8 }
0x1d8c   :  { %9098 = vmatpush1.bf16.msra.mxu0 %v11926_v35 }
0x1d8d   :  { %9100 = vmatprep.subr.bf16.mxu0 %v11929_v11 }
0x1d90   :  { %9102 = vmatpush1.bf16.msra.mxu0 %v11944_v9 }
0x1d91   :  { %9104 = vmatprep.subr.bf16.mxu0 %v11947_v23 }
0x1d94   :  { %9106 = vmatpush1.bf16.msra.mxu0 %v11962_v14 }
0x1d95   :  { %9108 = vmatprep.subr.bf16.mxu0 %v11965_v20 }
0x1d98   :  { %9110 = vmatpush1.bf16.msra.mxu0 %v11980_v34 }
0x1d99   :  { %9112 = vmatprep.subr.bf16.mxu0 %v11983_v5 }
0x1d9c   :  { %9114 = vmatpush1.bf16.msra.mxu0 %v11998_v27 }
0x1d9d   :  { %9116 = vmatprep.subr.bf16.mxu0 %v12001_v36 }
0x1da0   :  { %9118 = vmatpush1.bf16.msra.mxu0 %v12014_v29 }
0x1da1   :  { %7179 = vmatprep.subr.mxu0 %v13126_v63 }
0x1e36   :  { %v6081_v4 = vpop.f32.mrb[58].mxu0 }
0x1e37   :  { %v7173_v37 = vpop.f32.mrb[59].mxu0  ;;  %v6085_v61 = vsel %vm4439_vm2, %v6081_v4, -inf }
0x1e38   :  { %6086 = vmax.xlane.f32.xlu0 %v6085_v61  ;;  %v13422_v37 = vld [vmem:[#allocation18_spill] sm:$0xff]  ;;  %v13423_v61 = vld [vmem:[#allocation19_spill] sm:$0xff] }
0x1ec5   :  { %v6087_v1 = vpop.xlane.xlu0 %6086 }
0x1ec6   :  { %v6088_v49 = vsub.f32 %v6081_v4, %v6087_v1  ;;  %v13421_v4 = vld [vmem:[#allocation17_spill] sm:$0xff]  ;;  %v13424_v1 = vld [vmem:[#allocation20_spill] sm:$0xff] }
0x1ec8   :  { %v6089_v6 = vmul.f32 1.442695, %v6088_v49  ;;  %v13425_v49 = vld [vmem:[#allocation21_spill] sm:$0xff] }
0x1eca   :  { %9672 = vpow2.f32 %v6089_v6  ;;  %v13426_v6 = vld [vmem:[#allocation22_spill] sm:$0xff] }
0x1ed4   :  { %v9673_v21 = vpop.eup %9672 }
0x1ed5   :  { %v6091_v30 = vsel %vm4439_vm2, %v9673_v21, 0.0 }
0x1ed6   :  { %6092 = vadd.xlane.f32.xlu1 %v6091_v30  ;;  %v13428_v30 = vld [vmem:[#allocation24_spill] sm:$0xff] }
0x1f63   :  { %v6093_v46 = vpop.xlane.xlu1 %6092 }
0x1f64   :  { %9674 = vrcp.f32 %v6093_v46  ;;  %v13429_v46 = vld [vmem:[#allocation25_spill] sm:$0xff] }
0x1f6e   :  { %v9675_v56 = vpop.eup %9674 }
0x1f6f   :  { %v6095_v48 = vmul.f32 %v9675_v56, %v9673_v21  ;;  %v13427_v21 = vld [vmem:[#allocation23_spill] sm:$0xff]  ;;  %v13430_v56 = vld [vmem:[#allocation26_spill] sm:$0xff] }
0x1f71   :  { %7177 = vmatmul.mubr.msk.f32.vlgmr.msra.gmra.mrb[58].mxu1 %vm4439_vm2, %v6095_v48  ;;  %v13431_v48 = vld [vmem:[#allocation27_spill] sm:$0xff] }
0x1f72   :  { %6308 = vmatprep.mubr.f32.mxu1 %v6014_v26  ;;  %9122 = vmatpush1.bf16.msra.mxu1 %v12031_v45  ;;  %v13420_v26 = vld [vmem:[#allocation16_spill] sm:$0xff] }
0x1f73   :  { %9124 = vmatprep.subr.bf16.mxu1 %v12034_v39 }
0x1f76   :  { %9126 = vmatpush1.bf16.msra.mxu1 %v12050_v62 }
0x1f77   :  { %9128 = vmatprep.subr.bf16.mxu1 %v12054_v19 }
0x1f7a   :  { %9130 = vmatpush1.bf16.msra.mxu1 %v12069_v42 }
0x1f7b   :  { %9132 = vmatprep.subr.bf16.mxu1 %v12072_v40 }
0x1f7e   :  { %9134 = vmatpush1.bf16.msra.mxu1 %v12087_v58 }
0x1f7f   :  { %9136 = vmatprep.subr.bf16.mxu1 %v12090_v31 }
0x1f82   :  { %9138 = vmatpush1.bf16.msra.mxu1 %v12105_v25 }
0x1f83   :  { %9140 = vmatprep.subr.bf16.mxu1 %v13319_v50 }
0x1f86   :  { %9142 = vmatpush1.bf16.msra.mxu1 %v13320_v2 }
0x1f87   :  { %9144 = vmatprep.subr.bf16.mxu1 %v13415_v12 }
0x1f8a   :  { %9146 = vmatpush1.bf16.msra.mxu1 %v13416_v41 }
0x1f8b   :  { %9148 = vmatprep.subr.bf16.mxu1 %v13417_v0 }
0x1f8e   :  { %9150 = vmatpush1.bf16.msra.mxu1 %v13418_v47 }
0x1f8f   :  { %9152 = vmatprep.subr.bf16.mxu1 %v13419_v32 }
0x1f92   :  { %9154 = vmatpush1.bf16.msra.mxu1 %v13420_v26 }
0x1f93   :  { %9156 = vmatprep.subr.bf16.mxu1 %v13421_v4  ;;  %v13432_v4 = vld [vmem:[#allocation28_spill] sm:$0xff] }
0x1f96   :  { %9158 = vmatpush1.bf16.msra.mxu1 %v13422_v37  ;;  %v13433_v37 = vld [vmem:[#allocation29_spill] sm:$0xff] }
0x1f97   :  { %9160 = vmatprep.subr.bf16.mxu1 %v13423_v61  ;;  %v13434_v61 = vld [vmem:[#allocation30_spill] sm:$0xff] }
0x1f9a   :  { %9162 = vmatpush1.bf16.msra.mxu1 %v13424_v1 }
0x1f9b   :  { %9164 = vmatprep.subr.bf16.mxu1 %v13425_v49 }
0x1f9e   :  { %9166 = vmatpush1.bf16.msra.mxu1 %v13426_v6 }
0x1f9f   :  { %9168 = vmatprep.subr.bf16.mxu1 %v13427_v21  ;;  %v13435_v21 = vld [vmem:[#allocation32_spill] sm:$0xff] }
0x1fa2   :  { %9170 = vmatpush1.bf16.msra.mxu1 %v13428_v30 }
0x1fa3   :  { %9172 = vmatprep.subr.bf16.mxu1 %v13429_v46 }
0x1fa6   :  { %9174 = vmatpush1.bf16.msra.mxu1 %v13430_v56  ;;  %v13438_v56 = vld [vmem:[#allocation31_spill] sm:$0xff] }
0x1fa7   :  { %9176 = vmatprep.subr.bf16.mxu1 %v13431_v48 }
0x1faa   :  { %9178 = vmatpush1.bf16.msra.mxu1 %v13432_v4  ;;  %v13436_v4 = vld [vmem:[#allocation40_spill] sm:$0xff] }
0x1fab   :  { %9180 = vmatprep.subr.bf16.mxu1 %v13433_v37  ;;  %v13437_v37 = vld [vmem:[#allocation41_spill] sm:$0xff] }
0x1fae   :  { %9182 = vmatpush1.bf16.msra.mxu1 %v13434_v61 }
0x1faf   :  { %7184 = vmatprep.subr.mxu1 %v13126_v63 }
0x2044   :  { %v6165_v49 = vpop.f32.mrb[58].mxu1 }
0x2045   :  { %v7178_v6 = vpop.f32.mrb[59].mxu1  ;;  %6238 = vmatmul.mubr.f32.vlgmr.msra.gmra.mrb[60].mxu0 %v6165_v49  ;;  %6309 = vmatmul.mubr.f32.vlgmr.msra.gmra.mrb[60].mxu1 %v6165_v49 }
0x2046   :  { %7180 = vmatpush3.xpose.msra.mxu0 %v13435_v21  ;;  %7185 = vmatpush3.msra.mxu1 %v13435_v21 }
0x2047   :  { %7181 = vmatprep.mubr.msk.f32.mxu0 %vm9787_vm1, %v13126_v63  ;;  %7186 = vmatprep.mubr.msk.f32.mxu1 %vm9787_vm1, %v13126_v63 }
0x2048   :  { %9184 = vmatprep.subr.bf16.mxu0 %v13436_v4  ;;  %9248 = vmatprep.subr.bf16.mxu1 %v13437_v37 }
0x2118   :  { %v6239_v61 = vpop.f32.mrb[60].mxu0  ;;  %v6310_v48 = vpop.f32.mrb[60].mxu1 }
0x2119   :  { %v6315_v6 = vadd.f32 %v6239_v61, %v13438_v56  ;;  %v6241_v46 = vpop.f32.mrb[61].mxu0  ;;  %v6312_v49 = vpop.f32.mrb[61].mxu1  ;;  %v6317_v47 = vadd.f32 %v6310_v48, %v12330_v51 }
0x211a   :  { %v6316_v30 = vadd.f32 %v6241_v46, %v12319_v22  ;;  %v6318_v26 = vadd.f32 %v6312_v49, %v12325_v28 }
0x211b   :  { %v7076_v1 = vmul.f32 -1.442695, %v6315_v6 }
0x211c   :  { %v7077_v21 = vmul.f32 -1.442695, %v6316_v30  ;;  %v7078_v32 = vmul.f32 -1.442695, %v6318_v26 }
0x211d   :  { %9676 = vpow2.f32 %v7076_v1 }
0x211e   :  { %9678 = vpow2.f32 %v7077_v21 }
0x211f   :  { %9680 = vpow2.f32 %v7078_v32 }
0x2120   :  { %9682 = vtanh.f32 %v6317_v47 }
0x2127   :  { %v9677_v4 = vpop.eup %9676 }
0x2128   :  { %v9679_v0 = vpop.eup %9678  ;;  %v6322_v37 = vadd.f32 1.0, %v9677_v4 }
0x2129   :  { %v6328_v41 = vadd.f32 1.0, %v9679_v0  ;;  %v9681_v61 = vpop.eup %9680 }
0x212a   :  { %9684 = vrcp.f32 %v6322_v37  ;;  %v9683_v56 = vpop.eup %9682  ;;  %v6335_v1 = vadd.f32 1.0, %v9681_v61 }
0x212b   :  { %9686 = vrcp.f32 %v6328_v41  ;;  %v12766_v41 = vld [vmem:[%s12947_s1] sm:$0xff]  ;;  %s9788_s1 = smov [#allocation7]  }
0x212c   :  { %9688 = vrcp.f32 %v6335_v1  ;;  %s7009_s0 = sshll.u32 %s9788_s1, 4  ;;  %s7010_s0 = int_to_ptr.vmem [resolvable:$true] %s7009_s0 }
0x212d   :  { %s9737_s19 = scalar_lea.vmem %s7010_s0, 128  ;;  %p9742_p1 = scmp.lt.s32.totalorder %s7010_s0, %s7010_s0 }
0x212e   :  { %p9738_p0 = scmp.ne.s32.totalorder %s7010_s0, %s9737_s19  ;;  %p9743_p2 = scmp.lt.s32.totalorder %s9737_s19, %s9737_s19 }
0x2130   :  { %p9744_p3 = por %p9743_p2, %p9742_p1 }
0x2132   :  { %p9745_p4 = pnand %p9744_p3, %p9738_p0 }
0x2134   :  { %v9685_v46 = vpop.eup %9684 }
0x2135   :  { %v9687_v6 = vpop.eup %9686  ;;  %v6339_v30 = vmul.f32 %v9685_v46, %v9683_v56 }
0x2136   :  { %v6338_v21 = vmul.f32 %v9687_v6, %v12676_v44  ;;  %v9689_v26 = vpop.eup %9688 }
0x2138   :  { %v12760_v49 = vadd.f32 %v6339_v30, %v6338_v21 }
0x213a   :  { %9690 = vtanh.f32 %v12760_v49 }
0x2144   :  { %v9691_v4 = vpop.eup %9690 }
0x2145   :  { %v6342_v32 = vmul.f32 %v9691_v4, %v9689_v26  ;;  %v13439_v26 = vld [vmem:[#allocation45_spill] sm:$0xff] }
0x2146   :  { %v13440_v4 = vld [vmem:[#allocation13_spill] sm:$0xff] }
0x2147   :  { %v6343_v0 = vadd.f32 %v12766_v41, %v6342_v32  ;;  %v13441_v32 = vld [vmem:[#allocation14_spill] sm:$0xff] }
0x2149   :  { %7182 = vmatmul.mubr.f32.vlgmr.msra.gmra.mrb[62].mxu0 %v6343_v0 }
0x214a   :  { %6566 = vmatprep.mubr.f32.mxu0 %v6343_v0  ;;  %9186 = vmatpush1.bf16.msra.mxu0 %v11737_v15 }
0x214b   :  { %9188 = vmatprep.subr.bf16.mxu0 %v11739_v16 }
0x214e   :  { %9190 = vmatpush1.bf16.msra.mxu0 %v11755_v52 }
0x214f   :  { %9192 = vmatprep.subr.bf16.mxu0 %v11766_v18 }
0x2152   :  { %9194 = vmatpush1.bf16.msra.mxu0 %v11782_v53 }
0x2153   :  { %9196 = vmatprep.subr.bf16.mxu0 %v11785_v17 }
0x2156   :  { %9198 = vmatpush1.bf16.msra.mxu0 %v11800_v54 }
0x2157   :  { %9200 = vmatprep.subr.bf16.mxu0 %v11803_v57 }
0x215a   :  { %9202 = vmatpush1.bf16.msra.mxu0 %v11818_v55 }
0x215b   :  { %9204 = vmatprep.subr.bf16.mxu0 %v11821_v59 }
0x215e   :  { %9206 = vmatpush1.bf16.msra.mxu0 %v11836_v24 }
0x215f   :  { %9208 = vmatprep.subr.bf16.mxu0 %v11839_v10 }
0x2162   :  { %9210 = vmatpush1.bf16.msra.mxu0 %v11854_v43 }
0x2163   :  { %9212 = vmatprep.subr.bf16.mxu0 %v11857_v33 }
0x2166   :  { %9214 = vmatpush1.bf16.msra.mxu0 %v11872_v38 }
0x2167   :  { %9216 = vmatprep.subr.bf16.mxu0 %v11875_v60 }
0x216a   :  { %9218 = vmatpush1.bf16.msra.mxu0 %v11890_v13 }
0x216b   :  { %9220 = vmatprep.subr.bf16.mxu0 %v11893_v7 }
0x216e   :  { %9222 = vmatpush1.bf16.msra.mxu0 %v11908_v3 }
0x216f   :  { %9224 = vmatprep.subr.bf16.mxu0 %v11911_v8 }
0x2172   :  { %9226 = vmatpush1.bf16.msra.mxu0 %v11926_v35 }
0x2173   :  { %9228 = vmatprep.subr.bf16.mxu0 %v11929_v11 }
0x2176   :  { %9230 = vmatpush1.bf16.msra.mxu0 %v11944_v9 }
0x2177   :  { %9232 = vmatprep.subr.bf16.mxu0 %v11947_v23 }
0x217a   :  { %9234 = vmatpush1.bf16.msra.mxu0 %v11962_v14 }
0x217b   :  { %9236 = vmatprep.subr.bf16.mxu0 %v11965_v20 }
0x217e   :  { %9238 = vmatpush1.bf16.msra.mxu0 %v11980_v34 }
0x217f   :  { %9240 = vmatprep.subr.bf16.mxu0 %v11983_v5 }
0x2182   :  { %9242 = vmatpush1.bf16.msra.mxu0 %v11998_v27 }
0x2183   :  { %9244 = vmatprep.subr.bf16.mxu0 %v12001_v36 }
0x2186   :  { %9246 = vmatpush1.bf16.msra.mxu0 %v12014_v29 }
0x2187   :  { %7189 = vmatprep.subr.mxu0 %v13126_v63 }
0x221c   :  { %v6410_v44 = vpop.f32.mrb[62].mxu0 }
0x221d   :  { %v7183_v47 = vpop.f32.mrb[63].mxu0  ;;  %v6414_v37 = vsel %vm4439_vm2, %v6410_v44, -inf }
0x221e   :  { %6415 = vmax.xlane.f32.xlu0 %v6414_v37  ;;  %v13444_v47 = vld [vmem:[#allocation17_spill] sm:$0xff]  ;;  %v13445_v37 = vld [vmem:[#allocation18_spill] sm:$0xff] }
0x22ab   :  { %v6416_v56 = vpop.xlane.xlu0 %6415 }
0x22ac   :  { %v6417_v48 = vsub.f32 %v6410_v44, %v6416_v56  ;;  %v13443_v44 = vld [vmem:[#allocation16_spill] sm:$0xff]  ;;  %v13446_v56 = vld [vmem:[#allocation19_spill] sm:$0xff] }
0x22ae   :  { %v6418_v61 = vmul.f32 1.442695, %v6417_v48  ;;  %v13447_v48 = vld [vmem:[#allocation20_spill] sm:$0xff] }
0x22b0   :  { %9692 = vpow2.f32 %v6418_v61  ;;  %v13448_v61 = vld [vmem:[#allocation21_spill] sm:$0xff] }
0x22ba   :  { %v9693_v46 = vpop.eup %9692 }
0x22bb   :  { %v6420_v6 = vsel %vm4439_vm2, %v9693_v46, 0.0 }
0x22bc   :  { %6421 = vadd.xlane.f32.xlu1 %v6420_v6  ;;  %v13450_v6 = vld [vmem:[#allocation23_spill] sm:$0xff] }
0x2349   :  { %v6422_v30 = vpop.xlane.xlu1 %6421 }
0x234a   :  { %9694 = vrcp.f32 %v6422_v30  ;;  %v13451_v30 = vld [vmem:[#allocation24_spill] sm:$0xff] }
0x2354   :  { %v9695_v1 = vpop.eup %9694 }
0x2355   :  { %v6424_v21 = vmul.f32 %v9695_v1, %v9693_v46  ;;  %v13449_v46 = vld [vmem:[#allocation22_spill] sm:$0xff]  ;;  %v13452_v1 = vld [vmem:[#allocation25_spill] sm:$0xff] }
0x2357   :  { %7187 = vmatmul.mubr.msk.f32.vlgmr.msra.gmra.mrb[62].mxu1 %vm4439_vm2, %v6424_v21  ;;  %v13453_v21 = vld [vmem:[#allocation26_spill] sm:$0xff] }
0x2358   :  { %6637 = vmatprep.mubr.f32.mxu1 %v6343_v0  ;;  %9250 = vmatpush1.bf16.msra.mxu1 %v12031_v45  ;;  %v13442_v0 = vld [vmem:[#allocation15_spill] sm:$0xff] }
0x2359   :  { %9252 = vmatprep.subr.bf16.mxu1 %v12034_v39 }
0x235c   :  { %9254 = vmatpush1.bf16.msra.mxu1 %v12050_v62 }
0x235d   :  { %9256 = vmatprep.subr.bf16.mxu1 %v12054_v19 }
0x2360   :  { %9258 = vmatpush1.bf16.msra.mxu1 %v12069_v42 }
0x2361   :  { %9260 = vmatprep.subr.bf16.mxu1 %v12072_v40 }
0x2364   :  { %9262 = vmatpush1.bf16.msra.mxu1 %v12087_v58 }
0x2365   :  { %9264 = vmatprep.subr.bf16.mxu1 %v12090_v31 }
0x2368   :  { %9266 = vmatpush1.bf16.msra.mxu1 %v12105_v25 }
0x2369   :  { %9268 = vmatprep.subr.bf16.mxu1 %v13319_v50 }
0x236c   :  { %9270 = vmatpush1.bf16.msra.mxu1 %v13320_v2 }
0x236d   :  { %9272 = vmatprep.subr.bf16.mxu1 %v13415_v12 }
0x2370   :  { %9274 = vmatpush1.bf16.msra.mxu1 %v13439_v26 }
0x2371   :  { %9276 = vmatprep.subr.bf16.mxu1 %v13440_v4 }
0x2374   :  { %9278 = vmatpush1.bf16.msra.mxu1 %v13441_v32 }
0x2375   :  { %9280 = vmatprep.subr.bf16.mxu1 %v13442_v0 }
0x2378   :  { %9282 = vmatpush1.bf16.msra.mxu1 %v13443_v44  ;;  %v13454_v44 = vld [vmem:[#allocation27_spill] sm:$0xff] }
0x2379   :  { %9284 = vmatprep.subr.bf16.mxu1 %v13444_v47  ;;  %v13455_v47 = vld [vmem:[#allocation28_spill] sm:$0xff] }
0x237c   :  { %9286 = vmatpush1.bf16.msra.mxu1 %v13445_v37  ;;  %v13456_v37 = vld [vmem:[#allocation29_spill] sm:$0xff] }
0x237d   :  { %9288 = vmatprep.subr.bf16.mxu1 %v13446_v56  ;;  %v13457_v56 = vld [vmem:[#allocation30_spill] sm:$0xff] }
0x2380   :  { %9290 = vmatpush1.bf16.msra.mxu1 %v13447_v48 }
0x2381   :  { %9292 = vmatprep.subr.bf16.mxu1 %v13448_v61 }
0x2384   :  { %9294 = vmatpush1.bf16.msra.mxu1 %v13449_v46 }
0x2385   :  { %9296 = vmatprep.subr.bf16.mxu1 %v13450_v6  ;;  %v9736_v6 = vld [vmem:[#allocation7] sm:$0xff] }
0x2388   :  { %9298 = vmatpush1.bf16.msra.mxu1 %v13451_v30 }
0x2389   :  { %9300 = vmatprep.subr.bf16.mxu1 %v13452_v1 }
0x238c   :  { %9302 = vmatpush1.bf16.msra.mxu1 %v13453_v21  ;;  %v13460_v21 = vld [vmem:[#allocation31_spill] sm:$0xff] }
0x238d   :  { %9304 = vmatprep.subr.bf16.mxu1 %v13454_v44 }
0x2390   :  { %9306 = vmatpush1.bf16.msra.mxu1 %v13455_v47  ;;  %v13458_v47 = vld [vmem:[#allocation40_spill] sm:$0xff] }
0x2391   :  { %9308 = vmatprep.subr.bf16.mxu1 %v13456_v37  ;;  %v13459_v37 = vld [vmem:[#allocation41_spill] sm:$0xff] }
0x2394   :  { %9310 = vmatpush1.bf16.msra.mxu1 %v13457_v56 }
0x2395   :  { %7194 = vmatprep.subr.mxu1 %v13126_v63 }
0x242a   :  { %v6494_v61 = vpop.f32.mrb[62].mxu1 }
0x242b   :  { %v7188_v46 = vpop.f32.mrb[63].mxu1  ;;  %6567 = vmatmul.mubr.f32.vlgmr.msra.gmra.mrb[64].mxu0 %v6494_v61  ;;  %6638 = vmatmul.mubr.f32.vlgmr.msra.gmra.mrb[64].mxu1 %v6494_v61 }
0x242c   :  { %7190 = vmatpush3.xpose.msra.mxu0 %v9736_v6  ;;  %7195 = vmatpush3.msra.mxu1 %v9736_v6 }
0x242d   :  { %7191 = vmatprep.mubr.msk.f32.mxu0 %vm9787_vm1, %v13126_v63  ;;  %7196 = vmatprep.mubr.msk.f32.mxu1 %vm9787_vm1, %v13126_v63 }
0x242e   :  { %9312 = vmatprep.subr.bf16.mxu0 %v13458_v47  ;;  %9376 = vmatprep.subr.bf16.mxu1 %v13459_v37 }
0x24fe   :  { %v6568_v56 = vpop.f32.mrb[64].mxu0  ;;  %v6639_v44 = vpop.f32.mrb[64].mxu1 }
0x24ff   :  { %v6644_v1 = vadd.f32 %v6568_v56, %v13460_v21  ;;  %v6570_v46 = vpop.f32.mrb[65].mxu0  ;;  %v6641_v30 = vpop.f32.mrb[65].mxu1  ;;  %v6646_v63 = vadd.f32 %v6639_v44, %v12330_v51 }
0x2500   :  { %v6645_v61 = vadd.f32 %v6570_v46, %v12319_v22  ;;  %v6647_v0 = vadd.f32 %v6641_v30, %v12325_v28 }
0x2501   :  { %v7080_v48 = vmul.f32 -1.442695, %v6644_v1 }
0x2502   :  { %v7081_v6 = vmul.f32 -1.442695, %v6645_v61  ;;  %v7082_v32 = vmul.f32 -1.442695, %v6647_v0 }
0x2503   :  { %9696 = vpow2.f32 %v7080_v48 }
0x2504   :  { %9698 = vpow2.f32 %v7081_v6 }
0x2505   :  { %9700 = vpow2.f32 %v7082_v32 }
0x2506   :  { %9702 = vtanh.f32 %v6646_v63 }
0x250d   :  { %v9697_v47 = vpop.eup %9696 }
0x250e   :  { %v9699_v4 = vpop.eup %9698  ;;  %v6651_v37 = vadd.f32 1.0, %v9697_v47 }
0x250f   :  { %v6657_v26 = vadd.f32 1.0, %v9699_v4  ;;  %v9701_v56 = vpop.eup %9700 }
0x2510   :  { %9704 = vrcp.f32 %v6651_v37  ;;  %v9703_v21 = vpop.eup %9702  ;;  %v6664_v48 = vadd.f32 1.0, %v9701_v56 }
0x2511   :  { %9706 = vrcp.f32 %v6657_v26 }
0x2512   :  { %9708 = vrcp.f32 %v6664_v48 }
0x251a   :  { %v9705_v46 = vpop.eup %9704 }
0x251b   :  { %v9707_v1 = vpop.eup %9706  ;;  %v6668_v61 = vmul.f32 %v9705_v46, %v9703_v21 }
0x251c   :  { %v6667_v6 = vmul.f32 %v9707_v1, %v12760_v49  ;;  %v9709_v0 = vpop.eup %9708 }
0x251e   :  { %v12847_v30 = vadd.f32 %v6668_v61, %v6667_v6 }
0x2520   :  { %9710 = vtanh.f32 %v12847_v30 }
0x252a   :  { %v9711_v44 = vpop.eup %9710 }
0x252b   :  { %v6671_v32 = vmul.f32 %v9711_v44, %v9709_v0 }
0x252d   :  { %v6672_v4 = vadd.f32 %v12766_v41, %v6671_v32 }
0x252f   :  { %7192 = vmatmul.mubr.f32.vlgmr.msra.gmra.mrb[66].mxu0 %v6672_v4 }
0x2530   :  { %6895 = vmatprep.mubr.f32.mxu0 %v6672_v4  ;;  %9314 = vmatpush1.bf16.msra.mxu0 %v11737_v15 }
0x2531   :  { %9316 = vmatprep.subr.bf16.mxu0 %v11739_v16 }
0x2534   :  { %9318 = vmatpush1.bf16.msra.mxu0 %v11755_v52 }
0x2535   :  { %9320 = vmatprep.subr.bf16.mxu0 %v11766_v18 }
0x2538   :  { %9322 = vmatpush1.bf16.msra.mxu0 %v11782_v53 }
0x2539   :  { %9324 = vmatprep.subr.bf16.mxu0 %v11785_v17 }
0x253c   :  { %9326 = vmatpush1.bf16.msra.mxu0 %v11800_v54 }
0x253d   :  { %9328 = vmatprep.subr.bf16.mxu0 %v11803_v57 }
0x2540   :  { %9330 = vmatpush1.bf16.msra.mxu0 %v11818_v55 }
0x2541   :  { %9332 = vmatprep.subr.bf16.mxu0 %v11821_v59 }
0x2544   :  { %9334 = vmatpush1.bf16.msra.mxu0 %v11836_v24 }
0x2545   :  { %9336 = vmatprep.subr.bf16.mxu0 %v11839_v10  ;;  %v13461_v10 = vld [vmem:[#allocation45_spill] sm:$0xff] }
0x2548   :  { %9338 = vmatpush1.bf16.msra.mxu0 %v11854_v43  ;;  %v13462_v43 = vld [vmem:[#allocation13_spill] sm:$0xff] }
0x2549   :  { %9340 = vmatprep.subr.bf16.mxu0 %v11857_v33  ;;  %v13463_v33 = vld [vmem:[#allocation14_spill] sm:$0xff] }
0x254c   :  { %9342 = vmatpush1.bf16.msra.mxu0 %v11872_v38  ;;  %v13464_v38 = vld [vmem:[#allocation15_spill] sm:$0xff] }
0x254d   :  { %9344 = vmatprep.subr.bf16.mxu0 %v11875_v60  ;;  %v13465_v60 = vld [vmem:[#allocation16_spill] sm:$0xff] }
0x2550   :  { %9346 = vmatpush1.bf16.msra.mxu0 %v11890_v13  ;;  %v13466_v13 = vld [vmem:[#allocation17_spill] sm:$0xff] }
0x2551   :  { %9348 = vmatprep.subr.bf16.mxu0 %v11893_v7  ;;  %v13467_v7 = vld [vmem:[#allocation18_spill] sm:$0xff] }
0x2554   :  { %9350 = vmatpush1.bf16.msra.mxu0 %v11908_v3  ;;  %v13468_v3 = vld [vmem:[#allocation19_spill] sm:$0xff] }
0x2555   :  { %9352 = vmatprep.subr.bf16.mxu0 %v11911_v8  ;;  %v13469_v8 = vld [vmem:[#allocation20_spill] sm:$0xff] }
0x2558   :  { %9354 = vmatpush1.bf16.msra.mxu0 %v11926_v35  ;;  %v13470_v35 = vld [vmem:[#allocation21_spill] sm:$0xff] }
0x2559   :  { %9356 = vmatprep.subr.bf16.mxu0 %v11929_v11  ;;  %v13471_v11 = vld [vmem:[#allocation22_spill] sm:$0xff] }
0x255c   :  { %9358 = vmatpush1.bf16.msra.mxu0 %v11944_v9  ;;  %v13472_v9 = vld [vmem:[#allocation23_spill] sm:$0xff] }
0x255d   :  { %9360 = vmatprep.subr.bf16.mxu0 %v11947_v23  ;;  %v13473_v23 = vld [vmem:[#allocation24_spill] sm:$0xff] }
0x2560   :  { %9362 = vmatpush1.bf16.msra.mxu0 %v11962_v14  ;;  %v13474_v14 = vld [vmem:[#allocation25_spill] sm:$0xff] }
0x2561   :  { %9364 = vmatprep.subr.bf16.mxu0 %v11965_v20  ;;  %v13475_v20 = vld [vmem:[#allocation26_spill] sm:$0xff] }
0x2564   :  { %9366 = vmatpush1.bf16.msra.mxu0 %v11980_v34  ;;  %v13476_v34 = vld [vmem:[#allocation27_spill] sm:$0xff] }
0x2565   :  { %9368 = vmatprep.subr.bf16.mxu0 %v11983_v5  ;;  %v13477_v5 = vld [vmem:[#allocation28_spill] sm:$0xff] }
0x2568   :  { %9370 = vmatpush1.bf16.msra.mxu0 %v11998_v27  ;;  %v13478_v27 = vld [vmem:[#allocation29_spill] sm:$0xff] }
0x2569   :  { %9372 = vmatprep.subr.bf16.mxu0 %v12001_v36  ;;  %v13479_v36 = vld [vmem:[#allocation30_spill] sm:$0xff] }
0x256c   :  { %9374 = vmatpush1.bf16.msra.mxu0 %v12014_v29 }
0x2602   :  { %v6739_v15 = vpop.f32.mrb[66].mxu0 }
0x2603   :  { %v7193_v16 = vpop.f32.mrb[67].mxu0  ;;  %v6743_v52 = vsel %vm4439_vm2, %v6739_v15, -inf }
0x2604   :  { %6744 = vmax.xlane.f32.xlu0 %v6743_v52 }
0x2691   :  { %v6745_v18 = vpop.xlane.xlu0 %6744 }
0x2692   :  { %v6746_v53 = vsub.f32 %v6739_v15, %v6745_v18 }
0x2694   :  { %v6747_v17 = vmul.f32 1.442695, %v6746_v53 }
0x2696   :  { %9712 = vpow2.f32 %v6747_v17 }
0x26a0   :  { %v9713_v54 = vpop.eup %9712 }
0x26a1   :  { %v6749_v57 = vsel %vm4439_vm2, %v9713_v54, 0.0 }
0x26a2   :  { %6750 = vadd.xlane.f32.xlu1 %v6749_v57 }
0x272f   :  { %v6751_v55 = vpop.xlane.xlu1 %6750 }
0x2730   :  { %9714 = vrcp.f32 %v6751_v55 }
0x273a   :  { %v9715_v59 = vpop.eup %9714 }
0x273b   :  { %v6753_v24 = vmul.f32 %v9715_v59, %v9713_v54 }
0x273d   :  { %7197 = vmatmul.mubr.msk.f32.vlgmr.msra.gmra.mrb[66].mxu1 %vm4439_vm2, %v6753_v24 }
0x273e   :  { %6966 = vmatprep.mubr.f32.mxu1 %v6672_v4  ;;  %9378 = vmatpush1.bf16.msra.mxu1 %v12031_v45 }
0x273f   :  { %9380 = vmatprep.subr.bf16.mxu1 %v12034_v39 }
0x2742   :  { %9382 = vmatpush1.bf16.msra.mxu1 %v12050_v62 }
0x2743   :  { %9384 = vmatprep.subr.bf16.mxu1 %v12054_v19 }
0x2746   :  { %9386 = vmatpush1.bf16.msra.mxu1 %v12069_v42 }
0x2747   :  { %9388 = vmatprep.subr.bf16.mxu1 %v12072_v40 }
0x274a   :  { %9390 = vmatpush1.bf16.msra.mxu1 %v12087_v58 }
0x274b   :  { %9392 = vmatprep.subr.bf16.mxu1 %v12090_v31 }
0x274e   :  { %9394 = vmatpush1.bf16.msra.mxu1 %v12105_v25 }
0x274f   :  { %9396 = vmatprep.subr.bf16.mxu1 %v13319_v50 }
0x2752   :  { %9398 = vmatpush1.bf16.msra.mxu1 %v13320_v2 }
0x2753   :  { %9400 = vmatprep.subr.bf16.mxu1 %v13415_v12 }
0x2756   :  { %9402 = vmatpush1.bf16.msra.mxu1 %v13461_v10 }
0x2757   :  { %9404 = vmatprep.subr.bf16.mxu1 %v13462_v43 }
0x275a   :  { %9406 = vmatpush1.bf16.msra.mxu1 %v13463_v33 }
0x275b   :  { %9408 = vmatprep.subr.bf16.mxu1 %v13464_v38 }
0x275e   :  { %9410 = vmatpush1.bf16.msra.mxu1 %v13465_v60 }
0x275f   :  { %9412 = vmatprep.subr.bf16.mxu1 %v13466_v13 }
0x2762   :  { %9414 = vmatpush1.bf16.msra.mxu1 %v13467_v7 }
0x2763   :  { %9416 = vmatprep.subr.bf16.mxu1 %v13468_v3 }
0x2766   :  { %9418 = vmatpush1.bf16.msra.mxu1 %v13469_v8 }
0x2767   :  { %9420 = vmatprep.subr.bf16.mxu1 %v13470_v35 }
0x276a   :  { %9422 = vmatpush1.bf16.msra.mxu1 %v13471_v11 }
0x276b   :  { %9424 = vmatprep.subr.bf16.mxu1 %v13472_v9 }
0x276e   :  { %9426 = vmatpush1.bf16.msra.mxu1 %v13473_v23 }
0x276f   :  { %9428 = vmatprep.subr.bf16.mxu1 %v13474_v14 }
0x2772   :  { %9430 = vmatpush1.bf16.msra.mxu1 %v13475_v20 }
0x2773   :  { %9432 = vmatprep.subr.bf16.mxu1 %v13476_v34 }
0x2776   :  { %9434 = vmatpush1.bf16.msra.mxu1 %v13477_v5 }
0x2777   :  { %9436 = vmatprep.subr.bf16.mxu1 %v13478_v27 }
0x277a   :  { %9438 = vmatpush1.bf16.msra.mxu1 %v13479_v36 }
0x2810   :  { %v6823_v29 = vpop.f32.mrb[66].mxu1 }
0x2811   :  { %v7198_v45 = vpop.f32.mrb[67].mxu1  ;;  %6896 = vmatmul.mubr.f32.vlgmr.msra.gmra.mrb[68].mxu0 %v6823_v29  ;;  %6967 = vmatmul.mubr.f32.vlgmr.msra.gmra.mrb[68].mxu1 %v6823_v29 }
0x2812   :  { %9748 = shalt.err (!%p9745_p4)
}
0x2813   :  { %s9749_s21 = scalar_lea.hbm %s12955_s9, 128 }
0x2814   :  { %p9750_p5 = scmp.ne.s32.totalorder %s12955_s9, %s9749_s21  ;;  %p9753_p6 = scmp.lt.u32.totalorder %s9749_s21, %s12955_s9 }
0x2816   :  { %p9755_p7 = pnand %p9753_p6, %p9750_p5 }
0x2818   :  { %9758 = shalt.err (!%p9755_p7)
}
0x2819   :  { %7012 = dma.vmem_to_hbm [thread:$0]  %s7010_s0, 128, %s12955_s9, [#allocation8]   ;;  %v13480_v19 = vld [vmem:[#allocation31_spill] sm:$0xff] }
0x281a   :  { %s9789_s9 = smov [#allocation9]  }
0x281b   :  { %s7019_s28 = sshll.u32 %s9789_s9, 4  ;;  %s7020_s28 = int_to_ptr.vmem [resolvable:$true] %s7019_s28 }
0x281c   :  { %s9759_s5 = scalar_lea.vmem %s7020_s28, 128  ;;  %p9764_p9 = scmp.lt.s32.totalorder %s7020_s28, %s7020_s28 }
0x281d   :  { %p9760_p8 = scmp.ne.s32.totalorder %s7020_s28, %s9759_s5  ;;  %p9765_p10 = scmp.lt.s32.totalorder %s9759_s5, %s9759_s5 }
0x281f   :  { %p9766_p11 = por %p9765_p10, %p9764_p9 }
0x2821   :  { %p9767_p12 = pnand %p9766_p11, %p9760_p8 }
0x28e4   :  { %v6897_v39 = vpop.f32.mrb[68].mxu0  ;;  %v6968_v62 = vpop.f32.mrb[68].mxu1 }
0x28e5   :  { %v6973_v42 = vadd.f32 %v6897_v39, %v13480_v19  ;;  %v6899_v40 = vpop.f32.mrb[69].mxu0  ;;  %v6970_v58 = vpop.f32.mrb[69].mxu1  ;;  %v6975_v49 = vadd.f32 %v6968_v62, %v12330_v51 }
0x28e6   :  { %v6974_v31 = vadd.f32 %v6899_v40, %v12319_v22  ;;  %v6976_v2 = vadd.f32 %v6970_v58, %v12325_v28 }
0x28e7   :  { %v7084_v25 = vmul.f32 -1.442695, %v6973_v42 }
0x28e8   :  { %v7085_v50 = vmul.f32 -1.442695, %v6974_v31  ;;  %v7086_v12 = vmul.f32 -1.442695, %v6976_v2 }
0x28e9   :  { %9716 = vpow2.f32 %v7084_v25 }
0x28ea   :  { %9718 = vpow2.f32 %v7085_v50 }
0x28eb   :  { %9720 = vpow2.f32 %v7086_v12 }
0x28ec   :  { %9722 = vtanh.f32 %v6975_v49 }
0x28f3   :  { %v9717_v26 = vpop.eup %9716 }
0x28f4   :  { %v9719_v21 = vpop.eup %9718  ;;  %v6980_v63 = vadd.f32 1.0, %v9717_v26 }
0x28f5   :  { %v6986_v47 = vadd.f32 1.0, %v9719_v21  ;;  %v9721_v37 = vpop.eup %9720 }
0x28f6   :  { %9724 = vrcp.f32 %v6980_v63  ;;  %v9723_v56 = vpop.eup %9722  ;;  %v6993_v61 = vadd.f32 1.0, %v9721_v37 }
0x28f7   :  { %9726 = vrcp.f32 %v6986_v47 }
0x28f8   :  { %9728 = vrcp.f32 %v6993_v61 }
0x2900   :  { %v9725_v22 = vpop.eup %9724 }
0x2901   :  { %v9727_v46 = vpop.eup %9726  ;;  %v6997_v1 = vmul.f32 %v9725_v22, %v9723_v56 }
0x2902   :  { %v6996_v48 = vmul.f32 %v9727_v46, %v12847_v30  ;;  %v9729_v51 = vpop.eup %9728 }
0x2904   :  { %v6998_v28 = vadd.f32 %v6997_v1, %v6996_v48 }
0x2906   :  { %9730 = vtanh.f32 %v6998_v28 }
0x2910   :  { %v9731_v6 = vpop.eup %9730 }
0x2911   :  { %v7000_v0 = vmul.f32 %v9731_v6, %v9729_v51 }
0x2913   :  { %v7001_v44 = vadd.f32 %v12766_v41, %v7000_v0 }
0x2915   :  { %7002 = vst [vmem:[#allocation9] sm:$0xff] %v7001_v44 }
0x2916   :  { %9770 = shalt.err (!%p9767_p12)
}
0x2917   :  { %s9771_s30 = scalar_lea.hbm %s12956_s10, 128 }
0x2918   :  { %p9772_p13 = scmp.ne.s32.totalorder %s12956_s10, %s9771_s30  ;;  %p9775_p0 = scmp.lt.u32.totalorder %s9771_s30, %s12956_s10 }
0x291a   :  { %p9777_p1 = pnand %p9775_p0, %p9772_p13 }
0x291c   :  { %9780 = shalt.err (!%p9777_p1)
}
0x291d   :  { %7022 = dma.vmem_to_hbm [thread:$0]  %s7020_s28, 128, %s12956_s10, [#allocation10]  }
0x291e   :  { %9781 = dma.done.wait [#allocation8], 128  }
0x291f   :  { %9782 = vsyncadd [#allocation8], 4294967168 }
0x2920   :  { %9783 = dma.done.wait [#allocation10], 128  }
0x2921   :  { %9784 = vsyncadd [#allocation10], 4294967168 }
0x2922   :  { %7029 = vsyncpa [#allocation8], 1 }
0x2923   :  { %7030 = vsyncpa [#allocation10], 1 }

</bundles_post_ra>
